<compile_context>
chip_gen: v7x
topology: tpu7x:2x2x1
jax: 0.10.0
libtpu: 0.0.40
codegen_flags: <defaults>
</compile_context>

<pallas_src>
import jax
import jax.numpy as jnp
from jax import lax
from jax.experimental import pallas as pl
from jax.experimental.pallas import tpu as pltpu

BN_EPS = 1e-5
MAX_SHIFT = 2         # halo of the 5x5 RICD conv
LAYERS_ENH = 3
LAYERS_CAL = 3


def _build_params(key):
    """Deterministic flat parameter bank + name->offset map."""
    chunks, off = [], {}
    count = [0]

    def add(name, arr):
        arr = jnp.asarray(arr, jnp.float32).reshape(-1)
        off[name] = count[0]
        count[0] += int(arr.shape[0])
        chunks.append(arr)

    keys = iter(jax.random.split(key, 32))

    def conv_w(shape):
        return jax.random.normal(next(keys), shape, jnp.float32) * 0.02

    def bn_w():
        return 1.0 + 0.02 * jax.random.normal(next(keys), (1,), jnp.float32)

    # ---- EnhanceNetwork (channels = 1) ----
    add("e_in_w", conv_w((3, 3)));      add("e_in_b", jnp.zeros((1,)))
    add("e_blk_w", conv_w((3, 3)));     add("e_blk_b", jnp.zeros((1,)))
    add("e_bn_w", bn_w());              add("e_bn_b", jnp.zeros((1,)))
    add("e_out_w", conv_w((3, 3)));     add("e_out_b", jnp.zeros((1,)))
    # RICD (diff_conv)
    add("r_c1_w", conv_w((5, 5)));      add("r_c1_b", jnp.zeros((1,)))
    add("r_c2_w", conv_w((3, 3)));      add("r_c2_b", jnp.zeros((1,)))
    add("r_p1", jnp.full((1,), 0.25));  add("r_p2", jnp.full((1,), 0.25))
    # final_out_conv: Conv2d(2 -> 1, 3x3) -> two 3x3 planes + one bias
    add("f_w0", conv_w((3, 3)));        add("f_w1", conv_w((3, 3)))
    add("f_b", jnp.zeros((1,)))

    # ---- CalibrateNetwork (channels = 1) ----
    add("c_in_w", conv_w((3, 3)));      add("c_in_b", jnp.zeros((1,)))
    add("c_in_bn_w", bn_w());           add("c_in_bn_b", jnp.zeros((1,)))
    add("c_b1_w", conv_w((3, 3)));      add("c_b1_b", jnp.zeros((1,)))
    add("c_b1_bn_w", bn_w());           add("c_b1_bn_b", jnp.zeros((1,)))
    add("c_b2_w", conv_w((3, 3)));      add("c_b2_b", jnp.zeros((1,)))
    add("c_b2_bn_w", bn_w());           add("c_b2_bn_b", jnp.zeros((1,)))
    add("c_out_w", conv_w((3, 3)));     add("c_out_b", jnp.zeros((1,)))

    return jnp.concatenate(chunks), off


def _make_kernel(off, N, H, W):
    """One Network *stage* per grid step; input_op carried in VMEM scratch."""
    inv_count = 1.0 / float(N * H * W)

    def kernel(p_ref, x_hbm, i_out, r_out, in_out, att_out, carry_ref, inp_ref):
        s = pl.program_id(0)

        # ---- hoisted scalar parameter reads (SMEM -> scalars, once/stage) ---
        def taps(name, n):
            o = off[name]
            return [p_ref[o + t] for t in range(n)]

        def sc(name):
            return p_ref[off[name]]

        w_e_in, b_e_in = taps("e_in_w", 9), sc("e_in_b")
        w_e_blk, b_e_blk = taps("e_blk_w", 9), sc("e_blk_b")
        g_e_bn, be_e_bn = sc("e_bn_w"), sc("e_bn_b")
        w_e_out, b_e_out = taps("e_out_w", 9), sc("e_out_b")
        w_r1, b_r1, a_r1 = taps("r_c1_w", 25), sc("r_c1_b"), sc("r_p1")
        w_r2, b_r2, a_r2 = taps("r_c2_w", 9), sc("r_c2_b"), sc("r_p2")
        w_f0, w_f1, b_f = taps("f_w0", 9), taps("f_w1", 9), sc("f_b")
        w_c_in, b_c_in = taps("c_in_w", 9), sc("c_in_b")
        g_c_in, be_c_in = sc("c_in_bn_w"), sc("c_in_bn_b")
        w_c1, b_c1 = taps("c_b1_w", 9), sc("c_b1_b")
        g_c1, be_c1 = sc("c_b1_bn_w"), sc("c_b1_bn_b")
        w_c2, b_c2 = taps("c_b2_w", 9), sc("c_b2_b")
        g_c2, be_c2 = sc("c_b2_bn_w"), sc("c_b2_bn_b")
        w_c_out, b_c_out = taps("c_out_w", 9), sc("c_out_b")

        # ---- tiny boundary masks: (1,1,W) lane masks, (1,H,1) sublane masks -
        lane = lax.broadcasted_iota(jnp.int32, (1, 1, W), 2)
        row = lax.broadcasted_iota(jnp.int32, (1, H, 1), 1)
        wm = {d: ((lane + d >= 0) & (lane + d < W)).astype(jnp.float32)
              for d in range(-MAX_SHIFT, MAX_SHIFT + 1) if d != 0}
        hm = {d: ((row + d >= 0) & (row + d < H)).astype(jnp.float32)
              for d in range(-MAX_SHIFT, MAX_SHIFT + 1) if d != 0}

        def wshift_cols(x, P):
            # cols[dj][n, i, j] = x[n, i, j+dj] (zero outside [0, W))
            cols = {0: x}
            for dj in range(1, P + 1):
                cols[dj] = pltpu.roll(x, (-dj) % W, axis=2) * wm[dj]
                cols[-dj] = pltpu.roll(x, dj, axis=2) * wm[-dj]
            return cols

        def conv_cols(cols, w, bias, K):
            # 1->1 channel "same" conv from precomputed W-shifted columns.
            # Per kernel row: weighted sum over dj (VALU only), then one
            # sublane roll + mask for the H shift (XLU).
            P = K // 2
            acc = None
            for di in range(-P, P + 1):
                t = None
                for dj in range(-P, P + 1):
                    term = w[(di + P) * K + (dj + P)] * cols[dj]
                    t = term if t is None else t + term
                if di != 0:
                    t = pltpu.roll(t, (-di) % H, axis=1) * hm[di]
                acc = t if acc is None else acc + t
            if bias is not None:
                acc = acc + bias
            return acc

        def conv(x, w, bias, K):
            return conv_cols(wshift_cols(x, K // 2), w, bias, K)

        def batchnorm(x, gamma, beta):
            # training-mode BN, C == 1 -> stats over the whole (N,H,W) slab.
            # Both reductions issued back-to-back before any consumer.
            x2 = x * x
            s_x = jnp.sum(x)
            s_x2 = jnp.sum(x2)
            mean = s_x * inv_count
            var = jnp.maximum(s_x2 * inv_count - mean * mean, 0.0)
            return (x - mean) * (gamma * lax.rsqrt(var + BN_EPS)) + beta

        def relu(t):
            return jnp.maximum(t, 0.0)

        def sigmoid(t):
            # numerically stable; tanh runs on the EUP slot
            return 0.5 * (jnp.tanh(0.5 * t) + 1.0)

        def prelu(t, a):
            return jnp.maximum(t, 0.0) + a * jnp.minimum(t, 0.0)

        # ---- stage carry + single-buffered original input -------------------
        @pl.when(s == 0)
        def _():
            pltpu.sync_copy(x_hbm, inp_ref)     # HBM -> VMEM, once for all stages
            carry_ref[...] = inp_ref[...]

        inp = inp_ref[...]          # original network input (every stage)
        x_op = carry_ref[...]       # input_op for this stage
        in_out[0] = x_op

        # ---- EnhanceNetwork --------------------------------------------------
        # W-shifted columns of the stage input, shared by e_in / RICD 5x5 / 3x3
        cols_in = wshift_cols(x_op, MAX_SHIFT)
        fea = relu(conv_cols(cols_in, w_e_in, b_e_in, 3))
        y11 = prelu(conv_cols(cols_in, w_r1, b_r1, 5), a_r1)
        y21 = prelu(conv_cols(cols_in, w_r2, b_r2, 3), a_r2)
        diff = sigmoid(y11 - y21)

        def enh_block(_, f):        # shared block parameters, as in PyTorch
            blk = relu(batchnorm(conv(f, w_e_blk, b_e_blk, 3), g_e_bn, be_e_bn))
            return f + blk

        fea = lax.fori_loop(0, LAYERS_ENH, enh_block, fea, unroll=True)
        fea = sigmoid(conv(fea, w_e_out, b_e_out, 3))
        # final_out_conv over channel-concat (fea, diff) == sum of two 1->1
        # convs; their biases fold into the single b_f (skip the zero adds).
        fea = sigmoid(conv(fea, w_f0, None, 3) + conv(diff, w_f1, None, 3) + b_f)
        illu = sigmoid(fea + x_op)

        # ---- stage glue: r = sigmoid(input / illu) ---------------------------
        r = sigmoid(inp * pl.reciprocal(illu, approx=True))

        # ---- CalibrateNetwork ------------------------------------------------
        cfea = relu(batchnorm(conv(r, w_c_in, b_c_in, 3), g_c_in, be_c_in))

        def cal_block(_, f):        # shared block parameters, as in PyTorch
            t = relu(batchnorm(conv(f, w_c1, b_c1, 3), g_c1, be_c1))
            t = relu(batchnorm(conv(t, w_c2, b_c2, 3), g_c2, be_c2))
            return f + t

        cfea = lax.fori_loop(0, LAYERS_CAL, cal_block, cfea, unroll=True)
        att = r - sigmoid(conv(cfea, w_c_out, b_c_out, 3))

        # ---- streamed per-stage outputs + carry update -----------------------
        carry_ref[...] = inp + att
        i_out[0] = illu
        r_out[0] = r
        att_out[0] = jnp.abs(att)

    return kernel


def network_forward(params_vec, off, x_nchw, stage=3):
    """Full Network forward; one Pallas grid step per stage."""
    assert x_nchw.ndim == 4 and x_nchw.shape[1] == 1, "expected NCHW with C=1"
    N, _, H, W = x_nchw.shape
    x = x_nchw.reshape(N, H, W).astype(jnp.float32)

    kernel = _make_kernel(off, N, H, W)

    stage_out = jax.ShapeDtypeStruct((stage, N, H, W), jnp.float32)
    block_out = pl.BlockSpec((1, N, H, W), lambda s: (s, 0, 0, 0))

    # explicit scoped-VMEM budget: generous for intermediates, capped below
    # v7x's 64 MiB physical VMEM; also lifts v5e's 16 MiB default.
    slab_bytes = N * H * W * 4
    vmem_limit = int(min(max(80 * slab_bytes, 32 << 20), 48 << 20))

    ilist_a, rlist_a, inlist_a, attlist_a = pl.pallas_call(
        kernel,
        out_shape=(stage_out, stage_out, stage_out, stage_out),
        grid=(stage,),
        in_specs=[
            pl.BlockSpec(memory_space=pltpu.MemorySpace.SMEM),   # param table
            pl.BlockSpec(memory_space=pl.ANY),                   # input image (HBM)
        ],
        out_specs=(block_out, block_out, block_out, block_out),
        scratch_shapes=[
            pltpu.VMEM((N, H, W), jnp.float32),   # input_op carry
            pltpu.VMEM((N, H, W), jnp.float32),   # single-buffered original input
        ],
        compiler_params=pltpu.CompilerParams(
            dimension_semantics=("arbitrary",),
            vmem_limit_bytes=vmem_limit),
    )(params_vec, x)

    def unstack(a):
        return [a[s].reshape(N, 1, H, W) for s in range(stage)]

    ilist = unstack(ilist_a)
    rlist = unstack(rlist_a)
    inlist = unstack(inlist_a)
    attlist = unstack(attlist_a)
    i_k = ilist[-1]     # i_k is the last-stage illumination map (== ilist[-1])
    return ilist, rlist, inlist, attlist, i_k


if __name__ == "__main__":
    key = jax.random.PRNGKey(0)
    pkey, xkey = jax.random.split(key)

    params_vec, off = _build_params(pkey)
    # lane-dense demo shape: W = 128 fills the 128-lane vregs (NCHW, C = 1)
    x = jax.random.uniform(xkey, (2, 1, 16, 128), jnp.float32)

    ilist, rlist, inlist, attlist, i_k = network_forward(params_vec, off, x, stage=3)
    jax.block_until_ready((ilist, rlist, inlist, attlist, i_k))

    # basic shape sanity
    assert len(ilist) == 3 and ilist[0].shape == (2, 1, 16, 128)
    assert all(a.shape == (2, 1, 16, 128)
               for lst in (rlist, inlist, attlist) for a in lst)
    assert i_k.shape == (2, 1, 16, 128)
    print("KERNEL_OK")
</pallas_src>

<mosaic_0001>
module attributes {stable_mosaic.version = 11 : i64} {
  func.func @kernel(%arg0: i32, %arg1: memref<135xf32, #tpu.memory_space<smem>>, %arg2: memref<2x16x128xf32, #tpu.memory_space<any>>, %arg3: memref<1x2x16x128xf32, #tpu.memory_space<vmem>>, %arg4: memref<1x2x16x128xf32, #tpu.memory_space<vmem>>, %arg5: memref<1x2x16x128xf32, #tpu.memory_space<vmem>>, %arg6: memref<1x2x16x128xf32, #tpu.memory_space<vmem>>, %arg7: memref<2x16x128xf32, #tpu.memory_space<vmem>>, %arg8: memref<2x16x128xf32, #tpu.memory_space<vmem>>) attributes {dimension_semantics = [#tpu.dimension_semantics<arbitrary>], iteration_bounds = array<i64: 3>, scalar_prefetch = 0 : i64, scratch_operands = 2 : i64, tpu.core_type = #tpu.core_type<tc>, window_params = [{transform_indices = @transform_0, window_bounds = array<i64: 135>}, {}, {transform_indices = @transform_2, window_bounds = array<i64: 1, 2, 16, 128>}, {transform_indices = @transform_3, window_bounds = array<i64: 1, 2, 16, 128>}, {transform_indices = @transform_4, window_bounds = array<i64: 1, 2, 16, 128>}, {transform_indices = @transform_5, window_bounds = array<i64: 1, 2, 16, 128>}]} {
    %c0 = arith.constant 0 : index
    %0 = memref.load %arg1[%c0] : memref<135xf32, #tpu.memory_space<smem>>
    %c1 = arith.constant 1 : index
    %1 = memref.load %arg1[%c1] : memref<135xf32, #tpu.memory_space<smem>>
    %c2 = arith.constant 2 : index
    %2 = memref.load %arg1[%c2] : memref<135xf32, #tpu.memory_space<smem>>
    %c3 = arith.constant 3 : index
    %3 = memref.load %arg1[%c3] : memref<135xf32, #tpu.memory_space<smem>>
    %c4 = arith.constant 4 : index
    %4 = memref.load %arg1[%c4] : memref<135xf32, #tpu.memory_space<smem>>
    %c5 = arith.constant 5 : index
    %5 = memref.load %arg1[%c5] : memref<135xf32, #tpu.memory_space<smem>>
    %c6 = arith.constant 6 : index
    %6 = memref.load %arg1[%c6] : memref<135xf32, #tpu.memory_space<smem>>
    %c7 = arith.constant 7 : index
    %7 = memref.load %arg1[%c7] : memref<135xf32, #tpu.memory_space<smem>>
    %c8 = arith.constant 8 : index
    %8 = memref.load %arg1[%c8] : memref<135xf32, #tpu.memory_space<smem>>
    %c9 = arith.constant 9 : index
    %9 = memref.load %arg1[%c9] : memref<135xf32, #tpu.memory_space<smem>>
    %c10 = arith.constant 10 : index
    %10 = memref.load %arg1[%c10] : memref<135xf32, #tpu.memory_space<smem>>
    %c11 = arith.constant 11 : index
    %11 = memref.load %arg1[%c11] : memref<135xf32, #tpu.memory_space<smem>>
    %c12 = arith.constant 12 : index
    %12 = memref.load %arg1[%c12] : memref<135xf32, #tpu.memory_space<smem>>
    %c13 = arith.constant 13 : index
    %13 = memref.load %arg1[%c13] : memref<135xf32, #tpu.memory_space<smem>>
    %c14 = arith.constant 14 : index
    %14 = memref.load %arg1[%c14] : memref<135xf32, #tpu.memory_space<smem>>
    %c15 = arith.constant 15 : index
    %15 = memref.load %arg1[%c15] : memref<135xf32, #tpu.memory_space<smem>>
    %c16 = arith.constant 16 : index
    %16 = memref.load %arg1[%c16] : memref<135xf32, #tpu.memory_space<smem>>
    %c17 = arith.constant 17 : index
    %17 = memref.load %arg1[%c17] : memref<135xf32, #tpu.memory_space<smem>>
    %c18 = arith.constant 18 : index
    %18 = memref.load %arg1[%c18] : memref<135xf32, #tpu.memory_space<smem>>
    %c19 = arith.constant 19 : index
    %19 = memref.load %arg1[%c19] : memref<135xf32, #tpu.memory_space<smem>>
    %c20 = arith.constant 20 : index
    %20 = memref.load %arg1[%c20] : memref<135xf32, #tpu.memory_space<smem>>
    %c21 = arith.constant 21 : index
    %21 = memref.load %arg1[%c21] : memref<135xf32, #tpu.memory_space<smem>>
    %c22 = arith.constant 22 : index
    %22 = memref.load %arg1[%c22] : memref<135xf32, #tpu.memory_space<smem>>
    %c23 = arith.constant 23 : index
    %23 = memref.load %arg1[%c23] : memref<135xf32, #tpu.memory_space<smem>>
    %c24 = arith.constant 24 : index
    %24 = memref.load %arg1[%c24] : memref<135xf32, #tpu.memory_space<smem>>
    %c25 = arith.constant 25 : index
    %25 = memref.load %arg1[%c25] : memref<135xf32, #tpu.memory_space<smem>>
    %c26 = arith.constant 26 : index
    %26 = memref.load %arg1[%c26] : memref<135xf32, #tpu.memory_space<smem>>
    %c27 = arith.constant 27 : index
    %27 = memref.load %arg1[%c27] : memref<135xf32, #tpu.memory_space<smem>>
    %c28 = arith.constant 28 : index
    %28 = memref.load %arg1[%c28] : memref<135xf32, #tpu.memory_space<smem>>
    %c29 = arith.constant 29 : index
    %29 = memref.load %arg1[%c29] : memref<135xf32, #tpu.memory_space<smem>>
    %c30 = arith.constant 30 : index
    %30 = memref.load %arg1[%c30] : memref<135xf32, #tpu.memory_space<smem>>
    %c31 = arith.constant 31 : index
    %31 = memref.load %arg1[%c31] : memref<135xf32, #tpu.memory_space<smem>>
    %c32 = arith.constant 32 : index
    %32 = memref.load %arg1[%c32] : memref<135xf32, #tpu.memory_space<smem>>
    %c33 = arith.constant 33 : index
    %33 = memref.load %arg1[%c33] : memref<135xf32, #tpu.memory_space<smem>>
    %c34 = arith.constant 34 : index
    %34 = memref.load %arg1[%c34] : memref<135xf32, #tpu.memory_space<smem>>
    %c35 = arith.constant 35 : index
    %35 = memref.load %arg1[%c35] : memref<135xf32, #tpu.memory_space<smem>>
    %c36 = arith.constant 36 : index
    %36 = memref.load %arg1[%c36] : memref<135xf32, #tpu.memory_space<smem>>
    %c37 = arith.constant 37 : index
    %37 = memref.load %arg1[%c37] : memref<135xf32, #tpu.memory_space<smem>>
    %c38 = arith.constant 38 : index
    %38 = memref.load %arg1[%c38] : memref<135xf32, #tpu.memory_space<smem>>
    %c39 = arith.constant 39 : index
    %39 = memref.load %arg1[%c39] : memref<135xf32, #tpu.memory_space<smem>>
    %c40 = arith.constant 40 : index
    %40 = memref.load %arg1[%c40] : memref<135xf32, #tpu.memory_space<smem>>
    %c41 = arith.constant 41 : index
    %41 = memref.load %arg1[%c41] : memref<135xf32, #tpu.memory_space<smem>>
    %c42 = arith.constant 42 : index
    %42 = memref.load %arg1[%c42] : memref<135xf32, #tpu.memory_space<smem>>
    %c43 = arith.constant 43 : index
    %43 = memref.load %arg1[%c43] : memref<135xf32, #tpu.memory_space<smem>>
    %c44 = arith.constant 44 : index
    %44 = memref.load %arg1[%c44] : memref<135xf32, #tpu.memory_space<smem>>
    %c45 = arith.constant 45 : index
    %45 = memref.load %arg1[%c45] : memref<135xf32, #tpu.memory_space<smem>>
    %c46 = arith.constant 46 : index
    %46 = memref.load %arg1[%c46] : memref<135xf32, #tpu.memory_space<smem>>
    %c47 = arith.constant 47 : index
    %47 = memref.load %arg1[%c47] : memref<135xf32, #tpu.memory_space<smem>>
    %c48 = arith.constant 48 : index
    %48 = memref.load %arg1[%c48] : memref<135xf32, #tpu.memory_space<smem>>
    %c49 = arith.constant 49 : index
    %49 = memref.load %arg1[%c49] : memref<135xf32, #tpu.memory_space<smem>>
    %c50 = arith.constant 50 : index
    %50 = memref.load %arg1[%c50] : memref<135xf32, #tpu.memory_space<smem>>
    %c51 = arith.constant 51 : index
    %51 = memref.load %arg1[%c51] : memref<135xf32, #tpu.memory_space<smem>>
    %c52 = arith.constant 52 : index
    %52 = memref.load %arg1[%c52] : memref<135xf32, #tpu.memory_space<smem>>
    %c53 = arith.constant 53 : index
    %53 = memref.load %arg1[%c53] : memref<135xf32, #tpu.memory_space<smem>>
    %c54 = arith.constant 54 : index
    %54 = memref.load %arg1[%c54] : memref<135xf32, #tpu.memory_space<smem>>
    %c55 = arith.constant 55 : index
    %55 = memref.load %arg1[%c55] : memref<135xf32, #tpu.memory_space<smem>>
    %c56 = arith.constant 56 : index
    %56 = memref.load %arg1[%c56] : memref<135xf32, #tpu.memory_space<smem>>
    %c57 = arith.constant 57 : index
    %57 = memref.load %arg1[%c57] : memref<135xf32, #tpu.memory_space<smem>>
    %c68 = arith.constant 68 : index
    %58 = memref.load %arg1[%c68] : memref<135xf32, #tpu.memory_space<smem>>
    %c58 = arith.constant 58 : index
    %59 = memref.load %arg1[%c58] : memref<135xf32, #tpu.memory_space<smem>>
    %c59 = arith.constant 59 : index
    %60 = memref.load %arg1[%c59] : memref<135xf32, #tpu.memory_space<smem>>
    %c60 = arith.constant 60 : index
    %61 = memref.load %arg1[%c60] : memref<135xf32, #tpu.memory_space<smem>>
    %c61 = arith.constant 61 : index
    %62 = memref.load %arg1[%c61] : memref<135xf32, #tpu.memory_space<smem>>
    %c62 = arith.constant 62 : index
    %63 = memref.load %arg1[%c62] : memref<135xf32, #tpu.memory_space<smem>>
    %c63 = arith.constant 63 : index
    %64 = memref.load %arg1[%c63] : memref<135xf32, #tpu.memory_space<smem>>
    %c64 = arith.constant 64 : index
    %65 = memref.load %arg1[%c64] : memref<135xf32, #tpu.memory_space<smem>>
    %c65 = arith.constant 65 : index
    %66 = memref.load %arg1[%c65] : memref<135xf32, #tpu.memory_space<smem>>
    %c66 = arith.constant 66 : index
    %67 = memref.load %arg1[%c66] : memref<135xf32, #tpu.memory_space<smem>>
    %c67 = arith.constant 67 : index
    %68 = memref.load %arg1[%c67] : memref<135xf32, #tpu.memory_space<smem>>
    %c69 = arith.constant 69 : index
    %69 = memref.load %arg1[%c69] : memref<135xf32, #tpu.memory_space<smem>>
    %c70 = arith.constant 70 : index
    %70 = memref.load %arg1[%c70] : memref<135xf32, #tpu.memory_space<smem>>
    %c71 = arith.constant 71 : index
    %71 = memref.load %arg1[%c71] : memref<135xf32, #tpu.memory_space<smem>>
    %c72 = arith.constant 72 : index
    %72 = memref.load %arg1[%c72] : memref<135xf32, #tpu.memory_space<smem>>
    %c73 = arith.constant 73 : index
    %73 = memref.load %arg1[%c73] : memref<135xf32, #tpu.memory_space<smem>>
    %c74 = arith.constant 74 : index
    %74 = memref.load %arg1[%c74] : memref<135xf32, #tpu.memory_space<smem>>
    %c75 = arith.constant 75 : index
    %75 = memref.load %arg1[%c75] : memref<135xf32, #tpu.memory_space<smem>>
    %c76 = arith.constant 76 : index
    %76 = memref.load %arg1[%c76] : memref<135xf32, #tpu.memory_space<smem>>
    %c77 = arith.constant 77 : index
    %77 = memref.load %arg1[%c77] : memref<135xf32, #tpu.memory_space<smem>>
    %c78 = arith.constant 78 : index
    %78 = memref.load %arg1[%c78] : memref<135xf32, #tpu.memory_space<smem>>
    %c79 = arith.constant 79 : index
    %79 = memref.load %arg1[%c79] : memref<135xf32, #tpu.memory_space<smem>>
    %c80 = arith.constant 80 : index
    %80 = memref.load %arg1[%c80] : memref<135xf32, #tpu.memory_space<smem>>
    %c81 = arith.constant 81 : index
    %81 = memref.load %arg1[%c81] : memref<135xf32, #tpu.memory_space<smem>>
    %c82 = arith.constant 82 : index
    %82 = memref.load %arg1[%c82] : memref<135xf32, #tpu.memory_space<smem>>
    %c83 = arith.constant 83 : index
    %83 = memref.load %arg1[%c83] : memref<135xf32, #tpu.memory_space<smem>>
    %c84 = arith.constant 84 : index
    %84 = memref.load %arg1[%c84] : memref<135xf32, #tpu.memory_space<smem>>
    %c85 = arith.constant 85 : index
    %85 = memref.load %arg1[%c85] : memref<135xf32, #tpu.memory_space<smem>>
    %c86 = arith.constant 86 : index
    %86 = memref.load %arg1[%c86] : memref<135xf32, #tpu.memory_space<smem>>
    %c87 = arith.constant 87 : index
    %87 = memref.load %arg1[%c87] : memref<135xf32, #tpu.memory_space<smem>>
    %c88 = arith.constant 88 : index
    %88 = memref.load %arg1[%c88] : memref<135xf32, #tpu.memory_space<smem>>
    %c89 = arith.constant 89 : index
    %89 = memref.load %arg1[%c89] : memref<135xf32, #tpu.memory_space<smem>>
    %c90 = arith.constant 90 : index
    %90 = memref.load %arg1[%c90] : memref<135xf32, #tpu.memory_space<smem>>
    %c91 = arith.constant 91 : index
    %91 = memref.load %arg1[%c91] : memref<135xf32, #tpu.memory_space<smem>>
    %c92 = arith.constant 92 : index
    %92 = memref.load %arg1[%c92] : memref<135xf32, #tpu.memory_space<smem>>
    %c93 = arith.constant 93 : index
    %93 = memref.load %arg1[%c93] : memref<135xf32, #tpu.memory_space<smem>>
    %c94 = arith.constant 94 : index
    %94 = memref.load %arg1[%c94] : memref<135xf32, #tpu.memory_space<smem>>
    %c95 = arith.constant 95 : index
    %95 = memref.load %arg1[%c95] : memref<135xf32, #tpu.memory_space<smem>>
    %c96 = arith.constant 96 : index
    %96 = memref.load %arg1[%c96] : memref<135xf32, #tpu.memory_space<smem>>
    %c97 = arith.constant 97 : index
    %97 = memref.load %arg1[%c97] : memref<135xf32, #tpu.memory_space<smem>>
    %c98 = arith.constant 98 : index
    %98 = memref.load %arg1[%c98] : memref<135xf32, #tpu.memory_space<smem>>
    %c99 = arith.constant 99 : index
    %99 = memref.load %arg1[%c99] : memref<135xf32, #tpu.memory_space<smem>>
    %c100 = arith.constant 100 : index
    %100 = memref.load %arg1[%c100] : memref<135xf32, #tpu.memory_space<smem>>
    %c101 = arith.constant 101 : index
    %101 = memref.load %arg1[%c101] : memref<135xf32, #tpu.memory_space<smem>>
    %c102 = arith.constant 102 : index
    %102 = memref.load %arg1[%c102] : memref<135xf32, #tpu.memory_space<smem>>
    %c103 = arith.constant 103 : index
    %103 = memref.load %arg1[%c103] : memref<135xf32, #tpu.memory_space<smem>>
    %c104 = arith.constant 104 : index
    %104 = memref.load %arg1[%c104] : memref<135xf32, #tpu.memory_space<smem>>
    %c105 = arith.constant 105 : index
    %105 = memref.load %arg1[%c105] : memref<135xf32, #tpu.memory_space<smem>>
    %c106 = arith.constant 106 : index
    %106 = memref.load %arg1[%c106] : memref<135xf32, #tpu.memory_space<smem>>
    %c107 = arith.constant 107 : index
    %107 = memref.load %arg1[%c107] : memref<135xf32, #tpu.memory_space<smem>>
    %c108 = arith.constant 108 : index
    %108 = memref.load %arg1[%c108] : memref<135xf32, #tpu.memory_space<smem>>
    %c109 = arith.constant 109 : index
    %109 = memref.load %arg1[%c109] : memref<135xf32, #tpu.memory_space<smem>>
    %c110 = arith.constant 110 : index
    %110 = memref.load %arg1[%c110] : memref<135xf32, #tpu.memory_space<smem>>
    %c111 = arith.constant 111 : index
    %111 = memref.load %arg1[%c111] : memref<135xf32, #tpu.memory_space<smem>>
    %c112 = arith.constant 112 : index
    %112 = memref.load %arg1[%c112] : memref<135xf32, #tpu.memory_space<smem>>
    %c113 = arith.constant 113 : index
    %113 = memref.load %arg1[%c113] : memref<135xf32, #tpu.memory_space<smem>>
    %c114 = arith.constant 114 : index
    %114 = memref.load %arg1[%c114] : memref<135xf32, #tpu.memory_space<smem>>
    %c115 = arith.constant 115 : index
    %115 = memref.load %arg1[%c115] : memref<135xf32, #tpu.memory_space<smem>>
    %c116 = arith.constant 116 : index
    %116 = memref.load %arg1[%c116] : memref<135xf32, #tpu.memory_space<smem>>
    %c117 = arith.constant 117 : index
    %117 = memref.load %arg1[%c117] : memref<135xf32, #tpu.memory_space<smem>>
    %c118 = arith.constant 118 : index
    %118 = memref.load %arg1[%c118] : memref<135xf32, #tpu.memory_space<smem>>
    %c119 = arith.constant 119 : index
    %119 = memref.load %arg1[%c119] : memref<135xf32, #tpu.memory_space<smem>>
    %c120 = arith.constant 120 : index
    %120 = memref.load %arg1[%c120] : memref<135xf32, #tpu.memory_space<smem>>
    %c121 = arith.constant 121 : index
    %121 = memref.load %arg1[%c121] : memref<135xf32, #tpu.memory_space<smem>>
    %c122 = arith.constant 122 : index
    %122 = memref.load %arg1[%c122] : memref<135xf32, #tpu.memory_space<smem>>
    %c123 = arith.constant 123 : index
    %123 = memref.load %arg1[%c123] : memref<135xf32, #tpu.memory_space<smem>>
    %c124 = arith.constant 124 : index
    %124 = memref.load %arg1[%c124] : memref<135xf32, #tpu.memory_space<smem>>
    %c125 = arith.constant 125 : index
    %125 = memref.load %arg1[%c125] : memref<135xf32, #tpu.memory_space<smem>>
    %c126 = arith.constant 126 : index
    %126 = memref.load %arg1[%c126] : memref<135xf32, #tpu.memory_space<smem>>
    %c127 = arith.constant 127 : index
    %127 = memref.load %arg1[%c127] : memref<135xf32, #tpu.memory_space<smem>>
    %c128 = arith.constant 128 : index
    %128 = memref.load %arg1[%c128] : memref<135xf32, #tpu.memory_space<smem>>
    %c129 = arith.constant 129 : index
    %129 = memref.load %arg1[%c129] : memref<135xf32, #tpu.memory_space<smem>>
    %c130 = arith.constant 130 : index
    %130 = memref.load %arg1[%c130] : memref<135xf32, #tpu.memory_space<smem>>
    %c131 = arith.constant 131 : index
    %131 = memref.load %arg1[%c131] : memref<135xf32, #tpu.memory_space<smem>>
    %c132 = arith.constant 132 : index
    %132 = memref.load %arg1[%c132] : memref<135xf32, #tpu.memory_space<smem>>
    %c133 = arith.constant 133 : index
    %133 = memref.load %arg1[%c133] : memref<135xf32, #tpu.memory_space<smem>>
    %c134 = arith.constant 134 : index
    %134 = memref.load %arg1[%c134] : memref<135xf32, #tpu.memory_space<smem>>
    %135 = tpu.iota {dimensions = array<i32: 2>} : vector<1x1x128xi32>
    %136 = tpu.iota {dimensions = array<i32: 1>} : vector<1x16x1xi32>
    %c-2_i32 = arith.constant -2 : i32
    %137 = vector.broadcast %c-2_i32 : i32 to vector<1x1x128xi32>
    %138 = arith.addi %135, %137 : vector<1x1x128xi32>
    %c0_i32 = arith.constant 0 : i32
    %139 = vector.broadcast %c0_i32 : i32 to vector<1x1x128xi32>
    %140 = arith.cmpi sge, %138, %139 : vector<1x1x128xi32>
    %c-2_i32_0 = arith.constant -2 : i32
    %141 = vector.broadcast %c-2_i32_0 : i32 to vector<1x1x128xi32>
    %142 = arith.addi %135, %141 : vector<1x1x128xi32>
    %c128_i32 = arith.constant 128 : i32
    %143 = vector.broadcast %c128_i32 : i32 to vector<1x1x128xi32>
    %144 = arith.cmpi slt, %142, %143 : vector<1x1x128xi32>
    %145 = arith.andi %140, %144 : vector<1x1x128xi1>
    %146 = arith.extui %145 : vector<1x1x128xi1> to vector<1x1x128xi32>
    %147 = arith.sitofp %146 : vector<1x1x128xi32> to vector<1x1x128xf32>
    %c-1_i32 = arith.constant -1 : i32
    %148 = vector.broadcast %c-1_i32 : i32 to vector<1x1x128xi32>
    %149 = arith.addi %135, %148 : vector<1x1x128xi32>
    %c0_i32_1 = arith.constant 0 : i32
    %150 = vector.broadcast %c0_i32_1 : i32 to vector<1x1x128xi32>
    %151 = arith.cmpi sge, %149, %150 : vector<1x1x128xi32>
    %c-1_i32_2 = arith.constant -1 : i32
    %152 = vector.broadcast %c-1_i32_2 : i32 to vector<1x1x128xi32>
    %153 = arith.addi %135, %152 : vector<1x1x128xi32>
    %c128_i32_3 = arith.constant 128 : i32
    %154 = vector.broadcast %c128_i32_3 : i32 to vector<1x1x128xi32>
    %155 = arith.cmpi slt, %153, %154 : vector<1x1x128xi32>
    %156 = arith.andi %151, %155 : vector<1x1x128xi1>
    %157 = arith.extui %156 : vector<1x1x128xi1> to vector<1x1x128xi32>
    %158 = arith.sitofp %157 : vector<1x1x128xi32> to vector<1x1x128xf32>
    %c1_i32 = arith.constant 1 : i32
    %159 = vector.broadcast %c1_i32 : i32 to vector<1x1x128xi32>
    %160 = arith.addi %135, %159 : vector<1x1x128xi32>
    %c0_i32_4 = arith.constant 0 : i32
    %161 = vector.broadcast %c0_i32_4 : i32 to vector<1x1x128xi32>
    %162 = arith.cmpi sge, %160, %161 : vector<1x1x128xi32>
    %c1_i32_5 = arith.constant 1 : i32
    %163 = vector.broadcast %c1_i32_5 : i32 to vector<1x1x128xi32>
    %164 = arith.addi %135, %163 : vector<1x1x128xi32>
    %c128_i32_6 = arith.constant 128 : i32
    %165 = vector.broadcast %c128_i32_6 : i32 to vector<1x1x128xi32>
    %166 = arith.cmpi slt, %164, %165 : vector<1x1x128xi32>
    %167 = arith.andi %162, %166 : vector<1x1x128xi1>
    %168 = arith.extui %167 : vector<1x1x128xi1> to vector<1x1x128xi32>
    %169 = arith.sitofp %168 : vector<1x1x128xi32> to vector<1x1x128xf32>
    %c2_i32 = arith.constant 2 : i32
    %170 = vector.broadcast %c2_i32 : i32 to vector<1x1x128xi32>
    %171 = arith.addi %135, %170 : vector<1x1x128xi32>
    %c0_i32_7 = arith.constant 0 : i32
    %172 = vector.broadcast %c0_i32_7 : i32 to vector<1x1x128xi32>
    %173 = arith.cmpi sge, %171, %172 : vector<1x1x128xi32>
    %c2_i32_8 = arith.constant 2 : i32
    %174 = vector.broadcast %c2_i32_8 : i32 to vector<1x1x128xi32>
    %175 = arith.addi %135, %174 : vector<1x1x128xi32>
    %c128_i32_9 = arith.constant 128 : i32
    %176 = vector.broadcast %c128_i32_9 : i32 to vector<1x1x128xi32>
    %177 = arith.cmpi slt, %175, %176 : vector<1x1x128xi32>
    %178 = arith.andi %173, %177 : vector<1x1x128xi1>
    %179 = arith.extui %178 : vector<1x1x128xi1> to vector<1x1x128xi32>
    %180 = arith.sitofp %179 : vector<1x1x128xi32> to vector<1x1x128xf32>
    %c-2_i32_10 = arith.constant -2 : i32
    %181 = vector.broadcast %c-2_i32_10 : i32 to vector<1x16x1xi32>
    %182 = arith.addi %136, %181 : vector<1x16x1xi32>
    %c0_i32_11 = arith.constant 0 : i32
    %183 = vector.broadcast %c0_i32_11 : i32 to vector<1x16x1xi32>
    %184 = arith.cmpi sge, %182, %183 : vector<1x16x1xi32>
    %c-2_i32_12 = arith.constant -2 : i32
    %185 = vector.broadcast %c-2_i32_12 : i32 to vector<1x16x1xi32>
    %186 = arith.addi %136, %185 : vector<1x16x1xi32>
    %c16_i32 = arith.constant 16 : i32
    %187 = vector.broadcast %c16_i32 : i32 to vector<1x16x1xi32>
    %188 = arith.cmpi slt, %186, %187 : vector<1x16x1xi32>
    %189 = arith.andi %184, %188 : vector<1x16x1xi1>
    %190 = arith.extui %189 : vector<1x16x1xi1> to vector<1x16x1xi32>
    %191 = arith.sitofp %190 : vector<1x16x1xi32> to vector<1x16x1xf32>
    %c-1_i32_13 = arith.constant -1 : i32
    %192 = vector.broadcast %c-1_i32_13 : i32 to vector<1x16x1xi32>
    %193 = arith.addi %136, %192 : vector<1x16x1xi32>
    %c0_i32_14 = arith.constant 0 : i32
    %194 = vector.broadcast %c0_i32_14 : i32 to vector<1x16x1xi32>
    %195 = arith.cmpi sge, %193, %194 : vector<1x16x1xi32>
    %c-1_i32_15 = arith.constant -1 : i32
    %196 = vector.broadcast %c-1_i32_15 : i32 to vector<1x16x1xi32>
    %197 = arith.addi %136, %196 : vector<1x16x1xi32>
    %c16_i32_16 = arith.constant 16 : i32
    %198 = vector.broadcast %c16_i32_16 : i32 to vector<1x16x1xi32>
    %199 = arith.cmpi slt, %197, %198 : vector<1x16x1xi32>
    %200 = arith.andi %195, %199 : vector<1x16x1xi1>
    %201 = arith.extui %200 : vector<1x16x1xi1> to vector<1x16x1xi32>
    %202 = arith.sitofp %201 : vector<1x16x1xi32> to vector<1x16x1xf32>
    %c1_i32_17 = arith.constant 1 : i32
    %203 = vector.broadcast %c1_i32_17 : i32 to vector<1x16x1xi32>
    %204 = arith.addi %136, %203 : vector<1x16x1xi32>
    %c0_i32_18 = arith.constant 0 : i32
    %205 = vector.broadcast %c0_i32_18 : i32 to vector<1x16x1xi32>
    %206 = arith.cmpi sge, %204, %205 : vector<1x16x1xi32>
    %c1_i32_19 = arith.constant 1 : i32
    %207 = vector.broadcast %c1_i32_19 : i32 to vector<1x16x1xi32>
    %208 = arith.addi %136, %207 : vector<1x16x1xi32>
    %c16_i32_20 = arith.constant 16 : i32
    %209 = vector.broadcast %c16_i32_20 : i32 to vector<1x16x1xi32>
    %210 = arith.cmpi slt, %208, %209 : vector<1x16x1xi32>
    %211 = arith.andi %206, %210 : vector<1x16x1xi1>
    %212 = arith.extui %211 : vector<1x16x1xi1> to vector<1x16x1xi32>
    %213 = arith.sitofp %212 : vector<1x16x1xi32> to vector<1x16x1xf32>
    %c2_i32_21 = arith.constant 2 : i32
    %214 = vector.broadcast %c2_i32_21 : i32 to vector<1x16x1xi32>
    %215 = arith.addi %136, %214 : vector<1x16x1xi32>
    %c0_i32_22 = arith.constant 0 : i32
    %216 = vector.broadcast %c0_i32_22 : i32 to vector<1x16x1xi32>
    %217 = arith.cmpi sge, %215, %216 : vector<1x16x1xi32>
    %c2_i32_23 = arith.constant 2 : i32
    %218 = vector.broadcast %c2_i32_23 : i32 to vector<1x16x1xi32>
    %219 = arith.addi %136, %218 : vector<1x16x1xi32>
    %c16_i32_24 = arith.constant 16 : i32
    %220 = vector.broadcast %c16_i32_24 : i32 to vector<1x16x1xi32>
    %221 = arith.cmpi slt, %219, %220 : vector<1x16x1xi32>
    %222 = arith.andi %217, %221 : vector<1x16x1xi1>
    %223 = arith.extui %222 : vector<1x16x1xi1> to vector<1x16x1xi32>
    %224 = arith.sitofp %223 : vector<1x16x1xi32> to vector<1x16x1xf32>
    %c0_i32_25 = arith.constant 0 : i32
    %225 = arith.cmpi eq, %arg0, %c0_i32_25 : i32
    %226 = arith.extui %225 : i1 to i32
    %c0_i32_26 = arith.constant 0 : i32
    %227 = arith.cmpi ne, %226, %c0_i32_26 : i32
    scf.if %227 {
      "tpu.region"() ({
        %1293 = tpu.sem_alloc : memref<!tpu.dma_semaphore, #tpu.memory_space<semaphore_mem>>
        tpu.enqueue_dma source(%arg2 : memref<2x16x128xf32, #tpu.memory_space<any>>) target(%arg8 : memref<2x16x128xf32, #tpu.memory_space<vmem>>) target_semaphore(%1293 : memref<!tpu.dma_semaphore, #tpu.memory_space<semaphore_mem>>)
        tpu.wait_dma2 semaphore(%1293 : memref<!tpu.dma_semaphore, #tpu.memory_space<semaphore_mem>>) src(%arg2 : memref<2x16x128xf32, #tpu.memory_space<any>>) dst(%arg8 : memref<2x16x128xf32, #tpu.memory_space<vmem>>)
        tpu.yield
      }) : () -> ()
      %c0_214 = arith.constant 0 : index
      %c0_215 = arith.constant 0 : index
      %c0_216 = arith.constant 0 : index
      %1291 = vector.load %arg8[%c0_214, %c0_215, %c0_216] : memref<2x16x128xf32, #tpu.memory_space<vmem>>, vector<2x16x128xf32>
      %c0_217 = arith.constant 0 : index
      %c0_218 = arith.constant 0 : index
      %c0_219 = arith.constant 0 : index
      %1292 = vector.load %arg7[%c0_217, %c0_218, %c0_219] : memref<2x16x128xf32, #tpu.memory_space<vmem>>, vector<2x16x128xf32>
      tpu.vector_store %arg7[%c0_217, %c0_218, %c0_219], %1291 {strides = array<i32>} : memref<2x16x128xf32, #tpu.memory_space<vmem>>, vector<2x16x128xf32>,
    } else {
    }
    %c0_27 = arith.constant 0 : index
    %c0_28 = arith.constant 0 : index
    %c0_29 = arith.constant 0 : index
    %228 = vector.load %arg8[%c0_27, %c0_28, %c0_29] : memref<2x16x128xf32, #tpu.memory_space<vmem>>, vector<2x16x128xf32>
    %c0_30 = arith.constant 0 : index
    %c0_31 = arith.constant 0 : index
    %c0_32 = arith.constant 0 : index
    %229 = vector.load %arg7[%c0_30, %c0_31, %c0_32] : memref<2x16x128xf32, #tpu.memory_space<vmem>>, vector<2x16x128xf32>
    %c0_33 = arith.constant 0 : index
    %c0_34 = arith.constant 0 : index
    %c0_35 = arith.constant 0 : index
    %c0_36 = arith.constant 0 : index
    %230 = vector.load %arg5[%c0_33, %c0_34, %c0_35, %c0_36] : memref<1x2x16x128xf32, #tpu.memory_space<vmem>>, vector<1x2x16x128xf32>
    %231 = vector.shape_cast %230 : vector<1x2x16x128xf32> to vector<2x16x128xf32>
    %232 = vector.shape_cast %229 : vector<2x16x128xf32> to vector<1x2x16x128xf32>
    tpu.vector_store %arg5[%c0_33, %c0_34, %c0_35, %c0_36], %232 {strides = array<i32>} : memref<1x2x16x128xf32, #tpu.memory_space<vmem>>, vector<1x2x16x128xf32>,
    %c127_i32 = arith.constant 127 : i32
    %233 = tpu.dynamic_rotate %229 by %c127_i32 dim 2 : vector<2x16x128xf32>, i32 -> vector<2x16x128xf32>
    %234 = vector.broadcast %169 : vector<1x1x128xf32> to vector<2x16x128xf32>
    %235 = arith.mulf %233, %234 : vector<2x16x128xf32>
    %c1_i32_37 = arith.constant 1 : i32
    %236 = tpu.dynamic_rotate %229 by %c1_i32_37 dim 2 : vector<2x16x128xf32>, i32 -> vector<2x16x128xf32>
    %237 = vector.broadcast %158 : vector<1x1x128xf32> to vector<2x16x128xf32>
    %238 = arith.mulf %236, %237 : vector<2x16x128xf32>
    %c126_i32 = arith.constant 126 : i32
    %239 = tpu.dynamic_rotate %229 by %c126_i32 dim 2 : vector<2x16x128xf32>, i32 -> vector<2x16x128xf32>
    %240 = vector.broadcast %180 : vector<1x1x128xf32> to vector<2x16x128xf32>
    %241 = arith.mulf %239, %240 : vector<2x16x128xf32>
    %c2_i32_38 = arith.constant 2 : i32
    %242 = tpu.dynamic_rotate %229 by %c2_i32_38 dim 2 : vector<2x16x128xf32>, i32 -> vector<2x16x128xf32>
    %243 = vector.broadcast %147 : vector<1x1x128xf32> to vector<2x16x128xf32>
    %244 = arith.mulf %242, %243 : vector<2x16x128xf32>
    %245 = vector.broadcast %0 : f32 to vector<2x16x128xf32>
    %246 = arith.mulf %245, %238 : vector<2x16x128xf32>
    %247 = vector.broadcast %1 : f32 to vector<2x16x128xf32>
    %248 = arith.mulf %247, %229 : vector<2x16x128xf32>
    %249 = arith.addf %246, %248 : vector<2x16x128xf32>
    %250 = vector.broadcast %2 : f32 to vector<2x16x128xf32>
    %251 = arith.mulf %250, %235 : vector<2x16x128xf32>
    %252 = arith.addf %249, %251 : vector<2x16x128xf32>
    %c1_i32_39 = arith.constant 1 : i32
    %253 = tpu.dynamic_rotate %252 by %c1_i32_39 dim 1 : vector<2x16x128xf32>, i32 -> vector<2x16x128xf32>
    %254 = vector.broadcast %202 : vector<1x16x1xf32> to vector<2x16x128xf32>
    %255 = arith.mulf %253, %254 : vector<2x16x128xf32>
    %256 = vector.broadcast %3 : f32 to vector<2x16x128xf32>
    %257 = arith.mulf %256, %238 : vector<2x16x128xf32>
    %258 = vector.broadcast %4 : f32 to vector<2x16x128xf32>
    %259 = arith.mulf %258, %229 : vector<2x16x128xf32>
    %260 = arith.addf %257, %259 : vector<2x16x128xf32>
    %261 = vector.broadcast %5 : f32 to vector<2x16x128xf32>
    %262 = arith.mulf %261, %235 : vector<2x16x128xf32>
    %263 = arith.addf %260, %262 : vector<2x16x128xf32>
    %264 = arith.addf %255, %263 : vector<2x16x128xf32>
    %265 = vector.broadcast %6 : f32 to vector<2x16x128xf32>
    %266 = arith.mulf %265, %238 : vector<2x16x128xf32>
    %267 = vector.broadcast %7 : f32 to vector<2x16x128xf32>
    %268 = arith.mulf %267, %229 : vector<2x16x128xf32>
    %269 = arith.addf %266, %268 : vector<2x16x128xf32>
    %270 = vector.broadcast %8 : f32 to vector<2x16x128xf32>
    %271 = arith.mulf %270, %235 : vector<2x16x128xf32>
    %272 = arith.addf %269, %271 : vector<2x16x128xf32>
    %c15_i32 = arith.constant 15 : i32
    %273 = tpu.dynamic_rotate %272 by %c15_i32 dim 1 : vector<2x16x128xf32>, i32 -> vector<2x16x128xf32>
    %274 = vector.broadcast %213 : vector<1x16x1xf32> to vector<2x16x128xf32>
    %275 = arith.mulf %273, %274 : vector<2x16x128xf32>
    %276 = arith.addf %264, %275 : vector<2x16x128xf32>
    %277 = vector.broadcast %9 : f32 to vector<2x16x128xf32>
    %278 = arith.addf %276, %277 : vector<2x16x128xf32>
    %cst = arith.constant 0.000000e+00 : f32
    %279 = vector.broadcast %cst : f32 to vector<2x16x128xf32>
    %280 = arith.maximumf %278, %279 : vector<2x16x128xf32>
    %281 = vector.broadcast %32 : f32 to vector<2x16x128xf32>
    %282 = arith.mulf %281, %244 : vector<2x16x128xf32>
    %283 = vector.broadcast %33 : f32 to vector<2x16x128xf32>
    %284 = arith.mulf %283, %238 : vector<2x16x128xf32>
    %285 = arith.addf %282, %284 : vector<2x16x128xf32>
    %286 = vector.broadcast %34 : f32 to vector<2x16x128xf32>
    %287 = arith.mulf %286, %229 : vector<2x16x128xf32>
    %288 = arith.addf %285, %287 : vector<2x16x128xf32>
    %289 = vector.broadcast %35 : f32 to vector<2x16x128xf32>
    %290 = arith.mulf %289, %235 : vector<2x16x128xf32>
    %291 = arith.addf %288, %290 : vector<2x16x128xf32>
    %292 = vector.broadcast %36 : f32 to vector<2x16x128xf32>
    %293 = arith.mulf %292, %241 : vector<2x16x128xf32>
    %294 = arith.addf %291, %293 : vector<2x16x128xf32>
    %c2_i32_40 = arith.constant 2 : i32
    %295 = tpu.dynamic_rotate %294 by %c2_i32_40 dim 1 : vector<2x16x128xf32>, i32 -> vector<2x16x128xf32>
    %296 = vector.broadcast %191 : vector<1x16x1xf32> to vector<2x16x128xf32>
    %297 = arith.mulf %295, %296 : vector<2x16x128xf32>
    %298 = vector.broadcast %37 : f32 to vector<2x16x128xf32>
    %299 = arith.mulf %298, %244 : vector<2x16x128xf32>
    %300 = vector.broadcast %38 : f32 to vector<2x16x128xf32>
    %301 = arith.mulf %300, %238 : vector<2x16x128xf32>
    %302 = arith.addf %299, %301 : vector<2x16x128xf32>
    %303 = vector.broadcast %39 : f32 to vector<2x16x128xf32>
    %304 = arith.mulf %303, %229 : vector<2x16x128xf32>
    %305 = arith.addf %302, %304 : vector<2x16x128xf32>
    %306 = vector.broadcast %40 : f32 to vector<2x16x128xf32>
    %307 = arith.mulf %306, %235 : vector<2x16x128xf32>
    %308 = arith.addf %305, %307 : vector<2x16x128xf32>
    %309 = vector.broadcast %41 : f32 to vector<2x16x128xf32>
    %310 = arith.mulf %309, %241 : vector<2x16x128xf32>
    %311 = arith.addf %308, %310 : vector<2x16x128xf32>
    %c1_i32_41 = arith.constant 1 : i32
    %312 = tpu.dynamic_rotate %311 by %c1_i32_41 dim 1 : vector<2x16x128xf32>, i32 -> vector<2x16x128xf32>
    %313 = vector.broadcast %202 : vector<1x16x1xf32> to vector<2x16x128xf32>
    %314 = arith.mulf %312, %313 : vector<2x16x128xf32>
    %315 = arith.addf %297, %314 : vector<2x16x128xf32>
    %316 = vector.broadcast %42 : f32 to vector<2x16x128xf32>
    %317 = arith.mulf %316, %244 : vector<2x16x128xf32>
    %318 = vector.broadcast %43 : f32 to vector<2x16x128xf32>
    %319 = arith.mulf %318, %238 : vector<2x16x128xf32>
    %320 = arith.addf %317, %319 : vector<2x16x128xf32>
    %321 = vector.broadcast %44 : f32 to vector<2x16x128xf32>
    %322 = arith.mulf %321, %229 : vector<2x16x128xf32>
    %323 = arith.addf %320, %322 : vector<2x16x128xf32>
    %324 = vector.broadcast %45 : f32 to vector<2x16x128xf32>
    %325 = arith.mulf %324, %235 : vector<2x16x128xf32>
    %326 = arith.addf %323, %325 : vector<2x16x128xf32>
    %327 = vector.broadcast %46 : f32 to vector<2x16x128xf32>
    %328 = arith.mulf %327, %241 : vector<2x16x128xf32>
    %329 = arith.addf %326, %328 : vector<2x16x128xf32>
    %330 = arith.addf %315, %329 : vector<2x16x128xf32>
    %331 = vector.broadcast %47 : f32 to vector<2x16x128xf32>
    %332 = arith.mulf %331, %244 : vector<2x16x128xf32>
    %333 = vector.broadcast %48 : f32 to vector<2x16x128xf32>
    %334 = arith.mulf %333, %238 : vector<2x16x128xf32>
    %335 = arith.addf %332, %334 : vector<2x16x128xf32>
    %336 = vector.broadcast %49 : f32 to vector<2x16x128xf32>
    %337 = arith.mulf %336, %229 : vector<2x16x128xf32>
    %338 = arith.addf %335, %337 : vector<2x16x128xf32>
    %339 = vector.broadcast %50 : f32 to vector<2x16x128xf32>
    %340 = arith.mulf %339, %235 : vector<2x16x128xf32>
    %341 = arith.addf %338, %340 : vector<2x16x128xf32>
    %342 = vector.broadcast %51 : f32 to vector<2x16x128xf32>
    %343 = arith.mulf %342, %241 : vector<2x16x128xf32>
    %344 = arith.addf %341, %343 : vector<2x16x128xf32>
    %c15_i32_42 = arith.constant 15 : i32
    %345 = tpu.dynamic_rotate %344 by %c15_i32_42 dim 1 : vector<2x16x128xf32>, i32 -> vector<2x16x128xf32>
    %346 = vector.broadcast %213 : vector<1x16x1xf32> to vector<2x16x128xf32>
    %347 = arith.mulf %345, %346 : vector<2x16x128xf32>
    %348 = arith.addf %330, %347 : vector<2x16x128xf32>
    %349 = vector.broadcast %52 : f32 to vector<2x16x128xf32>
    %350 = arith.mulf %349, %244 : vector<2x16x128xf32>
    %351 = vector.broadcast %53 : f32 to vector<2x16x128xf32>
    %352 = arith.mulf %351, %238 : vector<2x16x128xf32>
    %353 = arith.addf %350, %352 : vector<2x16x128xf32>
    %354 = vector.broadcast %54 : f32 to vector<2x16x128xf32>
    %355 = arith.mulf %354, %229 : vector<2x16x128xf32>
    %356 = arith.addf %353, %355 : vector<2x16x128xf32>
    %357 = vector.broadcast %55 : f32 to vector<2x16x128xf32>
    %358 = arith.mulf %357, %235 : vector<2x16x128xf32>
    %359 = arith.addf %356, %358 : vector<2x16x128xf32>
    %360 = vector.broadcast %56 : f32 to vector<2x16x128xf32>
    %361 = arith.mulf %360, %241 : vector<2x16x128xf32>
    %362 = arith.addf %359, %361 : vector<2x16x128xf32>
    %c14_i32 = arith.constant 14 : i32
    %363 = tpu.dynamic_rotate %362 by %c14_i32 dim 1 : vector<2x16x128xf32>, i32 -> vector<2x16x128xf32>
    %364 = vector.broadcast %224 : vector<1x16x1xf32> to vector<2x16x128xf32>
    %365 = arith.mulf %363, %364 : vector<2x16x128xf32>
    %366 = arith.addf %348, %365 : vector<2x16x128xf32>
    %367 = vector.broadcast %57 : f32 to vector<2x16x128xf32>
    %368 = arith.addf %366, %367 : vector<2x16x128xf32>
    %cst_43 = arith.constant 0.000000e+00 : f32
    %369 = vector.broadcast %cst_43 : f32 to vector<2x16x128xf32>
    %370 = arith.maximumf %368, %369 : vector<2x16x128xf32>
    %cst_44 = arith.constant 0.000000e+00 : f32
    %371 = vector.broadcast %cst_44 : f32 to vector<2x16x128xf32>
    %372 = arith.minimumf %368, %371 : vector<2x16x128xf32>
    %373 = vector.broadcast %58 : f32 to vector<2x16x128xf32>
    %374 = arith.mulf %373, %372 : vector<2x16x128xf32>
    %375 = arith.addf %370, %374 : vector<2x16x128xf32>
    %376 = vector.broadcast %59 : f32 to vector<2x16x128xf32>
    %377 = arith.mulf %376, %238 : vector<2x16x128xf32>
    %378 = vector.broadcast %60 : f32 to vector<2x16x128xf32>
    %379 = arith.mulf %378, %229 : vector<2x16x128xf32>
    %380 = arith.addf %377, %379 : vector<2x16x128xf32>
    %381 = vector.broadcast %61 : f32 to vector<2x16x128xf32>
    %382 = arith.mulf %381, %235 : vector<2x16x128xf32>
    %383 = arith.addf %380, %382 : vector<2x16x128xf32>
    %c1_i32_45 = arith.constant 1 : i32
    %384 = tpu.dynamic_rotate %383 by %c1_i32_45 dim 1 : vector<2x16x128xf32>, i32 -> vector<2x16x128xf32>
    %385 = vector.broadcast %202 : vector<1x16x1xf32> to vector<2x16x128xf32>
    %386 = arith.mulf %384, %385 : vector<2x16x128xf32>
    %387 = vector.broadcast %62 : f32 to vector<2x16x128xf32>
    %388 = arith.mulf %387, %238 : vector<2x16x128xf32>
    %389 = vector.broadcast %63 : f32 to vector<2x16x128xf32>
    %390 = arith.mulf %389, %229 : vector<2x16x128xf32>
    %391 = arith.addf %388, %390 : vector<2x16x128xf32>
    %392 = vector.broadcast %64 : f32 to vector<2x16x128xf32>
    %393 = arith.mulf %392, %235 : vector<2x16x128xf32>
    %394 = arith.addf %391, %393 : vector<2x16x128xf32>
    %395 = arith.addf %386, %394 : vector<2x16x128xf32>
    %396 = vector.broadcast %65 : f32 to vector<2x16x128xf32>
    %397 = arith.mulf %396, %238 : vector<2x16x128xf32>
    %398 = vector.broadcast %66 : f32 to vector<2x16x128xf32>
    %399 = arith.mulf %398, %229 : vector<2x16x128xf32>
    %400 = arith.addf %397, %399 : vector<2x16x128xf32>
    %401 = vector.broadcast %67 : f32 to vector<2x16x128xf32>
    %402 = arith.mulf %401, %235 : vector<2x16x128xf32>
    %403 = arith.addf %400, %402 : vector<2x16x128xf32>
    %c15_i32_46 = arith.constant 15 : i32
    %404 = tpu.dynamic_rotate %403 by %c15_i32_46 dim 1 : vector<2x16x128xf32>, i32 -> vector<2x16x128xf32>
    %405 = vector.broadcast %213 : vector<1x16x1xf32> to vector<2x16x128xf32>
    %406 = arith.mulf %404, %405 : vector<2x16x128xf32>
    %407 = arith.addf %395, %406 : vector<2x16x128xf32>
    %408 = vector.broadcast %68 : f32 to vector<2x16x128xf32>
    %409 = arith.addf %407, %408 : vector<2x16x128xf32>
    %cst_47 = arith.constant 0.000000e+00 : f32
    %410 = vector.broadcast %cst_47 : f32 to vector<2x16x128xf32>
    %411 = arith.maximumf %409, %410 : vector<2x16x128xf32>
    %cst_48 = arith.constant 0.000000e+00 : f32
    %412 = vector.broadcast %cst_48 : f32 to vector<2x16x128xf32>
    %413 = arith.minimumf %409, %412 : vector<2x16x128xf32>
    %414 = vector.broadcast %69 : f32 to vector<2x16x128xf32>
    %415 = arith.mulf %414, %413 : vector<2x16x128xf32>
    %416 = arith.addf %411, %415 : vector<2x16x128xf32>
    %417 = arith.subf %375, %416 : vector<2x16x128xf32>
    %cst_49 = arith.constant 5.000000e-01 : f32
    %418 = vector.broadcast %cst_49 : f32 to vector<2x16x128xf32>
    %419 = arith.mulf %418, %417 : vector<2x16x128xf32>
    %420 = math.tanh %419 : vector<2x16x128xf32>
    %cst_50 = arith.constant 1.000000e+00 : f32
    %421 = vector.broadcast %cst_50 : f32 to vector<2x16x128xf32>
    %422 = arith.addf %420, %421 : vector<2x16x128xf32>
    %cst_51 = arith.constant 5.000000e-01 : f32
    %423 = vector.broadcast %cst_51 : f32 to vector<2x16x128xf32>
    %424 = arith.mulf %423, %422 : vector<2x16x128xf32>
    %c0_i32_52 = arith.constant 0 : i32
    %c127_i32_53 = arith.constant 127 : i32
    %425 = tpu.dynamic_rotate %280 by %c127_i32_53 dim 2 : vector<2x16x128xf32>, i32 -> vector<2x16x128xf32>
    %426 = vector.broadcast %169 : vector<1x1x128xf32> to vector<2x16x128xf32>
    %427 = arith.mulf %425, %426 : vector<2x16x128xf32>
    %c1_i32_54 = arith.constant 1 : i32
    %428 = tpu.dynamic_rotate %280 by %c1_i32_54 dim 2 : vector<2x16x128xf32>, i32 -> vector<2x16x128xf32>
    %429 = vector.broadcast %158 : vector<1x1x128xf32> to vector<2x16x128xf32>
    %430 = arith.mulf %428, %429 : vector<2x16x128xf32>
    %431 = vector.broadcast %10 : f32 to vector<2x16x128xf32>
    %432 = arith.mulf %431, %430 : vector<2x16x128xf32>
    %433 = vector.broadcast %11 : f32 to vector<2x16x128xf32>
    %434 = arith.mulf %433, %280 : vector<2x16x128xf32>
    %435 = arith.addf %432, %434 : vector<2x16x128xf32>
    %436 = vector.broadcast %12 : f32 to vector<2x16x128xf32>
    %437 = arith.mulf %436, %427 : vector<2x16x128xf32>
    %438 = arith.addf %435, %437 : vector<2x16x128xf32>
    %c1_i32_55 = arith.constant 1 : i32
    %439 = tpu.dynamic_rotate %438 by %c1_i32_55 dim 1 : vector<2x16x128xf32>, i32 -> vector<2x16x128xf32>
    %440 = vector.broadcast %202 : vector<1x16x1xf32> to vector<2x16x128xf32>
    %441 = arith.mulf %439, %440 : vector<2x16x128xf32>
    %442 = vector.broadcast %13 : f32 to vector<2x16x128xf32>
    %443 = arith.mulf %442, %430 : vector<2x16x128xf32>
    %444 = vector.broadcast %14 : f32 to vector<2x16x128xf32>
    %445 = arith.mulf %444, %280 : vector<2x16x128xf32>
    %446 = arith.addf %443, %445 : vector<2x16x128xf32>
    %447 = vector.broadcast %15 : f32 to vector<2x16x128xf32>
    %448 = arith.mulf %447, %427 : vector<2x16x128xf32>
    %449 = arith.addf %446, %448 : vector<2x16x128xf32>
    %450 = arith.addf %441, %449 : vector<2x16x128xf32>
    %451 = vector.broadcast %16 : f32 to vector<2x16x128xf32>
    %452 = arith.mulf %451, %430 : vector<2x16x128xf32>
    %453 = vector.broadcast %17 : f32 to vector<2x16x128xf32>
    %454 = arith.mulf %453, %280 : vector<2x16x128xf32>
    %455 = arith.addf %452, %454 : vector<2x16x128xf32>
    %456 = vector.broadcast %18 : f32 to vector<2x16x128xf32>
    %457 = arith.mulf %456, %427 : vector<2x16x128xf32>
    %458 = arith.addf %455, %457 : vector<2x16x128xf32>
    %c15_i32_56 = arith.constant 15 : i32
    %459 = tpu.dynamic_rotate %458 by %c15_i32_56 dim 1 : vector<2x16x128xf32>, i32 -> vector<2x16x128xf32>
    %460 = vector.broadcast %213 : vector<1x16x1xf32> to vector<2x16x128xf32>
    %461 = arith.mulf %459, %460 : vector<2x16x128xf32>
    %462 = arith.addf %450, %461 : vector<2x16x128xf32>
    %463 = vector.broadcast %19 : f32 to vector<2x16x128xf32>
    %464 = arith.addf %462, %463 : vector<2x16x128xf32>
    %465 = arith.mulf %464, %464 : vector<2x16x128xf32>
    %466 = vector.shape_cast %464 : vector<2x16x128xf32> to vector<1x2x16x128xf32>
    %cst_57 = arith.constant dense<0.000000e+00> : vector<1xf32>
    %467 = vector.multi_reduction <add>, %466, %cst_57 [1, 2, 3] : vector<1x2x16x128xf32> to vector<1xf32>
    %468 = vector.shape_cast %467 : vector<1xf32> to vector<1x1x1x1xf32>
    %469 = vector.extract %468[0, 0, 0, 0] : f32 from vector<1x1x1x1xf32>
    %470 = vector.shape_cast %465 : vector<2x16x128xf32> to vector<1x2x16x128xf32>
    %cst_58 = arith.constant dense<0.000000e+00> : vector<1xf32>
    %471 = vector.multi_reduction <add>, %470, %cst_58 [1, 2, 3] : vector<1x2x16x128xf32> to vector<1xf32>
    %472 = vector.shape_cast %471 : vector<1xf32> to vector<1x1x1x1xf32>
    %473 = vector.extract %472[0, 0, 0, 0] : f32 from vector<1x1x1x1xf32>
    %cst_59 = arith.constant 2.44140625E-4 : f32
    %474 = arith.mulf %469, %cst_59 : f32
    %cst_60 = arith.constant 2.44140625E-4 : f32
    %475 = arith.mulf %473, %cst_60 : f32
    %476 = arith.mulf %474, %474 : f32
    %477 = arith.subf %475, %476 : f32
    %cst_61 = arith.constant 0.000000e+00 : f32
    %478 = arith.maximumf %477, %cst_61 : f32
    %479 = vector.broadcast %474 : f32 to vector<2x16x128xf32>
    %480 = arith.subf %464, %479 : vector<2x16x128xf32>
    %cst_62 = arith.constant 9.99999974E-6 : f32
    %481 = arith.addf %478, %cst_62 : f32
    %482 = math.rsqrt %481 : f32
    %483 = arith.mulf %20, %482 : f32
    %484 = vector.broadcast %483 : f32 to vector<2x16x128xf32>
    %485 = arith.mulf %480, %484 : vector<2x16x128xf32>
    %486 = vector.broadcast %21 : f32 to vector<2x16x128xf32>
    %487 = arith.addf %485, %486 : vector<2x16x128xf32>
    %cst_63 = arith.constant 0.000000e+00 : f32
    %488 = vector.broadcast %cst_63 : f32 to vector<2x16x128xf32>
    %489 = arith.maximumf %487, %488 : vector<2x16x128xf32>
    %490 = arith.addf %280, %489 : vector<2x16x128xf32>
    %c1_i32_64 = arith.constant 1 : i32
    %c127_i32_65 = arith.constant 127 : i32
    %491 = tpu.dynamic_rotate %490 by %c127_i32_65 dim 2 : vector<2x16x128xf32>, i32 -> vector<2x16x128xf32>
    %492 = vector.broadcast %169 : vector<1x1x128xf32> to vector<2x16x128xf32>
    %493 = arith.mulf %491, %492 : vector<2x16x128xf32>
    %c1_i32_66 = arith.constant 1 : i32
    %494 = tpu.dynamic_rotate %490 by %c1_i32_66 dim 2 : vector<2x16x128xf32>, i32 -> vector<2x16x128xf32>
    %495 = vector.broadcast %158 : vector<1x1x128xf32> to vector<2x16x128xf32>
    %496 = arith.mulf %494, %495 : vector<2x16x128xf32>
    %497 = vector.broadcast %10 : f32 to vector<2x16x128xf32>
    %498 = arith.mulf %497, %496 : vector<2x16x128xf32>
    %499 = vector.broadcast %11 : f32 to vector<2x16x128xf32>
    %500 = arith.mulf %499, %490 : vector<2x16x128xf32>
    %501 = arith.addf %498, %500 : vector<2x16x128xf32>
    %502 = vector.broadcast %12 : f32 to vector<2x16x128xf32>
    %503 = arith.mulf %502, %493 : vector<2x16x128xf32>
    %504 = arith.addf %501, %503 : vector<2x16x128xf32>
    %c1_i32_67 = arith.constant 1 : i32
    %505 = tpu.dynamic_rotate %504 by %c1_i32_67 dim 1 : vector<2x16x128xf32>, i32 -> vector<2x16x128xf32>
    %506 = vector.broadcast %202 : vector<1x16x1xf32> to vector<2x16x128xf32>
    %507 = arith.mulf %505, %506 : vector<2x16x128xf32>
    %508 = vector.broadcast %13 : f32 to vector<2x16x128xf32>
    %509 = arith.mulf %508, %496 : vector<2x16x128xf32>
    %510 = vector.broadcast %14 : f32 to vector<2x16x128xf32>
    %511 = arith.mulf %510, %490 : vector<2x16x128xf32>
    %512 = arith.addf %509, %511 : vector<2x16x128xf32>
    %513 = vector.broadcast %15 : f32 to vector<2x16x128xf32>
    %514 = arith.mulf %513, %493 : vector<2x16x128xf32>
    %515 = arith.addf %512, %514 : vector<2x16x128xf32>
    %516 = arith.addf %507, %515 : vector<2x16x128xf32>
    %517 = vector.broadcast %16 : f32 to vector<2x16x128xf32>
    %518 = arith.mulf %517, %496 : vector<2x16x128xf32>
    %519 = vector.broadcast %17 : f32 to vector<2x16x128xf32>
    %520 = arith.mulf %519, %490 : vector<2x16x128xf32>
    %521 = arith.addf %518, %520 : vector<2x16x128xf32>
    %522 = vector.broadcast %18 : f32 to vector<2x16x128xf32>
    %523 = arith.mulf %522, %493 : vector<2x16x128xf32>
    %524 = arith.addf %521, %523 : vector<2x16x128xf32>
    %c15_i32_68 = arith.constant 15 : i32
    %525 = tpu.dynamic_rotate %524 by %c15_i32_68 dim 1 : vector<2x16x128xf32>, i32 -> vector<2x16x128xf32>
    %526 = vector.broadcast %213 : vector<1x16x1xf32> to vector<2x16x128xf32>
    %527 = arith.mulf %525, %526 : vector<2x16x128xf32>
    %528 = arith.addf %516, %527 : vector<2x16x128xf32>
    %529 = vector.broadcast %19 : f32 to vector<2x16x128xf32>
    %530 = arith.addf %528, %529 : vector<2x16x128xf32>
    %531 = arith.mulf %530, %530 : vector<2x16x128xf32>
    %532 = vector.shape_cast %530 : vector<2x16x128xf32> to vector<1x2x16x128xf32>
    %cst_69 = arith.constant dense<0.000000e+00> : vector<1xf32>
    %533 = vector.multi_reduction <add>, %532, %cst_69 [1, 2, 3] : vector<1x2x16x128xf32> to vector<1xf32>
    %534 = vector.shape_cast %533 : vector<1xf32> to vector<1x1x1x1xf32>
    %535 = vector.extract %534[0, 0, 0, 0] : f32 from vector<1x1x1x1xf32>
    %536 = vector.shape_cast %531 : vector<2x16x128xf32> to vector<1x2x16x128xf32>
    %cst_70 = arith.constant dense<0.000000e+00> : vector<1xf32>
    %537 = vector.multi_reduction <add>, %536, %cst_70 [1, 2, 3] : vector<1x2x16x128xf32> to vector<1xf32>
    %538 = vector.shape_cast %537 : vector<1xf32> to vector<1x1x1x1xf32>
    %539 = vector.extract %538[0, 0, 0, 0] : f32 from vector<1x1x1x1xf32>
    %cst_71 = arith.constant 2.44140625E-4 : f32
    %540 = arith.mulf %535, %cst_71 : f32
    %cst_72 = arith.constant 2.44140625E-4 : f32
    %541 = arith.mulf %539, %cst_72 : f32
    %542 = arith.mulf %540, %540 : f32
    %543 = arith.subf %541, %542 : f32
    %cst_73 = arith.constant 0.000000e+00 : f32
    %544 = arith.maximumf %543, %cst_73 : f32
    %545 = vector.broadcast %540 : f32 to vector<2x16x128xf32>
    %546 = arith.subf %530, %545 : vector<2x16x128xf32>
    %cst_74 = arith.constant 9.99999974E-6 : f32
    %547 = arith.addf %544, %cst_74 : f32
    %548 = math.rsqrt %547 : f32
    %549 = arith.mulf %20, %548 : f32
    %550 = vector.broadcast %549 : f32 to vector<2x16x128xf32>
    %551 = arith.mulf %546, %550 : vector<2x16x128xf32>
    %552 = vector.broadcast %21 : f32 to vector<2x16x128xf32>
    %553 = arith.addf %551, %552 : vector<2x16x128xf32>
    %cst_75 = arith.constant 0.000000e+00 : f32
    %554 = vector.broadcast %cst_75 : f32 to vector<2x16x128xf32>
    %555 = arith.maximumf %553, %554 : vector<2x16x128xf32>
    %556 = arith.addf %490, %555 : vector<2x16x128xf32>
    %c2_i32_76 = arith.constant 2 : i32
    %c127_i32_77 = arith.constant 127 : i32
    %557 = tpu.dynamic_rotate %556 by %c127_i32_77 dim 2 : vector<2x16x128xf32>, i32 -> vector<2x16x128xf32>
    %558 = vector.broadcast %169 : vector<1x1x128xf32> to vector<2x16x128xf32>
    %559 = arith.mulf %557, %558 : vector<2x16x128xf32>
    %c1_i32_78 = arith.constant 1 : i32
    %560 = tpu.dynamic_rotate %556 by %c1_i32_78 dim 2 : vector<2x16x128xf32>, i32 -> vector<2x16x128xf32>
    %561 = vector.broadcast %158 : vector<1x1x128xf32> to vector<2x16x128xf32>
    %562 = arith.mulf %560, %561 : vector<2x16x128xf32>
    %563 = vector.broadcast %10 : f32 to vector<2x16x128xf32>
    %564 = arith.mulf %563, %562 : vector<2x16x128xf32>
    %565 = vector.broadcast %11 : f32 to vector<2x16x128xf32>
    %566 = arith.mulf %565, %556 : vector<2x16x128xf32>
    %567 = arith.addf %564, %566 : vector<2x16x128xf32>
    %568 = vector.broadcast %12 : f32 to vector<2x16x128xf32>
    %569 = arith.mulf %568, %559 : vector<2x16x128xf32>
    %570 = arith.addf %567, %569 : vector<2x16x128xf32>
    %c1_i32_79 = arith.constant 1 : i32
    %571 = tpu.dynamic_rotate %570 by %c1_i32_79 dim 1 : vector<2x16x128xf32>, i32 -> vector<2x16x128xf32>
    %572 = vector.broadcast %202 : vector<1x16x1xf32> to vector<2x16x128xf32>
    %573 = arith.mulf %571, %572 : vector<2x16x128xf32>
    %574 = vector.broadcast %13 : f32 to vector<2x16x128xf32>
    %575 = arith.mulf %574, %562 : vector<2x16x128xf32>
    %576 = vector.broadcast %14 : f32 to vector<2x16x128xf32>
    %577 = arith.mulf %576, %556 : vector<2x16x128xf32>
    %578 = arith.addf %575, %577 : vector<2x16x128xf32>
    %579 = vector.broadcast %15 : f32 to vector<2x16x128xf32>
    %580 = arith.mulf %579, %559 : vector<2x16x128xf32>
    %581 = arith.addf %578, %580 : vector<2x16x128xf32>
    %582 = arith.addf %573, %581 : vector<2x16x128xf32>
    %583 = vector.broadcast %16 : f32 to vector<2x16x128xf32>
    %584 = arith.mulf %583, %562 : vector<2x16x128xf32>
    %585 = vector.broadcast %17 : f32 to vector<2x16x128xf32>
    %586 = arith.mulf %585, %556 : vector<2x16x128xf32>
    %587 = arith.addf %584, %586 : vector<2x16x128xf32>
    %588 = vector.broadcast %18 : f32 to vector<2x16x128xf32>
    %589 = arith.mulf %588, %559 : vector<2x16x128xf32>
    %590 = arith.addf %587, %589 : vector<2x16x128xf32>
    %c15_i32_80 = arith.constant 15 : i32
    %591 = tpu.dynamic_rotate %590 by %c15_i32_80 dim 1 : vector<2x16x128xf32>, i32 -> vector<2x16x128xf32>
    %592 = vector.broadcast %213 : vector<1x16x1xf32> to vector<2x16x128xf32>
    %593 = arith.mulf %591, %592 : vector<2x16x128xf32>
    %594 = arith.addf %582, %593 : vector<2x16x128xf32>
    %595 = vector.broadcast %19 : f32 to vector<2x16x128xf32>
    %596 = arith.addf %594, %595 : vector<2x16x128xf32>
    %597 = arith.mulf %596, %596 : vector<2x16x128xf32>
    %598 = vector.shape_cast %596 : vector<2x16x128xf32> to vector<1x2x16x128xf32>
    %cst_81 = arith.constant dense<0.000000e+00> : vector<1xf32>
    %599 = vector.multi_reduction <add>, %598, %cst_81 [1, 2, 3] : vector<1x2x16x128xf32> to vector<1xf32>
    %600 = vector.shape_cast %599 : vector<1xf32> to vector<1x1x1x1xf32>
    %601 = vector.extract %600[0, 0, 0, 0] : f32 from vector<1x1x1x1xf32>
    %602 = vector.shape_cast %597 : vector<2x16x128xf32> to vector<1x2x16x128xf32>
    %cst_82 = arith.constant dense<0.000000e+00> : vector<1xf32>
    %603 = vector.multi_reduction <add>, %602, %cst_82 [1, 2, 3] : vector<1x2x16x128xf32> to vector<1xf32>
    %604 = vector.shape_cast %603 : vector<1xf32> to vector<1x1x1x1xf32>
    %605 = vector.extract %604[0, 0, 0, 0] : f32 from vector<1x1x1x1xf32>
    %cst_83 = arith.constant 2.44140625E-4 : f32
    %606 = arith.mulf %601, %cst_83 : f32
    %cst_84 = arith.constant 2.44140625E-4 : f32
    %607 = arith.mulf %605, %cst_84 : f32
    %608 = arith.mulf %606, %606 : f32
    %609 = arith.subf %607, %608 : f32
    %cst_85 = arith.constant 0.000000e+00 : f32
    %610 = arith.maximumf %609, %cst_85 : f32
    %611 = vector.broadcast %606 : f32 to vector<2x16x128xf32>
    %612 = arith.subf %596, %611 : vector<2x16x128xf32>
    %cst_86 = arith.constant 9.99999974E-6 : f32
    %613 = arith.addf %610, %cst_86 : f32
    %614 = math.rsqrt %613 : f32
    %615 = arith.mulf %20, %614 : f32
    %616 = vector.broadcast %615 : f32 to vector<2x16x128xf32>
    %617 = arith.mulf %612, %616 : vector<2x16x128xf32>
    %618 = vector.broadcast %21 : f32 to vector<2x16x128xf32>
    %619 = arith.addf %617, %618 : vector<2x16x128xf32>
    %cst_87 = arith.constant 0.000000e+00 : f32
    %620 = vector.broadcast %cst_87 : f32 to vector<2x16x128xf32>
    %621 = arith.maximumf %619, %620 : vector<2x16x128xf32>
    %622 = arith.addf %556, %621 : vector<2x16x128xf32>
    %c127_i32_88 = arith.constant 127 : i32
    %623 = tpu.dynamic_rotate %622 by %c127_i32_88 dim 2 : vector<2x16x128xf32>, i32 -> vector<2x16x128xf32>
    %624 = vector.broadcast %169 : vector<1x1x128xf32> to vector<2x16x128xf32>
    %625 = arith.mulf %623, %624 : vector<2x16x128xf32>
    %c1_i32_89 = arith.constant 1 : i32
    %626 = tpu.dynamic_rotate %622 by %c1_i32_89 dim 2 : vector<2x16x128xf32>, i32 -> vector<2x16x128xf32>
    %627 = vector.broadcast %158 : vector<1x1x128xf32> to vector<2x16x128xf32>
    %628 = arith.mulf %626, %627 : vector<2x16x128xf32>
    %629 = vector.broadcast %22 : f32 to vector<2x16x128xf32>
    %630 = arith.mulf %629, %628 : vector<2x16x128xf32>
    %631 = vector.broadcast %23 : f32 to vector<2x16x128xf32>
    %632 = arith.mulf %631, %622 : vector<2x16x128xf32>
    %633 = arith.addf %630, %632 : vector<2x16x128xf32>
    %634 = vector.broadcast %24 : f32 to vector<2x16x128xf32>
    %635 = arith.mulf %634, %625 : vector<2x16x128xf32>
    %636 = arith.addf %633, %635 : vector<2x16x128xf32>
    %c1_i32_90 = arith.constant 1 : i32
    %637 = tpu.dynamic_rotate %636 by %c1_i32_90 dim 1 : vector<2x16x128xf32>, i32 -> vector<2x16x128xf32>
    %638 = vector.broadcast %202 : vector<1x16x1xf32> to vector<2x16x128xf32>
    %639 = arith.mulf %637, %638 : vector<2x16x128xf32>
    %640 = vector.broadcast %25 : f32 to vector<2x16x128xf32>
    %641 = arith.mulf %640, %628 : vector<2x16x128xf32>
    %642 = vector.broadcast %26 : f32 to vector<2x16x128xf32>
    %643 = arith.mulf %642, %622 : vector<2x16x128xf32>
    %644 = arith.addf %641, %643 : vector<2x16x128xf32>
    %645 = vector.broadcast %27 : f32 to vector<2x16x128xf32>
    %646 = arith.mulf %645, %625 : vector<2x16x128xf32>
    %647 = arith.addf %644, %646 : vector<2x16x128xf32>
    %648 = arith.addf %639, %647 : vector<2x16x128xf32>
    %649 = vector.broadcast %28 : f32 to vector<2x16x128xf32>
    %650 = arith.mulf %649, %628 : vector<2x16x128xf32>
    %651 = vector.broadcast %29 : f32 to vector<2x16x128xf32>
    %652 = arith.mulf %651, %622 : vector<2x16x128xf32>
    %653 = arith.addf %650, %652 : vector<2x16x128xf32>
    %654 = vector.broadcast %30 : f32 to vector<2x16x128xf32>
    %655 = arith.mulf %654, %625 : vector<2x16x128xf32>
    %656 = arith.addf %653, %655 : vector<2x16x128xf32>
    %c15_i32_91 = arith.constant 15 : i32
    %657 = tpu.dynamic_rotate %656 by %c15_i32_91 dim 1 : vector<2x16x128xf32>, i32 -> vector<2x16x128xf32>
    %658 = vector.broadcast %213 : vector<1x16x1xf32> to vector<2x16x128xf32>
    %659 = arith.mulf %657, %658 : vector<2x16x128xf32>
    %660 = arith.addf %648, %659 : vector<2x16x128xf32>
    %661 = vector.broadcast %31 : f32 to vector<2x16x128xf32>
    %662 = arith.addf %660, %661 : vector<2x16x128xf32>
    %cst_92 = arith.constant 5.000000e-01 : f32
    %663 = vector.broadcast %cst_92 : f32 to vector<2x16x128xf32>
    %664 = arith.mulf %663, %662 : vector<2x16x128xf32>
    %665 = math.tanh %664 : vector<2x16x128xf32>
    %cst_93 = arith.constant 1.000000e+00 : f32
    %666 = vector.broadcast %cst_93 : f32 to vector<2x16x128xf32>
    %667 = arith.addf %665, %666 : vector<2x16x128xf32>
    %cst_94 = arith.constant 5.000000e-01 : f32
    %668 = vector.broadcast %cst_94 : f32 to vector<2x16x128xf32>
    %669 = arith.mulf %668, %667 : vector<2x16x128xf32>
    %c127_i32_95 = arith.constant 127 : i32
    %670 = tpu.dynamic_rotate %669 by %c127_i32_95 dim 2 : vector<2x16x128xf32>, i32 -> vector<2x16x128xf32>
    %671 = vector.broadcast %169 : vector<1x1x128xf32> to vector<2x16x128xf32>
    %672 = arith.mulf %670, %671 : vector<2x16x128xf32>
    %c1_i32_96 = arith.constant 1 : i32
    %673 = tpu.dynamic_rotate %669 by %c1_i32_96 dim 2 : vector<2x16x128xf32>, i32 -> vector<2x16x128xf32>
    %674 = vector.broadcast %158 : vector<1x1x128xf32> to vector<2x16x128xf32>
    %675 = arith.mulf %673, %674 : vector<2x16x128xf32>
    %676 = vector.broadcast %70 : f32 to vector<2x16x128xf32>
    %677 = arith.mulf %676, %675 : vector<2x16x128xf32>
    %678 = vector.broadcast %71 : f32 to vector<2x16x128xf32>
    %679 = arith.mulf %678, %669 : vector<2x16x128xf32>
    %680 = arith.addf %677, %679 : vector<2x16x128xf32>
    %681 = vector.broadcast %72 : f32 to vector<2x16x128xf32>
    %682 = arith.mulf %681, %672 : vector<2x16x128xf32>
    %683 = arith.addf %680, %682 : vector<2x16x128xf32>
    %c1_i32_97 = arith.constant 1 : i32
    %684 = tpu.dynamic_rotate %683 by %c1_i32_97 dim 1 : vector<2x16x128xf32>, i32 -> vector<2x16x128xf32>
    %685 = vector.broadcast %202 : vector<1x16x1xf32> to vector<2x16x128xf32>
    %686 = arith.mulf %684, %685 : vector<2x16x128xf32>
    %687 = vector.broadcast %73 : f32 to vector<2x16x128xf32>
    %688 = arith.mulf %687, %675 : vector<2x16x128xf32>
    %689 = vector.broadcast %74 : f32 to vector<2x16x128xf32>
    %690 = arith.mulf %689, %669 : vector<2x16x128xf32>
    %691 = arith.addf %688, %690 : vector<2x16x128xf32>
    %692 = vector.broadcast %75 : f32 to vector<2x16x128xf32>
    %693 = arith.mulf %692, %672 : vector<2x16x128xf32>
    %694 = arith.addf %691, %693 : vector<2x16x128xf32>
    %695 = arith.addf %686, %694 : vector<2x16x128xf32>
    %696 = vector.broadcast %76 : f32 to vector<2x16x128xf32>
    %697 = arith.mulf %696, %675 : vector<2x16x128xf32>
    %698 = vector.broadcast %77 : f32 to vector<2x16x128xf32>
    %699 = arith.mulf %698, %669 : vector<2x16x128xf32>
    %700 = arith.addf %697, %699 : vector<2x16x128xf32>
    %701 = vector.broadcast %78 : f32 to vector<2x16x128xf32>
    %702 = arith.mulf %701, %672 : vector<2x16x128xf32>
    %703 = arith.addf %700, %702 : vector<2x16x128xf32>
    %c15_i32_98 = arith.constant 15 : i32
    %704 = tpu.dynamic_rotate %703 by %c15_i32_98 dim 1 : vector<2x16x128xf32>, i32 -> vector<2x16x128xf32>
    %705 = vector.broadcast %213 : vector<1x16x1xf32> to vector<2x16x128xf32>
    %706 = arith.mulf %704, %705 : vector<2x16x128xf32>
    %707 = arith.addf %695, %706 : vector<2x16x128xf32>
    %c127_i32_99 = arith.constant 127 : i32
    %708 = tpu.dynamic_rotate %424 by %c127_i32_99 dim 2 : vector<2x16x128xf32>, i32 -> vector<2x16x128xf32>
    %709 = vector.broadcast %169 : vector<1x1x128xf32> to vector<2x16x128xf32>
    %710 = arith.mulf %708, %709 : vector<2x16x128xf32>
    %c1_i32_100 = arith.constant 1 : i32
    %711 = tpu.dynamic_rotate %424 by %c1_i32_100 dim 2 : vector<2x16x128xf32>, i32 -> vector<2x16x128xf32>
    %712 = vector.broadcast %158 : vector<1x1x128xf32> to vector<2x16x128xf32>
    %713 = arith.mulf %711, %712 : vector<2x16x128xf32>
    %714 = vector.broadcast %79 : f32 to vector<2x16x128xf32>
    %715 = arith.mulf %714, %713 : vector<2x16x128xf32>
    %716 = vector.broadcast %80 : f32 to vector<2x16x128xf32>
    %717 = arith.mulf %716, %424 : vector<2x16x128xf32>
    %718 = arith.addf %715, %717 : vector<2x16x128xf32>
    %719 = vector.broadcast %81 : f32 to vector<2x16x128xf32>
    %720 = arith.mulf %719, %710 : vector<2x16x128xf32>
    %721 = arith.addf %718, %720 : vector<2x16x128xf32>
    %c1_i32_101 = arith.constant 1 : i32
    %722 = tpu.dynamic_rotate %721 by %c1_i32_101 dim 1 : vector<2x16x128xf32>, i32 -> vector<2x16x128xf32>
    %723 = vector.broadcast %202 : vector<1x16x1xf32> to vector<2x16x128xf32>
    %724 = arith.mulf %722, %723 : vector<2x16x128xf32>
    %725 = vector.broadcast %82 : f32 to vector<2x16x128xf32>
    %726 = arith.mulf %725, %713 : vector<2x16x128xf32>
    %727 = vector.broadcast %83 : f32 to vector<2x16x128xf32>
    %728 = arith.mulf %727, %424 : vector<2x16x128xf32>
    %729 = arith.addf %726, %728 : vector<2x16x128xf32>
    %730 = vector.broadcast %84 : f32 to vector<2x16x128xf32>
    %731 = arith.mulf %730, %710 : vector<2x16x128xf32>
    %732 = arith.addf %729, %731 : vector<2x16x128xf32>
    %733 = arith.addf %724, %732 : vector<2x16x128xf32>
    %734 = vector.broadcast %85 : f32 to vector<2x16x128xf32>
    %735 = arith.mulf %734, %713 : vector<2x16x128xf32>
    %736 = vector.broadcast %86 : f32 to vector<2x16x128xf32>
    %737 = arith.mulf %736, %424 : vector<2x16x128xf32>
    %738 = arith.addf %735, %737 : vector<2x16x128xf32>
    %739 = vector.broadcast %87 : f32 to vector<2x16x128xf32>
    %740 = arith.mulf %739, %710 : vector<2x16x128xf32>
    %741 = arith.addf %738, %740 : vector<2x16x128xf32>
    %c15_i32_102 = arith.constant 15 : i32
    %742 = tpu.dynamic_rotate %741 by %c15_i32_102 dim 1 : vector<2x16x128xf32>, i32 -> vector<2x16x128xf32>
    %743 = vector.broadcast %213 : vector<1x16x1xf32> to vector<2x16x128xf32>
    %744 = arith.mulf %742, %743 : vector<2x16x128xf32>
    %745 = arith.addf %733, %744 : vector<2x16x128xf32>
    %746 = arith.addf %707, %745 : vector<2x16x128xf32>
    %747 = vector.broadcast %88 : f32 to vector<2x16x128xf32>
    %748 = arith.addf %746, %747 : vector<2x16x128xf32>
    %cst_103 = arith.constant 5.000000e-01 : f32
    %749 = vector.broadcast %cst_103 : f32 to vector<2x16x128xf32>
    %750 = arith.mulf %749, %748 : vector<2x16x128xf32>
    %751 = math.tanh %750 : vector<2x16x128xf32>
    %cst_104 = arith.constant 1.000000e+00 : f32
    %752 = vector.broadcast %cst_104 : f32 to vector<2x16x128xf32>
    %753 = arith.addf %751, %752 : vector<2x16x128xf32>
    %cst_105 = arith.constant 5.000000e-01 : f32
    %754 = vector.broadcast %cst_105 : f32 to vector<2x16x128xf32>
    %755 = arith.mulf %754, %753 : vector<2x16x128xf32>
    %756 = arith.addf %755, %229 : vector<2x16x128xf32>
    %cst_106 = arith.constant 5.000000e-01 : f32
    %757 = vector.broadcast %cst_106 : f32 to vector<2x16x128xf32>
    %758 = arith.mulf %757, %756 : vector<2x16x128xf32>
    %759 = math.tanh %758 : vector<2x16x128xf32>
    %cst_107 = arith.constant 1.000000e+00 : f32
    %760 = vector.broadcast %cst_107 : f32 to vector<2x16x128xf32>
    %761 = arith.addf %759, %760 : vector<2x16x128xf32>
    %cst_108 = arith.constant 5.000000e-01 : f32
    %762 = vector.broadcast %cst_108 : f32 to vector<2x16x128xf32>
    %763 = arith.mulf %762, %761 : vector<2x16x128xf32>
    %764 = tpu.reciprocal %763 {approx = true} : vector<2x16x128xf32> -> vector<2x16x128xf32>
    %765 = arith.mulf %228, %764 : vector<2x16x128xf32>
    %cst_109 = arith.constant 5.000000e-01 : f32
    %766 = vector.broadcast %cst_109 : f32 to vector<2x16x128xf32>
    %767 = arith.mulf %766, %765 : vector<2x16x128xf32>
    %768 = math.tanh %767 : vector<2x16x128xf32>
    %cst_110 = arith.constant 1.000000e+00 : f32
    %769 = vector.broadcast %cst_110 : f32 to vector<2x16x128xf32>
    %770 = arith.addf %768, %769 : vector<2x16x128xf32>
    %cst_111 = arith.constant 5.000000e-01 : f32
    %771 = vector.broadcast %cst_111 : f32 to vector<2x16x128xf32>
    %772 = arith.mulf %771, %770 : vector<2x16x128xf32>
    %c127_i32_112 = arith.constant 127 : i32
    %773 = tpu.dynamic_rotate %772 by %c127_i32_112 dim 2 : vector<2x16x128xf32>, i32 -> vector<2x16x128xf32>
    %774 = vector.broadcast %169 : vector<1x1x128xf32> to vector<2x16x128xf32>
    %775 = arith.mulf %773, %774 : vector<2x16x128xf32>
    %c1_i32_113 = arith.constant 1 : i32
    %776 = tpu.dynamic_rotate %772 by %c1_i32_113 dim 2 : vector<2x16x128xf32>, i32 -> vector<2x16x128xf32>
    %777 = vector.broadcast %158 : vector<1x1x128xf32> to vector<2x16x128xf32>
    %778 = arith.mulf %776, %777 : vector<2x16x128xf32>
    %779 = vector.broadcast %89 : f32 to vector<2x16x128xf32>
    %780 = arith.mulf %779, %778 : vector<2x16x128xf32>
    %781 = vector.broadcast %90 : f32 to vector<2x16x128xf32>
    %782 = arith.mulf %781, %772 : vector<2x16x128xf32>
    %783 = arith.addf %780, %782 : vector<2x16x128xf32>
    %784 = vector.broadcast %91 : f32 to vector<2x16x128xf32>
    %785 = arith.mulf %784, %775 : vector<2x16x128xf32>
    %786 = arith.addf %783, %785 : vector<2x16x128xf32>
    %c1_i32_114 = arith.constant 1 : i32
    %787 = tpu.dynamic_rotate %786 by %c1_i32_114 dim 1 : vector<2x16x128xf32>, i32 -> vector<2x16x128xf32>
    %788 = vector.broadcast %202 : vector<1x16x1xf32> to vector<2x16x128xf32>
    %789 = arith.mulf %787, %788 : vector<2x16x128xf32>
    %790 = vector.broadcast %92 : f32 to vector<2x16x128xf32>
    %791 = arith.mulf %790, %778 : vector<2x16x128xf32>
    %792 = vector.broadcast %93 : f32 to vector<2x16x128xf32>
    %793 = arith.mulf %792, %772 : vector<2x16x128xf32>
    %794 = arith.addf %791, %793 : vector<2x16x128xf32>
    %795 = vector.broadcast %94 : f32 to vector<2x16x128xf32>
    %796 = arith.mulf %795, %775 : vector<2x16x128xf32>
    %797 = arith.addf %794, %796 : vector<2x16x128xf32>
    %798 = arith.addf %789, %797 : vector<2x16x128xf32>
    %799 = vector.broadcast %95 : f32 to vector<2x16x128xf32>
    %800 = arith.mulf %799, %778 : vector<2x16x128xf32>
    %801 = vector.broadcast %96 : f32 to vector<2x16x128xf32>
    %802 = arith.mulf %801, %772 : vector<2x16x128xf32>
    %803 = arith.addf %800, %802 : vector<2x16x128xf32>
    %804 = vector.broadcast %97 : f32 to vector<2x16x128xf32>
    %805 = arith.mulf %804, %775 : vector<2x16x128xf32>
    %806 = arith.addf %803, %805 : vector<2x16x128xf32>
    %c15_i32_115 = arith.constant 15 : i32
    %807 = tpu.dynamic_rotate %806 by %c15_i32_115 dim 1 : vector<2x16x128xf32>, i32 -> vector<2x16x128xf32>
    %808 = vector.broadcast %213 : vector<1x16x1xf32> to vector<2x16x128xf32>
    %809 = arith.mulf %807, %808 : vector<2x16x128xf32>
    %810 = arith.addf %798, %809 : vector<2x16x128xf32>
    %811 = vector.broadcast %98 : f32 to vector<2x16x128xf32>
    %812 = arith.addf %810, %811 : vector<2x16x128xf32>
    %813 = arith.mulf %812, %812 : vector<2x16x128xf32>
    %814 = vector.shape_cast %812 : vector<2x16x128xf32> to vector<1x2x16x128xf32>
    %cst_116 = arith.constant dense<0.000000e+00> : vector<1xf32>
    %815 = vector.multi_reduction <add>, %814, %cst_116 [1, 2, 3] : vector<1x2x16x128xf32> to vector<1xf32>
    %816 = vector.shape_cast %815 : vector<1xf32> to vector<1x1x1x1xf32>
    %817 = vector.extract %816[0, 0, 0, 0] : f32 from vector<1x1x1x1xf32>
    %818 = vector.shape_cast %813 : vector<2x16x128xf32> to vector<1x2x16x128xf32>
    %cst_117 = arith.constant dense<0.000000e+00> : vector<1xf32>
    %819 = vector.multi_reduction <add>, %818, %cst_117 [1, 2, 3] : vector<1x2x16x128xf32> to vector<1xf32>
    %820 = vector.shape_cast %819 : vector<1xf32> to vector<1x1x1x1xf32>
    %821 = vector.extract %820[0, 0, 0, 0] : f32 from vector<1x1x1x1xf32>
    %cst_118 = arith.constant 2.44140625E-4 : f32
    %822 = arith.mulf %817, %cst_118 : f32
    %cst_119 = arith.constant 2.44140625E-4 : f32
    %823 = arith.mulf %821, %cst_119 : f32
    %824 = arith.mulf %822, %822 : f32
    %825 = arith.subf %823, %824 : f32
    %cst_120 = arith.constant 0.000000e+00 : f32
    %826 = arith.maximumf %825, %cst_120 : f32
    %827 = vector.broadcast %822 : f32 to vector<2x16x128xf32>
    %828 = arith.subf %812, %827 : vector<2x16x128xf32>
    %cst_121 = arith.constant 9.99999974E-6 : f32
    %829 = arith.addf %826, %cst_121 : f32
    %830 = math.rsqrt %829 : f32
    %831 = arith.mulf %99, %830 : f32
    %832 = vector.broadcast %831 : f32 to vector<2x16x128xf32>
    %833 = arith.mulf %828, %832 : vector<2x16x128xf32>
    %834 = vector.broadcast %100 : f32 to vector<2x16x128xf32>
    %835 = arith.addf %833, %834 : vector<2x16x128xf32>
    %cst_122 = arith.constant 0.000000e+00 : f32
    %836 = vector.broadcast %cst_122 : f32 to vector<2x16x128xf32>
    %837 = arith.maximumf %835, %836 : vector<2x16x128xf32>
    %c0_i32_123 = arith.constant 0 : i32
    %c127_i32_124 = arith.constant 127 : i32
    %838 = tpu.dynamic_rotate %837 by %c127_i32_124 dim 2 : vector<2x16x128xf32>, i32 -> vector<2x16x128xf32>
    %839 = vector.broadcast %169 : vector<1x1x128xf32> to vector<2x16x128xf32>
    %840 = arith.mulf %838, %839 : vector<2x16x128xf32>
    %c1_i32_125 = arith.constant 1 : i32
    %841 = tpu.dynamic_rotate %837 by %c1_i32_125 dim 2 : vector<2x16x128xf32>, i32 -> vector<2x16x128xf32>
    %842 = vector.broadcast %158 : vector<1x1x128xf32> to vector<2x16x128xf32>
    %843 = arith.mulf %841, %842 : vector<2x16x128xf32>
    %844 = vector.broadcast %101 : f32 to vector<2x16x128xf32>
    %845 = arith.mulf %844, %843 : vector<2x16x128xf32>
    %846 = vector.broadcast %102 : f32 to vector<2x16x128xf32>
    %847 = arith.mulf %846, %837 : vector<2x16x128xf32>
    %848 = arith.addf %845, %847 : vector<2x16x128xf32>
    %849 = vector.broadcast %103 : f32 to vector<2x16x128xf32>
    %850 = arith.mulf %849, %840 : vector<2x16x128xf32>
    %851 = arith.addf %848, %850 : vector<2x16x128xf32>
    %c1_i32_126 = arith.constant 1 : i32
    %852 = tpu.dynamic_rotate %851 by %c1_i32_126 dim 1 : vector<2x16x128xf32>, i32 -> vector<2x16x128xf32>
    %853 = vector.broadcast %202 : vector<1x16x1xf32> to vector<2x16x128xf32>
    %854 = arith.mulf %852, %853 : vector<2x16x128xf32>
    %855 = vector.broadcast %104 : f32 to vector<2x16x128xf32>
    %856 = arith.mulf %855, %843 : vector<2x16x128xf32>
    %857 = vector.broadcast %105 : f32 to vector<2x16x128xf32>
    %858 = arith.mulf %857, %837 : vector<2x16x128xf32>
    %859 = arith.addf %856, %858 : vector<2x16x128xf32>
    %860 = vector.broadcast %106 : f32 to vector<2x16x128xf32>
    %861 = arith.mulf %860, %840 : vector<2x16x128xf32>
    %862 = arith.addf %859, %861 : vector<2x16x128xf32>
    %863 = arith.addf %854, %862 : vector<2x16x128xf32>
    %864 = vector.broadcast %107 : f32 to vector<2x16x128xf32>
    %865 = arith.mulf %864, %843 : vector<2x16x128xf32>
    %866 = vector.broadcast %108 : f32 to vector<2x16x128xf32>
    %867 = arith.mulf %866, %837 : vector<2x16x128xf32>
    %868 = arith.addf %865, %867 : vector<2x16x128xf32>
    %869 = vector.broadcast %109 : f32 to vector<2x16x128xf32>
    %870 = arith.mulf %869, %840 : vector<2x16x128xf32>
    %871 = arith.addf %868, %870 : vector<2x16x128xf32>
    %c15_i32_127 = arith.constant 15 : i32
    %872 = tpu.dynamic_rotate %871 by %c15_i32_127 dim 1 : vector<2x16x128xf32>, i32 -> vector<2x16x128xf32>
    %873 = vector.broadcast %213 : vector<1x16x1xf32> to vector<2x16x128xf32>
    %874 = arith.mulf %872, %873 : vector<2x16x128xf32>
    %875 = arith.addf %863, %874 : vector<2x16x128xf32>
    %876 = vector.broadcast %110 : f32 to vector<2x16x128xf32>
    %877 = arith.addf %875, %876 : vector<2x16x128xf32>
    %878 = arith.mulf %877, %877 : vector<2x16x128xf32>
    %879 = vector.shape_cast %877 : vector<2x16x128xf32> to vector<1x2x16x128xf32>
    %cst_128 = arith.constant dense<0.000000e+00> : vector<1xf32>
    %880 = vector.multi_reduction <add>, %879, %cst_128 [1, 2, 3] : vector<1x2x16x128xf32> to vector<1xf32>
    %881 = vector.shape_cast %880 : vector<1xf32> to vector<1x1x1x1xf32>
    %882 = vector.extract %881[0, 0, 0, 0] : f32 from vector<1x1x1x1xf32>
    %883 = vector.shape_cast %878 : vector<2x16x128xf32> to vector<1x2x16x128xf32>
    %cst_129 = arith.constant dense<0.000000e+00> : vector<1xf32>
    %884 = vector.multi_reduction <add>, %883, %cst_129 [1, 2, 3] : vector<1x2x16x128xf32> to vector<1xf32>
    %885 = vector.shape_cast %884 : vector<1xf32> to vector<1x1x1x1xf32>
    %886 = vector.extract %885[0, 0, 0, 0] : f32 from vector<1x1x1x1xf32>
    %cst_130 = arith.constant 2.44140625E-4 : f32
    %887 = arith.mulf %882, %cst_130 : f32
    %cst_131 = arith.constant 2.44140625E-4 : f32
    %888 = arith.mulf %886, %cst_131 : f32
    %889 = arith.mulf %887, %887 : f32
    %890 = arith.subf %888, %889 : f32
    %cst_132 = arith.constant 0.000000e+00 : f32
    %891 = arith.maximumf %890, %cst_132 : f32
    %892 = vector.broadcast %887 : f32 to vector<2x16x128xf32>
    %893 = arith.subf %877, %892 : vector<2x16x128xf32>
    %cst_133 = arith.constant 9.99999974E-6 : f32
    %894 = arith.addf %891, %cst_133 : f32
    %895 = math.rsqrt %894 : f32
    %896 = arith.mulf %111, %895 : f32
    %897 = vector.broadcast %896 : f32 to vector<2x16x128xf32>
    %898 = arith.mulf %893, %897 : vector<2x16x128xf32>
    %899 = vector.broadcast %112 : f32 to vector<2x16x128xf32>
    %900 = arith.addf %898, %899 : vector<2x16x128xf32>
    %cst_134 = arith.constant 0.000000e+00 : f32
    %901 = vector.broadcast %cst_134 : f32 to vector<2x16x128xf32>
    %902 = arith.maximumf %900, %901 : vector<2x16x128xf32>
    %c127_i32_135 = arith.constant 127 : i32
    %903 = tpu.dynamic_rotate %902 by %c127_i32_135 dim 2 : vector<2x16x128xf32>, i32 -> vector<2x16x128xf32>
    %904 = vector.broadcast %169 : vector<1x1x128xf32> to vector<2x16x128xf32>
    %905 = arith.mulf %903, %904 : vector<2x16x128xf32>
    %c1_i32_136 = arith.constant 1 : i32
    %906 = tpu.dynamic_rotate %902 by %c1_i32_136 dim 2 : vector<2x16x128xf32>, i32 -> vector<2x16x128xf32>
    %907 = vector.broadcast %158 : vector<1x1x128xf32> to vector<2x16x128xf32>
    %908 = arith.mulf %906, %907 : vector<2x16x128xf32>
    %909 = vector.broadcast %113 : f32 to vector<2x16x128xf32>
    %910 = arith.mulf %909, %908 : vector<2x16x128xf32>
    %911 = vector.broadcast %114 : f32 to vector<2x16x128xf32>
    %912 = arith.mulf %911, %902 : vector<2x16x128xf32>
    %913 = arith.addf %910, %912 : vector<2x16x128xf32>
    %914 = vector.broadcast %115 : f32 to vector<2x16x128xf32>
    %915 = arith.mulf %914, %905 : vector<2x16x128xf32>
    %916 = arith.addf %913, %915 : vector<2x16x128xf32>
    %c1_i32_137 = arith.constant 1 : i32
    %917 = tpu.dynamic_rotate %916 by %c1_i32_137 dim 1 : vector<2x16x128xf32>, i32 -> vector<2x16x128xf32>
    %918 = vector.broadcast %202 : vector<1x16x1xf32> to vector<2x16x128xf32>
    %919 = arith.mulf %917, %918 : vector<2x16x128xf32>
    %920 = vector.broadcast %116 : f32 to vector<2x16x128xf32>
    %921 = arith.mulf %920, %908 : vector<2x16x128xf32>
    %922 = vector.broadcast %117 : f32 to vector<2x16x128xf32>
    %923 = arith.mulf %922, %902 : vector<2x16x128xf32>
    %924 = arith.addf %921, %923 : vector<2x16x128xf32>
    %925 = vector.broadcast %118 : f32 to vector<2x16x128xf32>
    %926 = arith.mulf %925, %905 : vector<2x16x128xf32>
    %927 = arith.addf %924, %926 : vector<2x16x128xf32>
    %928 = arith.addf %919, %927 : vector<2x16x128xf32>
    %929 = vector.broadcast %119 : f32 to vector<2x16x128xf32>
    %930 = arith.mulf %929, %908 : vector<2x16x128xf32>
    %931 = vector.broadcast %120 : f32 to vector<2x16x128xf32>
    %932 = arith.mulf %931, %902 : vector<2x16x128xf32>
    %933 = arith.addf %930, %932 : vector<2x16x128xf32>
    %934 = vector.broadcast %121 : f32 to vector<2x16x128xf32>
    %935 = arith.mulf %934, %905 : vector<2x16x128xf32>
    %936 = arith.addf %933, %935 : vector<2x16x128xf32>
    %c15_i32_138 = arith.constant 15 : i32
    %937 = tpu.dynamic_rotate %936 by %c15_i32_138 dim 1 : vector<2x16x128xf32>, i32 -> vector<2x16x128xf32>
    %938 = vector.broadcast %213 : vector<1x16x1xf32> to vector<2x16x128xf32>
    %939 = arith.mulf %937, %938 : vector<2x16x128xf32>
    %940 = arith.addf %928, %939 : vector<2x16x128xf32>
    %941 = vector.broadcast %122 : f32 to vector<2x16x128xf32>
    %942 = arith.addf %940, %941 : vector<2x16x128xf32>
    %943 = arith.mulf %942, %942 : vector<2x16x128xf32>
    %944 = vector.shape_cast %942 : vector<2x16x128xf32> to vector<1x2x16x128xf32>
    %cst_139 = arith.constant dense<0.000000e+00> : vector<1xf32>
    %945 = vector.multi_reduction <add>, %944, %cst_139 [1, 2, 3] : vector<1x2x16x128xf32> to vector<1xf32>
    %946 = vector.shape_cast %945 : vector<1xf32> to vector<1x1x1x1xf32>
    %947 = vector.extract %946[0, 0, 0, 0] : f32 from vector<1x1x1x1xf32>
    %948 = vector.shape_cast %943 : vector<2x16x128xf32> to vector<1x2x16x128xf32>
    %cst_140 = arith.constant dense<0.000000e+00> : vector<1xf32>
    %949 = vector.multi_reduction <add>, %948, %cst_140 [1, 2, 3] : vector<1x2x16x128xf32> to vector<1xf32>
    %950 = vector.shape_cast %949 : vector<1xf32> to vector<1x1x1x1xf32>
    %951 = vector.extract %950[0, 0, 0, 0] : f32 from vector<1x1x1x1xf32>
    %cst_141 = arith.constant 2.44140625E-4 : f32
    %952 = arith.mulf %947, %cst_141 : f32
    %cst_142 = arith.constant 2.44140625E-4 : f32
    %953 = arith.mulf %951, %cst_142 : f32
    %954 = arith.mulf %952, %952 : f32
    %955 = arith.subf %953, %954 : f32
    %cst_143 = arith.constant 0.000000e+00 : f32
    %956 = arith.maximumf %955, %cst_143 : f32
    %957 = vector.broadcast %952 : f32 to vector<2x16x128xf32>
    %958 = arith.subf %942, %957 : vector<2x16x128xf32>
    %cst_144 = arith.constant 9.99999974E-6 : f32
    %959 = arith.addf %956, %cst_144 : f32
    %960 = math.rsqrt %959 : f32
    %961 = arith.mulf %123, %960 : f32
    %962 = vector.broadcast %961 : f32 to vector<2x16x128xf32>
    %963 = arith.mulf %958, %962 : vector<2x16x128xf32>
    %964 = vector.broadcast %124 : f32 to vector<2x16x128xf32>
    %965 = arith.addf %963, %964 : vector<2x16x128xf32>
    %cst_145 = arith.constant 0.000000e+00 : f32
    %966 = vector.broadcast %cst_145 : f32 to vector<2x16x128xf32>
    %967 = arith.maximumf %965, %966 : vector<2x16x128xf32>
    %968 = arith.addf %837, %967 : vector<2x16x128xf32>
    %c1_i32_146 = arith.constant 1 : i32
    %c127_i32_147 = arith.constant 127 : i32
    %969 = tpu.dynamic_rotate %968 by %c127_i32_147 dim 2 : vector<2x16x128xf32>, i32 -> vector<2x16x128xf32>
    %970 = vector.broadcast %169 : vector<1x1x128xf32> to vector<2x16x128xf32>
    %971 = arith.mulf %969, %970 : vector<2x16x128xf32>
    %c1_i32_148 = arith.constant 1 : i32
    %972 = tpu.dynamic_rotate %968 by %c1_i32_148 dim 2 : vector<2x16x128xf32>, i32 -> vector<2x16x128xf32>
    %973 = vector.broadcast %158 : vector<1x1x128xf32> to vector<2x16x128xf32>
    %974 = arith.mulf %972, %973 : vector<2x16x128xf32>
    %975 = vector.broadcast %101 : f32 to vector<2x16x128xf32>
    %976 = arith.mulf %975, %974 : vector<2x16x128xf32>
    %977 = vector.broadcast %102 : f32 to vector<2x16x128xf32>
    %978 = arith.mulf %977, %968 : vector<2x16x128xf32>
    %979 = arith.addf %976, %978 : vector<2x16x128xf32>
    %980 = vector.broadcast %103 : f32 to vector<2x16x128xf32>
    %981 = arith.mulf %980, %971 : vector<2x16x128xf32>
    %982 = arith.addf %979, %981 : vector<2x16x128xf32>
    %c1_i32_149 = arith.constant 1 : i32
    %983 = tpu.dynamic_rotate %982 by %c1_i32_149 dim 1 : vector<2x16x128xf32>, i32 -> vector<2x16x128xf32>
    %984 = vector.broadcast %202 : vector<1x16x1xf32> to vector<2x16x128xf32>
    %985 = arith.mulf %983, %984 : vector<2x16x128xf32>
    %986 = vector.broadcast %104 : f32 to vector<2x16x128xf32>
    %987 = arith.mulf %986, %974 : vector<2x16x128xf32>
    %988 = vector.broadcast %105 : f32 to vector<2x16x128xf32>
    %989 = arith.mulf %988, %968 : vector<2x16x128xf32>
    %990 = arith.addf %987, %989 : vector<2x16x128xf32>
    %991 = vector.broadcast %106 : f32 to vector<2x16x128xf32>
    %992 = arith.mulf %991, %971 : vector<2x16x128xf32>
    %993 = arith.addf %990, %992 : vector<2x16x128xf32>
    %994 = arith.addf %985, %993 : vector<2x16x128xf32>
    %995 = vector.broadcast %107 : f32 to vector<2x16x128xf32>
    %996 = arith.mulf %995, %974 : vector<2x16x128xf32>
    %997 = vector.broadcast %108 : f32 to vector<2x16x128xf32>
    %998 = arith.mulf %997, %968 : vector<2x16x128xf32>
    %999 = arith.addf %996, %998 : vector<2x16x128xf32>
    %1000 = vector.broadcast %109 : f32 to vector<2x16x128xf32>
    %1001 = arith.mulf %1000, %971 : vector<2x16x128xf32>
    %1002 = arith.addf %999, %1001 : vector<2x16x128xf32>
    %c15_i32_150 = arith.constant 15 : i32
    %1003 = tpu.dynamic_rotate %1002 by %c15_i32_150 dim 1 : vector<2x16x128xf32>, i32 -> vector<2x16x128xf32>
    %1004 = vector.broadcast %213 : vector<1x16x1xf32> to vector<2x16x128xf32>
    %1005 = arith.mulf %1003, %1004 : vector<2x16x128xf32>
    %1006 = arith.addf %994, %1005 : vector<2x16x128xf32>
    %1007 = vector.broadcast %110 : f32 to vector<2x16x128xf32>
    %1008 = arith.addf %1006, %1007 : vector<2x16x128xf32>
    %1009 = arith.mulf %1008, %1008 : vector<2x16x128xf32>
    %1010 = vector.shape_cast %1008 : vector<2x16x128xf32> to vector<1x2x16x128xf32>
    %cst_151 = arith.constant dense<0.000000e+00> : vector<1xf32>
    %1011 = vector.multi_reduction <add>, %1010, %cst_151 [1, 2, 3] : vector<1x2x16x128xf32> to vector<1xf32>
    %1012 = vector.shape_cast %1011 : vector<1xf32> to vector<1x1x1x1xf32>
    %1013 = vector.extract %1012[0, 0, 0, 0] : f32 from vector<1x1x1x1xf32>
    %1014 = vector.shape_cast %1009 : vector<2x16x128xf32> to vector<1x2x16x128xf32>
    %cst_152 = arith.constant dense<0.000000e+00> : vector<1xf32>
    %1015 = vector.multi_reduction <add>, %1014, %cst_152 [1, 2, 3] : vector<1x2x16x128xf32> to vector<1xf32>
    %1016 = vector.shape_cast %1015 : vector<1xf32> to vector<1x1x1x1xf32>
    %1017 = vector.extract %1016[0, 0, 0, 0] : f32 from vector<1x1x1x1xf32>
    %cst_153 = arith.constant 2.44140625E-4 : f32
    %1018 = arith.mulf %1013, %cst_153 : f32
    %cst_154 = arith.constant 2.44140625E-4 : f32
    %1019 = arith.mulf %1017, %cst_154 : f32
    %1020 = arith.mulf %1018, %1018 : f32
    %1021 = arith.subf %1019, %1020 : f32
    %cst_155 = arith.constant 0.000000e+00 : f32
    %1022 = arith.maximumf %1021, %cst_155 : f32
    %1023 = vector.broadcast %1018 : f32 to vector<2x16x128xf32>
    %1024 = arith.subf %1008, %1023 : vector<2x16x128xf32>
    %cst_156 = arith.constant 9.99999974E-6 : f32
    %1025 = arith.addf %1022, %cst_156 : f32
    %1026 = math.rsqrt %1025 : f32
    %1027 = arith.mulf %111, %1026 : f32
    %1028 = vector.broadcast %1027 : f32 to vector<2x16x128xf32>
    %1029 = arith.mulf %1024, %1028 : vector<2x16x128xf32>
    %1030 = vector.broadcast %112 : f32 to vector<2x16x128xf32>
    %1031 = arith.addf %1029, %1030 : vector<2x16x128xf32>
    %cst_157 = arith.constant 0.000000e+00 : f32
    %1032 = vector.broadcast %cst_157 : f32 to vector<2x16x128xf32>
    %1033 = arith.maximumf %1031, %1032 : vector<2x16x128xf32>
    %c127_i32_158 = arith.constant 127 : i32
    %1034 = tpu.dynamic_rotate %1033 by %c127_i32_158 dim 2 : vector<2x16x128xf32>, i32 -> vector<2x16x128xf32>
    %1035 = vector.broadcast %169 : vector<1x1x128xf32> to vector<2x16x128xf32>
    %1036 = arith.mulf %1034, %1035 : vector<2x16x128xf32>
    %c1_i32_159 = arith.constant 1 : i32
    %1037 = tpu.dynamic_rotate %1033 by %c1_i32_159 dim 2 : vector<2x16x128xf32>, i32 -> vector<2x16x128xf32>
    %1038 = vector.broadcast %158 : vector<1x1x128xf32> to vector<2x16x128xf32>
    %1039 = arith.mulf %1037, %1038 : vector<2x16x128xf32>
    %1040 = vector.broadcast %113 : f32 to vector<2x16x128xf32>
    %1041 = arith.mulf %1040, %1039 : vector<2x16x128xf32>
    %1042 = vector.broadcast %114 : f32 to vector<2x16x128xf32>
    %1043 = arith.mulf %1042, %1033 : vector<2x16x128xf32>
    %1044 = arith.addf %1041, %1043 : vector<2x16x128xf32>
    %1045 = vector.broadcast %115 : f32 to vector<2x16x128xf32>
    %1046 = arith.mulf %1045, %1036 : vector<2x16x128xf32>
    %1047 = arith.addf %1044, %1046 : vector<2x16x128xf32>
    %c1_i32_160 = arith.constant 1 : i32
    %1048 = tpu.dynamic_rotate %1047 by %c1_i32_160 dim 1 : vector<2x16x128xf32>, i32 -> vector<2x16x128xf32>
    %1049 = vector.broadcast %202 : vector<1x16x1xf32> to vector<2x16x128xf32>
    %1050 = arith.mulf %1048, %1049 : vector<2x16x128xf32>
    %1051 = vector.broadcast %116 : f32 to vector<2x16x128xf32>
    %1052 = arith.mulf %1051, %1039 : vector<2x16x128xf32>
    %1053 = vector.broadcast %117 : f32 to vector<2x16x128xf32>
    %1054 = arith.mulf %1053, %1033 : vector<2x16x128xf32>
    %1055 = arith.addf %1052, %1054 : vector<2x16x128xf32>
    %1056 = vector.broadcast %118 : f32 to vector<2x16x128xf32>
    %1057 = arith.mulf %1056, %1036 : vector<2x16x128xf32>
    %1058 = arith.addf %1055, %1057 : vector<2x16x128xf32>
    %1059 = arith.addf %1050, %1058 : vector<2x16x128xf32>
    %1060 = vector.broadcast %119 : f32 to vector<2x16x128xf32>
    %1061 = arith.mulf %1060, %1039 : vector<2x16x128xf32>
    %1062 = vector.broadcast %120 : f32 to vector<2x16x128xf32>
    %1063 = arith.mulf %1062, %1033 : vector<2x16x128xf32>
    %1064 = arith.addf %1061, %1063 : vector<2x16x128xf32>
    %1065 = vector.broadcast %121 : f32 to vector<2x16x128xf32>
    %1066 = arith.mulf %1065, %1036 : vector<2x16x128xf32>
    %1067 = arith.addf %1064, %1066 : vector<2x16x128xf32>
    %c15_i32_161 = arith.constant 15 : i32
    %1068 = tpu.dynamic_rotate %1067 by %c15_i32_161 dim 1 : vector<2x16x128xf32>, i32 -> vector<2x16x128xf32>
    %1069 = vector.broadcast %213 : vector<1x16x1xf32> to vector<2x16x128xf32>
    %1070 = arith.mulf %1068, %1069 : vector<2x16x128xf32>
    %1071 = arith.addf %1059, %1070 : vector<2x16x128xf32>
    %1072 = vector.broadcast %122 : f32 to vector<2x16x128xf32>
    %1073 = arith.addf %1071, %1072 : vector<2x16x128xf32>
    %1074 = arith.mulf %1073, %1073 : vector<2x16x128xf32>
    %1075 = vector.shape_cast %1073 : vector<2x16x128xf32> to vector<1x2x16x128xf32>
    %cst_162 = arith.constant dense<0.000000e+00> : vector<1xf32>
    %1076 = vector.multi_reduction <add>, %1075, %cst_162 [1, 2, 3] : vector<1x2x16x128xf32> to vector<1xf32>
    %1077 = vector.shape_cast %1076 : vector<1xf32> to vector<1x1x1x1xf32>
    %1078 = vector.extract %1077[0, 0, 0, 0] : f32 from vector<1x1x1x1xf32>
    %1079 = vector.shape_cast %1074 : vector<2x16x128xf32> to vector<1x2x16x128xf32>
    %cst_163 = arith.constant dense<0.000000e+00> : vector<1xf32>
    %1080 = vector.multi_reduction <add>, %1079, %cst_163 [1, 2, 3] : vector<1x2x16x128xf32> to vector<1xf32>
    %1081 = vector.shape_cast %1080 : vector<1xf32> to vector<1x1x1x1xf32>
    %1082 = vector.extract %1081[0, 0, 0, 0] : f32 from vector<1x1x1x1xf32>
    %cst_164 = arith.constant 2.44140625E-4 : f32
    %1083 = arith.mulf %1078, %cst_164 : f32
    %cst_165 = arith.constant 2.44140625E-4 : f32
    %1084 = arith.mulf %1082, %cst_165 : f32
    %1085 = arith.mulf %1083, %1083 : f32
    %1086 = arith.subf %1084, %1085 : f32
    %cst_166 = arith.constant 0.000000e+00 : f32
    %1087 = arith.maximumf %1086, %cst_166 : f32
    %1088 = vector.broadcast %1083 : f32 to vector<2x16x128xf32>
    %1089 = arith.subf %1073, %1088 : vector<2x16x128xf32>
    %cst_167 = arith.constant 9.99999974E-6 : f32
    %1090 = arith.addf %1087, %cst_167 : f32
    %1091 = math.rsqrt %1090 : f32
    %1092 = arith.mulf %123, %1091 : f32
    %1093 = vector.broadcast %1092 : f32 to vector<2x16x128xf32>
    %1094 = arith.mulf %1089, %1093 : vector<2x16x128xf32>
    %1095 = vector.broadcast %124 : f32 to vector<2x16x128xf32>
    %1096 = arith.addf %1094, %1095 : vector<2x16x128xf32>
    %cst_168 = arith.constant 0.000000e+00 : f32
    %1097 = vector.broadcast %cst_168 : f32 to vector<2x16x128xf32>
    %1098 = arith.maximumf %1096, %1097 : vector<2x16x128xf32>
    %1099 = arith.addf %968, %1098 : vector<2x16x128xf32>
    %c2_i32_169 = arith.constant 2 : i32
    %c127_i32_170 = arith.constant 127 : i32
    %1100 = tpu.dynamic_rotate %1099 by %c127_i32_170 dim 2 : vector<2x16x128xf32>, i32 -> vector<2x16x128xf32>
    %1101 = vector.broadcast %169 : vector<1x1x128xf32> to vector<2x16x128xf32>
    %1102 = arith.mulf %1100, %1101 : vector<2x16x128xf32>
    %c1_i32_171 = arith.constant 1 : i32
    %1103 = tpu.dynamic_rotate %1099 by %c1_i32_171 dim 2 : vector<2x16x128xf32>, i32 -> vector<2x16x128xf32>
    %1104 = vector.broadcast %158 : vector<1x1x128xf32> to vector<2x16x128xf32>
    %1105 = arith.mulf %1103, %1104 : vector<2x16x128xf32>
    %1106 = vector.broadcast %101 : f32 to vector<2x16x128xf32>
    %1107 = arith.mulf %1106, %1105 : vector<2x16x128xf32>
    %1108 = vector.broadcast %102 : f32 to vector<2x16x128xf32>
    %1109 = arith.mulf %1108, %1099 : vector<2x16x128xf32>
    %1110 = arith.addf %1107, %1109 : vector<2x16x128xf32>
    %1111 = vector.broadcast %103 : f32 to vector<2x16x128xf32>
    %1112 = arith.mulf %1111, %1102 : vector<2x16x128xf32>
    %1113 = arith.addf %1110, %1112 : vector<2x16x128xf32>
    %c1_i32_172 = arith.constant 1 : i32
    %1114 = tpu.dynamic_rotate %1113 by %c1_i32_172 dim 1 : vector<2x16x128xf32>, i32 -> vector<2x16x128xf32>
    %1115 = vector.broadcast %202 : vector<1x16x1xf32> to vector<2x16x128xf32>
    %1116 = arith.mulf %1114, %1115 : vector<2x16x128xf32>
    %1117 = vector.broadcast %104 : f32 to vector<2x16x128xf32>
    %1118 = arith.mulf %1117, %1105 : vector<2x16x128xf32>
    %1119 = vector.broadcast %105 : f32 to vector<2x16x128xf32>
    %1120 = arith.mulf %1119, %1099 : vector<2x16x128xf32>
    %1121 = arith.addf %1118, %1120 : vector<2x16x128xf32>
    %1122 = vector.broadcast %106 : f32 to vector<2x16x128xf32>
    %1123 = arith.mulf %1122, %1102 : vector<2x16x128xf32>
    %1124 = arith.addf %1121, %1123 : vector<2x16x128xf32>
    %1125 = arith.addf %1116, %1124 : vector<2x16x128xf32>
    %1126 = vector.broadcast %107 : f32 to vector<2x16x128xf32>
    %1127 = arith.mulf %1126, %1105 : vector<2x16x128xf32>
    %1128 = vector.broadcast %108 : f32 to vector<2x16x128xf32>
    %1129 = arith.mulf %1128, %1099 : vector<2x16x128xf32>
    %1130 = arith.addf %1127, %1129 : vector<2x16x128xf32>
    %1131 = vector.broadcast %109 : f32 to vector<2x16x128xf32>
    %1132 = arith.mulf %1131, %1102 : vector<2x16x128xf32>
    %1133 = arith.addf %1130, %1132 : vector<2x16x128xf32>
    %c15_i32_173 = arith.constant 15 : i32
    %1134 = tpu.dynamic_rotate %1133 by %c15_i32_173 dim 1 : vector<2x16x128xf32>, i32 -> vector<2x16x128xf32>
    %1135 = vector.broadcast %213 : vector<1x16x1xf32> to vector<2x16x128xf32>
    %1136 = arith.mulf %1134, %1135 : vector<2x16x128xf32>
    %1137 = arith.addf %1125, %1136 : vector<2x16x128xf32>
    %1138 = vector.broadcast %110 : f32 to vector<2x16x128xf32>
    %1139 = arith.addf %1137, %1138 : vector<2x16x128xf32>
    %1140 = arith.mulf %1139, %1139 : vector<2x16x128xf32>
    %1141 = vector.shape_cast %1139 : vector<2x16x128xf32> to vector<1x2x16x128xf32>
    %cst_174 = arith.constant dense<0.000000e+00> : vector<1xf32>
    %1142 = vector.multi_reduction <add>, %1141, %cst_174 [1, 2, 3] : vector<1x2x16x128xf32> to vector<1xf32>
    %1143 = vector.shape_cast %1142 : vector<1xf32> to vector<1x1x1x1xf32>
    %1144 = vector.extract %1143[0, 0, 0, 0] : f32 from vector<1x1x1x1xf32>
    %1145 = vector.shape_cast %1140 : vector<2x16x128xf32> to vector<1x2x16x128xf32>
    %cst_175 = arith.constant dense<0.000000e+00> : vector<1xf32>
    %1146 = vector.multi_reduction <add>, %1145, %cst_175 [1, 2, 3] : vector<1x2x16x128xf32> to vector<1xf32>
    %1147 = vector.shape_cast %1146 : vector<1xf32> to vector<1x1x1x1xf32>
    %1148 = vector.extract %1147[0, 0, 0, 0] : f32 from vector<1x1x1x1xf32>
    %cst_176 = arith.constant 2.44140625E-4 : f32
    %1149 = arith.mulf %1144, %cst_176 : f32
    %cst_177 = arith.constant 2.44140625E-4 : f32
    %1150 = arith.mulf %1148, %cst_177 : f32
    %1151 = arith.mulf %1149, %1149 : f32
    %1152 = arith.subf %1150, %1151 : f32
    %cst_178 = arith.constant 0.000000e+00 : f32
    %1153 = arith.maximumf %1152, %cst_178 : f32
    %1154 = vector.broadcast %1149 : f32 to vector<2x16x128xf32>
    %1155 = arith.subf %1139, %1154 : vector<2x16x128xf32>
    %cst_179 = arith.constant 9.99999974E-6 : f32
    %1156 = arith.addf %1153, %cst_179 : f32
    %1157 = math.rsqrt %1156 : f32
    %1158 = arith.mulf %111, %1157 : f32
    %1159 = vector.broadcast %1158 : f32 to vector<2x16x128xf32>
    %1160 = arith.mulf %1155, %1159 : vector<2x16x128xf32>
    %1161 = vector.broadcast %112 : f32 to vector<2x16x128xf32>
    %1162 = arith.addf %1160, %1161 : vector<2x16x128xf32>
    %cst_180 = arith.constant 0.000000e+00 : f32
    %1163 = vector.broadcast %cst_180 : f32 to vector<2x16x128xf32>
    %1164 = arith.maximumf %1162, %1163 : vector<2x16x128xf32>
    %c127_i32_181 = arith.constant 127 : i32
    %1165 = tpu.dynamic_rotate %1164 by %c127_i32_181 dim 2 : vector<2x16x128xf32>, i32 -> vector<2x16x128xf32>
    %1166 = vector.broadcast %169 : vector<1x1x128xf32> to vector<2x16x128xf32>
    %1167 = arith.mulf %1165, %1166 : vector<2x16x128xf32>
    %c1_i32_182 = arith.constant 1 : i32
    %1168 = tpu.dynamic_rotate %1164 by %c1_i32_182 dim 2 : vector<2x16x128xf32>, i32 -> vector<2x16x128xf32>
    %1169 = vector.broadcast %158 : vector<1x1x128xf32> to vector<2x16x128xf32>
    %1170 = arith.mulf %1168, %1169 : vector<2x16x128xf32>
    %1171 = vector.broadcast %113 : f32 to vector<2x16x128xf32>
    %1172 = arith.mulf %1171, %1170 : vector<2x16x128xf32>
    %1173 = vector.broadcast %114 : f32 to vector<2x16x128xf32>
    %1174 = arith.mulf %1173, %1164 : vector<2x16x128xf32>
    %1175 = arith.addf %1172, %1174 : vector<2x16x128xf32>
    %1176 = vector.broadcast %115 : f32 to vector<2x16x128xf32>
    %1177 = arith.mulf %1176, %1167 : vector<2x16x128xf32>
    %1178 = arith.addf %1175, %1177 : vector<2x16x128xf32>
    %c1_i32_183 = arith.constant 1 : i32
    %1179 = tpu.dynamic_rotate %1178 by %c1_i32_183 dim 1 : vector<2x16x128xf32>, i32 -> vector<2x16x128xf32>
    %1180 = vector.broadcast %202 : vector<1x16x1xf32> to vector<2x16x128xf32>
    %1181 = arith.mulf %1179, %1180 : vector<2x16x128xf32>
    %1182 = vector.broadcast %116 : f32 to vector<2x16x128xf32>
    %1183 = arith.mulf %1182, %1170 : vector<2x16x128xf32>
    %1184 = vector.broadcast %117 : f32 to vector<2x16x128xf32>
    %1185 = arith.mulf %1184, %1164 : vector<2x16x128xf32>
    %1186 = arith.addf %1183, %1185 : vector<2x16x128xf32>
    %1187 = vector.broadcast %118 : f32 to vector<2x16x128xf32>
    %1188 = arith.mulf %1187, %1167 : vector<2x16x128xf32>
    %1189 = arith.addf %1186, %1188 : vector<2x16x128xf32>
    %1190 = arith.addf %1181, %1189 : vector<2x16x128xf32>
    %1191 = vector.broadcast %119 : f32 to vector<2x16x128xf32>
    %1192 = arith.mulf %1191, %1170 : vector<2x16x128xf32>
    %1193 = vector.broadcast %120 : f32 to vector<2x16x128xf32>
    %1194 = arith.mulf %1193, %1164 : vector<2x16x128xf32>
    %1195 = arith.addf %1192, %1194 : vector<2x16x128xf32>
    %1196 = vector.broadcast %121 : f32 to vector<2x16x128xf32>
    %1197 = arith.mulf %1196, %1167 : vector<2x16x128xf32>
    %1198 = arith.addf %1195, %1197 : vector<2x16x128xf32>
    %c15_i32_184 = arith.constant 15 : i32
    %1199 = tpu.dynamic_rotate %1198 by %c15_i32_184 dim 1 : vector<2x16x128xf32>, i32 -> vector<2x16x128xf32>
    %1200 = vector.broadcast %213 : vector<1x16x1xf32> to vector<2x16x128xf32>
    %1201 = arith.mulf %1199, %1200 : vector<2x16x128xf32>
    %1202 = arith.addf %1190, %1201 : vector<2x16x128xf32>
    %1203 = vector.broadcast %122 : f32 to vector<2x16x128xf32>
    %1204 = arith.addf %1202, %1203 : vector<2x16x128xf32>
    %1205 = arith.mulf %1204, %1204 : vector<2x16x128xf32>
    %1206 = vector.shape_cast %1204 : vector<2x16x128xf32> to vector<1x2x16x128xf32>
    %cst_185 = arith.constant dense<0.000000e+00> : vector<1xf32>
    %1207 = vector.multi_reduction <add>, %1206, %cst_185 [1, 2, 3] : vector<1x2x16x128xf32> to vector<1xf32>
    %1208 = vector.shape_cast %1207 : vector<1xf32> to vector<1x1x1x1xf32>
    %1209 = vector.extract %1208[0, 0, 0, 0] : f32 from vector<1x1x1x1xf32>
    %1210 = vector.shape_cast %1205 : vector<2x16x128xf32> to vector<1x2x16x128xf32>
    %cst_186 = arith.constant dense<0.000000e+00> : vector<1xf32>
    %1211 = vector.multi_reduction <add>, %1210, %cst_186 [1, 2, 3] : vector<1x2x16x128xf32> to vector<1xf32>
    %1212 = vector.shape_cast %1211 : vector<1xf32> to vector<1x1x1x1xf32>
    %1213 = vector.extract %1212[0, 0, 0, 0] : f32 from vector<1x1x1x1xf32>
    %cst_187 = arith.constant 2.44140625E-4 : f32
    %1214 = arith.mulf %1209, %cst_187 : f32
    %cst_188 = arith.constant 2.44140625E-4 : f32
    %1215 = arith.mulf %1213, %cst_188 : f32
    %1216 = arith.mulf %1214, %1214 : f32
    %1217 = arith.subf %1215, %1216 : f32
    %cst_189 = arith.constant 0.000000e+00 : f32
    %1218 = arith.maximumf %1217, %cst_189 : f32
    %1219 = vector.broadcast %1214 : f32 to vector<2x16x128xf32>
    %1220 = arith.subf %1204, %1219 : vector<2x16x128xf32>
    %cst_190 = arith.constant 9.99999974E-6 : f32
    %1221 = arith.addf %1218, %cst_190 : f32
    %1222 = math.rsqrt %1221 : f32
    %1223 = arith.mulf %123, %1222 : f32
    %1224 = vector.broadcast %1223 : f32 to vector<2x16x128xf32>
    %1225 = arith.mulf %1220, %1224 : vector<2x16x128xf32>
    %1226 = vector.broadcast %124 : f32 to vector<2x16x128xf32>
    %1227 = arith.addf %1225, %1226 : vector<2x16x128xf32>
    %cst_191 = arith.constant 0.000000e+00 : f32
    %1228 = vector.broadcast %cst_191 : f32 to vector<2x16x128xf32>
    %1229 = arith.maximumf %1227, %1228 : vector<2x16x128xf32>
    %1230 = arith.addf %1099, %1229 : vector<2x16x128xf32>
    %c127_i32_192 = arith.constant 127 : i32
    %1231 = tpu.dynamic_rotate %1230 by %c127_i32_192 dim 2 : vector<2x16x128xf32>, i32 -> vector<2x16x128xf32>
    %1232 = vector.broadcast %169 : vector<1x1x128xf32> to vector<2x16x128xf32>
    %1233 = arith.mulf %1231, %1232 : vector<2x16x128xf32>
    %c1_i32_193 = arith.constant 1 : i32
    %1234 = tpu.dynamic_rotate %1230 by %c1_i32_193 dim 2 : vector<2x16x128xf32>, i32 -> vector<2x16x128xf32>
    %1235 = vector.broadcast %158 : vector<1x1x128xf32> to vector<2x16x128xf32>
    %1236 = arith.mulf %1234, %1235 : vector<2x16x128xf32>
    %1237 = vector.broadcast %125 : f32 to vector<2x16x128xf32>
    %1238 = arith.mulf %1237, %1236 : vector<2x16x128xf32>
    %1239 = vector.broadcast %126 : f32 to vector<2x16x128xf32>
    %1240 = arith.mulf %1239, %1230 : vector<2x16x128xf32>
    %1241 = arith.addf %1238, %1240 : vector<2x16x128xf32>
    %1242 = vector.broadcast %127 : f32 to vector<2x16x128xf32>
    %1243 = arith.mulf %1242, %1233 : vector<2x16x128xf32>
    %1244 = arith.addf %1241, %1243 : vector<2x16x128xf32>
    %c1_i32_194 = arith.constant 1 : i32
    %1245 = tpu.dynamic_rotate %1244 by %c1_i32_194 dim 1 : vector<2x16x128xf32>, i32 -> vector<2x16x128xf32>
    %1246 = vector.broadcast %202 : vector<1x16x1xf32> to vector<2x16x128xf32>
    %1247 = arith.mulf %1245, %1246 : vector<2x16x128xf32>
    %1248 = vector.broadcast %128 : f32 to vector<2x16x128xf32>
    %1249 = arith.mulf %1248, %1236 : vector<2x16x128xf32>
    %1250 = vector.broadcast %129 : f32 to vector<2x16x128xf32>
    %1251 = arith.mulf %1250, %1230 : vector<2x16x128xf32>
    %1252 = arith.addf %1249, %1251 : vector<2x16x128xf32>
    %1253 = vector.broadcast %130 : f32 to vector<2x16x128xf32>
    %1254 = arith.mulf %1253, %1233 : vector<2x16x128xf32>
    %1255 = arith.addf %1252, %1254 : vector<2x16x128xf32>
    %1256 = arith.addf %1247, %1255 : vector<2x16x128xf32>
    %1257 = vector.broadcast %131 : f32 to vector<2x16x128xf32>
    %1258 = arith.mulf %1257, %1236 : vector<2x16x128xf32>
    %1259 = vector.broadcast %132 : f32 to vector<2x16x128xf32>
    %1260 = arith.mulf %1259, %1230 : vector<2x16x128xf32>
    %1261 = arith.addf %1258, %1260 : vector<2x16x128xf32>
    %1262 = vector.broadcast %133 : f32 to vector<2x16x128xf32>
    %1263 = arith.mulf %1262, %1233 : vector<2x16x128xf32>
    %1264 = arith.addf %1261, %1263 : vector<2x16x128xf32>
    %c15_i32_195 = arith.constant 15 : i32
    %1265 = tpu.dynamic_rotate %1264 by %c15_i32_195 dim 1 : vector<2x16x128xf32>, i32 -> vector<2x16x128xf32>
    %1266 = vector.broadcast %213 : vector<1x16x1xf32> to vector<2x16x128xf32>
    %1267 = arith.mulf %1265, %1266 : vector<2x16x128xf32>
    %1268 = arith.addf %1256, %1267 : vector<2x16x128xf32>
    %1269 = vector.broadcast %134 : f32 to vector<2x16x128xf32>
    %1270 = arith.addf %1268, %1269 : vector<2x16x128xf32>
    %cst_196 = arith.constant 5.000000e-01 : f32
    %1271 = vector.broadcast %cst_196 : f32 to vector<2x16x128xf32>
    %1272 = arith.mulf %1271, %1270 : vector<2x16x128xf32>
    %1273 = math.tanh %1272 : vector<2x16x128xf32>
    %cst_197 = arith.constant 1.000000e+00 : f32
    %1274 = vector.broadcast %cst_197 : f32 to vector<2x16x128xf32>
    %1275 = arith.addf %1273, %1274 : vector<2x16x128xf32>
    %cst_198 = arith.constant 5.000000e-01 : f32
    %1276 = vector.broadcast %cst_198 : f32 to vector<2x16x128xf32>
    %1277 = arith.mulf %1276, %1275 : vector<2x16x128xf32>
    %1278 = arith.subf %772, %1277 : vector<2x16x128xf32>
    %1279 = arith.addf %228, %1278 : vector<2x16x128xf32>
    %c0_199 = arith.constant 0 : index
    %c0_200 = arith.constant 0 : index
    %c0_201 = arith.constant 0 : index
    %1280 = vector.load %arg7[%c0_199, %c0_200, %c0_201] : memref<2x16x128xf32, #tpu.memory_space<vmem>>, vector<2x16x128xf32>
    tpu.vector_store %arg7[%c0_199, %c0_200, %c0_201], %1279 {strides = array<i32>} : memref<2x16x128xf32, #tpu.memory_space<vmem>>, vector<2x16x128xf32>,
    %c0_202 = arith.constant 0 : index
    %c0_203 = arith.constant 0 : index
    %c0_204 = arith.constant 0 : index
    %c0_205 = arith.constant 0 : index
    %1281 = vector.load %arg3[%c0_202, %c0_203, %c0_204, %c0_205] : memref<1x2x16x128xf32, #tpu.memory_space<vmem>>, vector<1x2x16x128xf32>
    %1282 = vector.shape_cast %1281 : vector<1x2x16x128xf32> to vector<2x16x128xf32>
    %1283 = vector.shape_cast %763 : vector<2x16x128xf32> to vector<1x2x16x128xf32>
    tpu.vector_store %arg3[%c0_202, %c0_203, %c0_204, %c0_205], %1283 {strides = array<i32>} : memref<1x2x16x128xf32, #tpu.memory_space<vmem>>, vector<1x2x16x128xf32>,
    %c0_206 = arith.constant 0 : index
    %c0_207 = arith.constant 0 : index
    %c0_208 = arith.constant 0 : index
    %c0_209 = arith.constant 0 : index
    %1284 = vector.load %arg4[%c0_206, %c0_207, %c0_208, %c0_209] : memref<1x2x16x128xf32, #tpu.memory_space<vmem>>, vector<1x2x16x128xf32>
    %1285 = vector.shape_cast %1284 : vector<1x2x16x128xf32> to vector<2x16x128xf32>
    %1286 = vector.shape_cast %772 : vector<2x16x128xf32> to vector<1x2x16x128xf32>
    tpu.vector_store %arg4[%c0_206, %c0_207, %c0_208, %c0_209], %1286 {strides = array<i32>} : memref<1x2x16x128xf32, #tpu.memory_space<vmem>>, vector<1x2x16x128xf32>,
    %1287 = math.absf %1278 : vector<2x16x128xf32>
    %c0_210 = arith.constant 0 : index
    %c0_211 = arith.constant 0 : index
    %c0_212 = arith.constant 0 : index
    %c0_213 = arith.constant 0 : index
    %1288 = vector.load %arg6[%c0_210, %c0_211, %c0_212, %c0_213] : memref<1x2x16x128xf32, #tpu.memory_space<vmem>>, vector<1x2x16x128xf32>
    %1289 = vector.shape_cast %1288 : vector<1x2x16x128xf32> to vector<2x16x128xf32>
    %1290 = vector.shape_cast %1287 : vector<2x16x128xf32> to vector<1x2x16x128xf32>
    tpu.vector_store %arg6[%c0_210, %c0_211, %c0_212, %c0_213], %1290 {strides = array<i32>} : memref<1x2x16x128xf32, #tpu.memory_space<vmem>>, vector<1x2x16x128xf32>,
    return
  }
  func.func @transform_0(%arg0: i32) -> i32 {
    %c0_i32 = arith.constant 0 : i32
    %c0_i32_0 = arith.constant 0 : i32
    return %c0_i32 : i32
  }
  func.func @transform_2(%arg0: i32) -> (i32, i32, i32, i32) {
    %c0_i32 = arith.constant 0 : i32
    %c0_i32_0 = arith.constant 0 : i32
    %c0_i32_1 = arith.constant 0 : i32
    %c0_i32_2 = arith.constant 0 : i32
    return %arg0, %c0_i32, %c0_i32_0, %c0_i32_1 : i32, i32, i32, i32
  }
  func.func @transform_3(%arg0: i32) -> (i32, i32, i32, i32) {
    %c0_i32 = arith.constant 0 : i32
    %c0_i32_0 = arith.constant 0 : i32
    %c0_i32_1 = arith.constant 0 : i32
    %c0_i32_2 = arith.constant 0 : i32
    return %arg0, %c0_i32, %c0_i32_0, %c0_i32_1 : i32, i32, i32, i32
  }
  func.func @transform_4(%arg0: i32) -> (i32, i32, i32, i32) {
    %c0_i32 = arith.constant 0 : i32
    %c0_i32_0 = arith.constant 0 : i32
    %c0_i32_1 = arith.constant 0 : i32
    %c0_i32_2 = arith.constant 0 : i32
    return %arg0, %c0_i32, %c0_i32_0, %c0_i32_1 : i32, i32, i32, i32
  }
  func.func @transform_5(%arg0: i32) -> (i32, i32, i32, i32) {
    %c0_i32 = arith.constant 0 : i32
    %c0_i32_0 = arith.constant 0 : i32
    %c0_i32_1 = arith.constant 0 : i32
    %c0_i32_2 = arith.constant 0 : i32
    return %arg0, %c0_i32, %c0_i32_0, %c0_i32_1 : i32, i32, i32, i32
  }
}

</mosaic_0001>

<bundles_post_ra>
// kernel: tpu_custom_call.1
= control target key start
LH: loop header
LB: loop body
LE: loop exit
PB: predicated region body
PF: predicated region fallthrough
CT: control target
= control target key end

     0   :  { %s7381_s0 = inlined_call_operand.hbm [shape: f32[135], index: 0, kind: input, shape index: {}]   ;;  %s7382_s1 = inlined_call_operand.hbm [shape: f32[2,16,128], index: 1, kind: input, shape index: {}]   ;;  %s7383_s2 = inlined_call_operand.hbm [shape: f32[3,2,16,128], index: 2, kind: output, shape index: {0}]   ;;  %s7384_s3 = inlined_call_operand.hbm [shape: f32[3,2,16,128], index: 3, kind: output, shape index: {1}]   ;;  %s7385_s4 = inlined_call_operand.hbm [shape: f32[3,2,16,128], index: 4, kind: output, shape index: {2}]   ;;  %s7386_s5 = inlined_call_operand.hbm [shape: f32[3,2,16,128], index: 5, kind: output, shape index: {3}]  }
   0x1   :  { %7456 = sst [smem:[#allocation204_spill]] %s7381_s0 }
   0x2   :  { %7457 = sst [smem:[#allocation205_spill]] %s7383_s2 }
   0x3   :  { %7458 = sst [smem:[#allocation206_spill]] %s7384_s3 }
   0x4   :  { %7459 = sst [smem:[#allocation207_spill]] %s7385_s4 }
   0x5   :  { %7460 = sst [smem:[#allocation208_spill]] %s7386_s5 }
   0x6   :  { %11 = vsyncpa [#allocation6], 0 }
   0x7   :  { %12 = vsyncpa [#allocation5], 0 }
   0x8   :  { %14 = vsyncpa [#allocation5 + $0x1], 0 }
   0x9   :  { %15 = vsyncpa [#allocation9], 0 }
   0xa   :  { %17 = vsyncpa [#allocation9 + $0x1], 0 }
   0xb   :  { %18 = vsyncpa [#allocation12], 0 }
   0xc   :  { %20 = vsyncpa [#allocation12 + $0x1], 0  ;;  %s4396_s18 = smov 0   ;;  %s4398_s19 = smov 0  }
   0xd   :  { %s4400_s20 = smov 0   ;;  %s4402_s21 = smov 0  }
   0xe LB: > { %7461 = sst [smem:[#allocation23_spill]] %s4338_s18  ;;  %s4417_s22 = sadd.s32 4294967295, %s4350_s21   ;;  %s4350_s21 = sphi %s4402_s21, %s7847_s21   ;;  %s4346_s20 = sphi %s4400_s20, %s7850_s20   ;;  %s4342_s19 = sphi %s4398_s19, %s7849_s19   ;;  %s4338_s18 = sphi %s4396_s18, %s7848_s18  }
   0xf   : > { %7462 = sst [smem:[#allocation24_spill]] %s4342_s19  ;;  %s7387_s23 = sadd.s32 4294967294, %s4350_s21  }
  0x10   : > { %7463 = sst [smem:[#allocation25_spill]] %s4346_s20  ;;  %s4421_s24 = sadd.s32 1, %s4350_s21  }
  0x11   : > { %7464 = sst [smem:[#allocation26_spill]] %s4350_s21  ;;  %s54_s25 = sadd.s32 1, %s4346_s20 }
  0x12   : > { %7465 = sst [smem:[#allocation27_spill]] %s4421_s24  ;;  %s51_s26 = ssub.s32 %s4350_s21, %s4421_s24 }
  0x13   : > { %p64_p0 = scmp.ne.s32.totalorder %s4346_s20, %s4342_s19  ;;  %p52_p1 = scmp.eq.s32.totalorder %s51_s26, 0 }
  0x14   : > { %p65_p2 = scmp.eq.s32.totalorder %s4417_s22, 2  ;;  %p70_p3 = scmp.ne.s32.totalorder %s4342_s19, %s4338_s18 }
  0x15   : > { %p71_p4 = scmp.eq.s32.totalorder %s7387_s23, 2  ;;  %p3764_p7 = scmp.ge.s32.totalorder %s4350_s21, 1 }
  0x16   : > { %s4434_s27 = scalar_select %p52_p1, %s4346_s20, %s54_s25  }
  0x17   : > { %p4436_p5 = por %p65_p2, %p64_p0  ;;  %p4440_p6 = por %p71_p4, %p70_p3 }
  0x18   : > { %7466 = sst [smem:[#allocation28_spill]] %s4434_s27  ;;  %p156_p8 = scmp.lt.s32.totalorder %s4350_s21, 4 }
  0x19   : > { %s7467_s28 = scalar_select %p4436_p5, 1, 0 }
  0x1a   : > { %s7469_s29 = scalar_select %p4440_p6, 1, 0 }
  0x1b   : > { %7468 = sst [smem:[#allocation29_spill]] %s7467_s28  ;;  %p3765_p9 = scmp.ne.s32.totalorder %s4417_s22, 0 }
  0x1c   : > { %7470 = sst [smem:[#allocation30_spill]] %s7469_s29  ;;  %p4447_p10 = pnand %p3764_p7, %p156_p8 }
  0x1d   : > { %p4022_p11 = scmp.eq.s32.totalorder %s4417_s22, 0  ;;  %s7472_s0 = sld [smem:[#allocation204_spill]] }
  0x1e   : > { %p4005_p12 = pneg %p4447_p10 }
  0x20   : > { %p4006_p13 = pnand %p4022_p11, %p4005_p12 }
  0x22   : > { %p4157_p1 = pneg %p4006_p13 }
  0x23   : > { %s4155_s8 = scalar_lea.hbm %s7472_s0, 32 }
  0x24   : > { %p4156_p0 = scmp.ne.s32.totalorder %s7472_s0, %s4155_s8  ;;  %p4162_p4 = scmp.lt.u32.totalorder %s4155_s8, %s7472_s0 }
  0x26   : > { %p4158_p2 = pnand %p4157_p1, %p4156_p0 }
  0x28   : > { %p4159_p3 = pneg %p4158_p2 }
  0x2a   : > { %p4164_p7 = pnand %p4162_p4, %p4159_p3 }
  0x2c   : > { %4167 = shalt.err (!%p4164_p7)
}
  0x2d   : > { %s4352_s13 = smov [#allocation4]   ;;  %180 = sbr.rel (%p4447_p10) target bundleno = 5302 (0x14b6), region = 24 }
  0x2e   : > { %4008 = dma.hbm_to_smem (!%p4006_p13), %s7472_s0, 32, %s4352_s13, [#allocation6]  }
  0x34   : > { %4319 = dma.done.wait (%p4022_p11), [#allocation6], 32  }
  0x35   : > { %4321 = vsyncadd (%p4022_p11), [#allocation6], 4294967264 }
  0x36   : > { %186 = sfence }
  0x37   : > { %s4475_s16 = sand.u32 1, %s4342_s19   ;;  %s4477_s17 = sld [smem:[#allocation4]]  ;;  %v352_v0 = vlaneseq  ;;  %v4353_v8 = vmov 0.0  }
  0x38   : > { %7473 = sst [smem:[#allocation31_spill]] %s4475_s16  ;;  %s4480_s25 = sshll.u32 %s4475_s16, 5 }
  0x39   : > { %s4482_s26 = sld [smem:[#allocation4 + $0x1]]  ;;  %v353_v1 = vand.u32 127, %v352_v0  ;;  %v4484_v2 = vshrl.u32 %v352_v0, 7  ;;  %s4486_s30 = sld [smem:[#allocation4 + $0x2]] }
  0x3a   : > { %s4488_s6 = sld [smem:[#allocation4 + $0x3]]  ;;  %s4491_s7 = sld [smem:[#allocation4 + $0x4]] }
  0x3b   : > { %7474 = vst [vmem:[#allocation32_spill] sm:$0xff] %v4484_v2  ;;  %v356_v3 = vadd.s32 8, %v4484_v2  ;;  %v357_v4 = vadd.s32 4294967294, %v353_v1  ;;  %s4493_s8 = sld [smem:[#allocation4 + $0x5]]  ;;  %v363_v5 = vadd.s32 4294967295, %v353_v1  ;;  %v369_v6 = vadd.s32 1, %v353_v1 }
  0x3c   : > { %s4495_s9 = sld [smem:[#allocation4 + $0x6]]  ;;  %s4497_s10 = sld [smem:[#allocation4 + $0x7]]  ;;  %v375_v7 = vadd.s32 2, %v353_v1  ;;  %v381_v13 = vadd.s32 4294967294, %v4484_v2  ;;  %v393_v14 = vadd.s32 4294967295, %v4484_v2 }
  0x3d   : > { %vm358_vm0 = vcmp.ge.s32.totalorder %v357_v4, 0  ;;  %s4499_s11 = sld [smem:[#allocation4 + $0x8]]  ;;  %s4501_s12 = sld [smem:[#allocation4 + $0x9]]  ;;  %vm364_vm1 = vcmp.ge.s32.totalorder %v363_v5, 0  ;;  %vm371_vm2 = vcmp.lt.s32.totalorder %v369_v6, 128  ;;  %v406_v15 = vadd.s32 1, %v356_v3 }
  0x3e   : > { %v4503_v9 = vsel %vm358_vm0, 1.0, %v4353_v8  ;;  %s4505_s13 = sld [smem:[#allocation4 + $0xa]]  ;;  %s4507_s14 = sld [smem:[#allocation4 + $0xb]]  ;;  %v4509_v10 = vsel %vm364_vm1, 1.0, %v4353_v8  ;;  %v4515_v11 = vsel %vm371_vm2, 1.0, %v4353_v8  ;;  %vm377_vm3 = vcmp.lt.s32.totalorder %v375_v7, 128 }
  0x3f   : > { %7475 = vst [vmem:[#allocation33_spill] sm:$0xff] %v4503_v9  ;;  %7478 = vst [vmem:[#allocation36_spill] sm:$0xff] %v4509_v10  ;;  %s4511_s15 = sld [smem:[#allocation4 + $0xc]]  ;;  %s4513_s23 = sld [smem:[#allocation4 + $0xd]]  ;;  %v4521_v12 = vsel %vm377_vm3, 1.0, %v4353_v8  ;;  %vm383_vm4 = vcmp.ge.s32.totalorder %v381_v13, 0 }
  0x40   : > { %7481 = vst [vmem:[#allocation39_spill] sm:$0xff] %v4515_v11  ;;  %s4517_s0 = sld [smem:[#allocation4 + $0xe]]  ;;  %s4519_s27 = sld [smem:[#allocation4 + $0xf]]  ;;  %7484 = vst [vmem:[#allocation42_spill] sm:$0xff] %v4521_v12  ;;  %v418_v16 = vadd.s32 2, %v356_v3  ;;  %v4537_v17 = vsel %vm383_vm4, 1.0, %v4353_v8 }
  0x41   : > { %s4524_s20 = sld [smem:[#allocation4 + $0x10]]  ;;  %s4526_s19 = sld [smem:[#allocation4 + $0x11]]  ;;  %7491 = vst [vmem:[#allocation49_spill] sm:$0xff] %v4537_v17  ;;  %vm395_vm5 = vcmp.ge.s32.totalorder %v393_v14, 0  ;;  %vm410_vm6 = vcmp.lt.s32.totalorder %v406_v15, 16 }
  0x42   : > { %s4529_s24 = sld [smem:[#allocation4 + $0x12]]  ;;  %s4531_s29 = sld [smem:[#allocation4 + $0x13]]  ;;  %v4543_v18 = vsel %vm395_vm5, 1.0, %v4353_v8  ;;  %v4549_v19 = vsel %vm410_vm6, 1.0, %v4353_v8  ;;  %vm422_vm7 = vcmp.lt.s32.totalorder %v418_v16, 16 }
  0x43   : > { %s4533_s18 = sld [smem:[#allocation4 + $0x14]]  ;;  %s4535_s21 = sld [smem:[#allocation4 + $0x15]]  ;;  %7494 = vst [vmem:[#allocation52_spill] sm:$0xff] %v4543_v18  ;;  %7497 = vst [vmem:[#allocation55_spill] sm:$0xff] %v4549_v19  ;;  %v4555_v20 = vsel %vm422_vm7, 1.0, %v4353_v8 }
  0x44   : > { %7476 = sst [smem:[#allocation34_spill]] %s4505_s13  ;;  %s4539_s5 = sld [smem:[#allocation4 + $0x16]]  ;;  %7500 = vst [vmem:[#allocation58_spill] sm:$0xff] %v4555_v20 }
  0x45   : > { %7477 = sst [smem:[#allocation35_spill]] %s4507_s14  ;;  %s4541_s4 = sld [smem:[#allocation4 + $0x17]] }
  0x46   : > { %7479 = sst [smem:[#allocation37_spill]] %s4511_s15  ;;  %s4545_s16 = sld [smem:[#allocation4 + $0x18]] }
  0x47   : > { %7480 = sst [smem:[#allocation38_spill]] %s4513_s23  ;;  %s4547_s2 = sld [smem:[#allocation4 + $0x19]] }
  0x48   : > { %7482 = sst [smem:[#allocation40_spill]] %s4517_s0  ;;  %s4551_s3 = sld [smem:[#allocation4 + $0x1a]] }
  0x49   : > { %7483 = sst [smem:[#allocation41_spill]] %s4519_s27  ;;  %s4553_s28 = sld [smem:[#allocation4 + $0x1b]] }
  0x4a   : > { %7485 = sst [smem:[#allocation43_spill]] %s4524_s20  ;;  %s4577_s27 = sld [smem:[#allocation4 + $0x26]] }
  0x4b   : > { %7486 = sst [smem:[#allocation44_spill]] %s4526_s19  ;;  %s4641_s15 = sld [smem:[#allocation4 + $0x46]] }
  0x4c   : > { %7487 = sst [smem:[#allocation45_spill]] %s4529_s24  ;;  %s4571_s24 = sld [smem:[#allocation4 + $0x23]] }
  0x4d   : > { %7488 = sst [smem:[#allocation46_spill]] %s4531_s29  ;;  %s4643_s20 = sld [smem:[#allocation4 + $0x47]] }
  0x4e   : > { %7489 = sst [smem:[#allocation47_spill]] %s4533_s18  ;;  %s4563_s18 = sld [smem:[#allocation4 + $0x1f]] }
  0x4f   : > { %7490 = sst [smem:[#allocation48_spill]] %s4535_s21  ;;  %s4569_s29 = sld [smem:[#allocation4 + $0x22]] }
  0x50   : > { %7492 = sst [smem:[#allocation50_spill]] %s4539_s5  ;;  %s4557_s21 = sld [smem:[#allocation4 + $0x1c]] }
  0x51   : > { %7493 = sst [smem:[#allocation51_spill]] %s4541_s4  ;;  %s4559_s5 = sld [smem:[#allocation4 + $0x1d]] }
  0x52   : > { %7495 = sst [smem:[#allocation53_spill]] %s4545_s16  ;;  %s4561_s4 = sld [smem:[#allocation4 + $0x1e]] }
  0x53   : > { %7496 = sst [smem:[#allocation54_spill]] %s4547_s2  ;;  %s4567_s2 = sld [smem:[#allocation4 + $0x21]] }
  0x54   : > { %7498 = sst [smem:[#allocation56_spill]] %s4551_s3  ;;  %s4565_s16 = sld [smem:[#allocation4 + $0x20]] }
  0x55   : > { %7499 = sst [smem:[#allocation57_spill]] %s4553_s28  ;;  %s4573_s3 = sld [smem:[#allocation4 + $0x24]] }
  0x56   : > { %7501 = sst [smem:[#allocation59_spill]] %s4557_s21  ;;  %s4575_s28 = sld [smem:[#allocation4 + $0x25]] }
  0x57   : > { %7502 = sst [smem:[#allocation60_spill]] %s4559_s5  ;;  %s4579_s21 = sld [smem:[#allocation4 + $0x27]] }
  0x58   : > { %7503 = sst [smem:[#allocation61_spill]] %s4561_s4  ;;  %s4581_s5 = sld [smem:[#allocation4 + $0x28]] }
  0x59   : > { %7504 = sst [smem:[#allocation62_spill]] %s4563_s18  ;;  %s4583_s4 = sld [smem:[#allocation4 + $0x29]] }
  0x5a   : > { %7505 = sst [smem:[#allocation63_spill]] %s4565_s16  ;;  %s4585_s18 = sld [smem:[#allocation4 + $0x2a]] }
  0x5b   : > { %7506 = sst [smem:[#allocation64_spill]] %s4567_s2  ;;  %s4587_s16 = sld [smem:[#allocation4 + $0x2b]] }
  0x5c   : > { %7507 = sst [smem:[#allocation65_spill]] %s4569_s29  ;;  %s4589_s2 = sld [smem:[#allocation4 + $0x2c]] }
  0x5d   : > { %7508 = sst [smem:[#allocation66_spill]] %s4571_s24  ;;  %s4591_s29 = sld [smem:[#allocation4 + $0x2d]] }
  0x5e   : > { %7509 = sst [smem:[#allocation67_spill]] %s4573_s3  ;;  %s4593_s24 = sld [smem:[#allocation4 + $0x2e]] }
  0x5f   : > { %7510 = sst [smem:[#allocation68_spill]] %s4575_s28  ;;  %s4595_s3 = sld [smem:[#allocation4 + $0x2f]] }
  0x60   : > { %7511 = sst [smem:[#allocation69_spill]] %s4577_s27  ;;  %s4597_s28 = sld [smem:[#allocation4 + $0x30]] }
  0x61   : > { %7512 = sst [smem:[#allocation70_spill]] %s4579_s21  ;;  %s4599_s27 = sld [smem:[#allocation4 + $0x31]] }
  0x62   : > { %7513 = sst [smem:[#allocation71_spill]] %s4581_s5  ;;  %s4601_s21 = sld [smem:[#allocation4 + $0x32]] }
  0x63   : > { %7514 = sst [smem:[#allocation72_spill]] %s4583_s4  ;;  %s4603_s5 = sld [smem:[#allocation4 + $0x33]] }
  0x64   : > { %7515 = sst [smem:[#allocation73_spill]] %s4585_s18  ;;  %s4605_s4 = sld [smem:[#allocation4 + $0x34]] }
  0x65   : > { %7516 = sst [smem:[#allocation74_spill]] %s4587_s16  ;;  %s4607_s18 = sld [smem:[#allocation4 + $0x35]] }
  0x66   : > { %7517 = sst [smem:[#allocation75_spill]] %s4589_s2  ;;  %s4609_s16 = sld [smem:[#allocation4 + $0x36]] }
  0x67   : > { %7518 = sst [smem:[#allocation76_spill]] %s4591_s29  ;;  %s4611_s2 = sld [smem:[#allocation4 + $0x37]] }
  0x68   : > { %7519 = sst [smem:[#allocation77_spill]] %s4593_s24  ;;  %s4613_s29 = sld [smem:[#allocation4 + $0x38]] }
  0x69   : > { %7520 = sst [smem:[#allocation78_spill]] %s4595_s3  ;;  %s4615_s24 = sld [smem:[#allocation4 + $0x39]] }
  0x6a   : > { %7521 = sst [smem:[#allocation79_spill]] %s4597_s28  ;;  %s4617_s3 = sld [smem:[#allocation4 + $0x44]] }
  0x6b   : > { %7522 = sst [smem:[#allocation80_spill]] %s4599_s27  ;;  %s4619_s28 = sld [smem:[#allocation4 + $0x3a]] }
  0x6c   : > { %7523 = sst [smem:[#allocation81_spill]] %s4601_s21  ;;  %s4621_s27 = sld [smem:[#allocation4 + $0x3b]] }
  0x6d   : > { %7524 = sst [smem:[#allocation82_spill]] %s4603_s5  ;;  %s4623_s21 = sld [smem:[#allocation4 + $0x3c]] }
  0x6e   : > { %7525 = sst [smem:[#allocation83_spill]] %s4605_s4  ;;  %s4625_s5 = sld [smem:[#allocation4 + $0x3d]] }
  0x6f   : > { %7526 = sst [smem:[#allocation84_spill]] %s4607_s18  ;;  %s4627_s4 = sld [smem:[#allocation4 + $0x3e]] }
  0x70   : > { %7527 = sst [smem:[#allocation85_spill]] %s4609_s16  ;;  %s4629_s18 = sld [smem:[#allocation4 + $0x3f]] }
  0x71   : > { %7528 = sst [smem:[#allocation86_spill]] %s4611_s2  ;;  %s4631_s16 = sld [smem:[#allocation4 + $0x40]] }
  0x72   : > { %7529 = sst [smem:[#allocation87_spill]] %s4613_s29  ;;  %s4633_s2 = sld [smem:[#allocation4 + $0x41]] }
  0x73   : > { %7530 = sst [smem:[#allocation88_spill]] %s4615_s24  ;;  %s4635_s29 = sld [smem:[#allocation4 + $0x42]] }
  0x74   : > { %7531 = sst [smem:[#allocation89_spill]] %s4617_s3  ;;  %s4637_s24 = sld [smem:[#allocation4 + $0x43]] }
  0x75   : > { %s4639_s3 = sld [smem:[#allocation4 + $0x45]]  ;;  %7536 = sst [smem:[#allocation94_spill]] %s4641_s15 }
  0x76   : > { %7537 = sst [smem:[#allocation95_spill]] %s4643_s20  ;;  %s4645_s23 = sld [smem:[#allocation4 + $0x48]] }
  0x77   : > { %7532 = sst [smem:[#allocation90_spill]] %s4631_s16  ;;  %s4647_s19 = sld [smem:[#allocation4 + $0x49]] }
  0x78   : > { %s4649_s0 = sld [smem:[#allocation4 + $0x4a]]  ;;  %s4651_s14 = sld [smem:[#allocation4 + $0x4b]] }
  0x79   : > { %7533 = sst [smem:[#allocation91_spill]] %s4635_s29  ;;  %s4653_s13 = sld [smem:[#allocation4 + $0x4c]] }
  0x7a   : > { %7534 = sst [smem:[#allocation92_spill]] %s4637_s24  ;;  %s4655_s16 = sld [smem:[#allocation4 + $0x4d]] }
  0x7b   : > { %7535 = sst [smem:[#allocation93_spill]] %s4639_s3  ;;  %s4657_s29 = sld [smem:[#allocation4 + $0x4e]] }
  0x7c   : > { %7538 = sst [smem:[#allocation96_spill]] %s4645_s23  ;;  %s4659_s24 = sld [smem:[#allocation4 + $0x4f]] }
  0x7d   : > { %7539 = sst [smem:[#allocation97_spill]] %s4647_s19  ;;  %s4661_s3 = sld [smem:[#allocation4 + $0x50]] }
  0x7e   : > { %7540 = sst [smem:[#allocation98_spill]] %s4649_s0  ;;  %s4663_s15 = sld [smem:[#allocation4 + $0x51]] }
  0x7f   : > { %7541 = sst [smem:[#allocation99_spill]] %s4651_s14  ;;  %s4665_s20 = sld [smem:[#allocation4 + $0x52]] }
  0x80   : > { %7542 = sst [smem:[#allocation100_spill]] %s4653_s13  ;;  %s4667_s23 = sld [smem:[#allocation4 + $0x53]] }
  0x81   : > { %7543 = sst [smem:[#allocation101_spill]] %s4655_s16  ;;  %s4669_s19 = sld [smem:[#allocation4 + $0x54]] }
  0x82   : > { %7544 = sst [smem:[#allocation102_spill]] %s4657_s29  ;;  %s4671_s0 = sld [smem:[#allocation4 + $0x55]] }
  0x83   : > { %7545 = sst [smem:[#allocation103_spill]] %s4659_s24  ;;  %s4673_s14 = sld [smem:[#allocation4 + $0x56]] }
  0x84   : > { %7546 = sst [smem:[#allocation104_spill]] %s4661_s3  ;;  %s4675_s13 = sld [smem:[#allocation4 + $0x57]] }
  0x85   : > { %7547 = sst [smem:[#allocation105_spill]] %s4663_s15  ;;  %s4677_s16 = sld [smem:[#allocation4 + $0x58]] }
  0x86   : > { %7548 = sst [smem:[#allocation106_spill]] %s4665_s20  ;;  %s4679_s29 = sld [smem:[#allocation4 + $0x59]] }
  0x87   : > { %7549 = sst [smem:[#allocation107_spill]] %s4667_s23  ;;  %s4681_s24 = sld [smem:[#allocation4 + $0x5a]] }
  0x88   : > { %7550 = sst [smem:[#allocation108_spill]] %s4669_s19  ;;  %s4683_s3 = sld [smem:[#allocation4 + $0x5b]] }
  0x89   : > { %7551 = sst [smem:[#allocation109_spill]] %s4671_s0  ;;  %s4685_s15 = sld [smem:[#allocation4 + $0x5c]] }
  0x8a   : > { %7552 = sst [smem:[#allocation110_spill]] %s4673_s14  ;;  %s4687_s20 = sld [smem:[#allocation4 + $0x5d]] }
  0x8b   : > { %7553 = sst [smem:[#allocation111_spill]] %s4675_s13  ;;  %s4689_s23 = sld [smem:[#allocation4 + $0x5e]] }
  0x8c   : > { %7554 = sst [smem:[#allocation112_spill]] %s4677_s16  ;;  %s4691_s19 = sld [smem:[#allocation4 + $0x5f]] }
  0x8d   : > { %7555 = sst [smem:[#allocation113_spill]] %s4679_s29  ;;  %s4693_s0 = sld [smem:[#allocation4 + $0x60]] }
  0x8e   : > { %7556 = sst [smem:[#allocation114_spill]] %s4681_s24  ;;  %s4695_s14 = sld [smem:[#allocation4 + $0x61]] }
  0x8f   : > { %7557 = sst [smem:[#allocation115_spill]] %s4683_s3  ;;  %s4697_s13 = sld [smem:[#allocation4 + $0x62]] }
  0x90   : > { %7558 = sst [smem:[#allocation116_spill]] %s4685_s15  ;;  %s4699_s16 = sld [smem:[#allocation4 + $0x63]] }
  0x91   : > { %7559 = sst [smem:[#allocation117_spill]] %s4687_s20  ;;  %s4701_s29 = sld [smem:[#allocation4 + $0x64]] }
  0x92   : > { %7560 = sst [smem:[#allocation118_spill]] %s4689_s23  ;;  %s4703_s24 = sld [smem:[#allocation4 + $0x65]] }
  0x93   : > { %7561 = sst [smem:[#allocation119_spill]] %s4691_s19  ;;  %s4705_s3 = sld [smem:[#allocation4 + $0x66]] }
  0x94   : > { %7562 = sst [smem:[#allocation120_spill]] %s4693_s0  ;;  %s4707_s15 = sld [smem:[#allocation4 + $0x67]] }
  0x95   : > { %7563 = sst [smem:[#allocation121_spill]] %s4695_s14  ;;  %s4709_s20 = sld [smem:[#allocation4 + $0x68]] }
  0x96   : > { %7564 = sst [smem:[#allocation122_spill]] %s4697_s13  ;;  %s4711_s23 = sld [smem:[#allocation4 + $0x69]] }
  0x97   : > { %7565 = sst [smem:[#allocation123_spill]] %s4699_s16  ;;  %s4713_s19 = sld [smem:[#allocation4 + $0x6a]] }
  0x98   : > { %7566 = sst [smem:[#allocation124_spill]] %s4701_s29  ;;  %s4715_s0 = sld [smem:[#allocation4 + $0x6b]] }
  0x99   : > { %7567 = sst [smem:[#allocation125_spill]] %s4703_s24  ;;  %s4717_s14 = sld [smem:[#allocation4 + $0x6c]] }
  0x9a   : > { %7568 = sst [smem:[#allocation126_spill]] %s4705_s3  ;;  %s4719_s13 = sld [smem:[#allocation4 + $0x6d]] }
  0x9b   : > { %7569 = sst [smem:[#allocation127_spill]] %s4707_s15  ;;  %s4721_s16 = sld [smem:[#allocation4 + $0x6e]] }
  0x9c   : > { %7570 = sst [smem:[#allocation128_spill]] %s4709_s20  ;;  %s4723_s29 = sld [smem:[#allocation4 + $0x6f]] }
  0x9d   : > { %7571 = sst [smem:[#allocation129_spill]] %s4711_s23  ;;  %s4725_s24 = sld [smem:[#allocation4 + $0x70]] }
  0x9e   : > { %7572 = sst [smem:[#allocation130_spill]] %s4713_s19  ;;  %s4727_s3 = sld [smem:[#allocation4 + $0x71]] }
  0x9f   : > { %7573 = sst [smem:[#allocation131_spill]] %s4715_s0  ;;  %s4729_s15 = sld [smem:[#allocation4 + $0x72]] }
  0xa0   : > { %7574 = sst [smem:[#allocation132_spill]] %s4717_s14  ;;  %s4731_s20 = sld [smem:[#allocation4 + $0x73]] }
  0xa1   : > { %7575 = sst [smem:[#allocation133_spill]] %s4719_s13  ;;  %s4733_s23 = sld [smem:[#allocation4 + $0x74]] }
  0xa2   : > { %7576 = sst [smem:[#allocation134_spill]] %s4721_s16  ;;  %s4735_s19 = sld [smem:[#allocation4 + $0x75]] }
  0xa3   : > { %7577 = sst [smem:[#allocation135_spill]] %s4723_s29  ;;  %s4737_s0 = sld [smem:[#allocation4 + $0x76]] }
  0xa4   : > { %7578 = sst [smem:[#allocation136_spill]] %s4725_s24  ;;  %s4739_s14 = sld [smem:[#allocation4 + $0x77]] }
  0xa5   : > { %7579 = sst [smem:[#allocation137_spill]] %s4727_s3  ;;  %s4741_s16 = sld [smem:[#allocation4 + $0x78]] }
  0xa6   : > { %7580 = sst [smem:[#allocation138_spill]] %s4729_s15  ;;  %s4743_s29 = sld [smem:[#allocation4 + $0x79]] }
  0xa7   : > { %7581 = sst [smem:[#allocation139_spill]] %s4731_s20  ;;  %s4745_s3 = sld [smem:[#allocation4 + $0x7a]] }
  0xa8   : > { %7582 = sst [smem:[#allocation140_spill]] %s4733_s23  ;;  %s4747_s15 = sld [smem:[#allocation4 + $0x7b]] }
  0xa9   : > { %7583 = sst [smem:[#allocation141_spill]] %s4735_s19  ;;  %s4749_s20 = sld [smem:[#allocation4 + $0x7c]] }
  0xaa   : > { %7584 = sst [smem:[#allocation142_spill]] %s4737_s0  ;;  %s4751_s23 = sld [smem:[#allocation4 + $0x7d]] }
  0xab   : > { %7585 = sst [smem:[#allocation143_spill]] %s4739_s14  ;;  %s4753_s19 = sld [smem:[#allocation4 + $0x7e]] }
  0xac   : > { %7586 = sst [smem:[#allocation144_spill]] %s4741_s16  ;;  %s4755_s0 = sld [smem:[#allocation4 + $0x7f]] }
  0xad   : > { %7587 = sst [smem:[#allocation145_spill]] %s4743_s29  ;;  %s4757_s14 = sld [smem:[#allocation4 + $0x80]] }
  0xae   : > { %7588 = sst [smem:[#allocation146_spill]] %s4745_s3  ;;  %s4759_s16 = sld [smem:[#allocation4 + $0x81]] }
  0xaf   : > { %7589 = sst [smem:[#allocation147_spill]] %s4747_s15  ;;  %s4761_s24 = sld [smem:[#allocation4 + $0x82]] }
  0xb0   : > { %7590 = sst [smem:[#allocation148_spill]] %s4749_s20  ;;  %s4763_s29 = sld [smem:[#allocation4 + $0x83]] }
  0xb1   : > { %7591 = sst [smem:[#allocation149_spill]] %s4751_s23  ;;  %s4765_s3 = sld [smem:[#allocation4 + $0x84]] }
  0xb2   : > { %7592 = sst [smem:[#allocation150_spill]] %s4753_s19  ;;  %s4767_s13 = sld [smem:[#allocation4 + $0x85]] }
  0xb3   : > { %7593 = sst [smem:[#allocation151_spill]] %s4755_s0  ;;  %s4769_s15 = sld [smem:[#allocation4 + $0x86]] }
  0xb4   : > { %7594 = sst [smem:[#allocation152_spill]] %s4757_s14  ;;  %s4772_s20 = scalar_lea.vmem [#allocation7], %s4480_s25 }
  0xb5   : > { %7595 = sst [smem:[#allocation153_spill]] %s4759_s16  ;;  %s4775_s23 = scalar_lea.vmem [#allocation8], %s4480_s25 }
  0xb6   : > { %7596 = sst [smem:[#allocation154_spill]] %s4761_s24  ;;  %s4778_s19 = scalar_lea.vmem [#allocation10], %s4480_s25 }
  0xb7   : > { %7597 = sst [smem:[#allocation155_spill]] %s4763_s29  ;;  %s4781_s0 = scalar_lea.vmem [#allocation11], %s4480_s25 }
  0xb8   : > { %7598 = sst [smem:[#allocation156_spill]] %s4765_s3  ;;  %432 = sbr.rel (%p3765_p9) target bundleno = 211 (0xd3), region = 32 }
  0xb9   : > { %7599 = sst [smem:[#allocation157_spill]] %s4767_s13 }
  0xba   : > { %7600 = sst [smem:[#allocation158_spill]] %s4769_s15 }
  0xbb   : > { %7601 = sst [smem:[#allocation159_spill]] %s4772_s20 }
  0xbc   : > { %7602 = sst [smem:[#allocation160_spill]] %s4775_s23 }
  0xbf   : > { %s4354_s24 = smov [#allocation3]   ;;  %s4168_s13 = scalar_lea.hbm %s7382_s1, 512 }
  0xc0   : > { %s440_s14 = sshll.u32 %s4354_s24, 4  ;;  %p4169_p8 = scmp.ne.s32.totalorder %s7382_s1, %s4168_s13  ;;  %s441_s14 = int_to_ptr.vmem [resolvable:$true] %s440_s14 }
  0xc1   : > { %p4172_p10 = scmp.lt.u32.totalorder %s4168_s13, %s7382_s1 }
  0xc3   : > { %p4174_p11 = pnand %p4172_p10, %p4169_p8 }
  0xc5   : > { %4177 = shalt.err (!%p4174_p11)  }
  0xc6   : > { %s4178_s25 = scalar_lea.vmem %s441_s14, 512  ;;  %p4183_p9 = scmp.lt.s32.totalorder %s441_s14, %s441_s14 }
  0xc7   : > { %p4179_p12 = scmp.ne.s32.totalorder %s441_s14, %s4178_s25  ;;  %p4184_p13 = scmp.lt.s32.totalorder %s4178_s25, %s4178_s25 }
  0xc9   : > { %p4185_p0 = por %p4184_p13, %p4183_p9 }
  0xcb   : > { %p4186_p1 = pnand %p4185_p0, %p4179_p12 }
  0xcd   : > { %4189 = shalt.err (!%p4186_p1)  }
  0xce   : > { %443 = dma.hbm_to_vmem [thread:$0]  %s7382_s1, 512, %s441_s14, [#allocation13] }
  0xcf   : > { %4322 = dma.done.wait [#allocation13], 512 }
  0xd0   : > { %4323 = vsyncadd [#allocation13], 4294966784  ;;  %v448_v21 = vld [vmem:[#allocation3] sm:$0xff]  ;;  %v449_v22 = vld [vmem:[#allocation3 + $0x8] sm:$0xff] }
  0xd1   : > { %v450_v23 = vld [vmem:[#allocation3 + $0x10] sm:$0xff]  ;;  %452 = vst [vmem:[#allocation2] sm:$0xff] %v448_v21  ;;  %453 = vst [vmem:[#allocation2 + $0x8] sm:$0xff] %v449_v22  ;;  %v451_v24 = vld [vmem:[#allocation3 + $0x18] sm:$0xff] }
  0xd2   : > { %454 = vst [vmem:[#allocation2 + $0x10] sm:$0xff] %v450_v23  ;;  %455 = vst [vmem:[#allocation2 + $0x18] sm:$0xff] %v451_v24 }
  0xd3 PF: > { %s4355_s20 = smov 127   ;;  %s4356_s23 = smov 1   ;;  %v521_v29 = vstv %s4482_s26  ;;  %v516_v30 = vstv %s4477_s17  ;;  %v584_v31 = vstv %s4497_s10  ;;  %v4835_v34 = vstv %s4486_s30 }
  0xd4   : > { %v557_v35 = vstv %s4491_s7  ;;  %v4839_v38 = vstv %s4488_s6  ;;  %v4843_v40 = vstv %s4493_s8  ;;  %v579_v41 = vstv %s4495_s9  ;;  %s7604_s29 = sld [smem:[#allocation90_spill]]  ;;  %s7605_s16 = sld [smem:[#allocation91_spill]] }
  0xd5   : > { %v4854_v45 = vstv %s4499_s11  ;;  %vm543_vm8 = vcmp.lt.s32.totalorder %v4484_v2, 1  ;;  %vm606_vm9 = vcmp.lt.s32.totalorder %v4484_v2, 7  ;;  %v4880_v0 = vstv %s4501_s12  ;;  %s7615_s17 = sld [smem:[#allocation41_spill]]  ;;  %s7617_s26 = sld [smem:[#allocation45_spill]] }
  0xd6   : > { %s7618_s30 = sld [smem:[#allocation46_spill]]  ;;  %s7619_s6 = sld [smem:[#allocation47_spill]] }
  0xd7   : > { %s7620_s11 = sld [smem:[#allocation48_spill]]  ;;  %s4357_s14 = smov 0.0  }
  0xd8   : > { %v4797_v25 = vld [vmem:[#allocation2] sm:$0xff]  ;;  %v4799_v26 = vld [vmem:[#allocation2 + $0x8] sm:$0xff] }
  0xd9   : > { %v4801_v27 = vld [vmem:[#allocation2 + $0x18] sm:$0xff]  ;;  %468 = vrot.lane.b32.xlu1 %v4797_v25, %s4355_s20  ;;  %464 = vst [vmem:[%s4778_s19] sm:$0xff] %v4797_v25  ;;  %480 = vrot.lane.b32.xlu0 %v4797_v25, %s4356_s23  ;;  %465 = vst [vmem:[%s4778_s19 + $0x8] sm:$0xff] %v4799_v26  ;;  %v4813_v28 = vld [vmem:[#allocation2 + $0x10] sm:$0xff]  ;;  %v522_v32 = vmul.f32 %v521_v29, %v4797_v25  ;;  %v523_v33 = vmul.f32 %v521_v29, %v4799_v26 }
  0xda   : > { %467 = vst [vmem:[%s4778_s19 + $0x18] sm:$0xff] %v4801_v27  ;;  %466 = vst [vmem:[%s4778_s19 + $0x10] sm:$0xff] %v4813_v28  ;;  %v559_v39 = vmul.f32 %v557_v35, %v4799_v26  ;;  %v585_v44 = vmul.f32 %v584_v31, %v4797_v25  ;;  %v586_v46 = vmul.f32 %v584_v31, %v4799_v26 }
  0xdb   : > { %v558_v47 = vmul.f32 %v557_v35, %v4797_v25  ;;  %v524_v48 = vmul.f32 %v521_v29, %v4813_v28  ;;  %v525_v49 = vmul.f32 %v521_v29, %v4801_v27  ;;  %v561_v53 = vmul.f32 %v557_v35, %v4801_v27 }
  0xdc   : > { %v587_v58 = vmul.f32 %v584_v31, %v4813_v28  ;;  %v588_v59 = vmul.f32 %v584_v31, %v4801_v27  ;;  %v4885_v4 = vmul.f32 %v557_v35, %v4813_v28 }
  0xdd   : > { %470 = vrot.lane.b32.xlu1 %v4799_v26, %s4355_s20  ;;  %482 = vrot.lane.b32.xlu0 %v4799_v26, %s4356_s23 }
  0xe1   : > { %486 = vrot.lane.b32.xlu1 %v4801_v27, %s4356_s23  ;;  %484 = vrot.lane.b32.xlu0 %v4813_v28, %s4356_s23 }
  0xe5   : > { %474 = vrot.lane.b32.xlu1 %v4801_v27, %s4355_s20  ;;  %472 = vrot.lane.b32.xlu0 %v4813_v28, %s4355_s20 }
 0x14b   : > { %v469_v36 = vpop.permute.xlu1 %468  ;;  %v481_v37 = vpop.permute.xlu0 %480 }
 0x14c   : > { %v4847_v42 = vmul.f32 %v4515_v11, %v469_v36  ;;  %v4850_v43 = vmul.f32 %v4509_v10, %v481_v37 }
 0x14e   : > { %v517_v50 = vmul.f32 %v516_v30, %v4850_v43  ;;  %v531_v51 = vmul.f32 %v4835_v34, %v4847_v42  ;;  %v580_v52 = vmul.f32 %v579_v41, %v4850_v43  ;;  %v594_v56 = vmul.f32 %v4854_v45, %v4847_v42 }
 0x14f   : > { %v471_v54 = vpop.permute.xlu1 %470  ;;  %v483_v55 = vpop.permute.xlu0 %482  ;;  %v553_v57 = vmul.f32 %v4839_v38, %v4850_v43  ;;  %v567_v3 = vmul.f32 %v4843_v40, %v4847_v42 }
 0x150   : > { %v4873_v60 = vmul.f32 %v4515_v11, %v471_v54  ;;  %v4876_v61 = vmul.f32 %v4509_v10, %v483_v55  ;;  %v526_v62 = vadd.f32 %v522_v32, %v517_v50  ;;  %v589_v63 = vadd.f32 %v585_v44, %v580_v52 }
 0x151   : > { %v562_v1 = vadd.f32 %v558_v47, %v553_v57 }
 0x152   : > { %v518_v5 = vmul.f32 %v516_v30, %v4876_v61  ;;  %v532_v6 = vmul.f32 %v4835_v34, %v4873_v60  ;;  %v535_v7 = vadd.f32 %v531_v51, %v526_v62  ;;  %v554_v8 = vmul.f32 %v4839_v38, %v4876_v61 }
 0x153   : > { %v487_v13 = vpop.permute.xlu1 %486  ;;  %v485_v14 = vpop.permute.xlu0 %484  ;;  %v568_v15 = vmul.f32 %v4843_v40, %v4873_v60  ;;  %v581_v16 = vmul.f32 %v579_v41, %v4876_v61  ;;  %v595_v21 = vmul.f32 %v4854_v45, %v4873_v60  ;;  %v598_v22 = vadd.f32 %v594_v56, %v589_v63 }
 0x154   : > { %v4898_v23 = vmul.f32 %v4509_v10, %v487_v13  ;;  %v4901_v24 = vmul.f32 %v4509_v10, %v485_v14  ;;  %v527_v29 = vadd.f32 %v523_v33, %v518_v5  ;;  %v539_v31 = vrot.slane %v535_v7, 7 }
 0x155   : > { %v563_v32 = vadd.f32 %v559_v39, %v554_v8  ;;  %v590_v35 = vadd.f32 %v586_v46, %v581_v16  ;;  %v602_v36 = vrot.slane %v598_v22, 1  ;;  %v571_v37 = vadd.f32 %v567_v3, %v562_v1 }
 0x156   : > { %v536_v44 = vadd.f32 %v532_v6, %v527_v29  ;;  %v519_v47 = vmul.f32 %v516_v30, %v4901_v24  ;;  %v520_v50 = vmul.f32 %v516_v30, %v4898_v23  ;;  %v556_v51 = vmul.f32 %v4839_v38, %v4898_v23 }
 0x157   : > { %v475_v52 = vpop.permute.xlu1 %474  ;;  %v473_v54 = vpop.permute.xlu0 %472  ;;  %v572_v55 = vadd.f32 %v568_v15, %v563_v32  ;;  %v599_v56 = vadd.f32 %v595_v21, %v590_v35  ;;  %v582_v57 = vmul.f32 %v579_v41, %v4901_v24  ;;  %v583_v33 = vmul.f32 %v579_v41, %v4898_v23 }
 0x158   : > { %v4910_v39 = vmul.f32 %v4515_v11, %v475_v52  ;;  %v4913_v46 = vmul.f32 %v4515_v11, %v473_v54  ;;  %v541_v62 = vrot.slane %v536_v44, 7  ;;  %v528_v63 = vadd.f32 %v524_v48, %v519_v47 }
 0x159   : > { %v604_v30 = vrot.slane %v599_v56, 1  ;;  %v529_v1 = vadd.f32 %v525_v49, %v520_v50  ;;  %v565_v3 = vadd.f32 %v561_v53, %v556_v51  ;;  %v591_v5 = vadd.f32 %v587_v58, %v582_v57 }
 0x15a   : > { %7603 = vst [vmem:[#allocation161_spill] sm:$0xff] %v4910_v39  ;;  %v544_v6 = vsel %vm543_vm8, %v539_v31, %v541_v62  ;;  %v546_v7 = vsel %vm543_vm8, %v541_v62, %v539_v31  ;;  %v533_v41 = vmul.f32 %v4835_v34, %v4913_v46  ;;  %v534_v8 = vmul.f32 %v4835_v34, %v4910_v39 }
 0x15b   : > { %v576_v13 = vadd.f32 %v572_v55, %v544_v6  ;;  %v609_v48 = vsel %vm606_vm9, %v604_v30, %v602_v36  ;;  %v548_v49 = vmul.f32 %v4543_v18, %v546_v7  ;;  %v607_v53 = vsel %vm606_vm9, %v602_v36, %v604_v30 }
 0x15c   : > { %v612_v58 = vmul.f32 %v4549_v19, %v609_v48  ;;  %v537_v14 = vadd.f32 %v533_v41, %v528_v63  ;;  %v538_v15 = vadd.f32 %v534_v8, %v529_v1  ;;  %v570_v16 = vmul.f32 %v4843_v40, %v4910_v39 }
 0x15d   : > { %v575_v21 = vadd.f32 %v571_v37, %v548_v49  ;;  %v592_v22 = vadd.f32 %v588_v59, %v583_v33  ;;  %v596_v34 = vmul.f32 %v4854_v45, %v4913_v46  ;;  %v597_v29 = vmul.f32 %v4854_v45, %v4910_v39 }
 0x15e   : > { %v616_v31 = vadd.f32 %v612_v58, %v576_v13  ;;  %v540_v32 = vrot.slane %v537_v14, 7  ;;  %v542_v35 = vrot.slane %v538_v15, 7  ;;  %v574_v44 = vadd.f32 %v570_v16, %v565_v3 }
 0x15f   : > { %v615_v36 = vadd.f32 %v607_v53, %v575_v21  ;;  %v600_v47 = vadd.f32 %v596_v34, %v591_v5  ;;  %v601_v50 = vadd.f32 %v597_v29, %v592_v22  ;;  %v555_v51 = vmul.f32 %v4839_v38, %v4901_v24 }
 0x160   : > { %v621_v52 = vadd.f32 %v4880_v0, %v616_v31  ;;  %v545_v59 = vsel %vm543_vm8, %v540_v32, %v542_v35  ;;  %v547_v37 = vsel %vm543_vm8, %v542_v35, %v540_v32  ;;  %v569_v45 = vmul.f32 %v4843_v40, %v4913_v46 }
 0x161   : > { %v620_v54 = vadd.f32 %v4880_v0, %v615_v36  ;;  %v603_v55 = vrot.slane %v600_v47, 1  ;;  %v605_v56 = vrot.slane %v601_v50, 1  ;;  %v578_v33 = vadd.f32 %v574_v44, %v545_v59 }
 0x162   : > { %v4945_v57 = vmax.f32 %v621_v52, 0.0  ;;  %v550_v38 = vmul.f32 %v4543_v18, %v547_v37  ;;  %v564_v62 = vadd.f32 %v4885_v4, %v555_v51  ;;  %v926_v13 = vstv %s4621_s27  ;;  %s7612_s27 = sld [smem:[#allocation43_spill]] }
 0x163   : > { %v4949_v63 = vmax.f32 %v620_v54, 0.0  ;;  %v610_v30 = vsel %vm606_vm9, %v605_v56, %v603_v55  ;;  %v608_v5 = vsel %vm606_vm9, %v603_v55, %v605_v56  ;;  %v961_v48 = vstv %s4627_s4  ;;  %s7608_s4 = sld [smem:[#allocation35_spill]] }
 0x164   : > { %1078 = vrot.lane.b32.xlu1 %v4945_v57, %s4356_s23  ;;  %v614_v40 = vmul.f32 %v4549_v19, %v610_v30  ;;  %v573_v1 = vadd.f32 %v569_v45, %v564_v62  ;;  %v988_v53 = vstv %s4633_s2  ;;  %v921_v58 = vstv %s4619_s28  ;;  %s7607_s2 = sld [smem:[#allocation34_spill]]  ;;  %s7613_s28 = sld [smem:[#allocation37_spill]] }
 0x165   : > { %1076 = vrot.lane.b32.xlu0 %v4949_v63, %s4356_s23  ;;  %v927_v14 = vmul.f32 %v926_v13, %v4797_v25  ;;  %v4980_v15 = vstv %s4625_s5  ;;  %v962_v16 = vmul.f32 %v961_v48, %v4797_v25  ;;  %v4985_v21 = vstv %s4629_s18  ;;  %s7609_s5 = sld [smem:[#allocation40_spill]]  ;;  %s7610_s18 = sld [smem:[#allocation44_spill]] }
 0x166   : > { %v618_v3 = vadd.f32 %v614_v40, %v578_v33  ;;  %v577_v4 = vadd.f32 %v573_v1, %v550_v38  ;;  %v4988_v22 = vstv %s7604_s29  ;;  %v989_v34 = vmul.f32 %v988_v53, %v4797_v25 }
 0x167   : > { %v928_v29 = vmul.f32 %v926_v13, %v4799_v26  ;;  %v990_v31 = vmul.f32 %v988_v53, %v4799_v26  ;;  %v4996_v32 = vstv %s7605_s16  ;;  %v963_v35 = vmul.f32 %v961_v48, %v4799_v26 }
 0x168   : > { %1066 = vrot.lane.b32.xlu1 %v4945_v57, %s4355_s20  ;;  %v623_v6 = vadd.f32 %v4880_v0, %v618_v3  ;;  %v617_v7 = vadd.f32 %v608_v5, %v577_v4  ;;  %v929_v44 = vmul.f32 %v926_v13, %v4813_v28  ;;  %v930_v36 = vmul.f32 %v926_v13, %v4801_v27 }
 0x169   : > { %1064 = vrot.lane.b32.xlu0 %v4949_v63, %s4355_s20  ;;  %v964_v47 = vmul.f32 %v961_v48, %v4813_v28  ;;  %v991_v50 = vmul.f32 %v988_v53, %v4813_v28  ;;  %v922_v25 = vmul.f32 %v921_v58, %v4850_v43  ;;  %v923_v51 = vmul.f32 %v921_v58, %v4876_v61 }
 0x16a   : > { %v4965_v41 = vmax.f32 %v623_v6, 0.0  ;;  %v622_v8 = vadd.f32 %v4880_v0, %v617_v7  ;;  %v935_v0 = vstv %s4623_s21  ;;  %v992_v52 = vmul.f32 %v988_v53, %v4801_v27  ;;  %s7611_s21 = sld [smem:[#allocation38_spill]] }
 0x16b   : > { %v5009_v59 = vmul.f32 %v961_v48, %v4801_v27  ;;  %v936_v26 = vmul.f32 %v935_v0, %v4847_v42  ;;  %v937_v37 = vmul.f32 %v935_v0, %v4873_v60  ;;  %v957_v45 = vmul.f32 %v4980_v15, %v4850_v43 }
 0x16c   : > { %1082 = vrot.lane.b32.xlu1 %v4965_v41, %s4356_s23  ;;  %v4972_v49 = vmax.f32 %v622_v8, 0.0  ;;  %v971_v28 = vmul.f32 %v4985_v21, %v4847_v42  ;;  %v931_v54 = vadd.f32 %v927_v14, %v922_v25  ;;  %v932_v55 = vadd.f32 %v928_v29, %v923_v51 }
 0x16d   : > { %v984_v56 = vmul.f32 %v4988_v22, %v4850_v43  ;;  %v985_v33 = vmul.f32 %v4988_v22, %v4876_v61  ;;  %v966_v27 = vadd.f32 %v962_v16, %v957_v45  ;;  %v998_v38 = vmul.f32 %v4996_v32, %v4847_v42 }
 0x16e   : > { %1080 = vrot.lane.b32.xlu0 %v4972_v49, %s4356_s23  ;;  %v999_v62 = vmul.f32 %v4996_v32, %v4873_v60  ;;  %v958_v30 = vmul.f32 %v4980_v15, %v4876_v61  ;;  %v940_v40 = vadd.f32 %v936_v26, %v931_v54  ;;  %v941_v1 = vadd.f32 %v937_v37, %v932_v55 }
 0x16f   : > { %v993_v3 = vadd.f32 %v989_v34, %v984_v56  ;;  %v994_v4 = vadd.f32 %v990_v31, %v985_v33  ;;  %v975_v5 = vadd.f32 %v971_v28, %v966_v27  ;;  %v972_v7 = vmul.f32 %v4985_v21, %v4873_v60 }
 0x170   : > { %1070 = vrot.lane.b32.xlu1 %v4965_v41, %s4355_s20  ;;  %v967_v6 = vadd.f32 %v963_v35, %v958_v30  ;;  %v924_v8 = vmul.f32 %v921_v58, %v4901_v24  ;;  %v944_v13 = vrot.slane %v940_v40, 7  ;;  %v946_v48 = vrot.slane %v941_v1, 7 }
 0x171   : > { %v1002_v53 = vadd.f32 %v998_v38, %v993_v3  ;;  %v1003_v14 = vadd.f32 %v999_v62, %v994_v4  ;;  %v925_v29 = vmul.f32 %v921_v58, %v4898_v23  ;;  %v938_v51 = vmul.f32 %v935_v0, %v4913_v46 }
 0x172   : > { %1068 = vrot.lane.b32.xlu0 %v4972_v49, %s4355_s20  ;;  %v976_v16 = vadd.f32 %v972_v7, %v967_v6  ;;  %v933_v25 = vadd.f32 %v929_v44, %v924_v8  ;;  %v950_v34 = vsel %vm543_vm8, %v946_v48, %v944_v13  ;;  %v948_v26 = vsel %vm543_vm8, %v944_v13, %v946_v48 }
 0x173   : > { %v1006_v31 = vrot.slane %v1002_v53, 1  ;;  %v1008_v35 = vrot.slane %v1003_v14, 1  ;;  %v952_v37 = vmul.f32 %v4543_v18, %v950_v34  ;;  %v934_v28 = vadd.f32 %v930_v36, %v925_v29 }
 0x174   : > { %v980_v45 = vadd.f32 %v976_v16, %v948_v26  ;;  %v939_v54 = vmul.f32 %v935_v0, %v4910_v39  ;;  %v942_v55 = vadd.f32 %v938_v51, %v933_v25  ;;  %v959_v56 = vmul.f32 %v4980_v15, %v4901_v24 }
 0x175   : > { %v1010_v58 = vsel %vm606_vm9, %v1006_v31, %v1008_v35  ;;  %v1012_v44 = vsel %vm606_vm9, %v1008_v35, %v1006_v31  ;;  %v979_v33 = vadd.f32 %v975_v5, %v952_v37  ;;  %v973_v62 = vmul.f32 %v4985_v21, %v4913_v46 }
 0x176   : > { %v1015_v27 = vmul.f32 %v4549_v19, %v1012_v44  ;;  %v943_v38 = vadd.f32 %v939_v54, %v934_v28  ;;  %v945_v36 = vrot.slane %v942_v55, 7  ;;  %v968_v30 = vadd.f32 %v964_v47, %v959_v56 }
 0x177   : > { %v986_v0 = vmul.f32 %v4988_v22, %v4901_v24  ;;  %v987_v40 = vmul.f32 %v4988_v22, %v4898_v23  ;;  %v5051_v1 = vadd.f32 %v1010_v58, %v979_v33  ;;  %v1000_v5 = vmul.f32 %v4996_v32, %v4913_v46 }
 0x178   : > { %v5053_v3 = vadd.f32 %v1015_v27, %v980_v45  ;;  %v947_v4 = vrot.slane %v943_v38, 7  ;;  %v977_v6 = vadd.f32 %v973_v62, %v968_v30  ;;  %v1001_v47 = vmul.f32 %v4996_v32, %v4910_v39 }
 0x179   : > { %v995_v7 = vadd.f32 %v991_v50, %v986_v0  ;;  %v996_v8 = vadd.f32 %v992_v52, %v987_v40  ;;  %v960_v50 = vmul.f32 %v4980_v15, %v4898_v23  ;;  %v974_v25 = vmul.f32 %v4985_v21, %v4910_v39 }
 0x17a   : > { %7606 = vst [vmem:[#allocation162_spill] sm:$0xff] %v5053_v3  ;;  %v951_v13 = vsel %vm543_vm8, %v947_v4, %v945_v36  ;;  %v949_v22 = vsel %vm543_vm8, %v945_v36, %v947_v4  ;;  %v5079_v37 = vstv %s7607_s2  ;;  %v5082_v21 = vstv %s7608_s4 }
 0x17b   : > { %v954_v48 = vmul.f32 %v4543_v18, %v951_v13  ;;  %v1004_v53 = vadd.f32 %v1000_v5, %v995_v7  ;;  %v1005_v14 = vadd.f32 %v1001_v47, %v996_v8  ;;  %v969_v29 = vadd.f32 %v5009_v59, %v960_v50 }
 0x17c   : > { %v5085_v45 = vstv %s7609_s5  ;;  %v5088_v54 = vstv %s7610_s18  ;;  %v5092_v55 = vstv %s7611_s21  ;;  %v5095_v56 = vstv %s7612_s27 }
 0x17d   : > { %v981_v52 = vadd.f32 %v977_v6, %v954_v48  ;;  %v1007_v16 = vrot.slane %v1004_v53, 1  ;;  %v1009_v32 = vrot.slane %v1005_v14, 1  ;;  %v978_v15 = vadd.f32 %v974_v25, %v969_v29 }
 0x17e   : > { %v5099_v27 = vstv %s7613_s28  ;;  %v1095_v62 = vmul.f32 %v5082_v21, %v4945_v57  ;;  %v1130_v36 = vmul.f32 %v5085_v45, %v4945_v57  ;;  %v5107_v30 = vstv %s7615_s17 }
 0x17f   : > { %v1011_v51 = vsel %vm606_vm9, %v1007_v16, %v1009_v32  ;;  %v1013_v34 = vsel %vm606_vm9, %v1009_v32, %v1007_v16  ;;  %v982_v26 = vadd.f32 %v978_v15, %v949_v22  ;;  %v1157_v0 = vmul.f32 %v5088_v54, %v4945_v57 }
 0x180   : > { %v5073_v31 = vadd.f32 %v1011_v51, %v981_v52  ;;  %v1017_v35 = vmul.f32 %v4549_v19, %v1013_v34  ;;  %v5114_v5 = vstv %s7617_s26  ;;  %v1094_v8 = vmul.f32 %v5082_v21, %v4949_v63  ;;  %s7630_s26 = sld [smem:[#allocation64_spill]] }
 0x181   : > { %v1129_v47 = vmul.f32 %v5085_v45, %v4949_v63  ;;  %v1156_v53 = vmul.f32 %v5088_v54, %v4949_v63  ;;  %v1097_v50 = vmul.f32 %v5082_v21, %v4965_v41 }
 0x182   : > { %7614 = vst [vmem:[#allocation163_spill] sm:$0xff] %v5073_v31  ;;  %v5076_v59 = vadd.f32 %v1017_v35, %v982_v26 }
 0x184   : > { %7616 = vst [vmem:[#allocation164_spill] sm:$0xff] %v5076_v59 }
 0x1d6   : > { %v1079_v28 = vpop.permute.xlu1 %1078 }
 0x1d7   : > { %v1085_v58 = vmul.f32 %v4509_v10, %v1079_v28  ;;  %v1077_v44 = vpop.permute.xlu0 %1076 }
 0x1d8   : > { %v1084_v33 = vmul.f32 %v4509_v10, %v1077_v44 }
 0x1d9   : > { %v1090_v38 = vmul.f32 %v5079_v37, %v1085_v58  ;;  %v1152_v7 = vmul.f32 %v5095_v56, %v1085_v58  ;;  %v1125_v48 = vmul.f32 %v5092_v55, %v1085_v58  ;;  %v1132_v58 = vmul.f32 %v5085_v45, %v4965_v41 }
 0x1da   : > { %v1089_v40 = vmul.f32 %v5079_v37, %v1084_v33  ;;  %v1151_v4 = vmul.f32 %v5095_v56, %v1084_v33  ;;  %v1067_v6 = vpop.permute.xlu1 %1066  ;;  %v1124_v16 = vmul.f32 %v5092_v55, %v1084_v33 }
 0x1db   : > { %v1073_v13 = vmul.f32 %v4515_v11, %v1067_v6  ;;  %v1065_v22 = vpop.permute.xlu0 %1064  ;;  %v1099_v52 = vadd.f32 %v1095_v62, %v1090_v38  ;;  %v1161_v26 = vadd.f32 %v1157_v0, %v1152_v7 }
 0x1dc   : > { %v1072_v14 = vmul.f32 %v4515_v11, %v1065_v22  ;;  %v1098_v25 = vadd.f32 %v1094_v8, %v1089_v40  ;;  %v1160_v51 = vadd.f32 %v1156_v53, %v1151_v4  ;;  %v1134_v4 = vadd.f32 %v1130_v36, %v1125_v48 }
 0x1dd   : > { %v1104_v32 = vmul.f32 %v5099_v27, %v1073_v13  ;;  %v1166_v29 = vmul.f32 %v5114_v5, %v1073_v13  ;;  %v1139_v33 = vmul.f32 %v5107_v30, %v1073_v13  ;;  %v1133_v8 = vadd.f32 %v1129_v47, %v1124_v16 }
 0x1de   : > { %v1103_v34 = vmul.f32 %v5099_v27, %v1072_v14  ;;  %v1165_v15 = vmul.f32 %v5114_v5, %v1072_v14  ;;  %v1083_v35 = vpop.permute.xlu1 %1082  ;;  %v1138_v62 = vmul.f32 %v5107_v30, %v1072_v14  ;;  %v1159_v53 = vmul.f32 %v5088_v54, %v4965_v41 }
 0x1df   : > { %v1108_v28 = vadd.f32 %v1104_v32, %v1099_v52  ;;  %v1087_v44 = vmul.f32 %v4509_v10, %v1083_v35  ;;  %v1170_v22 = vadd.f32 %v1166_v29, %v1161_v26  ;;  %v1096_v14 = vmul.f32 %v5082_v21, %v4972_v49 }
 0x1e0   : > { %v1107_v38 = vadd.f32 %v1103_v34, %v1098_v25  ;;  %v1169_v6 = vadd.f32 %v1165_v15, %v1160_v51  ;;  %v1081_v40 = vpop.permute.xlu0 %1080  ;;  %v1143_v47 = vadd.f32 %v1139_v33, %v1134_v4  ;;  %v1142_v16 = vadd.f32 %v1138_v62, %v1133_v8 }
 0x1e1   : > { %v1113_v0 = vrot.slane %v1108_v28, 7  ;;  %v1092_v52 = vmul.f32 %v5079_v37, %v1087_v44  ;;  %v1086_v32 = vmul.f32 %v4509_v10, %v1081_v40  ;;  %v1154_v13 = vmul.f32 %v5095_v56, %v1087_v44 }
 0x1e2   : > { %v1111_v7 = vrot.slane %v1107_v38, 7  ;;  %v1071_v35 = vpop.permute.xlu1 %1070  ;;  %v1173_v31 = vrot.slane %v1169_v6, 1  ;;  %v1158_v29 = vmul.f32 %v5088_v54, %v4972_v49  ;;  %v1175_v51 = vrot.slane %v1170_v22, 1 }
 0x1e3   : > { %v1075_v36 = vmul.f32 %v4515_v11, %v1071_v35  ;;  %v1127_v15 = vmul.f32 %v5092_v55, %v1087_v44  ;;  %v1091_v26 = vmul.f32 %v5079_v37, %v1086_v32  ;;  %v1101_v28 = vadd.f32 %v1097_v50, %v1092_v52 }
 0x1e4   : > { %v1117_v48 = vsel %vm543_vm8, %v1113_v0, %v1111_v7  ;;  %v1069_v25 = vpop.permute.xlu0 %1068  ;;  %v1153_v38 = vmul.f32 %v5095_v56, %v1086_v32  ;;  %v1115_v62 = vsel %vm543_vm8, %v1111_v7, %v1113_v0  ;;  %v1179_v40 = vsel %vm606_vm9, %v1175_v51, %v1173_v31 }
 0x1e5   : > { %v1119_v34 = vmul.f32 %v4543_v18, %v1117_v48  ;;  %v1106_v33 = vmul.f32 %v5099_v27, %v1075_v36  ;;  %v1168_v6 = vmul.f32 %v5114_v5, %v1075_v36  ;;  %v1163_v4 = vadd.f32 %v1159_v53, %v1154_v13 }
 0x1e6   : > { %v1074_v8 = vmul.f32 %v4515_v11, %v1069_v25  ;;  %v1100_v44 = vadd.f32 %v1096_v14, %v1091_v26  ;;  %v1126_v35 = vmul.f32 %v5092_v55, %v1086_v32  ;;  %v1162_v50 = vadd.f32 %v1158_v29, %v1153_v38 }
 0x1e7   : > { %v1146_v22 = vadd.f32 %v1142_v16, %v1119_v34  ;;  %v1110_v52 = vadd.f32 %v1106_v33, %v1101_v28  ;;  %v1172_v48 = vadd.f32 %v1168_v6, %v1163_v4  ;;  %v1182_v17 = vmul.f32 %v4549_v19, %v1179_v40 }
 0x1e8   : > { %v1105_v59 = vmul.f32 %v5099_v27, %v1074_v8  ;;  %v1167_v20 = vmul.f32 %v5114_v5, %v1074_v8  ;;  %v1131_v0 = vmul.f32 %v5085_v45, %v4972_v49  ;;  %v1141_v53 = vmul.f32 %v5107_v30, %v1075_v36 }
 0x1e9   : > { %v1147_v7 = vadd.f32 %v1143_v47, %v1115_v62  ;;  %v1140_v14 = vmul.f32 %v5107_v30, %v1074_v8  ;;  %v1177_v16 = vsel %vm606_vm9, %v1173_v31, %v1175_v51  ;;  %v1136_v29 = vadd.f32 %v1132_v58, %v1127_v15 }
 0x1ea   : > { %v1109_v13 = vadd.f32 %v1105_v59, %v1100_v44  ;;  %v1171_v32 = vadd.f32 %v1167_v20, %v1162_v50  ;;  %v1135_v25 = vadd.f32 %v1131_v0, %v1126_v35  ;;  %v1185_v34 = vadd.f32 %v1177_v16, %v1146_v22 }
 0x1eb   : > { %v1114_v26 = vrot.slane %v1110_v52, 7  ;;  %v1176_v28 = vrot.slane %v1172_v48, 1  ;;  %v1145_v6 = vadd.f32 %v1141_v53, %v1136_v29  ;;  %v1186_v40 = vadd.f32 %v1182_v17, %v1147_v7 }
 0x1ec   : > { %v1112_v38 = vrot.slane %v1109_v13, 7  ;;  %v1174_v33 = vrot.slane %v1171_v32, 1  ;;  %v5172_v4 = vstv %s7618_s30  ;;  %v1144_v36 = vadd.f32 %v1140_v14, %v1135_v25  ;;  %s7631_s30 = sld [smem:[#allocation69_spill]] }
 0x1ed   : > { %v1190_v15 = vadd.f32 %v5172_v4, %v1185_v34  ;;  %v1191_v8 = vadd.f32 %v5172_v4, %v1186_v40 }
 0x1ee   : > { %v1118_v59 = vsel %vm543_vm8, %v1114_v26, %v1112_v38  ;;  %v1116_v20 = vsel %vm543_vm8, %v1112_v38, %v1114_v26  ;;  %v1180_v31 = vsel %vm606_vm9, %v1176_v28, %v1174_v33  ;;  %v1178_v22 = vsel %vm606_vm9, %v1174_v33, %v1176_v28 }
 0x1ef   : > { %v1121_v58 = vmul.f32 %v4543_v18, %v1118_v59  ;;  %v1149_v47 = vadd.f32 %v1145_v6, %v1116_v20  ;;  %v1184_v51 = vmul.f32 %v4549_v19, %v1180_v31  ;;  %v1194_v35 = vmul.f32 %v1190_v15, %v1190_v15 }
 0x1f0   : > { %v1198_v48 = vadd.f32 %v1191_v8, %v1190_v15  ;;  %v1195_v0 = vmul.f32 %v1191_v8, %v1191_v8 }
 0x1f1   : > { %v1148_v17 = vadd.f32 %v1144_v36, %v1121_v58  ;;  %v1188_v62 = vadd.f32 %v1184_v51, %v1149_v47 }
 0x1f2   : > { %v1210_v13 = vadd.f32 %v1195_v0, %v1194_v35 }
 0x1f3   : > { %v1187_v44 = vadd.f32 %v1178_v22, %v1148_v17  ;;  %v1193_v52 = vadd.f32 %v5172_v4, %v1188_v62 }
 0x1f5   : > { %v1192_v50 = vadd.f32 %v5172_v4, %v1187_v44  ;;  %v1197_v32 = vmul.f32 %v1193_v52, %v1193_v52 }
 0x1f7   : > { %v1199_v53 = vadd.f32 %v1198_v48, %v1192_v50  ;;  %v1196_v7 = vmul.f32 %v1192_v50, %v1192_v50  ;;  %v5191_v48 = vstv %s7620_s11  ;;  %s7635_s11 = sld [smem:[#allocation66_spill]] }
 0x1f8   : > { %7621 = vst [vmem:[#allocation165_spill] sm:$0xff] %v5191_v48 }
 0x1f9   : > { %v1200_v14 = vadd.f32 %v1199_v53, %v1193_v52  ;;  %v1211_v16 = vadd.f32 %v1210_v13, %v1196_v7 }
 0x1fb   : > { %1201 = vadd.xlane.f32.xlu0 %v1200_v14  ;;  %v1212_v29 = vadd.f32 %v1211_v16, %v1197_v32 }
 0x1fd   : > { %1213 = vadd.xlane.f32.xlu1 %v1212_v29 }
 0x288   : > { %v1202_v25 = vpop.xlane.xlu0 %1201 }
 0x289   : > { %v1203_v34 = vrot.slane %v1202_v25, 4 }
 0x28a   : > { %v1214_v26 = vpop.xlane.xlu1 %1213 }
 0x28b   : > { %v1204_v28 = vadd.f32 %v1203_v34, %v1202_v25  ;;  %v1215_v38 = vrot.slane %v1214_v26, 4 }
 0x28d   : > { %v1216_v33 = vadd.f32 %v1215_v38, %v1214_v26  ;;  %v1205_v6 = vrot.slane %v1204_v28, 2 }
 0x28f   : > { %v1206_v40 = vadd.f32 %v1205_v6, %v1204_v28  ;;  %v1217_v59 = vrot.slane %v1216_v33, 2 }
 0x291   : > { %v1207_v36 = vrot.slane %v1206_v40, 1  ;;  %v1218_v20 = vadd.f32 %v1217_v59, %v1216_v33 }
 0x293   : > { %v1208_v31 = vadd.f32 %v1207_v36, %v1206_v40  ;;  %v1219_v58 = vrot.slane %v1218_v20, 1 }
 0x295   : > { %3933 = vpush %v1208_v31  ;;  %v1220_v47 = vadd.f32 %v1219_v58, %v1218_v20 }
 0x297   : > { %3935 = vpush %v1220_v47 }
 0x2c6   : > { %s3934_s7 = spop %3933 }
 0x2c7   : > { %s1222_s8 = smul.f32 0.00024414063, %s3934_s7  ;;  %s7632_s7 = sld [smem:[#allocation74_spill]] }
 0x2c8   : > { %s3936_s9 = spop %3935 }
 0x2c9   : > { %s1224_s10 = smul.f32 %s1222_s8, %s1222_s8  ;;  %v1227_v62 = vstv %s1222_s8  ;;  %s4358_s8 = smov 2  }
 0x2ca   : > { %s1223_s12 = smul.f32 0.00024414063, %s3936_s9  ;;  %v1228_v22 = vsub.f32 %v1190_v15, %v1227_v62  ;;  %v1229_v44 = vsub.f32 %v1191_v8, %v1227_v62  ;;  %v1230_v0 = vsub.f32 %v1192_v50, %v1227_v62  ;;  %v1231_v53 = vsub.f32 %v1193_v52, %v1227_v62  ;;  %s7633_s9 = sld [smem:[#allocation79_spill]] }
 0x2cc   : > { %s1225_s13 = ssub.f32 %s1223_s12, %s1224_s10  ;;  %s7634_s10 = sld [smem:[#allocation84_spill]] }
 0x2cd   : > { %s7636_s12 = sld [smem:[#allocation71_spill]] }
 0x2ce   : > { %s1226_s15 = smax.f32 %s4357_s14, %s1225_s13  ;;  %s7637_s13 = sld [smem:[#allocation76_spill]] }
 0x2cf   : > { %s1232_s25 = sadd.f32 1e-05, %s1226_s15  ;;  %s7638_s15 = sld [smem:[#allocation81_spill]] }
 0x2d1   : > { %v1233_v51 = vstv %s1232_s25  ;;  %s7639_s25 = sld [smem:[#allocation86_spill]] }
 0x2d2   : > { %4067 = vrsqrt.f32 %v1233_v51 }
 0x2dc   : > { %v4068_v17 = vpop.eup %4067 }
 0x2dd   : > { %3937 = vpush %v4068_v17 }
 0x30e   : > { %s3938_s24 = spop %3937 }
 0x30f   : > { %s1236_s3 = smul.f32 %s3938_s24, %s7619_s6  ;;  %s7640_s24 = sld [smem:[#allocation92_spill]] }
 0x311   : > { %v1237_v35 = vstv %s1236_s3  ;;  %s4359_s3 = smov 126  }
 0x312   : > { %v1238_v7 = vmul.f32 %v1237_v35, %v1228_v22  ;;  %v1239_v13 = vmul.f32 %v1237_v35, %v1229_v44  ;;  %v1240_v14 = vmul.f32 %v1237_v35, %v1230_v0  ;;  %v1241_v32 = vmul.f32 %v1237_v35, %v1231_v53 }
 0x314   : > { %v1243_v16 = vadd.f32 %v5191_v48, %v1238_v7  ;;  %v1244_v29 = vadd.f32 %v5191_v48, %v1239_v13  ;;  %v1245_v26 = vadd.f32 %v5191_v48, %v1240_v14  ;;  %v1246_v15 = vadd.f32 %v5191_v48, %v1241_v32 }
 0x316   : > { %v1247_v25 = vmax.f32 %v1243_v16, 0.0  ;;  %v1248_v34 = vmax.f32 %v1244_v29, 0.0  ;;  %v1249_v52 = vmax.f32 %v1245_v26, 0.0  ;;  %v1250_v28 = vmax.f32 %v1246_v15, 0.0 }
 0x318   : > { %v5198_v8 = vadd.f32 %v1247_v25, %v4949_v63  ;;  %v5201_v50 = vadd.f32 %v1248_v34, %v4945_v57  ;;  %v5212_v63 = vadd.f32 %v1249_v52, %v4972_v49  ;;  %v5215_v57 = vadd.f32 %v1250_v28, %v4965_v41 }
 0x31a   : > { %1269 = vrot.lane.b32.xlu1 %v5201_v50, %s4356_s23  ;;  %1267 = vrot.lane.b32.xlu0 %v5198_v8, %s4356_s23  ;;  %v1284_v41 = vmul.f32 %v5201_v50, %v5082_v21  ;;  %v1316_v59 = vmul.f32 %v5201_v50, %v5085_v45  ;;  %v1340_v31 = vmul.f32 %v5201_v50, %v5088_v54 }
 0x31b   : > { %v1283_v58 = vmul.f32 %v5198_v8, %v5082_v21  ;;  %v1315_v47 = vmul.f32 %v5198_v8, %v5085_v45  ;;  %v1339_v22 = vmul.f32 %v5198_v8, %v5088_v54  ;;  %v1286_v44 = vmul.f32 %v5215_v57, %v5082_v21 }
 0x31c   : > { %v5247_v35 = vmul.f32 %v5215_v57, %v5085_v45  ;;  %v1342_v0 = vmul.f32 %v5215_v57, %v5088_v54  ;;  %v1285_v14 = vmul.f32 %v5212_v63, %v5082_v21 }
 0x31e   : > { %1257 = vrot.lane.b32.xlu1 %v5201_v50, %s4355_s20  ;;  %1255 = vrot.lane.b32.xlu0 %v5198_v8, %s4355_s20 }
 0x322   : > { %1273 = vrot.lane.b32.xlu1 %v5215_v57, %s4356_s23  ;;  %1271 = vrot.lane.b32.xlu0 %v5212_v63, %s4356_s23 }
 0x326   : > { %1261 = vrot.lane.b32.xlu1 %v5215_v57, %s4355_s20  ;;  %1259 = vrot.lane.b32.xlu0 %v5212_v63, %s4355_s20 }
 0x38c   : > { %v1270_v38 = vpop.permute.xlu1 %1269  ;;  %v1268_v33 = vpop.permute.xlu0 %1267 }
 0x38d   : > { %v1276_v49 = vmul.f32 %v4509_v10, %v1270_v38  ;;  %v1275_v6 = vmul.f32 %v4509_v10, %v1268_v33 }
 0x38f   : > { %v1280_v40 = vmul.f32 %v1276_v49, %v5079_v37  ;;  %v1336_v36 = vmul.f32 %v1276_v49, %v5095_v56  ;;  %v1279_v20 = vmul.f32 %v1275_v6, %v5079_v37  ;;  %v1335_v51 = vmul.f32 %v1275_v6, %v5095_v56 }
 0x390   : > { %v1258_v17 = vpop.permute.xlu1 %1257  ;;  %v1256_v62 = vpop.permute.xlu0 %1255  ;;  %v1312_v53 = vmul.f32 %v1276_v49, %v5092_v55  ;;  %v1311_v25 = vmul.f32 %v1275_v6, %v5092_v55 }
 0x391   : > { %v1264_v7 = vmul.f32 %v4515_v11, %v1258_v17  ;;  %v1263_v13 = vmul.f32 %v4515_v11, %v1256_v62  ;;  %v1288_v32 = vadd.f32 %v1284_v41, %v1280_v40  ;;  %v1344_v16 = vadd.f32 %v1340_v31, %v1336_v36 }
 0x392   : > { %v1287_v29 = vadd.f32 %v1283_v58, %v1279_v20  ;;  %v1343_v34 = vadd.f32 %v1339_v22, %v1335_v51  ;;  %v1320_v31 = vadd.f32 %v1316_v59, %v1312_v53  ;;  %v1319_v58 = vadd.f32 %v1315_v47, %v1311_v25 }
 0x393   : > { %v1292_v26 = vmul.f32 %v1264_v7, %v5099_v27  ;;  %v1348_v15 = vmul.f32 %v1264_v7, %v5114_v5  ;;  %v1291_v52 = vmul.f32 %v1263_v13, %v5099_v27  ;;  %v1324_v33 = vmul.f32 %v1264_v7, %v5107_v30 }
 0x394   : > { %v1274_v28 = vpop.permute.xlu1 %1273  ;;  %v1272_v38 = vpop.permute.xlu0 %1271  ;;  %v1347_v49 = vmul.f32 %v1263_v13, %v5114_v5  ;;  %v1323_v20 = vmul.f32 %v1263_v13, %v5107_v30 }
 0x395   : > { %v1278_v17 = vmul.f32 %v4509_v10, %v1274_v28  ;;  %v1277_v41 = vmul.f32 %v4509_v10, %v1272_v38  ;;  %v1296_v40 = vadd.f32 %v1292_v26, %v1288_v32  ;;  %v1352_v36 = vadd.f32 %v1348_v15, %v1344_v16 }
 0x396   : > { %v1295_v6 = vadd.f32 %v1291_v52, %v1287_v29  ;;  %v1351_v51 = vadd.f32 %v1347_v49, %v1343_v34  ;;  %v1317_v28 = vmul.f32 %v5212_v63, %v5085_v45  ;;  %v1341_v32 = vmul.f32 %v5212_v63, %v5088_v54 }
 0x397   : > { %v1282_v62 = vmul.f32 %v1278_v17, %v5079_v37  ;;  %v1301_v22 = vrot.slane %v1296_v40, 7  ;;  %v1357_v12 = vrot.slane %v1352_v36, 1  ;;  %v1338_v7 = vmul.f32 %v1278_v17, %v5095_v56 }
 0x398   : > { %v1299_v9 = vrot.slane %v1295_v6, 7  ;;  %v1355_v39 = vrot.slane %v1351_v51, 1  ;;  %v1281_v16 = vmul.f32 %v1277_v41, %v5079_v37  ;;  %v1262_v13 = vpop.permute.xlu1 %1261  ;;  %v1260_v59 = vpop.permute.xlu0 %1259  ;;  %v1328_v47 = vadd.f32 %v1324_v33, %v1320_v31 }
 0x399   : > { %v1327_v29 = vadd.f32 %v1323_v20, %v1319_v58  ;;  %v1314_v25 = vmul.f32 %v1278_v17, %v5092_v55  ;;  %v1290_v15 = vadd.f32 %v1286_v44, %v1282_v62  ;;  %v1337_v52 = vmul.f32 %v1277_v41, %v5095_v56 }
 0x39a   : > { %v1305_v53 = vsel %vm543_vm8, %v1301_v22, %v1299_v9  ;;  %v1361_v26 = vsel %vm606_vm9, %v1357_v12, %v1355_v39  ;;  %v1303_v38 = vsel %vm543_vm8, %v1299_v9, %v1301_v22  ;;  %v1346_v49 = vadd.f32 %v1342_v0, %v1338_v7 }
 0x39b   : > { %v1307_v34 = vmul.f32 %v4543_v18, %v1305_v53  ;;  %v1266_v33 = vmul.f32 %v4515_v11, %v1262_v13  ;;  %v1265_v40 = vmul.f32 %v4515_v11, %v1260_v59  ;;  %v1364_v6 = vmul.f32 %v4549_v19, %v1361_v26 }
 0x39c   : > { %v1289_v17 = vadd.f32 %v1285_v14, %v1281_v16  ;;  %v1313_v20 = vmul.f32 %v1277_v41, %v5092_v55  ;;  %v1345_v31 = vadd.f32 %v1341_v32, %v1337_v52  ;;  %v1332_v62 = vadd.f32 %v1328_v47, %v1303_v38 }
 0x39d   : > { %v1331_v36 = vadd.f32 %v1327_v29, %v1307_v34  ;;  %v1294_v58 = vmul.f32 %v1266_v33, %v5099_v27  ;;  %v1350_v44 = vmul.f32 %v1266_v33, %v5114_v5  ;;  %v1293_v51 = vmul.f32 %v1265_v40, %v5099_v27 }
 0x39e   : > { %v1326_v9 = vmul.f32 %v1266_v33, %v5107_v30  ;;  %v1349_v0 = vmul.f32 %v1265_v40, %v5114_v5  ;;  %v1359_v22 = vsel %vm606_vm9, %v1355_v39, %v1357_v12  ;;  %v1325_v41 = vmul.f32 %v1265_v40, %v5107_v30 }
 0x39f   : > { %v1298_v7 = vadd.f32 %v1294_v58, %v1290_v15  ;;  %v1354_v13 = vadd.f32 %v1350_v44, %v1346_v49  ;;  %v1297_v14 = vadd.f32 %v1293_v51, %v1289_v17  ;;  %v1322_v32 = vadd.f32 %v5247_v35, %v1314_v25 }
 0x3a0   : > { %v1353_v16 = vadd.f32 %v1349_v0, %v1345_v31  ;;  %v1367_v59 = vadd.f32 %v1359_v22, %v1331_v36  ;;  %v1321_v53 = vadd.f32 %v1317_v28, %v1313_v20  ;;  %v1368_v3 = vadd.f32 %v1364_v6, %v1332_v62 }
 0x3a1   : > { %v1302_v29 = vrot.slane %v1298_v7, 7  ;;  %v1358_v34 = vrot.slane %v1354_v13, 1  ;;  %v1300_v26 = vrot.slane %v1297_v14, 7  ;;  %v1330_v52 = vadd.f32 %v1326_v9, %v1322_v32 }
 0x3a2   : > { %v1356_v33 = vrot.slane %v1353_v16, 1  ;;  %v1329_v12 = vadd.f32 %v1325_v41, %v1321_v53  ;;  %v1371_v28 = vadd.f32 %v1367_v59, %v5172_v4  ;;  %v1372_v40 = vadd.f32 %v1368_v3, %v5172_v4 }
 0x3a3   : > { %v1306_v47 = vsel %vm543_vm8, %v1302_v29, %v1300_v26  ;;  %v1304_v39 = vsel %vm543_vm8, %v1300_v26, %v1302_v29 }
 0x3a4   : > { %v1309_v15 = vmul.f32 %v4543_v18, %v1306_v47  ;;  %v1334_v38 = vadd.f32 %v1330_v52, %v1304_v39  ;;  %v1362_v35 = vsel %vm606_vm9, %v1358_v34, %v1356_v33  ;;  %v1360_v36 = vsel %vm606_vm9, %v1356_v33, %v1358_v34 }
 0x3a5   : > { %v1366_v25 = vmul.f32 %v4549_v19, %v1362_v35  ;;  %v1375_v20 = vmul.f32 %v1371_v28, %v1371_v28  ;;  %v1379_v44 = vadd.f32 %v1372_v40, %v1371_v28  ;;  %v1376_v51 = vmul.f32 %v1372_v40, %v1372_v40 }
 0x3a6   : > { %v1333_v49 = vadd.f32 %v1329_v12, %v1309_v15 }
 0x3a7   : > { %v1370_v6 = vadd.f32 %v1366_v25, %v1334_v38  ;;  %v1391_v62 = vadd.f32 %v1376_v51, %v1375_v20 }
 0x3a8   : > { %v1369_v17 = vadd.f32 %v1360_v36, %v1333_v49 }
 0x3a9   : > { %v1374_v58 = vadd.f32 %v1370_v6, %v5172_v4 }
 0x3aa   : > { %v1373_v31 = vadd.f32 %v1369_v17, %v5172_v4 }
 0x3ab   : > { %v1378_v7 = vmul.f32 %v1374_v58, %v1374_v58 }
 0x3ac   : > { %v1380_v9 = vadd.f32 %v1379_v44, %v1373_v31  ;;  %v1377_v0 = vmul.f32 %v1373_v31, %v1373_v31 }
 0x3ae   : > { %v1381_v22 = vadd.f32 %v1380_v9, %v1374_v58  ;;  %v1392_v13 = vadd.f32 %v1391_v62, %v1377_v0 }
 0x3b0   : > { %1382 = vadd.xlane.f32.xlu0 %v1381_v22  ;;  %v1393_v3 = vadd.f32 %v1392_v13, %v1378_v7 }
 0x3b2   : > { %1394 = vadd.xlane.f32.xlu1 %v1393_v3 }
 0x43d   : > { %v1383_v14 = vpop.xlane.xlu0 %1382 }
 0x43e   : > { %v1384_v41 = vrot.slane %v1383_v14, 4 }
 0x43f   : > { %v1395_v32 = vpop.xlane.xlu1 %1394 }
 0x440   : > { %v1385_v16 = vadd.f32 %v1384_v41, %v1383_v14  ;;  %v1396_v59 = vrot.slane %v1395_v32, 4 }
 0x442   : > { %v1397_v53 = vadd.f32 %v1396_v59, %v1395_v32  ;;  %v1386_v29 = vrot.slane %v1385_v16, 2 }
 0x444   : > { %v1387_v34 = vadd.f32 %v1386_v29, %v1385_v16  ;;  %v1398_v26 = vrot.slane %v1397_v53, 2 }
 0x446   : > { %v1388_v52 = vrot.slane %v1387_v34, 1  ;;  %v1399_v33 = vadd.f32 %v1398_v26, %v1397_v53 }
 0x448   : > { %v1389_v47 = vadd.f32 %v1388_v52, %v1387_v34  ;;  %v1400_v12 = vrot.slane %v1399_v33, 1 }
 0x44a   : > { %3939 = vpush %v1389_v47  ;;  %v1401_v39 = vadd.f32 %v1400_v12, %v1399_v33 }
 0x44c   : > { %3941 = vpush %v1401_v39 }
 0x47b   : > { %s3940_s29 = spop %3939 }
 0x47c   : > { %s1403_s16 = smul.f32 0.00024414063, %s3940_s29  ;;  %s7641_s29 = sld [smem:[#allocation93_spill]] }
 0x47d   : > { %s3942_s2 = spop %3941 }
 0x47e   : > { %s1405_s4 = smul.f32 %s1403_s16, %s1403_s16  ;;  %v1408_v35 = vstv %s1403_s16  ;;  %s7647_s16 = sld [smem:[#allocation65_spill]] }
 0x47f   : > { %s1404_s5 = smul.f32 0.00024414063, %s3942_s2  ;;  %v1409_v25 = vsub.f32 %v1371_v28, %v1408_v35  ;;  %v1410_v49 = vsub.f32 %v1372_v40, %v1408_v35  ;;  %v1411_v6 = vsub.f32 %v1373_v31, %v1408_v35  ;;  %v1412_v17 = vsub.f32 %v1374_v58, %v1408_v35  ;;  %s7648_s2 = sld [smem:[#allocation70_spill]] }
 0x481   : > { %s1406_s18 = ssub.f32 %s1404_s5, %s1405_s4  ;;  %s7651_s4 = sld [smem:[#allocation75_spill]] }
 0x482   : > { %s7656_s5 = sld [smem:[#allocation80_spill]] }
 0x483   : > { %s1407_s21 = smax.f32 %s4357_s14, %s1406_s18  ;;  %s7658_s18 = sld [smem:[#allocation85_spill]] }
 0x484   : > { %s1413_s27 = sadd.f32 1e-05, %s1407_s21  ;;  %s7662_s21 = sld [smem:[#allocation63_spill]] }
 0x486   : > { %v1414_v15 = vstv %s1413_s27  ;;  %s7666_s27 = sld [smem:[#allocation68_spill]] }
 0x487   : > { %4069 = vrsqrt.f32 %v1414_v15 }
 0x491   : > { %v4070_v38 = vpop.eup %4069 }
 0x492   : > { %3943 = vpush %v4070_v38 }
 0x4c3   : > { %s3944_s28 = spop %3943 }
 0x4c4   : > { %s1417_s17 = smul.f32 %s3944_s28, %s7619_s6  ;;  %s7668_s28 = sld [smem:[#allocation73_spill]] }
 0x4c6   : > { %v1418_v36 = vstv %s1417_s17  ;;  %s7670_s17 = sld [smem:[#allocation78_spill]] }
 0x4c7   : > { %v1419_v20 = vmul.f32 %v1418_v36, %v1409_v25  ;;  %v1420_v44 = vmul.f32 %v1418_v36, %v1410_v49  ;;  %v1421_v51 = vmul.f32 %v1418_v36, %v1411_v6  ;;  %v1422_v9 = vmul.f32 %v1418_v36, %v1412_v17 }
 0x4c9   : > { %v1423_v0 = vadd.f32 %v1419_v20, %v5191_v48  ;;  %v1424_v62 = vadd.f32 %v1420_v44, %v5191_v48  ;;  %v1425_v13 = vadd.f32 %v1421_v51, %v5191_v48  ;;  %v1426_v3 = vadd.f32 %v1422_v9, %v5191_v48 }
 0x4ca   : > { %v753_v48 = vstv %s7651_s4 }
 0x4cb   : > { %v1427_v22 = vmax.f32 %v1423_v0, 0.0  ;;  %v1428_v7 = vmax.f32 %v1424_v62, 0.0  ;;  %v1429_v31 = vmax.f32 %v1425_v13, 0.0  ;;  %v1430_v58 = vmax.f32 %v1426_v3, 0.0 }
 0x4cd   : > { %v5315_v28 = vadd.f32 %v1427_v22, %v5198_v8  ;;  %v5318_v40 = vadd.f32 %v1428_v7, %v5201_v50  ;;  %v5329_v8 = vadd.f32 %v1429_v31, %v5212_v63  ;;  %v5332_v50 = vadd.f32 %v1430_v58, %v5215_v57 }
 0x4cf   : > { %7622 = vst [vmem:[#allocation166_spill] sm:$0xff] %v5315_v28  ;;  %7623 = vst [vmem:[#allocation167_spill] sm:$0xff] %v5318_v40  ;;  %1449 = vrot.lane.b32.xlu1 %v5318_v40, %s4356_s23  ;;  %1447 = vrot.lane.b32.xlu0 %v5315_v28, %s4356_s23  ;;  %v1464_v57 = vmul.f32 %v5318_v40, %v5082_v21  ;;  %v1496_v59 = vmul.f32 %v5318_v40, %v5085_v45 }
 0x4d0   : > { %7624 = vst [vmem:[#allocation168_spill] sm:$0xff] %v5329_v8  ;;  %7625 = vst [vmem:[#allocation169_spill] sm:$0xff] %v5332_v50  ;;  %v1520_v34 = vmul.f32 %v5318_v40, %v5088_v54  ;;  %v1463_v26 = vmul.f32 %v5315_v28, %v5082_v21  ;;  %v1495_v52 = vmul.f32 %v5315_v28, %v5085_v45 }
 0x4d1   : > { %v1519_v39 = vmul.f32 %v5315_v28, %v5088_v54  ;;  %v1466_v15 = vmul.f32 %v5332_v50, %v5082_v21  ;;  %v5364_v38 = vmul.f32 %v5332_v50, %v5085_v45  ;;  %v1522_v35 = vmul.f32 %v5332_v50, %v5088_v54 }
 0x4d2   : > { %v1465_v6 = vmul.f32 %v5329_v8, %v5082_v21 }
 0x4d3   : > { %1437 = vrot.lane.b32.xlu1 %v5318_v40, %s4355_s20  ;;  %1435 = vrot.lane.b32.xlu0 %v5315_v28, %s4355_s20  ;;  %v696_v40 = vstv %s7648_s2 }
 0x4d7   : > { %1453 = vrot.lane.b32.xlu1 %v5332_v50, %s4356_s23  ;;  %1451 = vrot.lane.b32.xlu0 %v5329_v8, %s4356_s23 }
 0x4db   : > { %1441 = vrot.lane.b32.xlu1 %v5332_v50, %s4355_s20  ;;  %1439 = vrot.lane.b32.xlu0 %v5329_v8, %s4355_s20 }
 0x541   : > { %v1450_v14 = vpop.permute.xlu1 %1449  ;;  %v1448_v41 = vpop.permute.xlu0 %1447 }
 0x542   : > { %v1456_v63 = vmul.f32 %v4509_v10, %v1450_v14  ;;  %v1455_v32 = vmul.f32 %v4509_v10, %v1448_v41 }
 0x544   : > { %v1460_v16 = vmul.f32 %v1456_v63, %v5079_v37  ;;  %v1516_v53 = vmul.f32 %v1456_v63, %v5095_v56  ;;  %v1459_v29 = vmul.f32 %v1455_v32, %v5079_v37  ;;  %v1515_v33 = vmul.f32 %v1455_v32, %v5095_v56 }
 0x545   : > { %v1438_v47 = vpop.permute.xlu1 %1437  ;;  %v1436_v12 = vpop.permute.xlu0 %1435  ;;  %v1492_v25 = vmul.f32 %v1456_v63, %v5092_v55  ;;  %v1491_v51 = vmul.f32 %v1455_v32, %v5092_v55 }
 0x546   : > { %v1444_v49 = vmul.f32 %v4515_v11, %v1438_v47  ;;  %v1443_v36 = vmul.f32 %v4515_v11, %v1436_v12  ;;  %v1468_v17 = vadd.f32 %v1464_v57, %v1460_v16  ;;  %v1524_v20 = vadd.f32 %v1520_v34, %v1516_v53 }
 0x547   : > { %v1467_v44 = vadd.f32 %v1463_v26, %v1459_v29  ;;  %v1523_v9 = vadd.f32 %v1519_v39, %v1515_v33  ;;  %v1500_v57 = vadd.f32 %v1496_v59, %v1492_v25  ;;  %v1499_v16 = vadd.f32 %v1495_v52, %v1491_v51 }
 0x548   : > { %v1472_v0 = vmul.f32 %v1444_v49, %v5099_v27  ;;  %v1528_v62 = vmul.f32 %v1444_v49, %v5114_v5  ;;  %v1471_v22 = vmul.f32 %v1443_v36, %v5099_v27  ;;  %v1504_v3 = vmul.f32 %v1444_v49, %v5107_v30 }
 0x549   : > { %v1454_v7 = vpop.permute.xlu1 %1453  ;;  %v1452_v13 = vpop.permute.xlu0 %1451  ;;  %v1527_v31 = vmul.f32 %v1443_v36, %v5114_v5  ;;  %v1503_v32 = vmul.f32 %v1443_v36, %v5107_v30  ;;  %v1497_v39 = vmul.f32 %v5329_v8, %v5085_v45  ;;  %v1521_v49 = vmul.f32 %v5329_v8, %v5088_v54 }
 0x54a   : > { %v1458_v21 = vmul.f32 %v4509_v10, %v1454_v7  ;;  %v1457_v58 = vmul.f32 %v4509_v10, %v1452_v13  ;;  %v1476_v14 = vadd.f32 %v1472_v0, %v1468_v17  ;;  %v1532_v41 = vadd.f32 %v1528_v62, %v1524_v20  ;;  %v7665_v10 = vld [vmem:[#allocation161_spill] sm:$0xff] }
 0x54b   : > { %v1475_v63 = vadd.f32 %v1471_v22, %v1467_v44  ;;  %v1531_v53 = vadd.f32 %v1527_v31, %v1523_v9  ;;  %v1508_v52 = vadd.f32 %v1504_v3, %v1500_v57  ;;  %v1507_v20 = vadd.f32 %v1503_v32, %v1499_v16 }
 0x54c   : > { %v1462_v29 = vmul.f32 %v1458_v21, %v5079_v37  ;;  %v1481_v34 = vrot.slane %v1476_v14, 7  ;;  %v1537_v26 = vrot.slane %v1532_v41, 1  ;;  %v1518_v47 = vmul.f32 %v1458_v21, %v5095_v56 }
 0x54d   : > { %v1479_v33 = vrot.slane %v1475_v63, 7  ;;  %v1535_v12 = vrot.slane %v1531_v53, 1  ;;  %v1461_v17 = vmul.f32 %v1457_v58, %v5079_v37  ;;  %v1442_v36 = vpop.permute.xlu1 %1441  ;;  %v1440_v59 = vpop.permute.xlu0 %1439  ;;  %v1494_v44 = vmul.f32 %v1458_v21, %v5092_v55 }
 0x54e   : > { %v1470_v45 = vadd.f32 %v1466_v15, %v1462_v29  ;;  %v1517_v0 = vmul.f32 %v1457_v58, %v5095_v56  ;;  %v1526_v54 = vadd.f32 %v1522_v35, %v1518_v47  ;;  %v1446_v62 = vmul.f32 %v4515_v11, %v1442_v36 }
 0x54f   : > { %v1485_v25 = vsel %vm543_vm8, %v1481_v34, %v1479_v33  ;;  %v1541_v9 = vsel %vm606_vm9, %v1537_v26, %v1535_v12  ;;  %v1483_v37 = vsel %vm543_vm8, %v1479_v33, %v1481_v34  ;;  %v1445_v22 = vmul.f32 %v4515_v11, %v1440_v59 }
 0x550   : > { %v1487_v51 = vmul.f32 %v4543_v18, %v1485_v25  ;;  %v1544_v13 = vmul.f32 %v4549_v19, %v1541_v9  ;;  %v1469_v3 = vadd.f32 %v1465_v6, %v1461_v17  ;;  %v1493_v31 = vmul.f32 %v1457_v58, %v5092_v55 }
 0x551   : > { %v1525_v21 = vadd.f32 %v1521_v49, %v1517_v0  ;;  %v1474_v14 = vmul.f32 %v1446_v62, %v5099_v27  ;;  %v1530_v15 = vmul.f32 %v1446_v62, %v5114_v5  ;;  %v1473_v56 = vmul.f32 %v1445_v22, %v5099_v27 }
 0x552   : > { %v1511_v7 = vadd.f32 %v1507_v20, %v1487_v51  ;;  %v1506_v41 = vmul.f32 %v1446_v62, %v5107_v30  ;;  %v1529_v35 = vmul.f32 %v1445_v22, %v5114_v5  ;;  %v1512_v63 = vadd.f32 %v1508_v52, %v1483_v37 }
 0x553   : > { %v1539_v32 = vsel %vm606_vm9, %v1535_v12, %v1537_v26  ;;  %v1478_v57 = vadd.f32 %v1474_v14, %v1470_v45  ;;  %v1534_v16 = vadd.f32 %v1530_v15, %v1526_v54  ;;  %v1477_v6 = vadd.f32 %v1473_v56, %v1469_v3  ;;  %v5446_v14 = vld [vmem:[%s4778_s19 + $0x8] sm:$0xff]  ;;  %v5450_v15 = vld [vmem:[%s4778_s19] sm:$0xff]  ;;  %v5454_v56 = vld [vmem:[%s4778_s19 + $0x18] sm:$0xff] }
 0x554   : > { %v1505_v55 = vmul.f32 %v1445_v22, %v5107_v30  ;;  %v1502_v58 = vadd.f32 %v5364_v38, %v1494_v44  ;;  %v1533_v53 = vadd.f32 %v1529_v35, %v1525_v21  ;;  %v1547_v29 = vadd.f32 %v1539_v32, %v1511_v7 }
 0x555   : > { %v1501_v34 = vadd.f32 %v1497_v39, %v1493_v31  ;;  %v1482_v33 = vrot.slane %v1478_v57, 7  ;;  %v1538_v27 = vrot.slane %v1534_v16, 1  ;;  %v1480_v47 = vrot.slane %v1477_v6, 7 }
 0x556   : > { %v1510_v49 = vadd.f32 %v1506_v41, %v1502_v58  ;;  %v1536_v17 = vrot.slane %v1533_v53, 1  ;;  %v1548_v5 = vadd.f32 %v1544_v13, %v1512_v63  ;;  %v5419_v39 = vadd.f32 %v1547_v29, %v5172_v4  ;;  %v5458_v41 = vld [vmem:[%s4778_s19 + $0x10] sm:$0xff] }
 0x557   : > { %v1486_v36 = vsel %vm543_vm8, %v1482_v33, %v1480_v47  ;;  %v1509_v26 = vadd.f32 %v1505_v55, %v1501_v34  ;;  %v1484_v12 = vsel %vm543_vm8, %v1480_v47, %v1482_v33  ;;  %v633_v35 = vstv %s7630_s26  ;;  %s7672_s26 = sld [smem:[#allocation83_spill]] }
 0x558   : > { %v1489_v30 = vmul.f32 %v4543_v18, %v1486_v36  ;;  %v1514_v59 = vadd.f32 %v1510_v49, %v1484_v12  ;;  %v1542_v38 = vsel %vm606_vm9, %v1538_v27, %v1536_v17  ;;  %7626 = vst [vmem:[#allocation170_spill] sm:$0xff] %v5419_v39  ;;  %v5423_v20 = vadd.f32 %v1548_v5, %v5172_v4 }
 0x559   : > { %v1546_v52 = vmul.f32 %v4549_v19, %v1542_v38  ;;  %v1540_v44 = vsel %vm606_vm9, %v1536_v17, %v1538_v27  ;;  %v1555_v45 = vmul.f32 %v5419_v39, %v5419_v39  ;;  %v687_v63 = vstv %s7631_s30  ;;  %s7676_s30 = sld [smem:[#allocation67_spill]] }
 0x55a   : > { %v1513_v25 = vadd.f32 %v1509_v26, %v1489_v30  ;;  %7627 = vst [vmem:[#allocation171_spill] sm:$0xff] %v5423_v20  ;;  %v1559_v54 = vadd.f32 %v5423_v20, %v5419_v39  ;;  %v1556_v62 = vmul.f32 %v5423_v20, %v5423_v20  ;;  %v744_v32 = vstv %s7632_s7  ;;  %s7677_s7 = sld [smem:[#allocation72_spill]] }
 0x55b   : > { %v1550_v51 = vadd.f32 %v1546_v52, %v1514_v59  ;;  %v789_v57 = vstv %s7633_s9  ;;  %v846_v16 = vstv %s7634_s10  ;;  %v651_v6 = vstv %s7635_s11  ;;  %s7679_s9 = sld [smem:[#allocation82_spill]]  ;;  %s7680_s10 = sld [smem:[#allocation87_spill]] }
 0x55c   : > { %v1549_v9 = vadd.f32 %v1540_v44, %v1513_v25  ;;  %v1571_v13 = vadd.f32 %v1556_v62, %v1555_v45  ;;  %v705_v55 = vstv %s7636_s12  ;;  %v762_v58 = vstv %s7637_s13  ;;  %s7724_s11 = sld [smem:[#allocation88_spill]]  ;;  %s7727_s12 = sld [smem:[#allocation89_spill]] }
 0x55d   : > { %v5433_v37 = vadd.f32 %v1550_v51, %v5172_v4  ;;  %v807_v53 = vstv %s7638_s15  ;;  %v864_v29 = vstv %s7639_s25  ;;  %v5476_v34 = vstv %s7640_s24 }
 0x55e   : > { %v5430_v0 = vadd.f32 %v1549_v9, %v5172_v4  ;;  %7642 = vst [vmem:[#allocation174_spill] sm:$0xff] %v5476_v34  ;;  %v5479_v33 = vmul.f32 %v633_v35, %v4850_v43  ;;  %v5482_v27 = vmul.f32 %v687_v63, %v4850_v43  ;;  %v5485_v47 = vmul.f32 %v744_v32, %v4850_v43 }
 0x55f   : > { %7629 = vst [vmem:[#allocation173_spill] sm:$0xff] %v5433_v37  ;;  %v1558_v4 = vmul.f32 %v5433_v37, %v5433_v37  ;;  %v5488_v49 = vstv %s7641_s29  ;;  %v5491_v17 = vmul.f32 %v789_v57, %v4850_v43  ;;  %v5494_v5 = vmul.f32 %v846_v16, %v4850_v43 }
 0x560   : > { %7628 = vst [vmem:[#allocation172_spill] sm:$0xff] %v5430_v0  ;;  %v1560_v22 = vadd.f32 %v1559_v54, %v5430_v0  ;;  %v1557_v7 = vmul.f32 %v5430_v0, %v5430_v0  ;;  %7643 = vst [vmem:[#allocation175_spill] sm:$0xff] %v5488_v49  ;;  %v5497_v36 = vmul.f32 %v633_v35, %v4876_v61  ;;  %v642_v8 = vstv %s7647_s16 }
 0x561   : > { %v5500_v26 = vmul.f32 %v687_v63, %v4876_v61  ;;  %v5503_v12 = vmul.f32 %v744_v32, %v4876_v61  ;;  %v5506_v30 = vmul.f32 %v789_v57, %v4876_v61  ;;  %v5509_v59 = vmul.f32 %v846_v16, %v4876_v61 }
 0x562   : > { %v1561_v3 = vadd.f32 %v1560_v22, %v5433_v37  ;;  %v1572_v31 = vadd.f32 %v1571_v13, %v1557_v7  ;;  %v5512_v38 = vmul.f32 %v633_v35, %v4901_v24  ;;  %v5515_v43 = vmul.f32 %v687_v63, %v4901_v24 }
 0x563   : > { %v5518_v52 = vmul.f32 %v744_v32, %v4901_v24  ;;  %v5521_v25 = vmul.f32 %v789_v57, %v4901_v24  ;;  %v5524_v44 = vmul.f32 %v846_v16, %v4901_v24  ;;  %v5527_v51 = vmul.f32 %v633_v35, %v4898_v23 }
 0x564   : > { %1562 = vadd.xlane.f32.xlu0 %v1561_v3  ;;  %v1573_v21 = vadd.f32 %v1572_v31, %v1558_v4  ;;  %v5530_v61 = vmul.f32 %v687_v63, %v4898_v23  ;;  %v5533_v9 = vmul.f32 %v744_v32, %v4898_v23  ;;  %v5537_v45 = vadd.f32 %v5476_v34, %v5051_v1  ;;  %v7659_v32 = vld [vmem:[#allocation162_spill] sm:$0xff] }
 0x565   : > { %v5540_v54 = vmul.f32 %v789_v57, %v4898_v23  ;;  %v5543_v62 = vmul.f32 %v846_v16, %v4898_v23  ;;  %v5546_v24 = vmul.f32 %v651_v6, %v4847_v42  ;;  %v5549_v22 = vmul.f32 %v705_v55, %v4847_v42 }
 0x566   : > { %1574 = vadd.xlane.f32.xlu1 %v1573_v21  ;;  %7644 = vst [vmem:[#allocation176_spill] sm:$0xff] %v5537_v45  ;;  %v5552_v7 = vmul.f32 %v762_v58, %v4847_v42  ;;  %v5555_v13 = vmul.f32 %v807_v53, %v4847_v42  ;;  %v5558_v1 = vmul.f32 %v864_v29, %v4847_v42  ;;  %v1031_v63 = vmin.f32 %v5537_v45, 0.0 }
 0x567   : > { %7645 = vst [vmem:[#allocation177_spill] sm:$0xff] %v5540_v54  ;;  %7646 = vst [vmem:[#allocation178_spill] sm:$0xff] %v5543_v62  ;;  %v5561_v23 = vmul.f32 %v651_v6, %v4873_v60  ;;  %v5564_v3 = vmul.f32 %v705_v55, %v4873_v60  ;;  %v5567_v4 = vmul.f32 %v762_v58, %v4873_v60  ;;  %v798_v0 = vstv %s7656_s5 }
 0x568   : > { %v5570_v31 = vmul.f32 %v807_v53, %v4873_v60  ;;  %v5573_v21 = vmul.f32 %v864_v29, %v4873_v60  ;;  %v5576_v35 = vmul.f32 %v651_v6, %v4913_v46  ;;  %v5579_v42 = vmul.f32 %v705_v55, %v4913_v46 }
 0x569   : > { %7649 = vst [vmem:[#allocation179_spill] sm:$0xff] %v5561_v23  ;;  %7650 = vst [vmem:[#allocation180_spill] sm:$0xff] %v5564_v3  ;;  %v5584_v57 = vadd.f32 %v5476_v34, %v7659_v32  ;;  %v5587_v16 = vmul.f32 %v762_v58, %v4913_v46  ;;  %v5590_v60 = vmul.f32 %v807_v53, %v4913_v46  ;;  %v855_v20 = vstv %s7658_s18  ;;  %s7749_s18 = sld [smem:[#allocation59_spill]] }
 0x56a   : > { %7652 = vst [vmem:[#allocation181_spill] sm:$0xff] %v5567_v4  ;;  %7653 = vst [vmem:[#allocation182_spill] sm:$0xff] %v5570_v31  ;;  %v5593_v11 = vmul.f32 %v864_v29, %v4913_v46  ;;  %v5596_v50 = vmul.f32 %v651_v6, %v7665_v10  ;;  %v5601_v32 = vmul.f32 %v705_v55, %v7665_v10  ;;  %v5621_v34 = vstv %s7662_s21  ;;  %s7750_s21 = sld [smem:[#allocation51_spill]] }
 0x56b   : > { %7654 = vst [vmem:[#allocation183_spill] sm:$0xff] %v5573_v21  ;;  %7655 = vst [vmem:[#allocation184_spill] sm:$0xff] %v5576_v35  ;;  %v5604_v28 = vmul.f32 %v762_v58, %v7665_v10  ;;  %v5608_v37 = vmul.f32 %v807_v53, %v7665_v10  ;;  %v5611_v46 = vmul.f32 %v864_v29, %v7665_v10  ;;  %v5633_v29 = vstv %s7670_s17  ;;  %s7753_s17 = sld [smem:[#allocation54_spill]] }
 0x56c   : > { %7657 = vst [vmem:[#allocation185_spill] sm:$0xff] %v5579_v42  ;;  %7660 = vst [vmem:[#allocation162_spill] sm:$0xff] %v5584_v57  ;;  %v5617_v39 = vmul.f32 %v5488_v49, %v1031_v63  ;;  %v643_v58 = vmul.f32 %v5450_v15, %v642_v8  ;;  %v697_v53 = vmul.f32 %v5450_v15, %v696_v40  ;;  %v5636_v6 = vstv %s7672_s26  ;;  %s7754_s26 = sld [smem:[#allocation53_spill]] }
 0x56d   : > { %7661 = vst [vmem:[#allocation186_spill] sm:$0xff] %v5587_v16  ;;  %7663 = vst [vmem:[#allocation187_spill] sm:$0xff] %v5590_v60  ;;  %v754_v10 = vmul.f32 %v5450_v15, %v753_v48  ;;  %v856_v55 = vmul.f32 %v5450_v15, %v855_v20  ;;  %v644_v49 = vmul.f32 %v5446_v14, %v642_v8  ;;  %v5683_v23 = vstv %s7676_s30  ;;  %s7755_s30 = sld [smem:[#allocation57_spill]] }
 0x56e   : > { %7664 = vst [vmem:[#allocation188_spill] sm:$0xff] %v5593_v11  ;;  %7667 = vst [vmem:[#allocation161_spill] sm:$0xff] %v5596_v50  ;;  %v755_v57 = vmul.f32 %v5446_v14, %v753_v48  ;;  %v5647_v50 = vmul.f32 %v5446_v14, %v855_v20  ;;  %v5650_v11 = vmul.f32 %v5458_v41, %v642_v8  ;;  %v5686_v54 = vstv %s7677_s7  ;;  %s7756_s7 = sld [smem:[#allocation61_spill]] }
 0x56f   : > { %7669 = vst [vmem:[#allocation189_spill] sm:$0xff] %v5601_v32  ;;  %7671 = vst [vmem:[#allocation190_spill] sm:$0xff] %v5604_v28  ;;  %v5625_v28 = vstv %s7666_s27  ;;  %v5644_v32 = vmul.f32 %v5446_v14, %v798_v0  ;;  %v5656_v18 = vmul.f32 %v5458_v41, %v753_v48  ;;  %v5659_v60 = vmul.f32 %v5458_v41, %v798_v0  ;;  %s7751_s27 = sld [smem:[#allocation56_spill]] }
 0x570   : > { %7673 = vst [vmem:[#allocation191_spill] sm:$0xff] %v5608_v37  ;;  %7674 = vst [vmem:[#allocation192_spill] sm:$0xff] %v5611_v46  ;;  %v5629_v37 = vstv %s7668_s28  ;;  %v799_v46 = vmul.f32 %v5450_v15, %v798_v0  ;;  %v5662_v42 = vmul.f32 %v5458_v41, %v855_v20  ;;  %v5665_v35 = vmul.f32 %v5454_v56, %v642_v8  ;;  %s7752_s28 = sld [smem:[#allocation60_spill]] }
 0x571   : > { %7675 = vst [vmem:[#allocation193_spill] sm:$0xff] %v5617_v39  ;;  %v698_v39 = vmul.f32 %v5446_v14, %v696_v40  ;;  %v5668_v31 = vmul.f32 %v5454_v56, %v696_v40  ;;  %v5671_v4 = vmul.f32 %v5454_v56, %v753_v48  ;;  %v5674_v3 = vmul.f32 %v5454_v56, %v798_v0 }
 0x572   : > { %7688 = vst [vmem:[#allocation199_spill] sm:$0xff] %v5686_v54  ;;  %v5692_v48 = vstv %s7679_s9  ;;  %s7760_s9 = sld [smem:[#allocation103_spill]] }
 0x573   : > { %7681 = vst [vmem:[#allocation194_spill] sm:$0xff] %v5668_v31  ;;  %7682 = vst [vmem:[#allocation195_spill] sm:$0xff] %v5671_v4  ;;  %v5695_v4 = vstv %s7680_s10  ;;  %s7761_s10 = sld [smem:[#allocation104_spill]] }
 0x574   : > { %7683 = vst [vmem:[#allocation196_spill] sm:$0xff] %v5674_v3  ;;  %7690 = vst [vmem:[#allocation201_spill] sm:$0xff] %v5692_v48 }
 0x575   : > { %7691 = vst [vmem:[#allocation202_spill] sm:$0xff] %v5695_v4 }
 0x577   : > { %506 = vrot.lane.b32.xlu1 %v5446_v14, %s4358_s8 }
 0x57a   : > { %504 = vrot.lane.b32.xlu0 %v5450_v15, %s4358_s8 }
 0x57b   : > { %510 = vrot.lane.b32.xlu1 %v5454_v56, %s4358_s8 }
 0x57e   : > { %508 = vrot.lane.b32.xlu0 %v5458_v41, %s4358_s8  ;;  %s7678_s8 = sld [smem:[#allocation77_spill]] }
 0x57f   : > { %494 = vrot.lane.b32.xlu1 %v5446_v14, %s4359_s3 }
 0x582   : > { %492 = vrot.lane.b32.xlu0 %v5450_v15, %s4359_s3  ;;  %v5653_v15 = vmul.f32 %v5458_v41, %v696_v40 }
 0x583   : > { %498 = vrot.lane.b32.xlu1 %v5454_v56, %s4359_s3 }
 0x584   : > { %v5689_v40 = vstv %s7678_s8  ;;  %s7759_s8 = sld [smem:[#allocation62_spill]] }
 0x585   : > { %7689 = vst [vmem:[#allocation200_spill] sm:$0xff] %v5689_v40 }
 0x586   : > { %496 = vrot.lane.b32.xlu0 %v5458_v41, %s4359_s3  ;;  %v7686_v41 = vld [vmem:[#allocation33_spill] sm:$0xff] }
 0x587   : > { %7687 = vst [vmem:[#allocation33_spill] sm:$0xff] %v5683_v23 }
 0x5f1   : > { %v1563_v63 = vpop.xlane.xlu0 %1562 }
 0x5f2   : > { %v1564_v45 = vrot.slane %v1563_v63, 4 }
 0x5f3   : > { %v1575_v19 = vpop.xlane.xlu1 %1574 }
 0x5f4   : > { %v1565_v16 = vadd.f32 %v1564_v45, %v1563_v63  ;;  %v1576_v14 = vrot.slane %v1575_v19, 4  ;;  %v5677_v45 = vmul.f32 %v5454_v56, %v855_v20 }
 0x5f5   : > { %v505_v21 = vpop.permute.xlu0 %504 }
 0x5f6   : > { %7684 = vst [vmem:[#allocation197_spill] sm:$0xff] %v5677_v45  ;;  %v5679_v63 = vadd.f32 %v1576_v14, %v1575_v19  ;;  %v512_v2 = vmul.f32 %v7686_v41, %v505_v21  ;;  %v1566_v8 = vrot.slane %v1565_v16, 2 }
 0x5f7   : > { %v507_v62 = vpop.permute.xlu1 %506 }
 0x5f8   : > { %7685 = vst [vmem:[#allocation198_spill] sm:$0xff] %v5679_v63  ;;  %v629_v0 = vmul.f32 %v5621_v34, %v512_v2  ;;  %v683_v20 = vmul.f32 %v5625_v28, %v512_v2  ;;  %v740_v19 = vmul.f32 %v5629_v37, %v512_v2  ;;  %v785_v56 = vmul.f32 %v5633_v29, %v512_v2 }
 0x5f9   : > { %v842_v21 = vmul.f32 %v5636_v6, %v512_v2  ;;  %v513_v14 = vmul.f32 %v7686_v41, %v507_v62  ;;  %v5703_v23 = vadd.f32 %v1566_v8, %v1565_v16  ;;  %v509_v16 = vpop.permute.xlu0 %508 }
 0x5fa   : > { %v638_v48 = vadd.f32 %v5479_v33, %v629_v0  ;;  %v692_v4 = vadd.f32 %v5482_v27, %v683_v20  ;;  %v749_v54 = vadd.f32 %v5485_v47, %v740_v19  ;;  %v794_v45 = vadd.f32 %v5491_v17, %v785_v56 }
 0x5fb   : > { %7692 = vst [vmem:[#allocation203_spill] sm:$0xff] %v5703_v23  ;;  %v851_v3 = vadd.f32 %v5494_v5, %v842_v21  ;;  %v630_v31 = vmul.f32 %v5621_v34, %v513_v14  ;;  %v684_v2 = vmul.f32 %v5625_v28, %v513_v14  ;;  %v741_v62 = vmul.f32 %v5629_v37, %v513_v14  ;;  %v511_v8 = vpop.permute.xlu1 %510 }
 0x5fc   : > { %v647_v23 = vadd.f32 %v643_v58, %v638_v48  ;;  %v701_v40 = vadd.f32 %v697_v53, %v692_v4  ;;  %v758_v63 = vadd.f32 %v754_v10, %v749_v54  ;;  %v803_v33 = vadd.f32 %v799_v46, %v794_v45  ;;  %v7694_v48 = vld [vmem:[#allocation195_spill] sm:$0xff] }
 0x5fd   : > { %v860_v0 = vadd.f32 %v856_v55, %v851_v3  ;;  %v639_v27 = vadd.f32 %v5497_v36, %v630_v31  ;;  %v693_v47 = vadd.f32 %v5500_v26, %v684_v2  ;;  %v750_v17 = vadd.f32 %v5503_v12, %v741_v62 }
 0x5fe   : > { %v786_v5 = vmul.f32 %v5633_v29, %v513_v14  ;;  %v843_v20 = vmul.f32 %v5636_v6, %v513_v14  ;;  %v514_v19 = vmul.f32 %v7686_v41, %v509_v16  ;;  %v515_v56 = vmul.f32 %v7686_v41, %v511_v8  ;;  %v7693_v41 = vld [vmem:[#allocation194_spill] sm:$0xff] }
 0x5ff   : > { %v648_v21 = vadd.f32 %v644_v49, %v639_v27  ;;  %v702_v58 = vadd.f32 %v698_v39, %v693_v47  ;;  %v759_v4 = vadd.f32 %v755_v57, %v750_v17  ;;  %v656_v54 = vadd.f32 %v5546_v24, %v647_v23  ;;  %v495_v8 = vpop.permute.xlu1 %494  ;;  %v7703_v27 = vld [vmem:[#allocation197_spill] sm:$0xff] }
 0x600   : > { %v795_v3 = vadd.f32 %v5506_v30, %v786_v5  ;;  %v852_v36 = vadd.f32 %v5509_v59, %v843_v20  ;;  %v631_v26 = vmul.f32 %v5621_v34, %v514_v19  ;;  %v685_v12 = vmul.f32 %v5625_v28, %v514_v19  ;;  %v7704_v17 = vld [vmem:[#allocation181_spill] sm:$0xff]  ;;  %v7705_v20 = vld [vmem:[#allocation182_spill] sm:$0xff] }
 0x601   : > { %v742_v31 = vmul.f32 %v5629_v37, %v514_v19  ;;  %v787_v46 = vmul.f32 %v5633_v29, %v514_v19  ;;  %v844_v55 = vmul.f32 %v5636_v6, %v514_v19  ;;  %v632_v49 = vmul.f32 %v5621_v34, %v515_v56 }
 0x602   : > { %v804_v39 = vadd.f32 %v5644_v32, %v795_v3  ;;  %v861_v24 = vadd.f32 %v5647_v50, %v852_v36  ;;  %v640_v30 = vadd.f32 %v5512_v38, %v631_v26  ;;  %v694_v59 = vadd.f32 %v5515_v43, %v685_v12  ;;  %v7698_v16 = vld [vmem:[#allocation203_spill] sm:$0xff] }
 0x603   : > { %v751_v23 = vadd.f32 %v5518_v52, %v742_v31  ;;  %v796_v57 = vadd.f32 %v5521_v25, %v787_v46  ;;  %v853_v53 = vadd.f32 %v5524_v44, %v844_v55  ;;  %v641_v10 = vadd.f32 %v5527_v51, %v632_v49  ;;  %v7707_v36 = vld [vmem:[#allocation199_spill] sm:$0xff]  ;;  %v7709_v31 = vld [vmem:[#allocation201_spill] sm:$0xff] }
 0x604   : > { %v649_v45 = vadd.f32 %v5650_v11, %v640_v30  ;;  %v703_v34 = vadd.f32 %v5653_v15, %v694_v59  ;;  %v686_v32 = vmul.f32 %v5625_v28, %v515_v56  ;;  %v743_v50 = vmul.f32 %v5629_v37, %v515_v56  ;;  %v493_v37 = vpop.permute.xlu0 %492  ;;  %v7711_v30 = vld [vmem:[#allocation183_spill] sm:$0xff] }
 0x605   : > { %v760_v38 = vadd.f32 %v5656_v18, %v751_v23  ;;  %v5744_v43 = vadd.f32 %v5659_v60, %v796_v57  ;;  %v5747_v52 = vadd.f32 %v5662_v42, %v853_v53  ;;  %v5750_v25 = vadd.f32 %v5665_v35, %v641_v10 }
 0x606   : > { %v695_v44 = vadd.f32 %v5530_v61, %v686_v32  ;;  %v752_v11 = vadd.f32 %v5533_v9, %v743_v50  ;;  %v788_v51 = vmul.f32 %v5633_v29, %v515_v56  ;;  %v845_v28 = vmul.f32 %v5636_v6, %v515_v56  ;;  %v7695_v9 = vld [vmem:[#allocation177_spill] sm:$0xff]  ;;  %v7696_v29 = vld [vmem:[#allocation178_spill] sm:$0xff]  ;;  %v7697_v6 = vld [vmem:[#allocation42_spill] sm:$0xff] }
 0x607   : > { %v710_v18 = vadd.f32 %v5549_v22, %v701_v40  ;;  %v767_v60 = vadd.f32 %v5552_v7, %v758_v63  ;;  %v812_v15 = vadd.f32 %v5555_v13, %v803_v33  ;;  %v869_v42 = vadd.f32 %v5558_v1, %v860_v0  ;;  %v7699_v40 = vld [vmem:[#allocation179_spill] sm:$0xff]  ;;  %v7700_v63 = vld [vmem:[#allocation32_spill] sm:$0xff]  ;;  %v7706_v56 = vld [vmem:[#allocation33_spill] sm:$0xff] }
 0x608   : > { %v5761_v35 = vadd.f32 %v7693_v41, %v695_v44  ;;  %v5764_v61 = vadd.f32 %v7694_v48, %v752_v11  ;;  %v797_v14 = vadd.f32 %v7695_v9, %v788_v51  ;;  %v854_v2 = vadd.f32 %v7696_v29, %v845_v28  ;;  %v7701_v13 = vld [vmem:[#allocation180_spill] sm:$0xff] }
 0x609   : > { %v500_v62 = vmul.f32 %v7697_v6, %v493_v37  ;;  %v1568_v22 = vrot.slane %v7698_v16, 1  ;;  %v657_v7 = vadd.f32 %v7699_v40, %v648_v21  ;;  %vm673_vm10 = vcmp.lt.s32.totalorder %v7700_v63, 2  ;;  %v7702_v33 = vld [vmem:[#allocation196_spill] sm:$0xff]  ;;  %v7716_v40 = vld [vmem:[#allocation186_spill] sm:$0xff] }
 0x60a   : > { %v711_v1 = vadd.f32 %v7701_v13, %v702_v58  ;;  %v5774_v0 = vadd.f32 %v7702_v33, %v797_v14  ;;  %v5777_v47 = vadd.f32 %v7703_v27, %v854_v2  ;;  %v768_v5 = vadd.f32 %v7704_v17, %v759_v4  ;;  %v7708_v21 = vld [vmem:[#allocation200_spill] sm:$0xff]  ;;  %v7710_v58 = vld [vmem:[#allocation202_spill] sm:$0xff]  ;;  %v7717_v33 = vld [vmem:[#allocation187_spill] sm:$0xff] }
 0x60b   : > { %v813_v19 = vadd.f32 %v7705_v20, %v804_v39  ;;  %v661_v3 = vmul.f32 %v7706_v56, %v500_v62  ;;  %v715_v26 = vmul.f32 %v7707_v36, %v500_v62  ;;  %v772_v12 = vmul.f32 %v7708_v21, %v500_v62  ;;  %v7714_v14 = vld [vmem:[#allocation184_spill] sm:$0xff]  ;;  %v7718_v20 = vld [vmem:[#allocation49_spill] sm:$0xff] }
 0x60c   : > { %v817_v46 = vmul.f32 %v7709_v31, %v500_v62  ;;  %v874_v55 = vmul.f32 %v7710_v58, %v500_v62  ;;  %v1569_v49 = vadd.f32 %v1568_v22, %v7698_v16  ;;  %v870_v59 = vadd.f32 %v7711_v30, %v861_v24  ;;  %v7715_v16 = vld [vmem:[#allocation185_spill] sm:$0xff]  ;;  %v7720_v30 = vld [vmem:[#allocation188_spill] sm:$0xff] }
 0x60d   : > { %v501_v23 = vmul.f32 %v7697_v6, %v495_v8  ;;  %v665_v57 = vadd.f32 %v661_v3, %v656_v54  ;;  %v719_v4 = vadd.f32 %v715_v26, %v710_v18  ;;  %v776_v53 = vadd.f32 %v772_v12, %v767_v60  ;;  %v7719_v3 = vld [vmem:[#allocation52_spill] sm:$0xff] }
 0x60e   : > { %v821_v39 = vadd.f32 %v817_v46, %v812_v15  ;;  %vm886_vm11 = vcmp.lt.s32.totalorder %v7700_v63, 6  ;;  %v878_v10 = vadd.f32 %v874_v55, %v869_v42  ;;  %3945 = vpush %v1569_v49  ;;  %v7712_v42 = vld [vmem:[#allocation198_spill] sm:$0xff]  ;;  %v658_v29 = vadd.f32 %v7714_v14, %v649_v45 }
 0x60f   : > { %v662_v32 = vmul.f32 %v7706_v56, %v501_v23  ;;  %v716_v50 = vmul.f32 %v7707_v36, %v501_v23  ;;  %v773_v44 = vmul.f32 %v7708_v21, %v501_v23  ;;  %v669_v11 = vrot.slane %v665_v57, 6 }
 0x610   : > { %v723_v51 = vrot.slane %v719_v4, 7  ;;  %v825_v28 = vrot.slane %v821_v39, 1  ;;  %v818_v24 = vmul.f32 %v7709_v31, %v501_v23  ;;  %v882_v37 = vrot.slane %v878_v10, 2  ;;  %v7721_v4 = vld [vmem:[#allocation55_spill] sm:$0xff] }
 0x611   : > { %v666_v54 = vadd.f32 %v662_v32, %v657_v7  ;;  %v720_v18 = vadd.f32 %v716_v50, %v711_v1  ;;  %v777_v60 = vadd.f32 %v773_v44, %v768_v5  ;;  %v875_v41 = vmul.f32 %v7710_v58, %v501_v23  ;;  %v7722_v44 = vld [vmem:[#allocation161_spill] sm:$0xff] }
 0x612   : > { %v822_v15 = vadd.f32 %v818_v24, %v813_v19  ;;  %v7713_v48 = vrot.slane %v7712_v42, 2  ;;  %v712_v22 = vadd.f32 %v7715_v16, %v703_v34  ;;  %v5801_v13 = vadd.f32 %v7716_v40, %v760_v38  ;;  %v497_v38 = vpop.permute.xlu0 %496  ;;  %v7729_v40 = vld [vmem:[#allocation176_spill] sm:$0xff] }
 0x613   : > { %v671_v2 = vrot.slane %v666_v54, 6  ;;  %v725_v62 = vrot.slane %v720_v18, 7  ;;  %v879_v7 = vadd.f32 %v875_v41, %v870_v59  ;;  %v814_v27 = vadd.f32 %v7717_v33, %v5744_v43  ;;  %v7725_v54 = vld [vmem:[#allocation58_spill] sm:$0xff] }
 0x614   : > { %v1579_v9 = vadd.f32 %v7713_v48, %v7712_v42  ;;  %v827_v8 = vrot.slane %v822_v15, 1  ;;  %v871_v59 = vadd.f32 %v7720_v30, %v5747_v52  ;;  %v502_v10 = vmul.f32 %v7697_v6, %v497_v38  ;;  %v7726_v42 = vld [vmem:[#allocation162_spill] sm:$0xff] }
 0x615   : > { %v674_v17 = vsel %vm673_vm10, %v669_v11, %v671_v2  ;;  %v676_v5 = vsel %vm673_vm10, %v671_v2, %v669_v11  ;;  %v727_v45 = vsel %vm543_vm8, %v723_v51, %v725_v62  ;;  %v729_v34 = vsel %vm543_vm8, %v725_v62, %v723_v51  ;;  %v7723_v51 = vld [vmem:[#allocation189_spill] sm:$0xff]  ;;  %v499_v2 = vpop.permute.xlu1 %498 }
 0x616   : > { %v1580_v1 = vrot.slane %v1579_v9, 1  ;;  %v678_v19 = vmul.f32 %v7718_v20, %v676_v5  ;;  %v731_v26 = vmul.f32 %v7719_v3, %v729_v34  ;;  %v736_v12 = vadd.f32 %v727_v45, %v674_v17  ;;  %v7733_v17 = vld [vmem:[#allocation175_spill] sm:$0xff] }
 0x617   : > { %v829_v43 = vsel %vm606_vm9, %v825_v28, %v827_v8  ;;  %v831_v46 = vsel %vm606_vm9, %v827_v8, %v825_v28  ;;  %v884_v55 = vrot.slane %v879_v7, 2  ;;  %v659_v11 = vadd.f32 %v7722_v44, %v5750_v25  ;;  %v7731_v7 = vld [vmem:[#allocation193_spill] sm:$0xff] }
 0x618   : > { %v1581_v49 = vadd.f32 %v1580_v1, %v1579_v9  ;;  %v735_v23 = vadd.f32 %v731_v26, %v678_v19  ;;  %v781_v57 = vadd.f32 %v777_v60, %v736_v12  ;;  %v834_v39 = vmul.f32 %v7721_v4, %v831_v46  ;;  %v7737_v46 = vld [vmem:[#allocation174_spill] sm:$0xff] }
 0x619   : > { %v887_v32 = vsel %vm886_vm11, %v882_v37, %v884_v55  ;;  %v889_v50 = vsel %vm886_vm11, %v884_v55, %v882_v37  ;;  %v713_v52 = vadd.f32 %v7723_v51, %v5761_v35  ;;  %v663_v60 = vmul.f32 %v7706_v56, %v502_v10  ;;  %v7728_v35 = vld [vmem:[#allocation190_spill] sm:$0xff] }
 0x61a   : > { %3947 = vpush %v1581_v49  ;;  %v780_v28 = vadd.f32 %v776_v53, %v735_v23  ;;  %v838_v24 = vadd.f32 %v834_v39, %v781_v57  ;;  %v892_v18 = vmul.f32 %v7725_v54, %v889_v50  ;;  %v717_v15 = vmul.f32 %v7707_v36, %v502_v10 }
 0x61b   : > { %v819_v41 = vmul.f32 %v7709_v31, %v502_v10  ;;  %v876_v37 = vmul.f32 %v7710_v58, %v502_v10  ;;  %v1028_v48 = vmax.f32 %v7726_v42, 0.0  ;;  %v667_v14 = vadd.f32 %v663_v60, %v658_v29  ;;  %v7734_v29 = vld [vmem:[#allocation191_spill] sm:$0xff] }
 0x61c   : > { %v837_v25 = vadd.f32 %v829_v43, %v780_v28  ;;  %v896_v9 = vadd.f32 %v892_v18, %v838_v24  ;;  %v770_v53 = vadd.f32 %v7728_v35, %v5764_v61  ;;  %v721_v62 = vadd.f32 %v717_v15, %v712_v22  ;;  %v7735_v61 = vld [vmem:[#allocation192_spill] sm:$0xff] }
 0x61d   : > { %v5840_v16 = vstv %s7724_s11  ;;  %v7730_v8 = vmax.f32 %v7729_v40, 0.0  ;;  %v7732_v33 = vmin.f32 %v7726_v42, 0.0  ;;  %v823_v34 = vadd.f32 %v819_v41, %v814_v27  ;;  %v7736_v43 = vld [vmem:[#allocation164_spill] sm:$0xff]  ;;  %s7762_s11 = sld [smem:[#allocation105_spill]] }
 0x61e   : > { %v895_v45 = vadd.f32 %v887_v32, %v837_v25  ;;  %v815_v38 = vadd.f32 %v7734_v29, %v5774_v0  ;;  %v872_v19 = vadd.f32 %v7735_v61, %v5777_v47  ;;  %v880_v22 = vadd.f32 %v876_v37, %v871_v59 }
 0x61f   : > { %v5845_v1 = vadd.f32 %v7731_v7, %v7730_v8  ;;  %v1037_v5 = vmul.f32 %v7733_v17, %v7732_v33  ;;  %v503_v26 = vmul.f32 %v7697_v6, %v499_v2  ;;  %v5856_v12 = vstv %s7727_s12  ;;  %s7763_s12 = sld [smem:[#allocation109_spill]] }
 0x620   : > { %v5860_v55 = vadd.f32 %v7737_v46, %v7736_v43  ;;  %v670_v49 = vrot.slane %v667_v14, 6  ;;  %v774_v30 = vmul.f32 %v7708_v21, %v502_v10  ;;  %v900_v27 = vadd.f32 %v5840_v16, %v895_v45 }
 0x621   : > { %v901_v23 = vadd.f32 %v5840_v16, %v896_v9  ;;  %v724_v0 = vrot.slane %v721_v62, 7  ;;  %v664_v57 = vmul.f32 %v7706_v56, %v503_v26  ;;  %v718_v47 = vmul.f32 %v7707_v36, %v503_v26 }
 0x622   : > { %v820_v6 = vmul.f32 %v7709_v31, %v503_v26  ;;  %v826_v59 = vrot.slane %v823_v34, 1  ;;  %v775_v39 = vmul.f32 %v7708_v21, %v503_v26  ;;  %v877_v32 = vmul.f32 %v7710_v58, %v503_v26 }
 0x623   : > { %v908_v50 = vmin.f32 %v900_v27, 0.0  ;;  %v883_v44 = vrot.slane %v880_v22, 2  ;;  %v668_v51 = vadd.f32 %v664_v57, %v659_v11  ;;  %v722_v10 = vadd.f32 %v718_v47, %v713_v52 }
 0x624   : > { %v824_v28 = vadd.f32 %v820_v6, %v815_v38  ;;  %v881_v24 = vadd.f32 %v877_v32, %v872_v19  ;;  %v904_v18 = vmax.f32 %v900_v27, 0.0  ;;  %v909_v15 = vmin.f32 %v901_v23, 0.0  ;;  %v7738_v19 = vld [vmem:[#allocation163_spill] sm:$0xff] }
 0x625   : > { %v913_v60 = vmul.f32 %v5856_v12, %v908_v50  ;;  %v672_v56 = vrot.slane %v668_v51, 6  ;;  %v726_v41 = vrot.slane %v722_v10, 7  ;;  %v905_v37 = vmax.f32 %v901_v23, 0.0 }
 0x626   : > { %v828_v36 = vrot.slane %v824_v28, 1  ;;  %v779_v31 = vadd.f32 %v775_v39, %v770_v53  ;;  %v885_v25 = vrot.slane %v881_v24, 2  ;;  %v914_v21 = vmul.f32 %v5856_v12, %v909_v15  ;;  %v7740_v15 = vld [vmem:[#allocation171_spill] sm:$0xff] }
 0x627   : > { %v5871_v9 = vadd.f32 %v913_v60, %v904_v18  ;;  %v675_v58 = vsel %vm673_vm10, %v670_v49, %v672_v56  ;;  %v677_v11 = vsel %vm673_vm10, %v672_v56, %v670_v49  ;;  %v728_v52 = vsel %vm543_vm8, %v724_v0, %v726_v41  ;;  %v7739_v18 = vld [vmem:[#allocation170_spill] sm:$0xff] }
 0x628   : > { %v730_v14 = vsel %vm543_vm8, %v726_v41, %v724_v0  ;;  %v680_v35 = vmul.f32 %v7718_v20, %v677_v11  ;;  %v738_v2 = vadd.f32 %v728_v52, %v675_v58  ;;  %v830_v62 = vsel %vm606_vm9, %v826_v59, %v828_v36 }
 0x629   : > { %v733_v53 = vmul.f32 %v7719_v3, %v730_v14  ;;  %v832_v40 = vsel %vm606_vm9, %v828_v36, %v826_v59  ;;  %v888_v8 = vsel %vm886_vm11, %v883_v44, %v885_v25  ;;  %v890_v7 = vsel %vm886_vm11, %v885_v25, %v883_v44  ;;  %v7742_v25 = vld [vmem:[#allocation173_spill] sm:$0xff] }
 0x62a   : > { %v1044_v33 = vsub.f32 %v5871_v9, %v5845_v1  ;;  %v778_v20 = vadd.f32 %v774_v30, %v5801_v13  ;;  %v783_v34 = vadd.f32 %v779_v31, %v738_v2  ;;  %v836_v29 = vmul.f32 %v7721_v4, %v832_v40 }
 0x62b   : > { %v737_v45 = vadd.f32 %v733_v53, %v680_v35  ;;  %v918_v38 = vadd.f32 %v914_v21, %v905_v37  ;;  %v1041_v61 = vadd.f32 %v1037_v5, %v1028_v48  ;;  %v1025_v22 = vadd.f32 %v7737_v46, %v7738_v19  ;;  %v7741_v37 = vld [vmem:[#allocation172_spill] sm:$0xff]  ;;  %v7743_v35 = vld [vmem:[#allocation165_spill] sm:$0xff] }
 0x62c   : > { %v840_v43 = vadd.f32 %v836_v29, %v783_v34  ;;  %v894_v49 = vmul.f32 %v7725_v54, %v890_v7  ;;  %v1034_v13 = vmin.f32 %v5860_v55, 0.0  ;;  %v1030_v59 = vmax.f32 %v5860_v55, 0.0 }
 0x62d   : > { %v782_v26 = vadd.f32 %v778_v20, %v737_v45  ;;  %v1045_v27 = vsub.f32 %v918_v38, %v1041_v61  ;;  %v1033_v30 = vmin.f32 %v1025_v22, 0.0  ;;  %v1029_v39 = vmax.f32 %v1025_v22, 0.0  ;;  %v7745_v45 = vld [vmem:[#allocation167_spill] sm:$0xff] }
 0x62e   : > { %v898_v1 = vadd.f32 %v894_v49, %v840_v43  ;;  %v1039_v48 = vmul.f32 %v7733_v17, %v1034_v13  ;;  %v1048_v36 = vmul.f32 0.5, %v1044_v33  ;;  %v7744_v33 = vld [vmem:[#allocation166_spill] sm:$0xff]  ;;  %v7747_v49 = vld [vmem:[#allocation169_spill] sm:$0xff] }
 0x62f   : > { %v839_v23 = vadd.f32 %v830_v62, %v782_v26  ;;  %v1038_v5 = vmul.f32 %v7733_v17, %v1033_v30  ;;  %v1049_v11 = vmul.f32 0.5, %v1045_v27  ;;  %v7746_v26 = vld [vmem:[#allocation168_spill] sm:$0xff] }
 0x630   : > { %v903_v57 = vadd.f32 %v5840_v16, %v898_v1  ;;  %v1043_v51 = vadd.f32 %v1039_v48, %v1030_v59 }
 0x631   : > { %v897_v0 = vadd.f32 %v888_v8, %v839_v23  ;;  %v1042_v28 = vadd.f32 %v1038_v5, %v1029_v39 }
 0x632   : > { %v911_v42 = vmin.f32 %v903_v57, 0.0  ;;  %v907_v6 = vmax.f32 %v903_v57, 0.0 }
 0x633   : > { %v902_v47 = vadd.f32 %v5840_v16, %v897_v0 }
 0x634   : > { %v916_v54 = vmul.f32 %v5856_v12, %v911_v42 }
 0x635   : > { %v910_v46 = vmin.f32 %v902_v47, 0.0  ;;  %v906_v32 = vmax.f32 %v902_v47, 0.0 }
 0x636   : > { %v920_v44 = vadd.f32 %v916_v54, %v907_v6  ;;  %v5963_v54 = vstv %s7749_s18  ;;  %s7775_s18 = sld [smem:[#allocation96_spill]] }
 0x637   : > { %v915_v50 = vmul.f32 %v5856_v12, %v910_v46 }
 0x638   : > { %v1047_v16 = vsub.f32 %v920_v44, %v1043_v51 }
 0x639   : > { %v919_v10 = vadd.f32 %v915_v50, %v906_v32  ;;  %v5966_v32 = vstv %s7750_s21  ;;  %v7757_v50 = vld [vmem:[#allocation36_spill] sm:$0xff]  ;;  %s7776_s21 = sld [smem:[#allocation99_spill]] }
 0x63a   : > { %v1051_v29 = vmul.f32 0.5, %v1047_v16  ;;  %v5977_v16 = vstv %s7753_s17  ;;  %s7779_s17 = sld [smem:[#allocation159_spill]] }
 0x63b   : > { %v1046_v24 = vsub.f32 %v919_v10, %v1042_v28  ;;  %v5971_v10 = vstv %s7751_s27  ;;  %v5974_v28 = vstv %s7752_s28  ;;  %s7777_s27 = sld [smem:[#allocation102_spill]]  ;;  %s7778_s28 = sld [smem:[#allocation112_spill]] }
 0x63d   : > { %v1050_v38 = vmul.f32 0.5, %v1046_v24 }
 0x63f   : > { %s3946_s13 = spop %3945 }
 0x640   : > { %s1583_s15 = smul.f32 0.00024414063, %s3946_s13  ;;  %s7764_s13 = sld [smem:[#allocation110_spill]] }
 0x642   : > { %s1585_s25 = smul.f32 %s1583_s15, %s1583_s15  ;;  %v1588_v12 = vstv %s1583_s15  ;;  %s7765_s15 = sld [smem:[#allocation111_spill]] }
 0x643   : > { %v1589_v60 = vsub.f32 %v7739_v18, %v1588_v12  ;;  %v1590_v56 = vsub.f32 %v7740_v15, %v1588_v12  ;;  %v1591_v31 = vsub.f32 %v7741_v37, %v1588_v12  ;;  %v1592_v9 = vsub.f32 %v7742_v25, %v1588_v12 }
 0x644   : > { %v5990_v15 = vstv %s7756_s7  ;;  %s7784_s7 = sld [smem:[#allocation114_spill]] }
 0x64b   : > { %s3948_s24 = spop %3947 }
 0x64c   : > { %s1584_s3 = smul.f32 0.00024414063, %s3948_s24  ;;  %s7767_s24 = sld [smem:[#allocation107_spill]] }
 0x64e   : > { %s1586_s29 = ssub.f32 %s1584_s3, %s1585_s25  ;;  %s7766_s25 = sld [smem:[#allocation106_spill]] }
 0x64f   : > { %s7768_s3 = sld [smem:[#allocation108_spill]] }
 0x650   : > { %s1587_s16 = smax.f32 %s4357_s14, %s1586_s29  ;;  %s7769_s29 = sld [smem:[#allocation95_spill]] }
 0x651   : > { %s1593_s2 = sadd.f32 1e-05, %s1587_s16  ;;  %s7770_s16 = sld [smem:[#allocation98_spill]] }
 0x653   : > { %v1594_v17 = vstv %s1593_s2  ;;  %s7771_s2 = sld [smem:[#allocation101_spill]] }
 0x654   : > { %4071 = vrsqrt.f32 %v1594_v17 }
 0x655   : > { %4073 = vtanh.f32 %v1048_v36 }
 0x656   : > { %4075 = vtanh.f32 %v1049_v11 }
 0x657   : > { %4077 = vtanh.f32 %v1051_v29 }
 0x658   : > { %4079 = vtanh.f32 %v1050_v38 }
 0x65e   : > { %v4072_v55 = vpop.eup %4071 }
 0x65f   : > { %3949 = vpush %v4072_v55  ;;  %v4074_v22 = vpop.eup %4073  ;;  %v5982_v55 = vstv %s7754_s26  ;;  %s7780_s26 = sld [smem:[#allocation160_spill]] }
 0x660   : > { %v4076_v23 = vpop.eup %4075  ;;  %v1056_v1 = vadd.f32 1.0, %v4074_v22 }
 0x661   : > { %v1057_v13 = vadd.f32 1.0, %v4076_v23  ;;  %v4078_v30 = vpop.eup %4077 }
 0x662   : > { %v5939_v0 = vmul.f32 0.5, %v1056_v1  ;;  %v4080_v47 = vpop.eup %4079  ;;  %v1059_v48 = vadd.f32 1.0, %v4078_v30 }
 0x663   : > { %v5941_v57 = vmul.f32 0.5, %v1057_v13  ;;  %v1058_v42 = vadd.f32 1.0, %v4080_v47 }
 0x664   : > { %v5953_v46 = vmul.f32 0.5, %v1059_v48 }
 0x665   : > { %v5951_v5 = vmul.f32 0.5, %v1058_v42 }
 0x690   : > { %s3950_s4 = spop %3949 }
 0x691   : > { %s1597_s5 = smul.f32 %s3950_s4, %s7619_s6  ;;  %s7748_s6 = sld [smem:[#allocation50_spill]] }
 0x692   : > { %s7772_s4 = sld [smem:[#allocation94_spill]] }
 0x693   : > { %v1598_v41 = vstv %s1597_s5  ;;  %s7773_s5 = sld [smem:[#allocation97_spill]] }
 0x694   : > { %v1599_v21 = vmul.f32 %v1598_v41, %v1589_v60  ;;  %v1600_v58 = vmul.f32 %v1598_v41, %v1590_v56  ;;  %v1601_v52 = vmul.f32 %v1598_v41, %v1591_v31  ;;  %v1602_v14 = vmul.f32 %v1598_v41, %v1592_v9 }
 0x695   : > { %v5987_v60 = vstv %s7755_s30  ;;  %s7783_s30 = sld [smem:[#allocation113_spill]] }
 0x696   : > { %v1603_v53 = vadd.f32 %v1599_v21, %v7743_v35  ;;  %v1604_v2 = vadd.f32 %v1600_v58, %v7743_v35  ;;  %v1605_v8 = vadd.f32 %v1601_v52, %v7743_v35  ;;  %v1606_v7 = vadd.f32 %v1602_v14, %v7743_v35  ;;  %v7758_v58 = vld [vmem:[#allocation39_spill] sm:$0xff] }
 0x697   : > { %v5960_v6 = vstv %s7748_s6  ;;  %s7774_s6 = sld [smem:[#allocation100_spill]] }
 0x698   : > { %v1607_v62 = vmax.f32 %v1603_v53, 0.0  ;;  %v1608_v40 = vmax.f32 %v1604_v2, 0.0  ;;  %v1609_v61 = vmax.f32 %v1605_v8, 0.0  ;;  %v1610_v19 = vmax.f32 %v1606_v7, 0.0 }
 0x69a   : > { %v1611_v20 = vadd.f32 %v1607_v62, %v7744_v33  ;;  %v1612_v34 = vadd.f32 %v1608_v40, %v7745_v45  ;;  %v5926_v43 = vadd.f32 %v1609_v61, %v7746_v26  ;;  %v5929_v27 = vadd.f32 %v1610_v19, %v7747_v49 }
 0x69c   : > { %1629 = vrot.lane.b32.xlu1 %v1612_v34, %s4356_s23  ;;  %1627 = vrot.lane.b32.xlu0 %v1611_v20, %s4356_s23  ;;  %v1645_v12 = vmul.f32 %v5966_v32, %v1611_v20  ;;  %v1680_v36 = vmul.f32 %v5971_v10, %v1611_v20  ;;  %v1707_v37 = vmul.f32 %v5974_v28, %v1611_v20 }
 0x69d   : > { %v1646_v31 = vmul.f32 %v5966_v32, %v1612_v34  ;;  %v1681_v9 = vmul.f32 %v5971_v10, %v1612_v34  ;;  %v1708_v21 = vmul.f32 %v5974_v28, %v1612_v34  ;;  %v1647_v13 = vmul.f32 %v5966_v32, %v5926_v43 }
 0x6a0   : > { %1617 = vrot.lane.b32.xlu1 %v1612_v34, %s4355_s20  ;;  %1615 = vrot.lane.b32.xlu0 %v1611_v20, %s4355_s20 }
 0x6a4   : > { %1633 = vrot.lane.b32.xlu1 %v5929_v27, %s4356_s23  ;;  %1631 = vrot.lane.b32.xlu0 %v5926_v43, %s4356_s23 }
 0x6a8   : > { %1621 = vrot.lane.b32.xlu1 %v5929_v27, %s4355_s20  ;;  %1619 = vrot.lane.b32.xlu0 %v5926_v43, %s4355_s20 }
 0x6ac   : > { %1898 = vrot.lane.b32.xlu0 %v5939_v0, %s4356_s23  ;;  %1900 = vrot.lane.b32.xlu1 %v5941_v57, %s4356_s23 }
 0x6b0   : > { %1886 = vrot.lane.b32.xlu0 %v5939_v0, %s4355_s20  ;;  %1888 = vrot.lane.b32.xlu1 %v5941_v57, %s4355_s20 }
 0x6b4   : > { %1902 = vrot.lane.b32.xlu0 %v5951_v5, %s4356_s23  ;;  %1904 = vrot.lane.b32.xlu1 %v5953_v46, %s4356_s23 }
 0x70e   : > { %v1628_v59 = vpop.permute.xlu0 %1627  ;;  %v1630_v39 = vpop.permute.xlu1 %1629 }
 0x70f   : > { %v1635_v44 = vmul.f32 %v7757_v50, %v1628_v59  ;;  %v1636_v51 = vmul.f32 %v7757_v50, %v1630_v39 }
 0x711   : > { %v1640_v24 = vmul.f32 %v5960_v6, %v1635_v44  ;;  %v1702_v17 = vmul.f32 %v5963_v54, %v1635_v44  ;;  %v1641_v18 = vmul.f32 %v5960_v6, %v1636_v51  ;;  %v1703_v25 = vmul.f32 %v5963_v54, %v1636_v51 }
 0x712   : > { %v1616_v56 = vpop.permute.xlu0 %1615  ;;  %v1618_v41 = vpop.permute.xlu1 %1617  ;;  %v1675_v35 = vmul.f32 %v5977_v16, %v1635_v44  ;;  %v1676_v2 = vmul.f32 %v5977_v16, %v1636_v51  ;;  %v1709_v51 = vmul.f32 %v5974_v28, %v5926_v43 }
 0x713   : > { %v1623_v11 = vmul.f32 %v7758_v58, %v1616_v56  ;;  %v1624_v52 = vmul.f32 %v7758_v58, %v1618_v41  ;;  %v1649_v14 = vadd.f32 %v1645_v12, %v1640_v24  ;;  %v1711_v53 = vadd.f32 %v1707_v37, %v1702_v17 }
 0x714   : > { %v1650_v62 = vadd.f32 %v1646_v31, %v1641_v18  ;;  %v1712_v45 = vadd.f32 %v1708_v21, %v1703_v25  ;;  %v1684_v49 = vadd.f32 %v1680_v36, %v1675_v35  ;;  %v1685_v23 = vadd.f32 %v1681_v9, %v1676_v2 }
 0x715   : > { %v1654_v40 = vmul.f32 %v5982_v55, %v1623_v11  ;;  %v1716_v8 = vmul.f32 %v5990_v15, %v1623_v11  ;;  %v1655_v7 = vmul.f32 %v5982_v55, %v1624_v52  ;;  %v1689_v34 = vmul.f32 %v5987_v60, %v1623_v11 }
 0x716   : > { %v1632_v33 = vpop.permute.xlu0 %1631  ;;  %v1634_v20 = vpop.permute.xlu1 %1633  ;;  %v1690_v29 = vmul.f32 %v5987_v60, %v1624_v52  ;;  %v1717_v38 = vmul.f32 %v5990_v15, %v1624_v52  ;;  %v1648_v21 = vmul.f32 %v5966_v32, %v5929_v27  ;;  %v1683_v35 = vmul.f32 %v5971_v10, %v5929_v27 }
 0x717   : > { %v1658_v61 = vadd.f32 %v1654_v40, %v1649_v14  ;;  %v1720_v19 = vadd.f32 %v1716_v8, %v1711_v53  ;;  %v1659_v22 = vadd.f32 %v1655_v7, %v1650_v62  ;;  %v1637_v26 = vmul.f32 %v7757_v50, %v1632_v33 }
 0x718   : > { %v1721_v1 = vadd.f32 %v1717_v38, %v1712_v45  ;;  %v1638_v48 = vmul.f32 %v7757_v50, %v1634_v20  ;;  %v1693_v59 = vadd.f32 %v1689_v34, %v1684_v49  ;;  %v1694_v39 = vadd.f32 %v1690_v29, %v1685_v23 }
 0x719   : > { %v1662_v30 = vrot.slane %v1658_v61, 7  ;;  %v1724_v47 = vrot.slane %v1720_v19, 1  ;;  %v1664_v42 = vrot.slane %v1659_v22, 7  ;;  %v1642_v12 = vmul.f32 %v5960_v6, %v1637_v26 }
 0x71a   : > { %v1726_v44 = vrot.slane %v1721_v1, 1  ;;  %v1704_v18 = vmul.f32 %v5963_v54, %v1637_v26  ;;  %v1620_v56 = vpop.permute.xlu0 %1619  ;;  %v1622_v41 = vpop.permute.xlu1 %1621  ;;  %v1643_v11 = vmul.f32 %v5960_v6, %v1638_v48  ;;  %v1705_v52 = vmul.f32 %v5963_v54, %v1638_v48 }
 0x71b   : > { %v1666_v24 = vsel %vm543_vm8, %v1662_v30, %v1664_v42  ;;  %v1668_v17 = vsel %vm543_vm8, %v1664_v42, %v1662_v30  ;;  %v1625_v53 = vmul.f32 %v7758_v58, %v1620_v56  ;;  %v1626_v2 = vmul.f32 %v7758_v58, %v1622_v41 }
 0x71c   : > { %v1670_v36 = vmul.f32 %v7719_v3, %v1668_v17  ;;  %v1698_v37 = vadd.f32 %v1694_v39, %v1666_v24  ;;  %v1728_v31 = vsel %vm606_vm9, %v1724_v47, %v1726_v44  ;;  %v1730_v25 = vsel %vm606_vm9, %v1726_v44, %v1724_v47 }
 0x71d   : > { %v1733_v9 = vmul.f32 %v7721_v4, %v1730_v25  ;;  %v1651_v40 = vadd.f32 %v1647_v13, %v1642_v12  ;;  %v1713_v8 = vadd.f32 %v1709_v51, %v1704_v18  ;;  %v1710_v7 = vmul.f32 %v5974_v28, %v5929_v27 }
 0x71e   : > { %v1697_v14 = vadd.f32 %v1693_v59, %v1670_v36  ;;  %v1678_v32 = vmul.f32 %v5977_v16, %v1638_v48  ;;  %v1656_v6 = vmul.f32 %v5982_v55, %v1625_v53  ;;  %v1718_v54 = vmul.f32 %v5990_v15, %v1625_v53 }
 0x71f   : > { %v1737_v62 = vadd.f32 %v1733_v9, %v1698_v37  ;;  %v1652_v20 = vadd.f32 %v1648_v21, %v1643_v11  ;;  %v1714_v45 = vadd.f32 %v1710_v7, %v1705_v52  ;;  %v1657_v34 = vmul.f32 %v5982_v55, %v1626_v2 }
 0x720   : > { %v1736_v33 = vadd.f32 %v1728_v31, %v1697_v14  ;;  %v1719_v29 = vmul.f32 %v5990_v15, %v1626_v2  ;;  %v1677_v38 = vmul.f32 %v5977_v16, %v1637_v26  ;;  %v1660_v61 = vadd.f32 %v1656_v6, %v1651_v40 }
 0x721   : > { %v1722_v19 = vadd.f32 %v1718_v54, %v1713_v8  ;;  %v1692_v27 = vmul.f32 %v5987_v60, %v1626_v2  ;;  %v1682_v28 = vmul.f32 %v5971_v10, %v5926_v43  ;;  %v1661_v22 = vadd.f32 %v1657_v34, %v1652_v20 }
 0x722   : > { %v1723_v49 = vadd.f32 %v1719_v29, %v1714_v45  ;;  %v1687_v23 = vadd.f32 %v1683_v35, %v1678_v32  ;;  %v1663_v1 = vrot.slane %v1660_v61, 7  ;;  %v1691_v13 = vmul.f32 %v5987_v60, %v1625_v53  ;;  %v1901_v32 = vpop.permute.xlu1 %1900 }
 0x723   : > { %v1725_v30 = vrot.slane %v1722_v19, 1  ;;  %v1665_v47 = vrot.slane %v1661_v22, 7  ;;  %v1740_v42 = vstv %s7759_s8  ;;  %v1686_v15 = vadd.f32 %v1682_v28, %v1677_v38  ;;  %s7786_s8 = sld [smem:[#allocation115_spill]] }
 0x724   : > { %v1727_v55 = vrot.slane %v1723_v49, 1  ;;  %v1696_v48 = vadd.f32 %v1692_v27, %v1687_v23  ;;  %v1742_v51 = vadd.f32 %v1740_v42, %v1737_v62  ;;  %v1741_v37 = vadd.f32 %v1740_v42, %v1736_v33  ;;  %v1899_v33 = vpop.permute.xlu0 %1898 }
 0x725   : > { %v1667_v16 = vsel %vm543_vm8, %v1663_v1, %v1665_v47  ;;  %v1669_v26 = vsel %vm543_vm8, %v1665_v47, %v1663_v1  ;;  %v1695_v59 = vadd.f32 %v1691_v13, %v1686_v15  ;;  %v1906_v20 = vmul.f32 %v7757_v50, %v1899_v33 }
 0x726   : > { %v1729_v43 = vsel %vm606_vm9, %v1725_v30, %v1727_v55  ;;  %v1731_v10 = vsel %vm606_vm9, %v1727_v55, %v1725_v30  ;;  %v1672_v60 = vmul.f32 %v7719_v3, %v1669_v26  ;;  %v1700_v39 = vadd.f32 %v1696_v48, %v1667_v16  ;;  %v1889_v54 = vpop.permute.xlu1 %1888 }
 0x727   : > { %v1735_v44 = vmul.f32 %v7721_v4, %v1731_v10  ;;  %v1746_v56 = vmul.f32 0.5, %v1742_v51  ;;  %v1745_v25 = vmul.f32 0.5, %v1741_v37  ;;  %v1907_v45 = vmul.f32 %v7757_v50, %v1901_v32 }
 0x728   : > { %v1699_v24 = vadd.f32 %v1695_v59, %v1672_v60  ;;  %v1887_v6 = vpop.permute.xlu0 %1886  ;;  %v6088_v34 = vstv %s7760_s9  ;;  %v1895_v38 = vmul.f32 %v7758_v58, %v1889_v54  ;;  %v1915_v61 = vstv %s7761_s10  ;;  %s7788_s9 = sld [smem:[#allocation119_spill]]  ;;  %s7789_s10 = sld [smem:[#allocation120_spill]] }
 0x729   : > { %v1739_v17 = vadd.f32 %v1735_v44, %v1700_v39  ;;  %4081 = vtanh.f32 %v1746_v56  ;;  %v1894_v29 = vmul.f32 %v7758_v58, %v1887_v6  ;;  %v6094_v19 = vstv %s7762_s11  ;;  %s7790_s11 = sld [smem:[#allocation121_spill]] }
 0x72a   : > { %v1738_v12 = vadd.f32 %v1729_v43, %v1699_v24  ;;  %v1972_v27 = vstv %s7763_s12  ;;  %v1911_v28 = vmul.f32 %v6088_v34, %v1906_v20  ;;  %v1912_v22 = vmul.f32 %v6088_v34, %v1907_v45  ;;  %s7791_s12 = sld [smem:[#allocation116_spill]] }
 0x72b   : > { %v1744_v18 = vadd.f32 %v1740_v42, %v1739_v17  ;;  %v1977_v49 = vstv %s7764_s13  ;;  %v1916_v23 = vmul.f32 %v1915_v61, %v5939_v0  ;;  %v1917_v1 = vmul.f32 %v1915_v61, %v5941_v57  ;;  %s7792_s13 = sld [smem:[#allocation117_spill]] }
 0x72c   : > { %v1743_v36 = vadd.f32 %v1740_v42, %v1738_v12  ;;  %v6103_v13 = vstv %s7765_s15  ;;  %v1925_v30 = vmul.f32 %v6094_v19, %v1894_v29  ;;  %v1926_v47 = vmul.f32 %v6094_v19, %v1895_v38  ;;  %v1903_v37 = vpop.permute.xlu0 %1902  ;;  %s7793_s15 = sld [smem:[#allocation118_spill]] }
 0x72d   : > { %v1748_v41 = vmul.f32 0.5, %v1744_v18  ;;  %v1973_v55 = vmul.f32 %v1972_v27, %v1906_v20  ;;  %v1974_v42 = vmul.f32 %v1972_v27, %v1907_v45  ;;  %v1920_v15 = vadd.f32 %v1916_v23, %v1911_v28 }
 0x72e   : > { %v1747_v31 = vmul.f32 0.5, %v1743_v36  ;;  %v1921_v48 = vadd.f32 %v1917_v1, %v1912_v22  ;;  %v1978_v16 = vmul.f32 %v1977_v49, %v5939_v0  ;;  %v1979_v26 = vmul.f32 %v1977_v49, %v5941_v57 }
 0x72f   : > { %4083 = vtanh.f32 %v1748_v41  ;;  %v1987_v43 = vmul.f32 %v6103_v13, %v1894_v29  ;;  %v1988_v10 = vmul.f32 %v6103_v13, %v1895_v38  ;;  %v1929_v59 = vadd.f32 %v1925_v30, %v1920_v15 }
 0x730   : > { %4085 = vtanh.f32 %v1745_v25  ;;  %v1930_v60 = vadd.f32 %v1926_v47, %v1921_v48  ;;  %v1982_v39 = vadd.f32 %v1978_v16, %v1973_v55  ;;  %v1983_v44 = vadd.f32 %v1979_v26, %v1974_v42 }
 0x731   : > { %4087 = vtanh.f32 %v1747_v31  ;;  %v1945_v51 = vstv %s7766_s25  ;;  %v1933_v12 = vrot.slane %v1929_v59, 7  ;;  %v1950_v56 = vstv %s7767_s24  ;;  %s7794_s25 = sld [smem:[#allocation122_spill]]  ;;  %s7795_s24 = sld [smem:[#allocation123_spill]] }
 0x732   : > { %v1991_v24 = vadd.f32 %v1987_v43, %v1982_v39  ;;  %v1992_v17 = vadd.f32 %v1988_v10, %v1983_v44  ;;  %v1935_v18 = vrot.slane %v1930_v60, 7  ;;  %v6114_v41 = vstv %s7768_s3 }
 0x733   : > { %v4082_v9 = vpop.eup %4081  ;;  %v1947_v36 = vmul.f32 %v1945_v51, %v1907_v45  ;;  %v1946_v31 = vmul.f32 %v1945_v51, %v1906_v20  ;;  %v1919_v32 = vmul.f32 %v1915_v61, %v5953_v46  ;;  %v6125_v6 = vmul.f32 %v1950_v56, %v5953_v46 }
 0x734   : > { %v1754_v21 = vadd.f32 1.0, %v4082_v9  ;;  %v1995_v25 = vrot.slane %v1991_v24, 1  ;;  %v1997_v9 = vrot.slane %v1992_v17, 1  ;;  %v1937_v20 = vsel %vm543_vm8, %v1933_v12, %v1935_v18 }
 0x735   : > { %v6135_v28 = vmul.f32 %v1950_v56, %v5951_v5  ;;  %v1981_v22 = vmul.f32 %v1977_v49, %v5953_v46  ;;  %v1980_v47 = vmul.f32 %v1977_v49, %v5951_v5  ;;  %v1790_v16 = vstv %s7769_s29 }
 0x736   : > { %v6057_v52 = vmul.f32 0.5, %v1754_v21  ;;  %v1905_v21 = vpop.permute.xlu1 %1904  ;;  %v1825_v26 = vstv %s7770_s16  ;;  %v1852_v43 = vstv %s7771_s2  ;;  %v6146_v10 = vstv %s7772_s4  ;;  %s7796_s2 = sld [smem:[#allocation124_spill]] }
 0x737   : > { %v1909_v54 = vmul.f32 %v7757_v50, %v1905_v21  ;;  %v6149_v59 = vstv %s7773_s5  ;;  %v6152_v60 = vstv %s7774_s6  ;;  %v1999_v44 = vsel %vm606_vm9, %v1995_v25, %v1997_v9 }
 0x738   : > { %1775 = vrot.lane.b32.xlu1 %v6057_v52, %s4356_s23 }
 0x739   : > { %v4084_v11 = vpop.eup %4083  ;;  %v1914_v15 = vmul.f32 %v6088_v34, %v1909_v54  ;;  %v6161_v39 = vmul.f32 %v1945_v51, %v1909_v54 }
 0x73a   : > { %v1756_v14 = vadd.f32 1.0, %v4084_v11  ;;  %v4086_v35 = vpop.eup %4085  ;;  %v1952_v11 = vmul.f32 %v1950_v56, %v5941_v57 }
 0x73b   : > { %v1753_v53 = vadd.f32 1.0, %v4086_v35  ;;  %v4088_v2 = vpop.eup %4087  ;;  %v1961_v35 = vmul.f32 %v6114_v41, %v1895_v38  ;;  %v1918_v38 = vmul.f32 %v1915_v61, %v5951_v5  ;;  %v1976_v61 = vmul.f32 %v1972_v27, %v1909_v54 }
 0x73c   : > { %1763 = vrot.lane.b32.xlu1 %v6057_v52, %s4355_s20  ;;  %v6063_v62 = vmul.f32 0.5, %v1756_v14  ;;  %v1755_v8 = vadd.f32 1.0, %v4088_v2  ;;  %v1939_v14 = vsel %vm543_vm8, %v1935_v18, %v1933_v12  ;;  %v1960_v2 = vmul.f32 %v6114_v41, %v1894_v29 }
 0x73d   : > { %v6065_v40 = vmul.f32 0.5, %v1753_v53  ;;  %v1951_v53 = vmul.f32 %v1950_v56, %v5939_v0  ;;  %v1956_v33 = vadd.f32 %v1952_v11, %v1947_v36  ;;  %v1941_v45 = vmul.f32 %v7719_v3, %v1939_v14 }
 0x73e   : > { %v6073_v7 = vmul.f32 0.5, %v1755_v8  ;;  %v1908_v8 = vmul.f32 %v7757_v50, %v1903_v37  ;;  %v2001_v0 = vsel %vm606_vm9, %v1997_v9, %v1995_v25  ;;  %v6167_v17 = vadd.f32 %v1919_v32, %v1914_v15 }
 0x73f   : > { %1773 = vrot.lane.b32.xlu0 %v6065_v40, %s4356_s23  ;;  %v1955_v57 = vadd.f32 %v1951_v53, %v1946_v31  ;;  %v1965_v29 = vadd.f32 %v1961_v35, %v1956_v33  ;;  %v2004_v42 = vmul.f32 %v7721_v4, %v2001_v0  ;;  %v6169_v12 = vadd.f32 %v1981_v22, %v1976_v61 }
 0x740   : > { %1779 = vrot.lane.b32.xlu1 %v6063_v62, %s4356_s23  ;;  %v1913_v1 = vmul.f32 %v6088_v34, %v1908_v8  ;;  %v1975_v30 = vmul.f32 %v1972_v27, %v1908_v8  ;;  %v6157_v34 = vmul.f32 %v1945_v51, %v1908_v8  ;;  %v6174_v56 = vstv %s7775_s18 }
 0x741   : > { %v1964_v23 = vadd.f32 %v1960_v2, %v1955_v57  ;;  %v1969_v55 = vadd.f32 %v1965_v29, %v1937_v20  ;;  %v6177_v36 = vstv %s7776_s21  ;;  %v6180_v37 = vstv %s7777_s27 }
 0x742   : > { %v6155_v49 = vadd.f32 %v1918_v38, %v1913_v1  ;;  %v6159_v27 = vadd.f32 %v1980_v47, %v1975_v30  ;;  %v6186_v9 = vstv %s7778_s28  ;;  %v1794_v14 = vmul.f32 %v1790_v16, %v6063_v62 }
 0x743   : > { %1761 = vrot.lane.b32.xlu0 %v6065_v40, %s4355_s20  ;;  %v1968_v48 = vadd.f32 %v1964_v23, %v1941_v45  ;;  %v6165_v24 = vadd.f32 %v2004_v42, %v1969_v55  ;;  %v1829_v35 = vmul.f32 %v1825_v26, %v6063_v62  ;;  %v1856_v53 = vmul.f32 %v1852_v43, %v6063_v62 }
 0x744   : > { %1767 = vrot.lane.b32.xlu1 %v6063_v62, %s4355_s20  ;;  %v1792_v2 = vmul.f32 %v1790_v16, %v6057_v52  ;;  %v1854_v8 = vmul.f32 %v1852_v43, %v6057_v52  ;;  %v1827_v57 = vmul.f32 %v1825_v26, %v6057_v52  ;;  %v6200_v29 = vmul.f32 %v1790_v16, %v6073_v7 }
 0x745   : > { %v6171_v18 = vadd.f32 %v1999_v44, %v1968_v48  ;;  %v6204_v23 = vmul.f32 %v1825_v26, %v6073_v7  ;;  %v1855_v47 = vmul.f32 %v1852_v43, %v6073_v7  ;;  %v1791_v55 = vmul.f32 %v1790_v16, %v6065_v40 }
 0x746   : > { %v1826_v42 = vmul.f32 %v1825_v26, %v6065_v40 }
 0x747   : > { %1777 = vrot.lane.b32.xlu0 %v6073_v7, %s4356_s23 }
 0x748   : > { %1892 = vrot.lane.b32.xlu1 %v5953_v46, %s4355_s20 }
 0x74b   : > { %1765 = vrot.lane.b32.xlu0 %v6073_v7, %s4355_s20 }
 0x74f   : > { %1890 = vrot.lane.b32.xlu0 %v5951_v5, %s4355_s20 }
 0x7aa   : > { %v1776_v46 = vpop.permute.xlu1 %1775 }
 0x7ab   : > { %v1782_v5 = vmul.f32 %v7757_v50, %v1776_v46  ;;  %v1853_v46 = vmul.f32 %v1852_v43, %v6065_v40 }
 0x7ad   : > { %v1787_v51 = vmul.f32 %v6146_v10, %v1782_v5  ;;  %v1849_v21 = vmul.f32 %v6152_v60, %v1782_v5  ;;  %v1822_v11 = vmul.f32 %v6149_v59, %v1782_v5 }
 0x7ae   : > { %v1764_v31 = vpop.permute.xlu1 %1763 }
 0x7af   : > { %v1770_v25 = vmul.f32 %v7758_v58, %v1764_v31  ;;  %v1796_v62 = vadd.f32 %v1792_v2, %v1787_v51  ;;  %v1858_v38 = vadd.f32 %v1854_v8, %v1849_v21  ;;  %v1831_v1 = vadd.f32 %v1827_v57, %v1822_v11 }
 0x7b1   : > { %v1774_v33 = vpop.permute.xlu0 %1773  ;;  %v1801_v32 = vmul.f32 %v6174_v56, %v1770_v25  ;;  %v1863_v54 = vmul.f32 %v6180_v37, %v1770_v25  ;;  %v1836_v45 = vmul.f32 %v6177_v36, %v1770_v25 }
 0x7b2   : > { %v1781_v20 = vmul.f32 %v7757_v50, %v1774_v33  ;;  %v1780_v0 = vpop.permute.xlu1 %1779 }
 0x7b3   : > { %v1784_v22 = vmul.f32 %v7757_v50, %v1780_v0  ;;  %v1805_v15 = vadd.f32 %v1801_v32, %v1796_v62  ;;  %v1867_v61 = vadd.f32 %v1863_v54, %v1858_v38  ;;  %v1840_v5 = vadd.f32 %v1836_v45, %v1831_v1 }
 0x7b4   : > { %v1786_v30 = vmul.f32 %v6146_v10, %v1781_v20  ;;  %v1848_v52 = vmul.f32 %v6152_v60, %v1781_v20  ;;  %v1821_v21 = vmul.f32 %v6149_v59, %v1781_v20 }
 0x7b5   : > { %v1762_v48 = vpop.permute.xlu0 %1761  ;;  %v1789_v31 = vmul.f32 %v6146_v10, %v1784_v22  ;;  %v1824_v25 = vmul.f32 %v6149_v59, %v1784_v22  ;;  %v1851_v7 = vmul.f32 %v6152_v60, %v1784_v22  ;;  %v1810_v43 = vrot.slane %v1805_v15, 7 }
 0x7b6   : > { %v1769_v44 = vmul.f32 %v7758_v58, %v1762_v48  ;;  %v1768_v51 = vpop.permute.xlu1 %1767  ;;  %v1795_v26 = vadd.f32 %v1791_v55, %v1786_v30  ;;  %v1857_v11 = vadd.f32 %v1853_v46, %v1848_v52  ;;  %v1872_v8 = vrot.slane %v1867_v61, 1 }
 0x7b7   : > { %v1772_v16 = vmul.f32 %v7758_v58, %v1768_v51  ;;  %v1798_v45 = vadd.f32 %v1794_v14, %v1789_v31  ;;  %v1830_v38 = vadd.f32 %v1826_v42, %v1821_v21  ;;  %v1833_v22 = vadd.f32 %v1829_v35, %v1824_v25 }
 0x7b8   : > { %v1800_v2 = vmul.f32 %v6174_v56, %v1769_v44  ;;  %v1862_v40 = vmul.f32 %v6180_v37, %v1769_v44  ;;  %v1835_v33 = vmul.f32 %v6177_v36, %v1769_v44  ;;  %v1860_v1 = vadd.f32 %v1856_v53, %v1851_v7 }
 0x7b9   : > { %v1778_v32 = vpop.permute.xlu0 %1777  ;;  %v1803_v54 = vmul.f32 %v6174_v56, %v1772_v16  ;;  %v1865_v30 = vmul.f32 %v6180_v37, %v1772_v16  ;;  %v1838_v61 = vmul.f32 %v6177_v36, %v1772_v16 }
 0x7ba   : > { %v1804_v57 = vadd.f32 %v1800_v2, %v1795_v26  ;;  %v1866_v20 = vadd.f32 %v1862_v40, %v1857_v11  ;;  %v1783_v0 = vmul.f32 %v7757_v50, %v1778_v32  ;;  %v1893_v62 = vpop.permute.xlu1 %1892  ;;  %v1839_v48 = vadd.f32 %v1835_v33, %v1830_v38 }
 0x7bb   : > { %v1807_v15 = vadd.f32 %v1803_v54, %v1798_v45  ;;  %v1897_v14 = vmul.f32 %v7758_v58, %v1893_v62  ;;  %v1869_v25 = vadd.f32 %v1865_v30, %v1860_v1  ;;  %v1842_v26 = vadd.f32 %v1838_v61, %v1833_v22 }
 0x7bc   : > { %v1808_v52 = vrot.slane %v1804_v57, 7  ;;  %v1870_v55 = vrot.slane %v1866_v20, 1  ;;  %v1788_v46 = vmul.f32 %v6146_v10, %v1783_v0  ;;  %v1850_v44 = vmul.f32 %v6152_v60, %v1783_v0 }
 0x7bd   : > { %v1766_v51 = vpop.permute.xlu0 %1765  ;;  %v1823_v7 = vmul.f32 %v6149_v59, %v1783_v0  ;;  %v1811_v16 = vrot.slane %v1807_v15, 7  ;;  %v1928_v33 = vmul.f32 %v6094_v19, %v1897_v14  ;;  %v1990_v57 = vmul.f32 %v6103_v13, %v1897_v14 }
 0x7be   : > { %v1812_v42 = vsel %vm543_vm8, %v1808_v52, %v1810_v43  ;;  %v1814_v35 = vsel %vm543_vm8, %v1810_v43, %v1808_v52  ;;  %v1874_v53 = vsel %vm606_vm9, %v1870_v55, %v1872_v8  ;;  %v1876_v31 = vsel %vm606_vm9, %v1872_v8, %v1870_v55 }
 0x7bf   : > { %v1816_v21 = vmul.f32 %v7719_v3, %v1814_v35  ;;  %v1844_v10 = vadd.f32 %v1840_v5, %v1812_v42  ;;  %v1879_v60 = vmul.f32 %v7721_v4, %v1876_v31  ;;  %v1771_v11 = vmul.f32 %v7758_v58, %v1766_v51 }
 0x7c0   : > { %v1797_v43 = vadd.f32 %v6200_v29, %v1788_v46  ;;  %v1859_v8 = vadd.f32 %v1855_v47, %v1850_v44  ;;  %v1873_v45 = vrot.slane %v1869_v25, 1  ;;  %v1832_v62 = vadd.f32 %v6204_v23, %v1823_v7 }
 0x7c1   : > { %v1843_v2 = vadd.f32 %v1839_v48, %v1816_v21  ;;  %v1883_v40 = vadd.f32 %v1879_v60, %v1844_v10  ;;  %v1891_v32 = vpop.permute.xlu0 %1890  ;;  %v1802_v54 = vmul.f32 %v6174_v56, %v1771_v11  ;;  %v1864_v5 = vmul.f32 %v6180_v37, %v1771_v11 }
 0x7c2   : > { %v1837_v0 = vmul.f32 %v6177_v36, %v1771_v11  ;;  %v1896_v22 = vmul.f32 %v7758_v58, %v1891_v32  ;;  %v1932_v37 = vadd.f32 %v1928_v33, %v6167_v17  ;;  %v1963_v1 = vmul.f32 %v6114_v41, %v1897_v14 }
 0x7c3   : > { %v1882_v20 = vadd.f32 %v1874_v53, %v1843_v2  ;;  %v2012_v59 = vadd.f32 %v6165_v24, %v1883_v40  ;;  %v1806_v38 = vadd.f32 %v1802_v54, %v1797_v43  ;;  %v1868_v29 = vadd.f32 %v1864_v5, %v1859_v8 }
 0x7c4   : > { %v1994_v24 = vadd.f32 %v1990_v57, %v6169_v12  ;;  %v1927_v36 = vmul.f32 %v6094_v19, %v1896_v22  ;;  %v1841_v15 = vadd.f32 %v1837_v0, %v1832_v62  ;;  %v1989_v61 = vmul.f32 %v6103_v13, %v1896_v22 }
 0x7c5   : > { %v2011_v47 = vadd.f32 %v6171_v18, %v1882_v20  ;;  %v2017_v56 = vadd.f32 %v6186_v9, %v2012_v59  ;;  %v1809_v30 = vrot.slane %v1806_v38, 7  ;;  %v1871_v52 = vrot.slane %v1868_v29, 1  ;;  %v4147_v38 = vld [vmem:[%s4778_s19 + $0x8] sm:$0xff] }
 0x7c6   : > { %v1958_v13 = vadd.f32 %v6125_v6, %v6161_v39  ;;  %v1931_v14 = vadd.f32 %v1927_v36, %v6155_v49  ;;  %v1993_v42 = vadd.f32 %v1989_v61, %v6159_v27  ;;  %v1936_v53 = vrot.slane %v1932_v37, 7 }
 0x7c7   : > { %v2016_v23 = vadd.f32 %v6186_v9, %v2011_v47  ;;  %v2021_v55 = vmul.f32 0.5, %v2017_v56  ;;  %v1813_v18 = vsel %vm543_vm8, %v1809_v30, %v1811_v16  ;;  %v1815_v17 = vsel %vm543_vm8, %v1811_v16, %v1809_v30  ;;  %v4148_v47 = vld [vmem:[%s4778_s19] sm:$0xff] }
 0x7c8   : > { %v1875_v48 = vsel %vm606_vm9, %v1871_v52, %v1873_v45  ;;  %v1877_v12 = vsel %vm606_vm9, %v1873_v45, %v1871_v52  ;;  %v1818_v19 = vmul.f32 %v7719_v3, %v1815_v17  ;;  %v1846_v44 = vadd.f32 %v1842_v26, %v1813_v18  ;;  %v4149_v18 = vld [vmem:[%s4778_s19 + $0x18] sm:$0xff] }
 0x7c9   : > { %v2020_v46 = vmul.f32 0.5, %v2016_v23  ;;  %4089 = vtanh.f32 %v2021_v55  ;;  %v1881_v51 = vmul.f32 %v7721_v4, %v1877_v12  ;;  %v1962_v31 = vmul.f32 %v6114_v41, %v1896_v22 }
 0x7ca   : > { %v1845_v35 = vadd.f32 %v1841_v15, %v1818_v19  ;;  %v1998_v10 = vrot.slane %v1994_v24, 1  ;;  %v1934_v60 = vrot.slane %v1931_v14, 7  ;;  %v1996_v25 = vrot.slane %v1993_v42, 1  ;;  %v457_v14 = vld [vmem:[#allocation3 + $0x8] sm:$0xff] }
 0x7cb   : > { %4091 = vtanh.f32 %v2020_v46  ;;  %v1885_v21 = vadd.f32 %v1881_v51, %v1846_v44  ;;  %v1957_v7 = vadd.f32 %v6135_v28, %v6157_v34  ;;  %v1967_v6 = vadd.f32 %v1963_v1, %v1958_v13  ;;  %v4150_v46 = vld [vmem:[%s4778_s19 + $0x10] sm:$0xff] }
 0x7cc   : > { %v1884_v16 = vadd.f32 %v1875_v48, %v1845_v35  ;;  %v1938_v39 = vsel %vm543_vm8, %v1934_v60, %v1936_v53  ;;  %v1940_v49 = vsel %vm543_vm8, %v1936_v53, %v1934_v60  ;;  %v2002_v27 = vsel %vm606_vm9, %v1998_v10, %v1996_v25  ;;  %v456_v35 = vld [vmem:[#allocation3] sm:$0xff] }
 0x7cd   : > { %v1943_v41 = vmul.f32 %v7719_v3, %v1940_v49  ;;  %v1966_v26 = vadd.f32 %v1962_v31, %v1957_v7  ;;  %v1971_v11 = vadd.f32 %v1967_v6, %v1938_v39  ;;  %v2006_v2 = vmul.f32 %v7721_v4, %v2002_v27  ;;  %v459_v27 = vld [vmem:[#allocation3 + $0x18] sm:$0xff] }
 0x7ce   : > { %v2000_v34 = vsel %vm606_vm9, %v1996_v25, %v1998_v10 }
 0x7cf   : > { %v1970_v40 = vadd.f32 %v1966_v26, %v1943_v41  ;;  %v2010_v28 = vadd.f32 %v2006_v2, %v1971_v11  ;;  %v458_v2 = vld [vmem:[#allocation3 + $0x10] sm:$0xff] }
 0x7d1   : > { %v2009_v33 = vadd.f32 %v2000_v34, %v1970_v40  ;;  %v2014_v32 = vadd.f32 %v2010_v28, %v1885_v21 }
 0x7d3   : > { %v4090_v43 = vpop.eup %4089  ;;  %v2013_v5 = vadd.f32 %v2009_v33, %v1884_v16  ;;  %v2019_v57 = vadd.f32 %v6186_v9, %v2014_v32 }
 0x7d4   : > { %v2029_v8 = vadd.f32 1.0, %v4090_v43 }
 0x7d5   : > { %v4092_v54 = vpop.eup %4091  ;;  %v2018_v45 = vadd.f32 %v6186_v9, %v2013_v5  ;;  %v2023_v0 = vmul.f32 0.5, %v2019_v57 }
 0x7d6   : > { %v2028_v20 = vadd.f32 1.0, %v4092_v54  ;;  %v2033_v59 = vmul.f32 0.5, %v2029_v8 }
 0x7d7   : > { %v2022_v22 = vmul.f32 0.5, %v2018_v45  ;;  %4093 = vtanh.f32 %v2023_v0 }
 0x7d8   : > { %v2032_v62 = vmul.f32 0.5, %v2028_v20  ;;  %v2037_v29 = vadd.f32 %v4147_v38, %v2033_v59 }
 0x7d9   : > { %4095 = vtanh.f32 %v2022_v22 }
 0x7da   : > { %v2036_v56 = vadd.f32 %v4148_v47, %v2032_v62  ;;  %v2041_v37 = vmul.f32 0.5, %v2037_v29  ;;  %v6327_v29 = vstv %s7783_s30  ;;  %s7797_s30 = sld [smem:[#allocation125_spill]] }
 0x7dc   : > { %v2040_v1 = vmul.f32 0.5, %v2036_v56  ;;  %4097 = vtanh.f32 %v2041_v37  ;;  %v2109_v56 = vstv %s7784_s7  ;;  %s7798_s7 = sld [smem:[#allocation131_spill]] }
 0x7de   : > { %4099 = vtanh.f32 %v2040_v1 }
 0x7e1   : > { %v4094_v30 = vpop.eup %4093 }
 0x7e2   : > { %v2031_v52 = vadd.f32 1.0, %v4094_v30 }
 0x7e3   : > { %v4096_v24 = vpop.eup %4095 }
 0x7e4   : > { %v2030_v36 = vadd.f32 1.0, %v4096_v24  ;;  %v2035_v23 = vmul.f32 0.5, %v2031_v52  ;;  %v6335_v24 = vstv %s7786_s8  ;;  %s7799_s8 = sld [smem:[#allocation126_spill]] }
 0x7e6   : > { %v4098_v9 = vpop.eup %4097  ;;  %v2034_v61 = vmul.f32 0.5, %v2030_v36  ;;  %v2039_v17 = vadd.f32 %v4149_v18, %v2035_v23 }
 0x7e7   : > { %v2049_v55 = vadd.f32 1.0, %v4098_v9 }
 0x7e8   : > { %v4100_v15 = vpop.eup %4099  ;;  %v2038_v19 = vadd.f32 %v4150_v46, %v2034_v61  ;;  %v2043_v44 = vmul.f32 0.5, %v2039_v17 }
 0x7e9   : > { %v2048_v48 = vadd.f32 1.0, %v4100_v15  ;;  %v2053_v12 = vmul.f32 0.5, %v2049_v55  ;;  %v2166_v55 = vstv %s7788_s9  ;;  %s7800_s9 = sld [smem:[#allocation132_spill]] }
 0x7ea   : > { %v2042_v51 = vmul.f32 0.5, %v2038_v19  ;;  %v2180_v19 = vstv %s7790_s11  ;;  %s7802_s11 = sld [smem:[#allocation128_spill]] }
 0x7eb   : > { %v2052_v13 = vmul.f32 0.5, %v2048_v48  ;;  %4101 = vrcp.f32 %v2053_v12  ;;  %3516 = vst [vmem:[%s7779_s17 + $0x8] sm:$0xff] %v2053_v12  ;;  %v2171_v12 = vstv %s7789_s10  ;;  %s7801_s10 = sld [smem:[#allocation129_spill]] }
 0x7ec   : > { %4103 = vtanh.f32 %v2043_v44 }
 0x7ed   : > { %4105 = vrcp.f32 %v2052_v13  ;;  %3515 = vst [vmem:[%s7779_s17] sm:$0xff] %v2052_v13 }
 0x7ee   : > { %4107 = vtanh.f32 %v2042_v51 }
 0x7f5   : > { %v4102_v42 = vpop.eup %4101 }
 0x7f6   : > { %v4104_v53 = vpop.eup %4103  ;;  %v2061_v31 = vmul.f32 %v4102_v42, %v457_v14 }
 0x7f7   : > { %v4106_v21 = vpop.eup %4105  ;;  %v2051_v10 = vadd.f32 1.0, %v4104_v53  ;;  %v2139_v53 = vstv %s7791_s12  ;;  %s7803_s12 = sld [smem:[#allocation127_spill]] }
 0x7f8   : > { %v4108_v60 = vpop.eup %4107  ;;  %v2065_v25 = vmul.f32 0.5, %v2061_v31  ;;  %v2060_v7 = vmul.f32 %v4106_v21, %v456_v35 }
 0x7f9   : > { %v2050_v16 = vadd.f32 1.0, %v4108_v60  ;;  %v2055_v6 = vmul.f32 0.5, %v2051_v10  ;;  %v2144_v60 = vstv %s7792_s13  ;;  %s7804_s13 = sld [smem:[#allocation130_spill]] }
 0x7fa   : > { %4109 = vtanh.f32 %v2065_v25  ;;  %v2064_v39 = vmul.f32 0.5, %v2060_v7 }
 0x7fb   : > { %v2054_v49 = vmul.f32 0.5, %v2050_v16  ;;  %4111 = vrcp.f32 %v2055_v6  ;;  %3518 = vst [vmem:[%s7779_s17 + $0x18] sm:$0xff] %v2055_v6  ;;  %v2153_v16 = vstv %s7793_s15  ;;  %s7805_s15 = sld [smem:[#allocation133_spill]] }
 0x7fc   : > { %4113 = vtanh.f32 %v2064_v39 }
 0x7fd   : > { %4115 = vrcp.f32 %v2054_v49  ;;  %3517 = vst [vmem:[%s7779_s17 + $0x10] sm:$0xff] %v2054_v49 }
 0x804   : > { %v4110_v41 = vpop.eup %4109 }
 0x805   : > { %v4112_v26 = vpop.eup %4111  ;;  %v2073_v11 = vadd.f32 1.0, %v4110_v41 }
 0x806   : > { %v4114_v40 = vpop.eup %4113  ;;  %v2063_v28 = vmul.f32 %v4112_v26, %v459_v27 }
 0x807   : > { %v4116_v34 = vpop.eup %4115  ;;  %v6294_v43 = vmul.f32 0.5, %v2073_v11  ;;  %v2072_v33 = vadd.f32 1.0, %v4114_v40 }
 0x808   : > { %v2067_v32 = vmul.f32 0.5, %v2063_v28  ;;  %v2062_v8 = vmul.f32 %v4116_v34, %v458_v2 }
 0x809   : > { %7781 = vst [vmem:[#allocation194_spill] sm:$0xff] %v6294_v43  ;;  %2094 = vrot.lane.b32.xlu1 %v6294_v43, %s4356_s23  ;;  %3520 = vst [vmem:[%s7780_s26 + $0x8] sm:$0xff] %v6294_v43  ;;  %v6300_v54 = vmul.f32 0.5, %v2072_v33  ;;  %v2111_v9 = vmul.f32 %v2109_v56, %v6294_v43  ;;  %v2173_v31 = vmul.f32 %v2171_v12, %v6294_v43 }
 0x80a   : > { %4117 = vtanh.f32 %v2067_v32  ;;  %v2066_v5 = vmul.f32 0.5, %v2062_v8  ;;  %v2146_v41 = vmul.f32 %v2144_v60, %v6294_v43 }
 0x80b   : > { %7782 = vst [vmem:[#allocation195_spill] sm:$0xff] %v6300_v54  ;;  %2092 = vrot.lane.b32.xlu0 %v6300_v54, %s4356_s23  ;;  %3519 = vst [vmem:[%s7780_s26] sm:$0xff] %v6300_v54  ;;  %v2110_v15 = vmul.f32 %v2109_v56, %v6300_v54  ;;  %v2172_v51 = vmul.f32 %v2171_v12, %v6300_v54  ;;  %v2145_v26 = vmul.f32 %v2144_v60, %v6300_v54 }
 0x80c   : > { %4119 = vtanh.f32 %v2066_v5 }
 0x80d   : > { %2082 = vrot.lane.b32.xlu1 %v6294_v43, %s4355_s20 }
 0x80f   : > { %2080 = vrot.lane.b32.xlu0 %v6300_v54, %s4355_s20 }
 0x814   : > { %v4118_v57 = vpop.eup %4117 }
 0x815   : > { %v2075_v20 = vadd.f32 1.0, %v4118_v57 }
 0x816   : > { %v4120_v59 = vpop.eup %4119 }
 0x817   : > { %v6310_v45 = vmul.f32 0.5, %v2075_v20  ;;  %v2074_v0 = vadd.f32 1.0, %v4120_v59 }
 0x819   : > { %7785 = vst [vmem:[#allocation177_spill] sm:$0xff] %v6310_v45  ;;  %2098 = vrot.lane.b32.xlu1 %v6310_v45, %s4356_s23  ;;  %3522 = vst [vmem:[%s7780_s26 + $0x18] sm:$0xff] %v6310_v45  ;;  %v6316_v62 = vmul.f32 0.5, %v2074_v0  ;;  %v2113_v33 = vmul.f32 %v2109_v56, %v6310_v45  ;;  %v2148_v5 = vmul.f32 %v2144_v60, %v6310_v45 }
 0x81a   : > { %v2175_v57 = vmul.f32 %v2171_v12, %v6310_v45 }
 0x81b   : > { %7787 = vst [vmem:[#allocation178_spill] sm:$0xff] %v6316_v62  ;;  %2096 = vrot.lane.b32.xlu0 %v6316_v62, %s4356_s23  ;;  %3521 = vst [vmem:[%s7780_s26 + $0x10] sm:$0xff] %v6316_v62  ;;  %v2112_v20 = vmul.f32 %v2109_v56, %v6316_v62 }
 0x81d   : > { %2086 = vrot.lane.b32.xlu1 %v6310_v45, %s4355_s20 }
 0x81f   : > { %2084 = vrot.lane.b32.xlu0 %v6316_v62, %s4355_s20 }
 0x87b   : > { %v2095_v38 = vpop.permute.xlu1 %2094 }
 0x87c   : > { %v2101_v22 = vmul.f32 %v7757_v50, %v2095_v38 }
 0x87d   : > { %v2093_v47 = vpop.permute.xlu0 %2092 }
 0x87e   : > { %v2100_v37 = vmul.f32 %v7757_v50, %v2093_v47  ;;  %v2106_v1 = vmul.f32 %v6327_v29, %v2101_v22  ;;  %v2168_v13 = vmul.f32 %v2166_v55, %v2101_v22  ;;  %v2141_v49 = vmul.f32 %v2139_v53, %v2101_v22 }
 0x87f   : > { %v2083_v30 = vpop.permute.xlu1 %2082 }
 0x880   : > { %v2105_v52 = vmul.f32 %v6327_v29, %v2100_v37  ;;  %v2089_v36 = vmul.f32 %v7758_v58, %v2083_v30  ;;  %v2115_v18 = vadd.f32 %v2111_v9, %v2106_v1  ;;  %v2167_v17 = vmul.f32 %v2166_v55, %v2100_v37 }
 0x881   : > { %v2081_v23 = vpop.permute.xlu0 %2080  ;;  %v2177_v7 = vadd.f32 %v2173_v31, %v2168_v13  ;;  %v2140_v27 = vmul.f32 %v2139_v53, %v2100_v37  ;;  %v2150_v0 = vadd.f32 %v2146_v41, %v2141_v49 }
 0x882   : > { %v2088_v61 = vmul.f32 %v7758_v58, %v2081_v23  ;;  %v2120_v48 = vmul.f32 %v6335_v24, %v2089_v36  ;;  %v2114_v46 = vadd.f32 %v2110_v15, %v2105_v52  ;;  %v2176_v21 = vadd.f32 %v2172_v51, %v2167_v17 }
 0x883   : > { %v2182_v10 = vmul.f32 %v2180_v19, %v2089_v36  ;;  %v2155_v28 = vmul.f32 %v2153_v16, %v2089_v36  ;;  %v2149_v38 = vadd.f32 %v2145_v26, %v2140_v27  ;;  %v2174_v15 = vmul.f32 %v2171_v12, %v6316_v62 }
 0x884   : > { %v2119_v44 = vmul.f32 %v6335_v24, %v2088_v61  ;;  %v2124_v14 = vadd.f32 %v2120_v48, %v2115_v18  ;;  %v2181_v42 = vmul.f32 %v2180_v19, %v2088_v61  ;;  %v2154_v34 = vmul.f32 %v2153_v16, %v2088_v61 }
 0x885   : > { %v2186_v11 = vadd.f32 %v2182_v10, %v2177_v7  ;;  %v2159_v36 = vadd.f32 %v2155_v28, %v2150_v0 }
 0x886   : > { %v2123_v35 = vadd.f32 %v2119_v44, %v2114_v46  ;;  %v2129_v6 = vrot.slane %v2124_v14, 7  ;;  %v2185_v39 = vadd.f32 %v2181_v42, %v2176_v21  ;;  %v2158_v23 = vadd.f32 %v2154_v34, %v2149_v38 }
 0x887   : > { %v2191_v37 = vrot.slane %v2186_v11, 1 }
 0x888   : > { %v2127_v25 = vrot.slane %v2123_v35, 7  ;;  %v2189_v8 = vrot.slane %v2185_v39, 1 }
 0x88a   : > { %v2133_v2 = vsel %vm543_vm8, %v2129_v6, %v2127_v25  ;;  %v2131_v1 = vsel %vm543_vm8, %v2127_v25, %v2129_v6  ;;  %v2193_v61 = vsel %vm606_vm9, %v2189_v8, %v2191_v37  ;;  %v2195_v18 = vsel %vm606_vm9, %v2191_v37, %v2189_v8 }
 0x88b   : > { %v2099_v40 = vpop.permute.xlu1 %2098  ;;  %v2135_v22 = vmul.f32 %v7719_v3, %v2133_v2  ;;  %v2163_v13 = vadd.f32 %v2159_v36, %v2131_v1  ;;  %v2147_v2 = vmul.f32 %v2144_v60, %v6316_v62 }
 0x88c   : > { %v2103_v32 = vmul.f32 %v7757_v50, %v2099_v40 }
 0x88d   : > { %v2097_v59 = vpop.permute.xlu0 %2096  ;;  %v2162_v44 = vadd.f32 %v2158_v23, %v2135_v22 }
 0x88e   : > { %v2102_v47 = vmul.f32 %v7757_v50, %v2097_v59  ;;  %v2108_v30 = vmul.f32 %v6327_v29, %v2103_v32  ;;  %v2170_v52 = vmul.f32 %v2166_v55, %v2103_v32  ;;  %v2143_v51 = vmul.f32 %v2139_v53, %v2103_v32 }
 0x88f   : > { %v2087_v9 = vpop.permute.xlu1 %2086  ;;  %v2201_v49 = vadd.f32 %v2193_v61, %v2162_v44 }
 0x890   : > { %v2107_v56 = vmul.f32 %v6327_v29, %v2102_v47  ;;  %v2169_v17 = vmul.f32 %v2166_v55, %v2102_v47  ;;  %v2091_v48 = vmul.f32 %v7758_v58, %v2087_v9  ;;  %v2117_v42 = vadd.f32 %v2113_v33, %v2108_v30 }
 0x891   : > { %v2085_v46 = vpop.permute.xlu0 %2084  ;;  %v2179_v35 = vadd.f32 %v2175_v57, %v2170_v52  ;;  %v2198_v55 = vmul.f32 %v7721_v4, %v2195_v18  ;;  %v2142_v7 = vmul.f32 %v2139_v53, %v2102_v47  ;;  %v2152_v11 = vadd.f32 %v2148_v5, %v2143_v51 }
 0x892   : > { %v2090_v14 = vmul.f32 %v7758_v58, %v2085_v46  ;;  %v2116_v12 = vadd.f32 %v2112_v20, %v2107_v56  ;;  %v2122_v29 = vmul.f32 %v6335_v24, %v2091_v48  ;;  %v2178_v31 = vadd.f32 %v2174_v15, %v2169_v17 }
 0x893   : > { %v2184_v21 = vmul.f32 %v2180_v19, %v2091_v48  ;;  %v2157_v39 = vmul.f32 %v2153_v16, %v2091_v48  ;;  %v2202_v8 = vadd.f32 %v2198_v55, %v2163_v13  ;;  %v2205_v57 = vstv %s7794_s25  ;;  %s7806_s25 = sld [smem:[#allocation134_spill]] }
 0x894   : > { %v2121_v10 = vmul.f32 %v6335_v24, %v2090_v14  ;;  %v2183_v25 = vmul.f32 %v2180_v19, %v2090_v14  ;;  %v2126_v6 = vadd.f32 %v2122_v29, %v2117_v42  ;;  %v2156_v40 = vmul.f32 %v2153_v16, %v2090_v14 }
 0x895   : > { %v2188_v27 = vadd.f32 %v2184_v21, %v2179_v35  ;;  %v2151_v24 = vadd.f32 %v2147_v2, %v2142_v7  ;;  %v2161_v19 = vadd.f32 %v2157_v39, %v2152_v11  ;;  %v2206_v59 = vadd.f32 %v2205_v57, %v2201_v49 }
 0x896   : > { %v2125_v41 = vadd.f32 %v2121_v10, %v2116_v12  ;;  %v2187_v26 = vadd.f32 %v2183_v25, %v2178_v31  ;;  %v2130_v28 = vrot.slane %v2126_v6, 7  ;;  %v2207_v37 = vadd.f32 %v2205_v57, %v2202_v8 }
 0x897   : > { %v2192_v34 = vrot.slane %v2188_v27, 1  ;;  %v2160_v16 = vadd.f32 %v2156_v40, %v2151_v24  ;;  %v2210_v52 = vmul.f32 %v2206_v59, %v2206_v59  ;;  %v2258_v2 = vstv %s7796_s2  ;;  %s7808_s2 = sld [smem:[#allocation136_spill]] }
 0x898   : > { %v2128_v33 = vrot.slane %v2125_v41, 7  ;;  %v2190_v32 = vrot.slane %v2187_v26, 1  ;;  %v2214_v23 = vadd.f32 %v2207_v37, %v2206_v59  ;;  %v2211_v15 = vmul.f32 %v2207_v37, %v2207_v37 }
 0x89a   : > { %v2134_v53 = vsel %vm543_vm8, %v2130_v28, %v2128_v33  ;;  %v2132_v20 = vsel %vm543_vm8, %v2128_v33, %v2130_v28  ;;  %v2196_v5 = vsel %vm606_vm9, %v2192_v34, %v2190_v32  ;;  %v2194_v1 = vsel %vm606_vm9, %v2190_v32, %v2192_v34 }
 0x89b   : > { %v2137_v60 = vmul.f32 %v7719_v3, %v2134_v53  ;;  %v2165_v0 = vadd.f32 %v2161_v19, %v2132_v20  ;;  %v2200_v38 = vmul.f32 %v7721_v4, %v2196_v5  ;;  %v2226_v18 = vadd.f32 %v2211_v15, %v2210_v52 }
 0x89c   : > { %v6430_v52 = vstv %s7801_s10  ;;  %s7814_s10 = sld [smem:[#allocation144_spill]] }
 0x89d   : > { %v2164_v22 = vadd.f32 %v2160_v16, %v2137_v60  ;;  %v2204_v47 = vadd.f32 %v2200_v38, %v2165_v0  ;;  %v6416_v16 = vstv %s7797_s30  ;;  %v6419_v0 = vstv %s7798_s7  ;;  %s7810_s30 = sld [smem:[#allocation137_spill]]  ;;  %s7811_s7 = sld [smem:[#allocation143_spill]] }
 0x89f   : > { %v2203_v30 = vadd.f32 %v2194_v1, %v2164_v22  ;;  %v2209_v36 = vadd.f32 %v2205_v57, %v2204_v47  ;;  %v6424_v1 = vstv %s7799_s8  ;;  %s7812_s8 = sld [smem:[#allocation138_spill]] }
 0x8a1   : > { %v2208_v9 = vadd.f32 %v2205_v57, %v2203_v30  ;;  %v2213_v48 = vmul.f32 %v2209_v36, %v2209_v36  ;;  %v6427_v30 = vstv %s7800_s9  ;;  %s7813_s9 = sld [smem:[#allocation141_spill]] }
 0x8a3   : > { %v2215_v56 = vadd.f32 %v2214_v23, %v2208_v9  ;;  %v2212_v61 = vmul.f32 %v2208_v9, %v2208_v9  ;;  %v6435_v23 = vstv %s7802_s11  ;;  %s7815_s11 = sld [smem:[#allocation140_spill]] }
 0x8a5   : > { %v2216_v17 = vadd.f32 %v2215_v56, %v2209_v36  ;;  %v2227_v46 = vadd.f32 %v2226_v18, %v2212_v61  ;;  %v6439_v56 = vstv %s7803_s12  ;;  %v6442_v61 = vstv %s7804_s13  ;;  %s7816_s12 = sld [smem:[#allocation139_spill]]  ;;  %s7817_s13 = sld [smem:[#allocation142_spill]] }
 0x8a7   : > { %2217 = vadd.xlane.f32.xlu0 %v2216_v17  ;;  %v2228_v44 = vadd.f32 %v2227_v46, %v2213_v48 }
 0x8a9   : > { %2229 = vadd.xlane.f32.xlu1 %v2228_v44 }
 0x934   : > { %v2218_v13 = vpop.xlane.xlu0 %2217 }
 0x935   : > { %v2219_v51 = vrot.slane %v2218_v13, 4 }
 0x936   : > { %v2230_v14 = vpop.xlane.xlu1 %2229 }
 0x937   : > { %v2220_v42 = vadd.f32 %v2219_v51, %v2218_v13  ;;  %v2231_v35 = vrot.slane %v2230_v14, 4  ;;  %v6450_v13 = vstv %s7805_s15  ;;  %s7818_s15 = sld [smem:[#allocation145_spill]] }
 0x939   : > { %v2221_v12 = vrot.slane %v2220_v42, 2  ;;  %v2232_v29 = vadd.f32 %v2231_v35, %v2230_v14 }
 0x93b   : > { %v2233_v31 = vrot.slane %v2232_v29, 2  ;;  %v2222_v21 = vadd.f32 %v2221_v12, %v2220_v42 }
 0x93d   : > { %v2223_v10 = vrot.slane %v2222_v21, 1  ;;  %v2234_v25 = vadd.f32 %v2233_v31, %v2232_v29 }
 0x93f   : > { %v2224_v55 = vadd.f32 %v2223_v10, %v2222_v21  ;;  %v2235_v7 = vrot.slane %v2234_v25, 1 }
 0x941   : > { %3951 = vpush %v2224_v55  ;;  %v2236_v6 = vadd.f32 %v2235_v7, %v2234_v25 }
 0x943   : > { %3953 = vpush %v2236_v6 }
 0x972   : > { %s3952_s3 = spop %3951 }
 0x973   : > { %s2238_s29 = smul.f32 0.00024414063, %s3952_s3 }
 0x974   : > { %s3954_s16 = spop %3953 }
 0x975   : > { %s2240_s4 = smul.f32 %s2238_s29, %s2238_s29  ;;  %v2243_v27 = vstv %s2238_s29 }
 0x976   : > { %s2239_s5 = smul.f32 0.00024414063, %s3954_s16  ;;  %v2244_v41 = vsub.f32 %v2206_v59, %v2243_v27  ;;  %v2245_v26 = vsub.f32 %v2207_v37, %v2243_v27  ;;  %v2246_v34 = vsub.f32 %v2208_v9, %v2243_v27  ;;  %v2247_v33 = vsub.f32 %v2209_v36, %v2243_v27 }
 0x978   : > { %s2241_s6 = ssub.f32 %s2239_s5, %s2240_s4 }
 0x97a   : > { %s2242_s18 = smax.f32 %s4357_s14, %s2241_s6 }
 0x97b   : > { %s2248_s21 = sadd.f32 1e-05, %s2242_s18 }
 0x97d   : > { %v2249_v39 = vstv %s2248_s21 }
 0x97e   : > { %4121 = vrsqrt.f32 %v2249_v39 }
 0x988   : > { %v4122_v49 = vpop.eup %4121 }
 0x989   : > { %3955 = vpush %v4122_v49 }
 0x9ba   : > { %s3956_s27 = spop %3955 }
 0x9bb   : > { %s2252_s28 = smul.f32 %s3956_s27, %s7795_s24  ;;  %s7807_s24 = sld [smem:[#allocation135_spill]] }
 0x9bd   : > { %v2253_v11 = vstv %s2252_s28 }
 0x9be   : > { %v2254_v40 = vmul.f32 %v2253_v11, %v2244_v41  ;;  %v2255_v28 = vmul.f32 %v2253_v11, %v2245_v26  ;;  %v2256_v19 = vmul.f32 %v2253_v11, %v2246_v34  ;;  %v2257_v8 = vmul.f32 %v2253_v11, %v2247_v33 }
 0x9c0   : > { %v2259_v32 = vadd.f32 %v2258_v2, %v2254_v40  ;;  %v2260_v24 = vadd.f32 %v2258_v2, %v2255_v28  ;;  %v2261_v20 = vadd.f32 %v2258_v2, %v2256_v19  ;;  %v2262_v5 = vadd.f32 %v2258_v2, %v2257_v8 }
 0x9c2   : > { %v6391_v57 = vmax.f32 %v2259_v32, 0.0  ;;  %v6393_v53 = vmax.f32 %v2260_v24, 0.0  ;;  %v6403_v59 = vmax.f32 %v2261_v20, 0.0  ;;  %v6405_v60 = vmax.f32 %v2262_v5, 0.0 }
 0x9c4   : > { %2281 = vrot.lane.b32.xlu1 %v6393_v53, %s4356_s23  ;;  %2279 = vrot.lane.b32.xlu0 %v6391_v57, %s4356_s23  ;;  %v2298_v48 = vmul.f32 %v6424_v1, %v6393_v53  ;;  %v2360_v46 = vmul.f32 %v6427_v30, %v6393_v53  ;;  %v2333_v51 = vmul.f32 %v6430_v52, %v6393_v53 }
 0x9c5   : > { %v2297_v14 = vmul.f32 %v6424_v1, %v6391_v57  ;;  %v2359_v21 = vmul.f32 %v6427_v30, %v6391_v57  ;;  %v2332_v11 = vmul.f32 %v6430_v52, %v6391_v57  ;;  %v2300_v32 = vmul.f32 %v6424_v1, %v6405_v60 }
 0x9c6   : > { %v2335_v24 = vmul.f32 %v6430_v52, %v6405_v60 }
 0x9c8   : > { %2269 = vrot.lane.b32.xlu1 %v6393_v53, %s4355_s20  ;;  %2267 = vrot.lane.b32.xlu0 %v6391_v57, %s4355_s20 }
 0x9cc   : > { %2285 = vrot.lane.b32.xlu1 %v6405_v60, %s4356_s23  ;;  %2283 = vrot.lane.b32.xlu0 %v6403_v59, %s4356_s23 }
 0x9d0   : > { %2273 = vrot.lane.b32.xlu1 %v6405_v60, %s4355_s20  ;;  %2271 = vrot.lane.b32.xlu0 %v6403_v59, %s4355_s20 }
 0xa36   : > { %v2282_v38 = vpop.permute.xlu1 %2281  ;;  %v2280_v22 = vpop.permute.xlu0 %2279 }
 0xa37   : > { %v2288_v47 = vmul.f32 %v7757_v50, %v2282_v38  ;;  %v2287_v37 = vmul.f32 %v7757_v50, %v2280_v22 }
 0xa39   : > { %v2293_v9 = vmul.f32 %v6416_v16, %v2288_v47  ;;  %v2355_v36 = vmul.f32 %v6419_v0, %v2288_v47  ;;  %v2292_v15 = vmul.f32 %v6416_v16, %v2287_v37  ;;  %v2354_v44 = vmul.f32 %v6419_v0, %v2287_v37 }
 0xa3a   : > { %v2270_v18 = vpop.permute.xlu1 %2269  ;;  %v2268_v17 = vpop.permute.xlu0 %2267  ;;  %v2328_v29 = vmul.f32 %v6435_v23, %v2288_v47  ;;  %v2327_v49 = vmul.f32 %v6435_v23, %v2287_v37  ;;  %v2362_v47 = vmul.f32 %v6427_v30, %v6405_v60 }
 0xa3b   : > { %v2276_v42 = vmul.f32 %v7758_v58, %v2270_v18  ;;  %v2275_v35 = vmul.f32 %v7758_v58, %v2268_v17  ;;  %v2302_v12 = vadd.f32 %v2298_v48, %v2293_v9  ;;  %v2364_v31 = vadd.f32 %v2360_v46, %v2355_v36 }
 0xa3c   : > { %v2301_v10 = vadd.f32 %v2297_v14, %v2292_v15  ;;  %v2363_v27 = vadd.f32 %v2359_v21, %v2354_v44  ;;  %v2337_v38 = vadd.f32 %v2333_v51, %v2328_v29  ;;  %v2336_v22 = vadd.f32 %v2332_v11, %v2327_v49 }
 0xa3d   : > { %v2307_v25 = vmul.f32 %v6439_v56, %v2276_v42  ;;  %v2369_v55 = vmul.f32 %v6450_v13, %v2276_v42  ;;  %v2306_v7 = vmul.f32 %v6439_v56, %v2275_v35  ;;  %v2368_v41 = vmul.f32 %v6450_v13, %v2275_v35 }
 0xa3e   : > { %v2286_v6 = vpop.permute.xlu1 %2285  ;;  %v2284_v39 = vpop.permute.xlu0 %2283  ;;  %v2342_v34 = vmul.f32 %v6442_v61, %v2276_v42  ;;  %v2341_v20 = vmul.f32 %v6442_v61, %v2275_v35  ;;  %v2299_v51 = vmul.f32 %v6424_v1, %v6403_v59  ;;  %v2361_v14 = vmul.f32 %v6427_v30, %v6403_v59 }
 0xa3f   : > { %v2290_v26 = vmul.f32 %v7757_v50, %v2286_v6  ;;  %v2311_v2 = vadd.f32 %v2307_v25, %v2302_v12  ;;  %v2373_v40 = vadd.f32 %v2369_v55, %v2364_v31  ;;  %v2310_v28 = vadd.f32 %v2306_v7, %v2301_v10 }
 0xa40   : > { %v2372_v33 = vadd.f32 %v2368_v41, %v2363_v27  ;;  %v2289_v5 = vmul.f32 %v7757_v50, %v2284_v39  ;;  %v2346_v46 = vadd.f32 %v2342_v34, %v2337_v38  ;;  %v2345_v35 = vadd.f32 %v2341_v20, %v2336_v22 }
 0xa41   : > { %v2316_v19 = vrot.slane %v2311_v2, 7  ;;  %v2314_v8 = vrot.slane %v2310_v28, 7  ;;  %v2295_v37 = vmul.f32 %v6416_v16, %v2290_v26  ;;  %v2378_v9 = vrot.slane %v2373_v40, 1 }
 0xa42   : > { %v2376_v15 = vrot.slane %v2372_v33, 1  ;;  %v2357_v18 = vmul.f32 %v6419_v0, %v2290_v26  ;;  %v2274_v17 = vpop.permute.xlu1 %2273  ;;  %v2272_v48 = vpop.permute.xlu0 %2271  ;;  %v2294_v12 = vmul.f32 %v6416_v16, %v2289_v5  ;;  %v2356_v29 = vmul.f32 %v6419_v0, %v2289_v5 }
 0xa43   : > { %v2320_v36 = vsel %vm543_vm8, %v2316_v19, %v2314_v8  ;;  %v2318_v42 = vsel %vm543_vm8, %v2314_v8, %v2316_v19  ;;  %v2304_v31 = vadd.f32 %v2300_v32, %v2295_v37  ;;  %v2330_v21 = vmul.f32 %v6435_v23, %v2290_v26 }
 0xa44   : > { %v2322_v44 = vmul.f32 %v7719_v3, %v2320_v36  ;;  %v2278_v10 = vmul.f32 %v7758_v58, %v2274_v17  ;;  %v2277_v25 = vmul.f32 %v7758_v58, %v2272_v48  ;;  %v2382_v7 = vsel %vm606_vm9, %v2378_v9, %v2376_v15 }
 0xa45   : > { %v2366_v6 = vadd.f32 %v2362_v47, %v2357_v18  ;;  %v2329_v39 = vmul.f32 %v6435_v23, %v2289_v5  ;;  %v2350_v49 = vadd.f32 %v2346_v46, %v2318_v42  ;;  %v2380_v27 = vsel %vm606_vm9, %v2376_v15, %v2378_v9 }
 0xa46   : > { %v2349_v55 = vadd.f32 %v2345_v35, %v2322_v44  ;;  %v2309_v41 = vmul.f32 %v6439_v56, %v2278_v10  ;;  %v2371_v11 = vmul.f32 %v6450_v13, %v2278_v10  ;;  %v2303_v26 = vadd.f32 %v2299_v51, %v2294_v12 }
 0xa47   : > { %v2365_v2 = vadd.f32 %v2361_v14, %v2356_v29  ;;  %v2308_v40 = vmul.f32 %v6439_v56, %v2277_v25  ;;  %v2370_v28 = vmul.f32 %v6450_v13, %v2277_v25  ;;  %v2385_v34 = vmul.f32 %v7721_v4, %v2382_v7 }
 0xa48   : > { %v2313_v33 = vadd.f32 %v2309_v41, %v2304_v31  ;;  %v2344_v32 = vmul.f32 %v6442_v61, %v2278_v10  ;;  %v2375_v19 = vadd.f32 %v2371_v11, %v2366_v6  ;;  %v2388_v8 = vadd.f32 %v2380_v27, %v2349_v55 }
 0xa49   : > { %v2334_v20 = vmul.f32 %v6430_v52, %v6403_v59  ;;  %v2312_v5 = vadd.f32 %v2308_v40, %v2303_v26  ;;  %v2374_v38 = vadd.f32 %v2370_v28, %v2365_v2  ;;  %v2339_v22 = vadd.f32 %v2335_v24, %v2330_v21 }
 0xa4a   : > { %v2317_v47 = vrot.slane %v2313_v33, 7  ;;  %v2379_v37 = vrot.slane %v2375_v19, 1  ;;  %v2343_v9 = vmul.f32 %v6442_v61, %v2277_v25  ;;  %v2389_v48 = vadd.f32 %v2385_v34, %v2350_v49 }
 0xa4b   : > { %v2315_v36 = vrot.slane %v2312_v5, 7  ;;  %v2377_v15 = vrot.slane %v2374_v38, 1  ;;  %v2338_v18 = vadd.f32 %v2334_v20, %v2329_v39  ;;  %v2348_v17 = vadd.f32 %v2344_v32, %v2339_v22 }
 0xa4c   : > { %v6509_v46 = vstv %s7806_s25  ;;  %s7819_s25 = sld [smem:[#allocation146_spill]] }
 0xa4d   : > { %v2321_v44 = vsel %vm543_vm8, %v2317_v47, %v2315_v36  ;;  %v2319_v51 = vsel %vm543_vm8, %v2315_v36, %v2317_v47  ;;  %v2383_v24 = vsel %vm606_vm9, %v2379_v37, %v2377_v15  ;;  %v2393_v14 = vadd.f32 %v6509_v46, %v2388_v8 }
 0xa4e   : > { %v2324_v42 = vmul.f32 %v7719_v3, %v2321_v44  ;;  %v2347_v35 = vadd.f32 %v2343_v9, %v2338_v18  ;;  %v2352_v12 = vadd.f32 %v2348_v17, %v2319_v51  ;;  %v2387_v29 = vmul.f32 %v7721_v4, %v2383_v24 }
 0xa4f   : > { %v2394_v10 = vadd.f32 %v6509_v46, %v2389_v48  ;;  %v2381_v25 = vsel %vm606_vm9, %v2377_v15, %v2379_v37  ;;  %v2397_v7 = vmul.f32 %v2393_v14, %v2393_v14 }
 0xa50   : > { %v2351_v31 = vadd.f32 %v2347_v35, %v2324_v42  ;;  %v2391_v21 = vadd.f32 %v2387_v29, %v2352_v12  ;;  %v6528_v35 = vstv %s7808_s2 }
 0xa51   : > { %v2401_v49 = vadd.f32 %v2394_v10, %v2393_v14  ;;  %v2398_v27 = vmul.f32 %v2394_v10, %v2394_v10  ;;  %7809 = vst [vmem:[#allocation42_spill] sm:$0xff] %v6528_v35 }
 0xa52   : > { %v2390_v55 = vadd.f32 %v2381_v25, %v2351_v31  ;;  %v2396_v39 = vadd.f32 %v6509_v46, %v2391_v21 }
 0xa53   : > { %v2413_v26 = vadd.f32 %v2398_v27, %v2397_v7 }
 0xa54   : > { %v2395_v6 = vadd.f32 %v6509_v46, %v2390_v55  ;;  %v2400_v40 = vmul.f32 %v2396_v39, %v2396_v39 }
 0xa56   : > { %v2402_v41 = vadd.f32 %v2401_v49, %v2395_v6  ;;  %v2399_v11 = vmul.f32 %v2395_v6, %v2395_v6 }
 0xa58   : > { %v2403_v2 = vadd.f32 %v2402_v41, %v2396_v39  ;;  %v2414_v28 = vadd.f32 %v2413_v26, %v2399_v11  ;;  %v6551_v11 = vstv %s7810_s30  ;;  %v6554_v26 = vstv %s7811_s7 }
 0xa5a   : > { %2404 = vadd.xlane.f32.xlu0 %v2403_v2  ;;  %v2415_v34 = vadd.f32 %v2414_v28, %v2400_v40  ;;  %v6557_v28 = vstv %s7812_s8 }
 0xa5c   : > { %2416 = vadd.xlane.f32.xlu1 %v2415_v34 }
 0xae7   : > { %v2405_v33 = vpop.xlane.xlu0 %2404 }
 0xae8   : > { %v2406_v32 = vrot.slane %v2405_v33, 4 }
 0xae9   : > { %v2417_v19 = vpop.xlane.xlu1 %2416 }
 0xaea   : > { %v2407_v8 = vadd.f32 %v2406_v32, %v2405_v33  ;;  %v2418_v20 = vrot.slane %v2417_v19, 4  ;;  %v6562_v32 = vstv %s7813_s9 }
 0xaec   : > { %v2408_v5 = vrot.slane %v2407_v8, 2  ;;  %v2419_v38 = vadd.f32 %v2418_v20, %v2417_v19  ;;  %v6565_v19 = vstv %s7814_s10 }
 0xaee   : > { %v2420_v22 = vrot.slane %v2419_v38, 2  ;;  %v2409_v47 = vadd.f32 %v2408_v5, %v2407_v8  ;;  %v6568_v8 = vstv %s7815_s11 }
 0xaf0   : > { %v2410_v37 = vrot.slane %v2409_v47, 1  ;;  %v2421_v9 = vadd.f32 %v2420_v22, %v2419_v38  ;;  %v6573_v38 = vstv %s7816_s12 }
 0xaf2   : > { %v2411_v36 = vadd.f32 %v2410_v37, %v2409_v47  ;;  %v2422_v15 = vrot.slane %v2421_v9, 1  ;;  %v6578_v37 = vstv %s7817_s13 }
 0xaf4   : > { %3957 = vpush %v2411_v36  ;;  %v2423_v18 = vadd.f32 %v2422_v15, %v2421_v9  ;;  %v6581_v9 = vstv %s7818_s15 }
 0xaf6   : > { %3959 = vpush %v2423_v18 }
 0xb25   : > { %s3958_s3 = spop %3957 }
 0xb26   : > { %s2425_s29 = smul.f32 0.00024414063, %s3958_s3  ;;  %s7820_s3 = sld [smem:[#allocation147_spill]] }
 0xb27   : > { %s3960_s16 = spop %3959 }
 0xb28   : > { %s2427_s4 = smul.f32 %s2425_s29, %s2425_s29  ;;  %v2430_v44 = vstv %s2425_s29 }
 0xb29   : > { %s2426_s5 = smul.f32 0.00024414063, %s3960_s16  ;;  %v2431_v51 = vsub.f32 %v2393_v14, %v2430_v44  ;;  %v2432_v24 = vsub.f32 %v2394_v10, %v2430_v44  ;;  %v2433_v31 = vsub.f32 %v2395_v6, %v2430_v44  ;;  %v2434_v21 = vsub.f32 %v2396_v39, %v2430_v44 }
 0xb2b   : > { %s2428_s6 = ssub.f32 %s2426_s5, %s2427_s4  ;;  %s7821_s4 = sld [smem:[#allocation148_spill]] }
 0xb2d   : > { %s2429_s18 = smax.f32 %s4357_s14, %s2428_s6 }
 0xb2e   : > { %s2435_s21 = sadd.f32 1e-05, %s2429_s18 }
 0xb30   : > { %v2436_v17 = vstv %s2435_s21 }
 0xb31   : > { %4123 = vrsqrt.f32 %v2436_v17 }
 0xb3b   : > { %v4124_v48 = vpop.eup %4123 }
 0xb3c   : > { %3961 = vpush %v4124_v48 }
 0xb6d   : > { %s3962_s27 = spop %3961 }
 0xb6e   : > { %s2439_s28 = smul.f32 %s3962_s27, %s7807_s24 }
 0xb70   : > { %v2440_v42 = vstv %s2439_s28 }
 0xb71   : > { %v2441_v12 = vmul.f32 %v2440_v42, %v2431_v51  ;;  %v2442_v29 = vmul.f32 %v2440_v42, %v2432_v24  ;;  %v2443_v7 = vmul.f32 %v2440_v42, %v2433_v31  ;;  %v2444_v49 = vmul.f32 %v2440_v42, %v2434_v21 }
 0xb73   : > { %v2446_v25 = vadd.f32 %v6528_v35, %v2441_v12  ;;  %v2447_v55 = vadd.f32 %v6528_v35, %v2442_v29  ;;  %v2448_v14 = vadd.f32 %v6528_v35, %v2443_v7  ;;  %v2449_v10 = vadd.f32 %v6528_v35, %v2444_v49 }
 0xb75   : > { %v2450_v27 = vmax.f32 %v2446_v25, 0.0  ;;  %v2451_v41 = vmax.f32 %v2447_v55, 0.0  ;;  %v6538_v6 = vmax.f32 %v2448_v14, 0.0  ;;  %v6540_v39 = vmax.f32 %v2449_v10, 0.0 }
 0xb77   : > { %2468 = vrot.lane.b32.xlu1 %v2451_v41, %s4356_s23  ;;  %2466 = vrot.lane.b32.xlu0 %v2450_v27, %s4356_s23  ;;  %v2485_v22 = vmul.f32 %v6557_v28, %v2451_v41  ;;  %v2520_v18 = vmul.f32 %v6562_v32, %v2451_v41  ;;  %v2547_v17 = vmul.f32 %v6565_v19, %v2451_v41 }
 0xb78   : > { %v2484_v48 = vmul.f32 %v6557_v28, %v2450_v27  ;;  %v2519_v51 = vmul.f32 %v6562_v32, %v2450_v27  ;;  %v2546_v24 = vmul.f32 %v6565_v19, %v2450_v27 }
 0xb7b   : > { %2456 = vrot.lane.b32.xlu1 %v2451_v41, %s4355_s20  ;;  %2454 = vrot.lane.b32.xlu0 %v2450_v27, %s4355_s20 }
 0xb7f   : > { %2472 = vrot.lane.b32.xlu1 %v6540_v39, %s4356_s23  ;;  %2470 = vrot.lane.b32.xlu0 %v6538_v6, %s4356_s23 }
 0xb83   : > { %2460 = vrot.lane.b32.xlu1 %v6540_v39, %s4355_s20  ;;  %2458 = vrot.lane.b32.xlu0 %v6538_v6, %s4355_s20 }
 0xbe9   : > { %v2469_v2 = vpop.permute.xlu1 %2468  ;;  %v2467_v40 = vpop.permute.xlu0 %2466 }
 0xbea   : > { %v2475_v34 = vmul.f32 %v7757_v50, %v2469_v2  ;;  %v2474_v33 = vmul.f32 %v7757_v50, %v2467_v40 }
 0xbec   : > { %v2480_v20 = vmul.f32 %v6551_v11, %v2475_v34  ;;  %v2542_v5 = vmul.f32 %v6554_v26, %v2475_v34  ;;  %v2479_v47 = vmul.f32 %v6551_v11, %v2474_v33  ;;  %v2541_v44 = vmul.f32 %v6554_v26, %v2474_v33 }
 0xbed   : > { %v2457_v36 = vpop.permute.xlu1 %2456  ;;  %v2455_v15 = vpop.permute.xlu0 %2454  ;;  %v2515_v31 = vmul.f32 %v6568_v8, %v2475_v34  ;;  %v2514_v25 = vmul.f32 %v6568_v8, %v2474_v33 }
 0xbee   : > { %v2463_v42 = vmul.f32 %v7758_v58, %v2457_v36  ;;  %v2462_v12 = vmul.f32 %v7758_v58, %v2455_v15  ;;  %v2489_v29 = vadd.f32 %v2485_v22, %v2480_v20  ;;  %v2551_v21 = vadd.f32 %v2547_v17, %v2542_v5 }
 0xbef   : > { %v2488_v55 = vadd.f32 %v2484_v48, %v2479_v47  ;;  %v2550_v27 = vadd.f32 %v2546_v24, %v2541_v44  ;;  %v2524_v47 = vadd.f32 %v2520_v18, %v2515_v31  ;;  %v2523_v36 = vadd.f32 %v2519_v51, %v2514_v25 }
 0xbf0   : > { %v2494_v7 = vmul.f32 %v6573_v38, %v2463_v42  ;;  %v2556_v49 = vmul.f32 %v6581_v9, %v2463_v42  ;;  %v2493_v41 = vmul.f32 %v6573_v38, %v2462_v12  ;;  %v2529_v2 = vmul.f32 %v6578_v37, %v2463_v42 }
 0xbf1   : > { %v2473_v14 = vpop.permute.xlu1 %2472  ;;  %v2471_v10 = vpop.permute.xlu0 %2470  ;;  %v2528_v40 = vmul.f32 %v6578_v37, %v2462_v12  ;;  %v2555_v20 = vmul.f32 %v6581_v9, %v2462_v12  ;;  %v2487_v17 = vmul.f32 %v6557_v28, %v6540_v39  ;;  %v2522_v12 = vmul.f32 %v6562_v32, %v6540_v39 }
 0xbf2   : > { %v2498_v34 = vadd.f32 %v2494_v7, %v2489_v29  ;;  %v2560_v5 = vadd.f32 %v2556_v49, %v2551_v21  ;;  %v2497_v22 = vadd.f32 %v2493_v41, %v2488_v55  ;;  %v2477_v33 = vmul.f32 %v7757_v50, %v2473_v14 }
 0xbf3   : > { %v2559_v15 = vadd.f32 %v2555_v20, %v2550_v27  ;;  %v2476_v24 = vmul.f32 %v7757_v50, %v2471_v10  ;;  %v2533_v42 = vadd.f32 %v2529_v2, %v2524_v47  ;;  %v2532_v62 = vadd.f32 %v2528_v40, %v2523_v36 }
 0xbf4   : > { %v2503_v48 = vrot.slane %v2498_v34, 7  ;;  %v2565_v45 = vrot.slane %v2560_v5, 1  ;;  %v2501_v44 = vrot.slane %v2497_v22, 7  ;;  %v2482_v51 = vmul.f32 %v6551_v11, %v2477_v33 }
 0xbf5   : > { %v2563_v54 = vrot.slane %v2559_v15, 1  ;;  %v2544_v31 = vmul.f32 %v6554_v26, %v2477_v33  ;;  %v2461_v21 = vpop.permute.xlu1 %2460  ;;  %v2459_v25 = vpop.permute.xlu0 %2458  ;;  %v2549_v10 = vmul.f32 %v6565_v19, %v6540_v39  ;;  %v2481_v27 = vmul.f32 %v6551_v11, %v2476_v24 }
 0xbf6   : > { %v2505_v29 = vsel %vm543_vm8, %v2501_v44, %v2503_v48  ;;  %v2507_v18 = vsel %vm543_vm8, %v2503_v48, %v2501_v44  ;;  %v2543_v2 = vmul.f32 %v6554_v26, %v2476_v24  ;;  %v2486_v20 = vmul.f32 %v6557_v28, %v6538_v6 }
 0xbf7   : > { %v2509_v55 = vmul.f32 %v7719_v3, %v2507_v18  ;;  %v2537_v7 = vadd.f32 %v2533_v42, %v2505_v29  ;;  %v2567_v49 = vsel %vm606_vm9, %v2563_v54, %v2565_v45  ;;  %v2569_v41 = vsel %vm606_vm9, %v2565_v45, %v2563_v54 }
 0xbf8   : > { %v2572_v14 = vmul.f32 %v7721_v4, %v2569_v41  ;;  %v2465_v34 = vmul.f32 %v7758_v58, %v2461_v21  ;;  %v2464_v5 = vmul.f32 %v7758_v58, %v2459_v25  ;;  %v2491_v47 = vadd.f32 %v2487_v17, %v2482_v51 }
 0xbf9   : > { %v2536_v40 = vadd.f32 %v2532_v62, %v2509_v55  ;;  %v2517_v54 = vmul.f32 %v6568_v8, %v2477_v33  ;;  %v2548_v45 = vmul.f32 %v6565_v19, %v6538_v6  ;;  %v2553_v36 = vadd.f32 %v2549_v10, %v2544_v31 }
 0xbfa   : > { %v2576_v22 = vadd.f32 %v2572_v14, %v2537_v7  ;;  %v2496_v15 = vmul.f32 %v6573_v38, %v2465_v34  ;;  %v2558_v62 = vmul.f32 %v6581_v9, %v2465_v34  ;;  %v2490_v48 = vadd.f32 %v2486_v20, %v2481_v27 }
 0xbfb   : > { %v2575_v39 = vadd.f32 %v2567_v49, %v2536_v40  ;;  %v2552_v44 = vadd.f32 %v2548_v45, %v2543_v2  ;;  %v2495_v42 = vmul.f32 %v6573_v38, %v2464_v5  ;;  %v2557_v29 = vmul.f32 %v6581_v9, %v2464_v5 }
 0xbfc   : > { %v2516_v17 = vmul.f32 %v6568_v8, %v2476_v24  ;;  %v2500_v18 = vadd.f32 %v2496_v15, %v2491_v47  ;;  %v2531_v33 = vmul.f32 %v6578_v37, %v2465_v34  ;;  %v2562_v51 = vadd.f32 %v2558_v62, %v2553_v36 }
 0xbfd   : > { %v2521_v31 = vmul.f32 %v6562_v32, %v6538_v6  ;;  %v2499_v21 = vadd.f32 %v2495_v42, %v2490_v48  ;;  %v2561_v25 = vadd.f32 %v2557_v29, %v2552_v44  ;;  %v2526_v55 = vadd.f32 %v2522_v12, %v2517_v54 }
 0xbfe   : > { %v2504_v7 = vrot.slane %v2500_v18, 7  ;;  %v2566_v49 = vrot.slane %v2562_v51, 1  ;;  %v2530_v41 = vmul.f32 %v6578_v37, %v2464_v5  ;;  %v6638_v27 = vstv %s7819_s25 }
 0xbff   : > { %v2502_v14 = vrot.slane %v2499_v21, 7  ;;  %v2564_v10 = vrot.slane %v2561_v25, 1  ;;  %v2525_v2 = vadd.f32 %v2521_v31, %v2516_v17  ;;  %v2535_v24 = vadd.f32 %v2531_v33, %v2526_v55 }
 0xc00   : > { %v6641_v40 = vadd.f32 %v6638_v27, %v2575_v39  ;;  %v2581_v15 = vadd.f32 %v6638_v27, %v2576_v22 }
 0xc01   : > { %v2506_v20 = vsel %vm543_vm8, %v2502_v14, %v2504_v7  ;;  %v2508_v6 = vsel %vm543_vm8, %v2504_v7, %v2502_v14  ;;  %v2568_v12 = vsel %vm606_vm9, %v2564_v10, %v2566_v49  ;;  %v2570_v34 = vsel %vm606_vm9, %v2566_v49, %v2564_v10 }
 0xc02   : > { %v2511_v5 = vmul.f32 %v7719_v3, %v2508_v6  ;;  %v2534_v47 = vadd.f32 %v2530_v41, %v2525_v2  ;;  %v2574_v54 = vmul.f32 %v7721_v4, %v2570_v34  ;;  %v2539_v45 = vadd.f32 %v2535_v24, %v2506_v20 }
 0xc03   : > { %v2584_v48 = vmul.f32 %v6641_v40, %v6641_v40  ;;  %v2588_v29 = vadd.f32 %v2581_v15, %v6641_v40  ;;  %v2585_v17 = vmul.f32 %v2581_v15, %v2581_v15 }
 0xc04   : > { %v2538_v39 = vadd.f32 %v2534_v47, %v2511_v5  ;;  %v2578_v36 = vadd.f32 %v2574_v54, %v2539_v45 }
 0xc05   : > { %v2600_v51 = vadd.f32 %v2585_v17, %v2584_v48 }
 0xc06   : > { %v2577_v62 = vadd.f32 %v2568_v12, %v2538_v39  ;;  %v2583_v42 = vadd.f32 %v6638_v27, %v2578_v36 }
 0xc08   : > { %v2582_v44 = vadd.f32 %v6638_v27, %v2577_v62  ;;  %v2587_v21 = vmul.f32 %v2583_v42, %v2583_v42 }
 0xc0a   : > { %v2589_v18 = vadd.f32 %v2588_v29, %v2582_v44  ;;  %v2586_v33 = vmul.f32 %v2582_v44, %v2582_v44  ;;  %v6663_v29 = vstv %s7821_s4 }
 0xc0c   : > { %v2590_v31 = vadd.f32 %v2589_v18, %v2583_v42  ;;  %v2601_v25 = vadd.f32 %v2600_v51, %v2586_v33 }
 0xc0e   : > { %2591 = vadd.xlane.f32.xlu0 %v2590_v31  ;;  %v2602_v55 = vadd.f32 %v2601_v25, %v2587_v21 }
 0xc10   : > { %2603 = vadd.xlane.f32.xlu1 %v2602_v55 }
 0xc9b   : > { %v2592_v22 = vpop.xlane.xlu0 %2591 }
 0xc9c   : > { %v2593_v7 = vrot.slane %v2592_v22, 4 }
 0xc9d   : > { %v2604_v49 = vpop.xlane.xlu1 %2603 }
 0xc9e   : > { %v2594_v41 = vadd.f32 %v2593_v7, %v2592_v22  ;;  %v2605_v14 = vrot.slane %v2604_v49, 4 }
 0xca0   : > { %v2595_v10 = vrot.slane %v2594_v41, 2  ;;  %v2606_v2 = vadd.f32 %v2605_v14, %v2604_v49 }
 0xca2   : > { %v2607_v24 = vrot.slane %v2606_v2, 2  ;;  %v2596_v20 = vadd.f32 %v2595_v10, %v2594_v41 }
 0xca4   : > { %v2597_v6 = vrot.slane %v2596_v20, 1  ;;  %v2608_v12 = vadd.f32 %v2607_v24, %v2606_v2 }
 0xca6   : > { %v2598_v34 = vadd.f32 %v2597_v6, %v2596_v20  ;;  %v2609_v5 = vrot.slane %v2608_v12, 1 }
 0xca8   : > { %3963 = vpush %v2598_v34  ;;  %v2610_v47 = vadd.f32 %v2609_v5, %v2608_v12 }
 0xcaa   : > { %3965 = vpush %v2610_v47 }
 0xcd9   : > { %s3964_s29 = spop %3963 }
 0xcda   : > { %s2612_s16 = smul.f32 0.00024414063, %s3964_s29 }
 0xcdb   : > { %s3966_s2 = spop %3965 }
 0xcdc   : > { %s2614_s5 = smul.f32 %s2612_s16, %s2612_s16  ;;  %v2617_v39 = vstv %s2612_s16 }
 0xcdd   : > { %s2613_s6 = smul.f32 0.00024414063, %s3966_s2  ;;  %v2618_v36 = vsub.f32 %v6641_v40, %v2617_v39  ;;  %v2619_v62 = vsub.f32 %v2581_v15, %v2617_v39  ;;  %v2620_v17 = vsub.f32 %v2582_v44, %v2617_v39  ;;  %v2621_v18 = vsub.f32 %v2583_v42, %v2617_v39 }
 0xcdf   : > { %s2615_s18 = ssub.f32 %s2613_s6, %s2614_s5 }
 0xce1   : > { %s2616_s21 = smax.f32 %s4357_s14, %s2615_s18 }
 0xce2   : > { %s2622_s27 = sadd.f32 1e-05, %s2616_s21 }
 0xce4   : > { %v2623_v54 = vstv %s2622_s27 }
 0xce5   : > { %4125 = vrsqrt.f32 %v2623_v54 }
 0xcef   : > { %v4126_v45 = vpop.eup %4125 }
 0xcf0   : > { %3967 = vpush %v4126_v45 }
 0xd21   : > { %s3968_s28 = spop %3967 }
 0xd22   : > { %s2626_s30 = smul.f32 %s3968_s28, %s7820_s3 }
 0xd24   : > { %v2627_v48 = vstv %s2626_s30 }
 0xd25   : > { %v2628_v33 = vmul.f32 %v2627_v48, %v2618_v36  ;;  %v2629_v51 = vmul.f32 %v2627_v48, %v2619_v62  ;;  %v2630_v31 = vmul.f32 %v2627_v48, %v2620_v17  ;;  %v2631_v21 = vmul.f32 %v2627_v48, %v2621_v18 }
 0xd27   : > { %v2633_v25 = vadd.f32 %v6663_v29, %v2628_v33  ;;  %v2634_v55 = vadd.f32 %v6663_v29, %v2629_v51  ;;  %v2635_v49 = vadd.f32 %v6663_v29, %v2630_v31  ;;  %v2636_v40 = vadd.f32 %v6663_v29, %v2631_v21 }
 0xd29   : > { %v2637_v22 = vmax.f32 %v2633_v25, 0.0  ;;  %v2638_v7 = vmax.f32 %v2634_v55, 0.0  ;;  %v2639_v42 = vmax.f32 %v2635_v49, 0.0  ;;  %v2640_v41 = vmax.f32 %v2636_v40, 0.0 }
 0xd2b   : > { %v6670_v15 = vadd.f32 %v2637_v22, %v6391_v57  ;;  %v6673_v44 = vadd.f32 %v2638_v7, %v6393_v53  ;;  %v6684_v57 = vadd.f32 %v2639_v42, %v6403_v59  ;;  %v6687_v53 = vadd.f32 %v2640_v41, %v6405_v60 }
 0xd2d   : > { %2659 = vrot.lane.b32.xlu1 %v6673_v44, %s4356_s23  ;;  %2657 = vrot.lane.b32.xlu0 %v6670_v15, %s4356_s23  ;;  %v2674_v34 = vmul.f32 %v6673_v44, %v6424_v1  ;;  %v2730_v5 = vmul.f32 %v6673_v44, %v6427_v30  ;;  %v2706_v54 = vmul.f32 %v6673_v44, %v6430_v52 }
 0xd2e   : > { %v2673_v45 = vmul.f32 %v6670_v15, %v6424_v1  ;;  %v2729_v18 = vmul.f32 %v6670_v15, %v6427_v30  ;;  %v2705_v42 = vmul.f32 %v6670_v15, %v6430_v52 }
 0xd31   : > { %2647 = vrot.lane.b32.xlu1 %v6673_v44, %s4355_s20  ;;  %2645 = vrot.lane.b32.xlu0 %v6670_v15, %s4355_s20 }
 0xd35   : > { %2663 = vrot.lane.b32.xlu1 %v6687_v53, %s4356_s23  ;;  %2661 = vrot.lane.b32.xlu0 %v6684_v57, %s4356_s23 }
 0xd39   : > { %2651 = vrot.lane.b32.xlu1 %v6687_v53, %s4355_s20  ;;  %2649 = vrot.lane.b32.xlu0 %v6684_v57, %s4355_s20 }
 0xd9f   : > { %v2660_v14 = vpop.permute.xlu1 %2659  ;;  %v2658_v10 = vpop.permute.xlu0 %2657 }
 0xda0   : > { %v2666_v59 = vmul.f32 %v7757_v50, %v2660_v14  ;;  %v2665_v2 = vmul.f32 %v7757_v50, %v2658_v10 }
 0xda2   : > { %v2670_v60 = vmul.f32 %v2666_v59, %v6416_v16  ;;  %v2726_v24 = vmul.f32 %v2666_v59, %v6419_v0  ;;  %v2669_v20 = vmul.f32 %v2665_v2, %v6416_v16  ;;  %v2725_v47 = vmul.f32 %v2665_v2, %v6419_v0 }
 0xda3   : > { %v2648_v6 = vpop.permute.xlu1 %2647  ;;  %v2646_v12 = vpop.permute.xlu0 %2645  ;;  %v2702_v48 = vmul.f32 %v2666_v59, %v6435_v23  ;;  %v2701_v22 = vmul.f32 %v2665_v2, %v6435_v23  ;;  %v2708_v2 = vmul.f32 %v6687_v53, %v6430_v52 }
 0xda4   : > { %v2654_v39 = vmul.f32 %v7758_v58, %v2648_v6  ;;  %v2653_v36 = vmul.f32 %v7758_v58, %v2646_v12  ;;  %v2678_v62 = vadd.f32 %v2674_v34, %v2670_v60  ;;  %v2734_v17 = vadd.f32 %v2730_v5, %v2726_v24 }
 0xda5   : > { %v2677_v33 = vadd.f32 %v2673_v45, %v2669_v20  ;;  %v2733_v7 = vadd.f32 %v2729_v18, %v2725_v47  ;;  %v2676_v24 = vmul.f32 %v6687_v53, %v6424_v1  ;;  %v2710_v5 = vadd.f32 %v2706_v54, %v2702_v48 }
 0xda6   : > { %v2682_v51 = vmul.f32 %v2654_v39, %v6439_v56  ;;  %v2738_v31 = vmul.f32 %v2654_v39, %v6450_v13  ;;  %v2681_v21 = vmul.f32 %v2653_v36, %v6439_v56  ;;  %v2737_v49 = vmul.f32 %v2653_v36, %v6450_v13 }
 0xda7   : > { %v2664_v25 = vpop.permute.xlu1 %2663  ;;  %v2662_v55 = vpop.permute.xlu0 %2661  ;;  %v2714_v59 = vmul.f32 %v2654_v39, %v6442_v61  ;;  %v2713_v12 = vmul.f32 %v2653_v36, %v6442_v61  ;;  %v2709_v47 = vadd.f32 %v2705_v42, %v2701_v22  ;;  %v2732_v45 = vmul.f32 %v6687_v53, %v6427_v30 }
 0xda8   : > { %v2668_v40 = vmul.f32 %v7757_v50, %v2664_v25  ;;  %v2686_v41 = vadd.f32 %v2682_v51, %v2678_v62  ;;  %v2742_v14 = vadd.f32 %v2738_v31, %v2734_v17  ;;  %v2685_v10 = vadd.f32 %v2681_v21, %v2677_v33 }
 0xda9   : > { %v2741_v60 = vadd.f32 %v2737_v49, %v2733_v7  ;;  %v2667_v34 = vmul.f32 %v7757_v50, %v2662_v55  ;;  %v2718_v21 = vadd.f32 %v2714_v59, %v2710_v5  ;;  %v2675_v54 = vmul.f32 %v6684_v57, %v6424_v1 }
 0xdaa   : > { %v2691_v20 = vrot.slane %v2686_v41, 7  ;;  %v2689_v6 = vrot.slane %v2685_v10, 7  ;;  %v2672_v39 = vmul.f32 %v2668_v40, %v6416_v16  ;;  %v2747_v62 = vrot.slane %v2742_v14, 1 }
 0xdab   : > { %v2745_v18 = vrot.slane %v2741_v60, 1  ;;  %v2728_v33 = vmul.f32 %v2668_v40, %v6419_v0  ;;  %v2652_v51 = vpop.permute.xlu1 %2651  ;;  %v2650_v31 = vpop.permute.xlu0 %2649  ;;  %v2731_v48 = vmul.f32 %v6684_v57, %v6427_v30  ;;  %v2717_v55 = vadd.f32 %v2713_v12, %v2709_v47 }
 0xdac   : > { %v2695_v17 = vsel %vm543_vm8, %v2691_v20, %v2689_v6  ;;  %v2693_v25 = vsel %vm543_vm8, %v2689_v6, %v2691_v20  ;;  %v2671_v22 = vmul.f32 %v2667_v34, %v6416_v16  ;;  %v2727_v7 = vmul.f32 %v2667_v34, %v6419_v0 }
 0xdad   : > { %v2697_v36 = vmul.f32 %v7719_v3, %v2695_v17  ;;  %v2680_v49 = vadd.f32 %v2676_v24, %v2672_v39  ;;  %v2704_v42 = vmul.f32 %v2668_v40, %v6435_v23  ;;  %v2656_v41 = vmul.f32 %v7758_v58, %v2652_v51 }
 0xdae   : > { %v2655_v14 = vmul.f32 %v7758_v58, %v2650_v31  ;;  %v2751_v59 = vsel %vm606_vm9, %v2747_v62, %v2745_v18  ;;  %v2736_v60 = vadd.f32 %v2732_v45, %v2728_v33  ;;  %v2703_v5 = vmul.f32 %v2667_v34, %v6435_v23 }
 0xdaf   : > { %v2721_v10 = vadd.f32 %v2717_v55, %v2697_v36  ;;  %v2722_v20 = vadd.f32 %v2718_v21, %v2693_v25  ;;  %v2749_v6 = vsel %vm606_vm9, %v2745_v18, %v2747_v62  ;;  %v2684_v12 = vmul.f32 %v2656_v41, %v6439_v56 }
 0xdb0   : > { %v2740_v24 = vmul.f32 %v2656_v41, %v6450_v13  ;;  %v2679_v40 = vadd.f32 %v2675_v54, %v2671_v22  ;;  %v2735_v47 = vadd.f32 %v2731_v48, %v2727_v7  ;;  %v2683_v39 = vmul.f32 %v2655_v14, %v6439_v56 }
 0xdb1   : > { %v2739_v17 = vmul.f32 %v2655_v14, %v6450_v13  ;;  %v2754_v51 = vmul.f32 %v7721_v4, %v2751_v59  ;;  %v2688_v31 = vadd.f32 %v2684_v12, %v2680_v49  ;;  %v2716_v45 = vmul.f32 %v2656_v41, %v6442_v61 }
 0xdb2   : > { %v2744_v34 = vadd.f32 %v2740_v24, %v2736_v60  ;;  %v2757_v33 = vadd.f32 %v2749_v6, %v2721_v10  ;;  %v2707_v62 = vmul.f32 %v6684_v57, %v6430_v52  ;;  %v2687_v18 = vadd.f32 %v2683_v39, %v2679_v40 }
 0xdb3   : > { %v2743_v21 = vadd.f32 %v2739_v17, %v2735_v47  ;;  %v2712_v36 = vadd.f32 %v2708_v2, %v2704_v42  ;;  %v2692_v25 = vrot.slane %v2688_v31, 7  ;;  %v2715_v48 = vmul.f32 %v2655_v14, %v6442_v61 }
 0xdb4   : > { %v2748_v54 = vrot.slane %v2744_v34, 1  ;;  %v2690_v55 = vrot.slane %v2687_v18, 7  ;;  %v2758_v7 = vadd.f32 %v2754_v51, %v2722_v20  ;;  %v2711_v43 = vadd.f32 %v2707_v62, %v2703_v5 }
 0xdb5   : > { %v2746_v22 = vrot.slane %v2743_v21, 1  ;;  %v2720_v59 = vadd.f32 %v2716_v45, %v2712_v36  ;;  %v2761_v2 = vadd.f32 %v2757_v33, %v6509_v46 }
 0xdb6   : > { %v2694_v49 = vsel %vm543_vm8, %v2690_v55, %v2692_v25  ;;  %v2696_v41 = vsel %vm543_vm8, %v2692_v25, %v2690_v55  ;;  %v2719_v60 = vadd.f32 %v2715_v48, %v2711_v43  ;;  %v2762_v12 = vadd.f32 %v2758_v7, %v6509_v46 }
 0xdb7   : > { %v2752_v10 = vsel %vm606_vm9, %v2748_v54, %v2746_v22  ;;  %v2699_v42 = vmul.f32 %v7719_v3, %v2696_v41  ;;  %v2724_v6 = vadd.f32 %v2720_v59, %v2694_v49  ;;  %v2750_v24 = vsel %vm606_vm9, %v2746_v22, %v2748_v54 }
 0xdb8   : > { %v2756_v14 = vmul.f32 %v7721_v4, %v2752_v10  ;;  %v2765_v47 = vmul.f32 %v2761_v2, %v2761_v2  ;;  %v2769_v51 = vadd.f32 %v2762_v12, %v2761_v2  ;;  %v2766_v31 = vmul.f32 %v2762_v12, %v2762_v12 }
 0xdb9   : > { %v2723_v20 = vadd.f32 %v2719_v60, %v2699_v42 }
 0xdba   : > { %v2760_v5 = vadd.f32 %v2756_v14, %v2724_v6  ;;  %v2781_v34 = vadd.f32 %v2766_v31, %v2765_v47 }
 0xdbb   : > { %v2759_v40 = vadd.f32 %v2750_v24, %v2723_v20 }
 0xdbc   : > { %v2764_v17 = vadd.f32 %v2760_v5, %v6509_v46 }
 0xdbd   : > { %v2763_v39 = vadd.f32 %v2759_v40, %v6509_v46 }
 0xdbe   : > { %v2768_v62 = vmul.f32 %v2764_v17, %v2764_v17 }
 0xdbf   : > { %v2770_v45 = vadd.f32 %v2769_v51, %v2763_v39  ;;  %v2767_v43 = vmul.f32 %v2763_v39, %v2763_v39 }
 0xdc1   : > { %v2771_v33 = vadd.f32 %v2770_v45, %v2764_v17  ;;  %v2782_v18 = vadd.f32 %v2781_v34, %v2767_v43 }
 0xdc3   : > { %2772 = vadd.xlane.f32.xlu0 %v2771_v33  ;;  %v2783_v21 = vadd.f32 %v2782_v18, %v2768_v62 }
 0xdc5   : > { %2784 = vadd.xlane.f32.xlu1 %v2783_v21 }
 0xe50   : > { %v2773_v36 = vpop.xlane.xlu0 %2772 }
 0xe51   : > { %v2774_v25 = vrot.slane %v2773_v36, 4 }
 0xe52   : > { %v2785_v54 = vpop.xlane.xlu1 %2784 }
 0xe53   : > { %v2775_v48 = vadd.f32 %v2774_v25, %v2773_v36  ;;  %v2786_v55 = vrot.slane %v2785_v54, 4 }
 0xe55   : > { %v2776_v22 = vrot.slane %v2775_v48, 2  ;;  %v2787_v7 = vadd.f32 %v2786_v55, %v2785_v54 }
 0xe57   : > { %v2788_v59 = vrot.slane %v2787_v7, 2  ;;  %v2777_v49 = vadd.f32 %v2776_v22, %v2775_v48 }
 0xe59   : > { %v2778_v41 = vrot.slane %v2777_v49, 1  ;;  %v2789_v10 = vadd.f32 %v2788_v59, %v2787_v7 }
 0xe5b   : > { %v2779_v42 = vadd.f32 %v2778_v41, %v2777_v49  ;;  %v2790_v60 = vrot.slane %v2789_v10, 1 }
 0xe5d   : > { %3969 = vpush %v2779_v42  ;;  %v2791_v14 = vadd.f32 %v2790_v60, %v2789_v10 }
 0xe5f   : > { %3971 = vpush %v2791_v14 }
 0xe8e   : > { %s3970_s7 = spop %3969 }
 0xe8f   : > { %s2793_s8 = smul.f32 0.00024414063, %s3970_s7 }
 0xe90   : > { %s3972_s9 = spop %3971 }
 0xe91   : > { %s2795_s10 = smul.f32 %s2793_s8, %s2793_s8  ;;  %v2798_v5 = vstv %s2793_s8 }
 0xe92   : > { %s2794_s11 = smul.f32 0.00024414063, %s3972_s9  ;;  %v2799_v24 = vsub.f32 %v2761_v2, %v2798_v5  ;;  %v2800_v40 = vsub.f32 %v2762_v12, %v2798_v5  ;;  %v2801_v45 = vsub.f32 %v2763_v39, %v2798_v5  ;;  %v2802_v43 = vsub.f32 %v2764_v17, %v2798_v5 }
 0xe94   : > { %s2796_s12 = ssub.f32 %s2794_s11, %s2795_s10 }
 0xe96   : > { %s2797_s13 = smax.f32 %s4357_s14, %s2796_s12 }
 0xe97   : > { %s2803_s15 = sadd.f32 1e-05, %s2797_s13 }
 0xe99   : > { %v2804_v6 = vstv %s2803_s15 }
 0xe9a   : > { %4127 = vrsqrt.f32 %v2804_v6 }
 0xea4   : > { %v4128_v20 = vpop.eup %4127 }
 0xea5   : > { %3973 = vpush %v4128_v20 }
 0xed6   : > { %s3974_s25 = spop %3973 }
 0xed7   : > { %s2807_s29 = smul.f32 %s3974_s25, %s7807_s24 }
 0xed9   : > { %v2808_v47 = vstv %s2807_s29 }
 0xeda   : > { %v2809_v51 = vmul.f32 %v2808_v47, %v2799_v24  ;;  %v2810_v31 = vmul.f32 %v2808_v47, %v2800_v40  ;;  %v2811_v62 = vmul.f32 %v2808_v47, %v2801_v45  ;;  %v2812_v18 = vmul.f32 %v2808_v47, %v2802_v43 }
 0xedc   : > { %v2813_v34 = vadd.f32 %v2809_v51, %v6528_v35  ;;  %v2814_v33 = vadd.f32 %v2810_v31, %v6528_v35  ;;  %v2815_v2 = vadd.f32 %v2811_v62, %v6528_v35  ;;  %v2816_v12 = vadd.f32 %v2812_v18, %v6528_v35 }
 0xede   : > { %v2817_v21 = vmax.f32 %v2813_v34, 0.0  ;;  %v2818_v36 = vmax.f32 %v2814_v33, 0.0  ;;  %v6787_v39 = vmax.f32 %v2815_v2, 0.0  ;;  %v6789_v17 = vmax.f32 %v2816_v12, 0.0 }
 0xee0   : > { %2835 = vrot.lane.b32.xlu1 %v2818_v36, %s4356_s23  ;;  %2833 = vrot.lane.b32.xlu0 %v2817_v21, %s4356_s23  ;;  %v2850_v59 = vmul.f32 %v2818_v36, %v6557_v28  ;;  %v2882_v42 = vmul.f32 %v2818_v36, %v6562_v32  ;;  %v2906_v60 = vmul.f32 %v2818_v36, %v6565_v19 }
 0xee1   : > { %v2849_v14 = vmul.f32 %v2817_v21, %v6557_v28  ;;  %v2881_v20 = vmul.f32 %v2817_v21, %v6562_v32  ;;  %v2905_v5 = vmul.f32 %v2817_v21, %v6565_v19 }
 0xee4   : > { %2823 = vrot.lane.b32.xlu1 %v2818_v36, %s4355_s20  ;;  %2821 = vrot.lane.b32.xlu0 %v2817_v21, %s4355_s20 }
 0xee8   : > { %2839 = vrot.lane.b32.xlu1 %v6789_v17, %s4356_s23  ;;  %2837 = vrot.lane.b32.xlu0 %v6787_v39, %s4356_s23 }
 0xeec   : > { %2827 = vrot.lane.b32.xlu1 %v6789_v17, %s4355_s20  ;;  %2825 = vrot.lane.b32.xlu0 %v6787_v39, %s4355_s20 }
 0xf52   : > { %v2836_v25 = vpop.permute.xlu1 %2835  ;;  %v2834_v54 = vpop.permute.xlu0 %2833 }
 0xf53   : > { %v2842_v48 = vmul.f32 %v7757_v50, %v2836_v25  ;;  %v2841_v55 = vmul.f32 %v7757_v50, %v2834_v54 }
 0xf55   : > { %v2846_v22 = vmul.f32 %v2842_v48, %v6551_v11  ;;  %v2902_v7 = vmul.f32 %v2842_v48, %v6554_v26  ;;  %v2845_v49 = vmul.f32 %v2841_v55, %v6551_v11  ;;  %v2901_v6 = vmul.f32 %v2841_v55, %v6554_v26 }
 0xf56   : > { %v2824_v41 = vpop.permute.xlu1 %2823  ;;  %v2822_v10 = vpop.permute.xlu0 %2821  ;;  %v2878_v51 = vmul.f32 %v2842_v48, %v6568_v8  ;;  %v2877_v45 = vmul.f32 %v2841_v55, %v6568_v8 }
 0xf57   : > { %v2830_v24 = vmul.f32 %v7758_v58, %v2824_v41  ;;  %v2829_v40 = vmul.f32 %v7758_v58, %v2822_v10  ;;  %v2854_v47 = vadd.f32 %v2850_v59, %v2846_v22  ;;  %v2910_v31 = vadd.f32 %v2906_v60, %v2902_v7 }
 0xf58   : > { %v2853_v43 = vadd.f32 %v2849_v14, %v2845_v49  ;;  %v2909_v21 = vadd.f32 %v2905_v5, %v2901_v6  ;;  %v2886_v7 = vadd.f32 %v2882_v42, %v2878_v51  ;;  %v2885_v59 = vadd.f32 %v2881_v20, %v2877_v45 }
 0xf59   : > { %v2858_v34 = vmul.f32 %v2830_v24, %v6573_v38  ;;  %v2914_v33 = vmul.f32 %v2830_v24, %v6581_v9  ;;  %v2857_v62 = vmul.f32 %v2829_v40, %v6573_v38  ;;  %v2890_v2 = vmul.f32 %v2830_v24, %v6578_v37 }
 0xf5a   : > { %v2840_v18 = vpop.permute.xlu1 %2839  ;;  %v2838_v36 = vpop.permute.xlu0 %2837  ;;  %v2889_v12 = vmul.f32 %v2829_v40, %v6578_v37  ;;  %v2913_v25 = vmul.f32 %v2829_v40, %v6581_v9  ;;  %v2852_v41 = vmul.f32 %v6789_v17, %v6557_v28  ;;  %v2884_v40 = vmul.f32 %v6789_v17, %v6562_v32 }
 0xf5b   : > { %v2862_v54 = vadd.f32 %v2858_v34, %v2854_v47  ;;  %v2918_v48 = vadd.f32 %v2914_v33, %v2910_v31  ;;  %v2861_v22 = vadd.f32 %v2857_v62, %v2853_v43  ;;  %v2844_v55 = vmul.f32 %v7757_v50, %v2840_v18 }
 0xf5c   : > { %v2917_v49 = vadd.f32 %v2913_v25, %v2909_v21  ;;  %v2843_v6 = vmul.f32 %v7757_v50, %v2838_v36  ;;  %v2894_v5 = vadd.f32 %v2890_v2, %v2886_v7  ;;  %v2893_v24 = vadd.f32 %v2889_v12, %v2885_v59 }
 0xf5d   : > { %v2867_v10 = vrot.slane %v2862_v54, 7  ;;  %v2923_v60 = vrot.slane %v2918_v48, 1  ;;  %v2865_v14 = vrot.slane %v2861_v22, 7  ;;  %v2848_v20 = vmul.f32 %v2844_v55, %v6551_v11 }
 0xf5e   : > { %v2921_v35 = vrot.slane %v2917_v49, 1  ;;  %v2904_v51 = vmul.f32 %v2844_v55, %v6554_v26  ;;  %v2828_v31 = vpop.permute.xlu1 %2827  ;;  %v2826_v45 = vpop.permute.xlu0 %2825  ;;  %v2908_v36 = vmul.f32 %v6789_v17, %v6565_v19  ;;  %v2847_v21 = vmul.f32 %v2843_v6, %v6551_v11 }
 0xf5f   : > { %v2869_v47 = vsel %vm543_vm8, %v2865_v14, %v2867_v10  ;;  %v2871_v42 = vsel %vm543_vm8, %v2867_v10, %v2865_v14  ;;  %v2903_v2 = vmul.f32 %v2843_v6, %v6554_v26  ;;  %v2851_v25 = vmul.f32 %v6787_v39, %v6557_v28 }
 0xf60   : > { %v2873_v43 = vmul.f32 %v7719_v3, %v2871_v42  ;;  %v2898_v34 = vadd.f32 %v2894_v5, %v2869_v47  ;;  %v2925_v33 = vsel %vm606_vm9, %v2921_v35, %v2923_v60  ;;  %v2927_v62 = vsel %vm606_vm9, %v2923_v60, %v2921_v35 }
 0xf61   : > { %v2930_v18 = vmul.f32 %v7721_v4, %v2927_v62  ;;  %v2832_v54 = vmul.f32 %v7758_v58, %v2828_v31  ;;  %v2831_v48 = vmul.f32 %v7758_v58, %v2826_v45  ;;  %v2856_v7 = vadd.f32 %v2852_v41, %v2848_v20 }
 0xf62   : > { %v2897_v12 = vadd.f32 %v2893_v24, %v2873_v43  ;;  %v2880_v35 = vmul.f32 %v2844_v55, %v6568_v8  ;;  %v2907_v59 = vmul.f32 %v6787_v39, %v6565_v19  ;;  %v2912_v49 = vadd.f32 %v2908_v36, %v2904_v51 }
 0xf63   : > { %v2934_v22 = vadd.f32 %v2930_v18, %v2898_v34  ;;  %v2860_v10 = vmul.f32 %v2832_v54, %v6573_v38  ;;  %v2916_v60 = vmul.f32 %v2832_v54, %v6581_v9  ;;  %v2855_v14 = vadd.f32 %v2851_v25, %v2847_v21 }
 0xf64   : > { %v2933_v17 = vadd.f32 %v2925_v33, %v2897_v12  ;;  %v2911_v5 = vadd.f32 %v2907_v59, %v2903_v2  ;;  %v2859_v24 = vmul.f32 %v2831_v48, %v6573_v38  ;;  %v2915_v47 = vmul.f32 %v2831_v48, %v6581_v9 }
 0xf65   : > { %v2879_v42 = vmul.f32 %v2843_v6, %v6568_v8  ;;  %v2864_v41 = vadd.f32 %v2860_v10, %v2856_v7  ;;  %v2892_v55 = vmul.f32 %v2832_v54, %v6578_v37  ;;  %v2920_v20 = vadd.f32 %v2916_v60, %v2912_v49 }
 0xf66   : > { %v2883_v31 = vmul.f32 %v6787_v39, %v6562_v32  ;;  %v2863_v51 = vadd.f32 %v2859_v24, %v2855_v14  ;;  %v2919_v45 = vadd.f32 %v2915_v47, %v2911_v5  ;;  %v2888_v43 = vadd.f32 %v2884_v40, %v2880_v35 }
 0xf67   : > { %v2868_v34 = vrot.slane %v2864_v41, 7  ;;  %v2924_v33 = vrot.slane %v2920_v20, 1  ;;  %v2891_v62 = vmul.f32 %v2831_v48, %v6578_v37  ;;  %v6860_v6 = vadd.f32 %v2933_v17, %v6638_v27 }
 0xf68   : > { %v2866_v18 = vrot.slane %v2863_v51, 7  ;;  %v2922_v36 = vrot.slane %v2919_v45, 1  ;;  %v2887_v21 = vadd.f32 %v2883_v31, %v2879_v42  ;;  %v2896_v2 = vadd.f32 %v2892_v55, %v2888_v43 }
 0xf69   : > { %v2938_v49 = vadd.f32 %v2934_v22, %v6638_v27  ;;  %v2941_v60 = vmul.f32 %v6860_v6, %v6860_v6 }
 0xf6a   : > { %v2870_v12 = vsel %vm543_vm8, %v2866_v18, %v2868_v34  ;;  %v2872_v39 = vsel %vm543_vm8, %v2868_v34, %v2866_v18  ;;  %v2926_v40 = vsel %vm606_vm9, %v2922_v36, %v2924_v33  ;;  %v2928_v25 = vsel %vm606_vm9, %v2924_v33, %v2922_v36 }
 0xf6b   : > { %v2875_v54 = vmul.f32 %v7719_v3, %v2872_v39  ;;  %v2895_v48 = vadd.f32 %v2891_v62, %v2887_v21  ;;  %v2932_v7 = vmul.f32 %v7721_v4, %v2928_v25  ;;  %v2900_v35 = vadd.f32 %v2896_v2, %v2870_v12 }
 0xf6c   : > { %v2945_v24 = vadd.f32 %v2938_v49, %v6860_v6  ;;  %v2942_v47 = vmul.f32 %v2938_v49, %v2938_v49 }
 0xf6d   : > { %v2899_v59 = vadd.f32 %v2895_v48, %v2875_v54  ;;  %v2936_v17 = vadd.f32 %v2932_v7, %v2900_v35 }
 0xf6e   : > { %v2957_v55 = vadd.f32 %v2942_v47, %v2941_v60 }
 0xf6f   : > { %v2935_v10 = vadd.f32 %v2926_v40, %v2899_v59  ;;  %v2940_v5 = vadd.f32 %v2936_v17, %v6638_v27 }
 0xf71   : > { %v2939_v14 = vadd.f32 %v2935_v10, %v6638_v27  ;;  %v2944_v31 = vmul.f32 %v2940_v5, %v2940_v5 }
 0xf73   : > { %v2946_v42 = vadd.f32 %v2945_v24, %v2939_v14  ;;  %v2943_v41 = vmul.f32 %v2939_v14, %v2939_v14 }
 0xf75   : > { %v2947_v20 = vadd.f32 %v2946_v42, %v2940_v5  ;;  %v2958_v51 = vadd.f32 %v2957_v55, %v2943_v41 }
 0xf77   : > { %2948 = vadd.xlane.f32.xlu0 %v2947_v20  ;;  %v2959_v45 = vadd.f32 %v2958_v51, %v2944_v31 }
 0xf79   : > { %2960 = vadd.xlane.f32.xlu1 %v2959_v45 }
0x1004   : > { %v2949_v22 = vpop.xlane.xlu0 %2948 }
0x1005   : > { %v2950_v43 = vrot.slane %v2949_v22, 4 }
0x1006   : > { %v2961_v34 = vpop.xlane.xlu1 %2960 }
0x1007   : > { %v2951_v33 = vadd.f32 %v2950_v43, %v2949_v22  ;;  %v2962_v62 = vrot.slane %v2961_v34, 4 }
0x1009   : > { %v2952_v18 = vrot.slane %v2951_v33, 2  ;;  %v2963_v36 = vadd.f32 %v2962_v62, %v2961_v34 }
0x100b   : > { %v2964_v21 = vrot.slane %v2963_v36, 2  ;;  %v2953_v2 = vadd.f32 %v2952_v18, %v2951_v33 }
0x100d   : > { %v2954_v12 = vrot.slane %v2953_v2, 1  ;;  %v2965_v39 = vadd.f32 %v2964_v21, %v2963_v36 }
0x100f   : > { %v2955_v40 = vadd.f32 %v2954_v12, %v2953_v2  ;;  %v2966_v25 = vrot.slane %v2965_v39, 1 }
0x1011   : > { %3975 = vpush %v2955_v40  ;;  %v2967_v54 = vadd.f32 %v2966_v25, %v2965_v39 }
0x1013   : > { %3977 = vpush %v2967_v54 }
0x1042   : > { %s3976_s16 = spop %3975 }
0x1043   : > { %s2969_s2 = smul.f32 0.00024414063, %s3976_s16 }
0x1044   : > { %s3978_s4 = spop %3977 }
0x1045   : > { %s2971_s5 = smul.f32 %s2969_s2, %s2969_s2  ;;  %v2974_v35 = vstv %s2969_s2 }
0x1046   : > { %s2970_s6 = smul.f32 0.00024414063, %s3978_s4  ;;  %v2975_v59 = vsub.f32 %v6860_v6, %v2974_v35  ;;  %v2976_v17 = vsub.f32 %v2938_v49, %v2974_v35  ;;  %v2977_v60 = vsub.f32 %v2939_v14, %v2974_v35  ;;  %v2978_v24 = vsub.f32 %v2940_v5, %v2974_v35 }
0x1048   : > { %s2972_s18 = ssub.f32 %s2970_s6, %s2971_s5 }
0x104a   : > { %s2973_s21 = smax.f32 %s4357_s14, %s2972_s18 }
0x104b   : > { %s2979_s27 = sadd.f32 1e-05, %s2973_s21 }
0x104d   : > { %v2980_v48 = vstv %s2979_s27 }
0x104e   : > { %4129 = vrsqrt.f32 %v2980_v48 }
0x1058   : > { %v4130_v7 = vpop.eup %4129 }
0x1059   : > { %3979 = vpush %v4130_v7 }
0x108a   : > { %s3980_s28 = spop %3979 }
0x108b   : > { %s2983_s30 = smul.f32 %s3980_s28, %s7820_s3 }
0x108d   : > { %v2984_v10 = vstv %s2983_s30  ;;  %s7131_s30 = sshll.u32 %s4417_s22, 9 }
0x108e   : > { %v2985_v47 = vmul.f32 %v2984_v10, %v2975_v59  ;;  %v2986_v42 = vmul.f32 %v2984_v10, %v2976_v17  ;;  %v2987_v41 = vmul.f32 %v2984_v10, %v2977_v60  ;;  %v2988_v55 = vmul.f32 %v2984_v10, %v2978_v24 }
0x1090   : > { %v2989_v20 = vadd.f32 %v2985_v47, %v6663_v29  ;;  %v2990_v31 = vadd.f32 %v2986_v42, %v6663_v29  ;;  %v2991_v22 = vadd.f32 %v2987_v41, %v6663_v29  ;;  %v2992_v43 = vadd.f32 %v2988_v55, %v6663_v29 }
0x1092   : > { %v2993_v51 = vmax.f32 %v2989_v20, 0.0  ;;  %v2994_v45 = vmax.f32 %v2990_v31, 0.0  ;;  %v2995_v14 = vmax.f32 %v2991_v22, 0.0  ;;  %v2996_v5 = vmax.f32 %v2992_v43, 0.0 }
0x1094   : > { %v6886_v6 = vadd.f32 %v2993_v51, %v6670_v15  ;;  %v6889_v49 = vadd.f32 %v2994_v45, %v6673_v44  ;;  %v6900_v15 = vadd.f32 %v2995_v14, %v6684_v57  ;;  %v6903_v44 = vadd.f32 %v2996_v5, %v6687_v53 }
0x1096   : > { %3015 = vrot.lane.b32.xlu1 %v6889_v49, %s4356_s23  ;;  %3013 = vrot.lane.b32.xlu0 %v6886_v6, %s4356_s23  ;;  %v3030_v12 = vmul.f32 %v6889_v49, %v6424_v1  ;;  %v3086_v39 = vmul.f32 %v6889_v49, %v6427_v30  ;;  %v3062_v25 = vmul.f32 %v6889_v49, %v6430_v52 }
0x1097   : > { %v3029_v54 = vmul.f32 %v6886_v6, %v6424_v1  ;;  %v3085_v10 = vmul.f32 %v6886_v6, %v6427_v30  ;;  %v3061_v22 = vmul.f32 %v6886_v6, %v6430_v52 }
0x109a   : > { %3003 = vrot.lane.b32.xlu1 %v6889_v49, %s4355_s20  ;;  %3001 = vrot.lane.b32.xlu0 %v6886_v6, %s4355_s20 }
0x109e   : > { %3019 = vrot.lane.b32.xlu1 %v6903_v44, %s4356_s23  ;;  %3017 = vrot.lane.b32.xlu0 %v6900_v15, %s4356_s23 }
0x10a2   : > { %3007 = vrot.lane.b32.xlu1 %v6903_v44, %s4355_s20  ;;  %3005 = vrot.lane.b32.xlu0 %v6900_v15, %s4355_s20 }
0x1108   : > { %v3016_v34 = vpop.permute.xlu1 %3015  ;;  %v3014_v33 = vpop.permute.xlu0 %3013 }
0x1109   : > { %v3022_v57 = vmul.f32 %v7757_v50, %v3016_v34  ;;  %v3021_v62 = vmul.f32 %v7757_v50, %v3014_v33 }
0x110b   : > { %v3026_v53 = vmul.f32 %v3022_v57, %v6416_v16  ;;  %v3082_v18 = vmul.f32 %v3022_v57, %v6419_v0  ;;  %v3025_v36 = vmul.f32 %v3021_v62, %v6416_v16  ;;  %v3081_v40 = vmul.f32 %v3021_v62, %v6419_v0 }
0x110c   : > { %v3004_v21 = vpop.permute.xlu1 %3003  ;;  %v3002_v2 = vpop.permute.xlu0 %3001  ;;  %v3058_v59 = vmul.f32 %v3022_v57, %v6435_v23  ;;  %v3057_v20 = vmul.f32 %v3021_v62, %v6435_v23  ;;  %v3032_v57 = vmul.f32 %v6903_v44, %v6424_v1  ;;  %v3064_v62 = vmul.f32 %v6903_v44, %v6430_v52 }
0x110d   : > { %v3010_v48 = vmul.f32 %v7758_v58, %v3004_v21  ;;  %v3009_v7 = vmul.f32 %v7758_v58, %v3002_v2  ;;  %v3034_v35 = vadd.f32 %v3030_v12, %v3026_v53  ;;  %v3090_v17 = vadd.f32 %v3086_v39, %v3082_v18 }
0x110e   : > { %v3033_v60 = vadd.f32 %v3029_v54, %v3025_v36  ;;  %v3089_v31 = vadd.f32 %v3085_v10, %v3081_v40  ;;  %v3066_v2 = vadd.f32 %v3062_v25, %v3058_v59  ;;  %v3065_v12 = vadd.f32 %v3061_v22, %v3057_v20 }
0x110f   : > { %v3038_v24 = vmul.f32 %v3010_v48, %v6439_v56  ;;  %v3094_v47 = vmul.f32 %v3010_v48, %v6450_v13  ;;  %v3037_v42 = vmul.f32 %v3009_v7, %v6439_v56  ;;  %v3093_v51 = vmul.f32 %v3009_v7, %v6450_v13 }
0x1110   : > { %v3020_v41 = vpop.permute.xlu1 %3019  ;;  %v3018_v55 = vpop.permute.xlu0 %3017  ;;  %v3070_v34 = vmul.f32 %v3010_v48, %v6442_v61  ;;  %v3069_v36 = vmul.f32 %v3009_v7, %v6442_v61  ;;  %v3088_v39 = vmul.f32 %v6903_v44, %v6427_v30  ;;  %v3031_v25 = vmul.f32 %v6900_v15, %v6424_v1 }
0x1111   : > { %v3024_v45 = vmul.f32 %v7757_v50, %v3020_v41  ;;  %v3042_v43 = vadd.f32 %v3038_v24, %v3034_v35  ;;  %v3098_v14 = vadd.f32 %v3094_v47, %v3090_v17  ;;  %v3041_v5 = vadd.f32 %v3037_v42, %v3033_v60 }
0x1112   : > { %v3097_v33 = vadd.f32 %v3093_v51, %v3089_v31  ;;  %v3023_v21 = vmul.f32 %v7757_v50, %v3018_v55  ;;  %v3074_v24 = vadd.f32 %v3070_v34, %v3066_v2  ;;  %v3087_v59 = vmul.f32 %v6900_v15, %v6427_v30 }
0x1113   : > { %v3047_v53 = vrot.slane %v3042_v43, 7  ;;  %v3045_v18 = vrot.slane %v3041_v5, 7  ;;  %v3028_v40 = vmul.f32 %v3024_v45, %v6416_v16  ;;  %v3103_v54 = vrot.slane %v3098_v14, 1 }
0x1114   : > { %v3101_v35 = vrot.slane %v3097_v33, 1  ;;  %v3084_v17 = vmul.f32 %v3024_v45, %v6419_v0  ;;  %v3008_v10 = vpop.permute.xlu1 %3007  ;;  %v3006_v60 = vpop.permute.xlu0 %3005  ;;  %v3073_v42 = vadd.f32 %v3069_v36, %v3065_v12  ;;  %v3027_v41 = vmul.f32 %v3023_v21, %v6416_v16 }
0x1115   : > { %v3051_v48 = vsel %vm543_vm8, %v3047_v53, %v3045_v18  ;;  %v3049_v47 = vsel %vm543_vm8, %v3045_v18, %v3047_v53  ;;  %v3083_v55 = vmul.f32 %v3023_v21, %v6419_v0  ;;  %v3036_v20 = vadd.f32 %v3032_v57, %v3028_v40 }
0x1116   : > { %v3053_v7 = vmul.f32 %v7719_v3, %v3051_v48  ;;  %v3060_v31 = vmul.f32 %v3024_v45, %v6435_v23  ;;  %v3012_v51 = vmul.f32 %v7758_v58, %v3008_v10  ;;  %v3011_v22 = vmul.f32 %v7758_v58, %v3006_v60 }
0x1117   : > { %v3107_v1 = vsel %vm606_vm9, %v3103_v54, %v3101_v35  ;;  %v3092_v30 = vadd.f32 %v3088_v39, %v3084_v17  ;;  %v3059_v14 = vmul.f32 %v3023_v21, %v6435_v23  ;;  %v3078_v5 = vadd.f32 %v3074_v24, %v3049_v47 }
0x1118   : > { %v3077_v43 = vadd.f32 %v3073_v42, %v3053_v7  ;;  %v3105_v16 = vsel %vm606_vm9, %v3101_v35, %v3103_v54  ;;  %v3040_v0 = vmul.f32 %v3012_v51, %v6439_v56  ;;  %v3096_v34 = vmul.f32 %v3012_v51, %v6450_v13 }
0x1119   : > { %v3035_v45 = vadd.f32 %v3031_v25, %v3027_v41  ;;  %v3091_v33 = vadd.f32 %v3087_v59, %v3083_v55  ;;  %v3039_v57 = vmul.f32 %v3011_v22, %v6439_v56  ;;  %v3095_v53 = vmul.f32 %v3011_v22, %v6450_v13 }
0x111a   : > { %v3110_v18 = vmul.f32 %v7721_v4, %v3107_v1  ;;  %v3044_v36 = vadd.f32 %v3040_v0, %v3036_v20  ;;  %v3072_v2 = vmul.f32 %v3012_v51, %v6442_v61  ;;  %v3100_v23 = vadd.f32 %v3096_v34, %v3092_v30 }
0x111b   : > { %v3113_v21 = vadd.f32 %v3105_v16, %v3077_v43  ;;  %v3063_v12 = vmul.f32 %v6900_v15, %v6430_v52  ;;  %v3043_v39 = vadd.f32 %v3039_v57, %v3035_v45  ;;  %v3099_v40 = vadd.f32 %v3095_v53, %v3091_v33 }
0x111c   : > { %v3068_v54 = vadd.f32 %v3064_v62, %v3060_v31  ;;  %v3048_v48 = vrot.slane %v3044_v36, 7  ;;  %v3104_v35 = vrot.slane %v3100_v23, 1  ;;  %v3071_v17 = vmul.f32 %v3011_v22, %v6442_v61 }
0x111d   : > { %v3046_v56 = vrot.slane %v3043_v39, 7  ;;  %v3102_v10 = vrot.slane %v3099_v40, 1  ;;  %v3114_v13 = vadd.f32 %v3110_v18, %v3078_v5  ;;  %v3067_v60 = vadd.f32 %v3063_v12, %v3059_v14 }
0x111e   : > { %v3076_v24 = vadd.f32 %v3072_v2, %v3068_v54  ;;  %v3117_v62 = vadd.f32 %v3113_v21, %v6509_v46 }
0x111f   : > { %v3050_v7 = vsel %vm543_vm8, %v3046_v56, %v3048_v48  ;;  %v3052_v25 = vsel %vm543_vm8, %v3048_v48, %v3046_v56  ;;  %v3108_v52 = vsel %vm606_vm9, %v3104_v35, %v3102_v10  ;;  %v3075_v47 = vadd.f32 %v3071_v17, %v3067_v60 }
0x1120   : > { %v3055_v59 = vmul.f32 %v7719_v3, %v3052_v25  ;;  %v3112_v61 = vmul.f32 %v7721_v4, %v3108_v52  ;;  %v3080_v42 = vadd.f32 %v3076_v24, %v3050_v7  ;;  %v3118_v20 = vadd.f32 %v3114_v13, %v6509_v46 }
0x1121   : > { %v3106_v31 = vsel %vm606_vm9, %v3102_v10, %v3104_v35  ;;  %v3121_v22 = vmul.f32 %v3117_v62, %v3117_v62 }
0x1122   : > { %v3079_v41 = vadd.f32 %v3075_v47, %v3055_v59  ;;  %v3116_v55 = vadd.f32 %v3112_v61, %v3080_v42  ;;  %v3125_v30 = vadd.f32 %v3118_v20, %v3117_v62  ;;  %v3122_v14 = vmul.f32 %v3118_v20, %v3118_v20  ;;  %v7822_v61 = vld [vmem:[#allocation42_spill] sm:$0xff] }
0x1124   : > { %v3115_v51 = vadd.f32 %v3106_v31, %v3079_v41  ;;  %v3120_v1 = vadd.f32 %v3116_v55, %v6509_v46  ;;  %v3137_v0 = vadd.f32 %v3122_v14, %v3121_v22 }
0x1126   : > { %v3119_v43 = vadd.f32 %v3115_v51, %v6509_v46  ;;  %v3124_v45 = vmul.f32 %v3120_v1, %v3120_v1 }
0x1128   : > { %v3126_v5 = vadd.f32 %v3125_v30, %v3119_v43  ;;  %v3123_v16 = vmul.f32 %v3119_v43, %v3119_v43 }
0x112a   : > { %v3127_v34 = vadd.f32 %v3126_v5, %v3120_v1  ;;  %v3138_v33 = vadd.f32 %v3137_v0, %v3123_v16 }
0x112c   : > { %3128 = vadd.xlane.f32.xlu0 %v3127_v34  ;;  %v3139_v57 = vadd.f32 %v3138_v33, %v3124_v45 }
0x112e   : > { %3140 = vadd.xlane.f32.xlu1 %v3139_v57 }
0x11b9   : > { %v3129_v53 = vpop.xlane.xlu0 %3128 }
0x11ba   : > { %v3130_v18 = vrot.slane %v3129_v53, 4 }
0x11bb   : > { %v3141_v36 = vpop.xlane.xlu1 %3140 }
0x11bc   : > { %v3131_v2 = vadd.f32 %v3130_v18, %v3129_v53  ;;  %v3142_v23 = vrot.slane %v3141_v36, 4 }
0x11be   : > { %v3132_v21 = vrot.slane %v3131_v2, 2  ;;  %v3143_v12 = vadd.f32 %v3142_v23, %v3141_v36 }
0x11c0   : > { %v3144_v39 = vrot.slane %v3143_v12, 2  ;;  %v3133_v46 = vadd.f32 %v3132_v21, %v3131_v2 }
0x11c2   : > { %v3134_v40 = vrot.slane %v3133_v46, 1  ;;  %v3145_v54 = vadd.f32 %v3144_v39, %v3143_v12 }
0x11c4   : > { %v3135_v48 = vadd.f32 %v3134_v40, %v3133_v46  ;;  %v3146_v35 = vrot.slane %v3145_v54, 1 }
0x11c6   : > { %3981 = vpush %v3135_v48  ;;  %v3147_v17 = vadd.f32 %v3146_v35, %v3145_v54 }
0x11c8   : > { %3983 = vpush %v3147_v17 }
0x11f7   : > { %s3982_s7 = spop %3981 }
0x11f8   : > { %s3149_s8 = smul.f32 0.00024414063, %s3982_s7 }
0x11f9   : > { %s3984_s9 = spop %3983 }
0x11fa   : > { %s3151_s10 = smul.f32 %s3149_s8, %s3149_s8  ;;  %v3154_v13 = vstv %s3149_s8 }
0x11fb   : > { %s3150_s11 = smul.f32 0.00024414063, %s3984_s9  ;;  %v3155_v60 = vsub.f32 %v3117_v62, %v3154_v13  ;;  %v3156_v24 = vsub.f32 %v3118_v20, %v3154_v13  ;;  %v3157_v59 = vsub.f32 %v3119_v43, %v3154_v13  ;;  %v3158_v47 = vsub.f32 %v3120_v1, %v3154_v13  ;;  %s7824_s9 = sld [smem:[#allocation206_spill]] }
0x11fd   : > { %s3152_s12 = ssub.f32 %s3150_s11, %s3151_s10  ;;  %s3576_s10 = sshll.u32 %s7780_s26, 4  ;;  %s7140_s10 = int_to_ptr.vmem [resolvable:$true] %s3576_s10 }
0x11ff   : > { %s3153_s13 = smax.f32 %s4357_s14, %s3152_s12 }
0x1200   : > { %s3159_s15 = sadd.f32 1e-05, %s3153_s13  ;;  %s7825_s13 = sld [smem:[#allocation205_spill]] }
0x1202   : > { %v3160_v56 = vstv %s3159_s15  ;;  %s4190_s15 = scalar_lea.vmem %s7140_s10, 512 }
0x1203   : > { %4131 = vrsqrt.f32 %v3160_v56  ;;  %p4191_p2 = scmp.ne.s32.totalorder %s7140_s10, %s4190_s15 }
0x1205   : > { %p4192_p3 = pnand %p4191_p2, %p4436_p5 }
0x1207   : > { %p4193_p4 = pneg %p4192_p3 }
0x120d   : > { %v4132_v10 = vpop.eup %4131 }
0x120e   : > { %3985 = vpush %v4132_v10 }
0x123f   : > { %s3986_s25 = spop %3985 }
0x1240   : > { %s3163_s29 = smul.f32 %s3986_s25, %s7807_s24  ;;  %s4360_s25 = smov [#allocation8]  }
0x1242   : > { %v3164_v7 = vstv %s3163_s29  ;;  %s4194_s29 = sshll.u32 %s4360_s25, 4  ;;  %s4195_s29 = int_to_ptr.vmem [resolvable:$false] %s4194_s29 }
0x1243   : > { %v3165_v25 = vmul.f32 %v3164_v7, %v3155_v60  ;;  %v3166_v52 = vmul.f32 %v3164_v7, %v3156_v24  ;;  %v3167_v55 = vmul.f32 %v3164_v7, %v3157_v59  ;;  %v3168_v31 = vmul.f32 %v3164_v7, %v3158_v47  ;;  %s4196_s26 = scalar_lea.vmem %s4195_s29, 1024  ;;  %p4197_p7 = scmp.lt.s32.totalorder %s7140_s10, %s4195_s29 }
0x1244   : > { %p4198_p8 = scmp.lt.s32.totalorder %s4196_s26, %s4190_s15 }
0x1245   : > { %v3169_v42 = vadd.f32 %v3165_v25, %v7822_v61  ;;  %v3170_v41 = vadd.f32 %v3166_v52, %v7822_v61  ;;  %v3171_v62 = vadd.f32 %v3167_v55, %v7822_v61  ;;  %v3172_v20 = vadd.f32 %v3168_v31, %v7822_v61 }
0x1246   : > { %p4199_p10 = por %p4198_p8, %p4197_p7 }
0x1247   : > { %v3173_v51 = vmax.f32 %v3169_v42, 0.0  ;;  %v3174_v22 = vmax.f32 %v3170_v41, 0.0  ;;  %v7003_v43 = vmax.f32 %v3171_v62, 0.0  ;;  %v7005_v1 = vmax.f32 %v3172_v20, 0.0 }
0x1248   : > { %p4200_p11 = pnand %p4199_p10, %p4193_p4 }
0x1249   : > { %3191 = vrot.lane.b32.xlu1 %v3174_v22, %s4356_s23  ;;  %3189 = vrot.lane.b32.xlu0 %v3173_v51, %s4356_s23  ;;  %v3206_v45 = vmul.f32 %v3174_v22, %v6557_v28  ;;  %v3238_v18 = vmul.f32 %v3174_v22, %v6562_v32  ;;  %v3262_v36 = vmul.f32 %v3174_v22, %v6565_v19 }
0x124a   : > { %v3205_v2 = vmul.f32 %v3173_v51, %v6557_v28  ;;  %v3237_v21 = vmul.f32 %v3173_v51, %v6562_v32  ;;  %v3261_v12 = vmul.f32 %v3173_v51, %v6565_v19 }
0x124d   : > { %3179 = vrot.lane.b32.xlu1 %v3174_v22, %s4355_s20  ;;  %3177 = vrot.lane.b32.xlu0 %v3173_v51, %s4355_s20  ;;  %v3208_v22 = vmul.f32 %v7005_v1, %v6557_v28 }
0x1251   : > { %3195 = vrot.lane.b32.xlu1 %v7005_v1, %s4356_s23  ;;  %3193 = vrot.lane.b32.xlu0 %v7003_v43, %s4356_s23 }
0x1255   : > { %3183 = vrot.lane.b32.xlu1 %v7005_v1, %s4355_s20  ;;  %3181 = vrot.lane.b32.xlu0 %v7003_v43, %s4355_s20 }
0x12bb   : > { %v3192_v30 = vpop.permute.xlu1 %3191  ;;  %v3190_v14 = vpop.permute.xlu0 %3189 }
0x12bc   : > { %v3198_v5 = vmul.f32 %v7757_v50, %v3192_v30  ;;  %v3197_v16 = vmul.f32 %v7757_v50, %v3190_v14 }
0x12be   : > { %v3202_v0 = vmul.f32 %v3198_v5, %v6551_v11  ;;  %v3258_v34 = vmul.f32 %v3198_v5, %v6554_v26  ;;  %v3201_v33 = vmul.f32 %v3197_v16, %v6551_v11  ;;  %v3257_v23 = vmul.f32 %v3197_v16, %v6554_v26 }
0x12bf   : > { %v3180_v57 = vpop.permute.xlu1 %3179  ;;  %v3178_v53 = vpop.permute.xlu0 %3177  ;;  %v3234_v54 = vmul.f32 %v3198_v5, %v6568_v8  ;;  %v3233_v35 = vmul.f32 %v3197_v16, %v6568_v8 }
0x12c0   : > { %v3186_v39 = vmul.f32 %v7758_v58, %v3180_v57  ;;  %v3185_v46 = vmul.f32 %v7758_v58, %v3178_v53  ;;  %v3210_v40 = vadd.f32 %v3206_v45, %v3202_v0  ;;  %v3266_v48 = vadd.f32 %v3262_v36, %v3258_v34 }
0x12c1   : > { %v3209_v17 = vadd.f32 %v3205_v2, %v3201_v33  ;;  %v3265_v7 = vadd.f32 %v3261_v12, %v3257_v23  ;;  %v3242_v55 = vadd.f32 %v3238_v18, %v3234_v54  ;;  %v3241_v31 = vadd.f32 %v3237_v21, %v3233_v35 }
0x12c2   : > { %v3214_v56 = vmul.f32 %v3186_v39, %v6573_v38  ;;  %v3270_v10 = vmul.f32 %v3186_v39, %v6581_v9  ;;  %v3213_v13 = vmul.f32 %v3185_v46, %v6573_v38  ;;  %v3246_v25 = vmul.f32 %v3186_v39, %v6578_v37 }
0x12c3   : > { %v3196_v60 = vpop.permute.xlu1 %3195  ;;  %v3194_v24 = vpop.permute.xlu0 %3193  ;;  %v3245_v52 = vmul.f32 %v3185_v46, %v6578_v37  ;;  %v3269_v59 = vmul.f32 %v3185_v46, %v6581_v9  ;;  %v3240_v34 = vmul.f32 %v7005_v1, %v6562_v32  ;;  %v3264_v46 = vmul.f32 %v7005_v1, %v6565_v19 }
0x12c4   : > { %v3218_v47 = vadd.f32 %v3214_v56, %v3210_v40  ;;  %v3274_v61 = vadd.f32 %v3270_v10, %v3266_v48  ;;  %v3217_v42 = vadd.f32 %v3213_v13, %v3209_v17  ;;  %v3200_v41 = vmul.f32 %v7757_v50, %v3196_v60 }
0x12c5   : > { %v3273_v51 = vadd.f32 %v3269_v59, %v3265_v7  ;;  %v3199_v14 = vmul.f32 %v7757_v50, %v3194_v24  ;;  %v3250_v5 = vadd.f32 %v3246_v25, %v3242_v55  ;;  %v3249_v16 = vadd.f32 %v3245_v52, %v3241_v31 }
0x12c6   : > { %v3223_v62 = vrot.slane %v3218_v47, 7  ;;  %v3279_v20 = vrot.slane %v3274_v61, 1  ;;  %v3221_v30 = vrot.slane %v3217_v42, 7  ;;  %v3204_v57 = vmul.f32 %v3200_v41, %v6551_v11 }
0x12c7   : > { %v3277_v0 = vrot.slane %v3273_v51, 1  ;;  %v3260_v53 = vmul.f32 %v3200_v41, %v6554_v26  ;;  %v3184_v18 = vpop.permute.xlu1 %3183  ;;  %v3182_v36 = vpop.permute.xlu0 %3181  ;;  %v3203_v40 = vmul.f32 %v3199_v14, %v6551_v11  ;;  %v3259_v54 = vmul.f32 %v3199_v14, %v6554_v26 }
0x12c8   : > { %v3225_v45 = vsel %vm543_vm8, %v3221_v30, %v3223_v62  ;;  %v3227_v33 = vsel %vm543_vm8, %v3223_v62, %v3221_v30  ;;  %v3207_v35 = vmul.f32 %v7003_v43, %v6557_v28  ;;  %v3188_v17 = vmul.f32 %v7758_v58, %v3184_v18 }
0x12c9   : > { %v3229_v2 = vmul.f32 %v7719_v3, %v3227_v33  ;;  %v3254_v23 = vadd.f32 %v3250_v5, %v3225_v45  ;;  %v3281_v21 = vsel %vm606_vm9, %v3277_v0, %v3279_v20  ;;  %v3283_v12 = vsel %vm606_vm9, %v3279_v20, %v3277_v0 }
0x12ca   : > { %v3286_v39 = vmul.f32 %v7721_v4, %v3283_v12  ;;  %v3187_v56 = vmul.f32 %v7758_v58, %v3182_v36  ;;  %v3212_v13 = vadd.f32 %v3208_v22, %v3204_v57  ;;  %v3236_v60 = vmul.f32 %v3200_v41, %v6568_v8 }
0x12cb   : > { %v3253_v48 = vadd.f32 %v3249_v16, %v3229_v2  ;;  %v3263_v24 = vmul.f32 %v7003_v43, %v6565_v19  ;;  %v3268_v7 = vadd.f32 %v3264_v46, %v3260_v53  ;;  %v3216_v11 = vmul.f32 %v3188_v17, %v6573_v38 }
0x12cc   : > { %v3290_v10 = vadd.f32 %v3286_v39, %v3254_v23  ;;  %v3272_v26 = vmul.f32 %v3188_v17, %v6581_v9  ;;  %v3211_v25 = vadd.f32 %v3207_v35, %v3203_v40  ;;  %v3215_v28 = vmul.f32 %v3187_v56, %v6573_v38 }
0x12cd   : > { %v3289_v1 = vadd.f32 %v3281_v21, %v3253_v48  ;;  %v3267_v52 = vadd.f32 %v3263_v24, %v3259_v54  ;;  %v3271_v59 = vmul.f32 %v3187_v56, %v6581_v9  ;;  %v3235_v47 = vmul.f32 %v3199_v14, %v6568_v8 }
0x12ce   : > { %v3220_v61 = vadd.f32 %v3216_v11, %v3212_v13  ;;  %v3248_v42 = vmul.f32 %v3188_v17, %v6578_v37  ;;  %v3276_v41 = vadd.f32 %v3272_v26, %v3268_v7  ;;  %v3239_v19 = vmul.f32 %v7003_v43, %v6562_v32 }
0x12cf   : > { %v3219_v55 = vadd.f32 %v3215_v28, %v3211_v25  ;;  %v3275_v31 = vadd.f32 %v3271_v59, %v3267_v52  ;;  %v3244_v51 = vadd.f32 %v3240_v34, %v3236_v60  ;;  %v3247_v20 = vmul.f32 %v3187_v56, %v6578_v37 }
0x12d0   : > { %v3224_v22 = vrot.slane %v3220_v61, 7  ;;  %v3280_v62 = vrot.slane %v3276_v41, 1  ;;  %v3243_v5 = vadd.f32 %v3239_v19, %v3235_v47  ;;  %v7076_v8 = vadd.f32 %v3289_v1, %v6638_v27 }
0x12d1   : > { %v3222_v30 = vrot.slane %v3219_v55, 7  ;;  %v3278_v38 = vrot.slane %v3275_v31, 1  ;;  %v3252_v9 = vadd.f32 %v3248_v42, %v3244_v51  ;;  %v3294_v53 = vadd.f32 %v3290_v10, %v6638_v27 }
0x12d2   : > { %v3251_v0 = vadd.f32 %v3247_v20, %v3243_v5  ;;  %v3297_v36 = vmul.f32 %v7076_v8, %v7076_v8 }
0x12d3   : > { %v3226_v14 = vsel %vm543_vm8, %v3222_v30, %v3224_v22  ;;  %v3228_v32 = vsel %vm543_vm8, %v3224_v22, %v3222_v30  ;;  %v3282_v43 = vsel %vm606_vm9, %v3278_v38, %v3280_v62  ;;  %v3284_v16 = vsel %vm606_vm9, %v3280_v62, %v3278_v38 }
0x12d4   : > { %v3231_v37 = vmul.f32 %v7719_v3, %v3228_v32  ;;  %v3288_v34 = vmul.f32 %v7721_v4, %v3284_v16  ;;  %v3256_v45 = vadd.f32 %v3252_v9, %v3226_v14  ;;  %v3301_v21 = vadd.f32 %v3294_v53, %v7076_v8 }
0x12d5   : > { %v3298_v12 = vmul.f32 %v3294_v53, %v3294_v53 }
0x12d6   : > { %v3255_v33 = vadd.f32 %v3251_v0, %v3231_v37  ;;  %v3292_v57 = vadd.f32 %v3288_v34, %v3256_v45 }
0x12d7   : > { %v3313_v40 = vadd.f32 %v3298_v12, %v3297_v36 }
0x12d8   : > { %v3291_v18 = vadd.f32 %v3282_v43, %v3255_v33  ;;  %v3296_v23 = vadd.f32 %v3292_v57, %v6638_v27 }
0x12da   : > { %v3295_v2 = vadd.f32 %v3291_v18, %v6638_v27  ;;  %v3300_v48 = vmul.f32 %v3296_v23, %v3296_v23 }
0x12dc   : > { %v3302_v39 = vadd.f32 %v3301_v21, %v3295_v2  ;;  %v3299_v46 = vmul.f32 %v3295_v2, %v3295_v2 }
0x12de   : > { %v3303_v54 = vadd.f32 %v3302_v39, %v3296_v23  ;;  %v3314_v35 = vadd.f32 %v3313_v40, %v3299_v46 }
0x12e0   : > { %3304 = vadd.xlane.f32.xlu0 %v3303_v54  ;;  %v3315_v17 = vadd.f32 %v3314_v35, %v3300_v48 }
0x12e2   : > { %3316 = vadd.xlane.f32.xlu1 %v3315_v17 }
0x136d   : > { %v3305_v56 = vpop.xlane.xlu0 %3304 }
0x136e   : > { %v3306_v10 = vrot.slane %v3305_v56, 4 }
0x136f   : > { %v3317_v13 = vpop.xlane.xlu1 %3316 }
0x1370   : > { %v3307_v60 = vadd.f32 %v3306_v10, %v3305_v56  ;;  %v3318_v24 = vrot.slane %v3317_v13, 4 }
0x1372   : > { %v3308_v1 = vrot.slane %v3307_v60, 2  ;;  %v3319_v7 = vadd.f32 %v3318_v24, %v3317_v13 }
0x1374   : > { %v3320_v27 = vrot.slane %v3319_v7, 2  ;;  %v3309_v11 = vadd.f32 %v3308_v1, %v3307_v60 }
0x1376   : > { %v3310_v26 = vrot.slane %v3309_v11, 1  ;;  %v3321_v25 = vadd.f32 %v3320_v27, %v3319_v7 }
0x1378   : > { %v3311_v52 = vadd.f32 %v3310_v26, %v3309_v11  ;;  %v3322_v28 = vrot.slane %v3321_v25, 1 }
0x137a   : > { %3987 = vpush %v3311_v52  ;;  %v3323_v59 = vadd.f32 %v3322_v28, %v3321_v25 }
0x137c   : > { %3989 = vpush %v3323_v59 }
0x13ab   : > { %s3988_s24 = spop %3987 }
0x13ac   : > { %s3325_s16 = smul.f32 0.00024414063, %s3988_s24 }
0x13ad   : > { %s3990_s2 = spop %3989 }
0x13ae   : > { %s3327_s4 = smul.f32 %s3325_s16, %s3325_s16  ;;  %v3330_v42 = vstv %s3325_s16 }
0x13af   : > { %s3326_s5 = smul.f32 0.00024414063, %s3990_s2  ;;  %v3331_v41 = vsub.f32 %v7076_v8, %v3330_v42  ;;  %v3332_v19 = vsub.f32 %v3294_v53, %v3330_v42  ;;  %v3333_v55 = vsub.f32 %v3295_v2, %v3330_v42  ;;  %v3334_v31 = vsub.f32 %v3296_v23, %v3330_v42 }
0x13b1   : > { %s3328_s6 = ssub.f32 %s3326_s5, %s3327_s4 }
0x13b3   : > { %s3329_s18 = smax.f32 %s4357_s14, %s3328_s6 }
0x13b4   : > { %s3335_s21 = sadd.f32 1e-05, %s3329_s18 }
0x13b6   : > { %v3336_v47 = vstv %s3335_s21 }
0x13b7   : > { %4133 = vrsqrt.f32 %v3336_v47 }
0x13c1   : > { %v4134_v61 = vpop.eup %4133 }
0x13c2   : > { %3991 = vpush %v4134_v61 }
0x13f3   : > { %s3992_s27 = spop %3991 }
0x13f4   : > { %s3339_s28 = smul.f32 %s3992_s27, %s7820_s3  ;;  %s3536_s3 = sand.u32 1, %s4417_s22  }
0x13f5   : > { %s7148_s22 = scalar_lea.sflag [#allocation9], %s3536_s3 }
0x13f6   : > { %v3340_v51 = vstv %s3339_s28 }
0x13f7   : > { %v3341_v22 = vmul.f32 %v3340_v51, %v3331_v41  ;;  %v3342_v62 = vmul.f32 %v3340_v51, %v3332_v19  ;;  %v3343_v20 = vmul.f32 %v3340_v51, %v3333_v55  ;;  %v3344_v30 = vmul.f32 %v3340_v51, %v3334_v31 }
0x13f9   : > { %v3345_v38 = vadd.f32 %v3341_v22, %v6663_v29  ;;  %v3346_v5 = vadd.f32 %v3342_v62, %v6663_v29  ;;  %v3347_v9 = vadd.f32 %v3343_v20, %v6663_v29  ;;  %v3348_v14 = vadd.f32 %v3344_v30, %v6663_v29 }
0x13fb   : > { %v3349_v32 = vmax.f32 %v3345_v38, 0.0  ;;  %v3350_v43 = vmax.f32 %v3346_v5, 0.0  ;;  %v3351_v8 = vmax.f32 %v3347_v9, 0.0  ;;  %v3352_v16 = vmax.f32 %v3348_v14, 0.0 }
0x13fd   : > { %v7102_v37 = vadd.f32 %v3349_v32, %v6886_v6  ;;  %v7105_v0 = vadd.f32 %v3350_v43, %v6889_v49  ;;  %v7112_v29 = vadd.f32 %v3351_v8, %v6900_v15  ;;  %v7115_v34 = vadd.f32 %v3352_v16, %v6903_v44 }
0x13ff   : > { %3371 = vrot.lane.b32.xlu1 %v7105_v0, %s4356_s23  ;;  %3369 = vrot.lane.b32.xlu0 %v7102_v37, %s4356_s23 }
0x1403   : > { %3375 = vrot.lane.b32.xlu1 %v7115_v34, %s4356_s23  ;;  %3373 = vrot.lane.b32.xlu0 %v7112_v29, %s4356_s23  ;;  %s7137_s23 = scalar_lea.hbm %s7824_s9, %s7131_s30 }
0x1407   : > { %3359 = vrot.lane.b32.xlu1 %v7105_v0, %s4355_s20  ;;  %3357 = vrot.lane.b32.xlu0 %v7102_v37, %s4355_s20 }
0x140b   : > { %3363 = vrot.lane.b32.xlu1 %v7115_v34, %s4355_s20  ;;  %3361 = vrot.lane.b32.xlu0 %v7112_v29, %s4355_s20  ;;  %s7146_s20 = scalar_lea.hbm %s7825_s13, %s7131_s30 }
0x140c   : > { %4203 = shalt.err (!%p4200_p11)
}
0x140d   : > { %s4204_s24 = scalar_lea.hbm %s7137_s23, 512  ;;  %s4208_s4 = scalar_lea.hbm %s7824_s9, 1536 }
0x140e   : > { %p4205_p12 = scmp.ne.s32.totalorder %s7137_s23, %s4204_s24  ;;  %p4209_p0 = scmp.lt.u32.totalorder %s7137_s23, %s7824_s9 }
0x140f   : > { %p4210_p1 = scmp.lt.u32.totalorder %s4208_s4, %s4204_s24  ;;  %p4212_p3 = scmp.lt.u32.totalorder %s4204_s24, %s7137_s23 }
0x1410   : > { %p4206_p9 = pnand %p4205_p12, %p4436_p5 }
0x1411   : > { %p4211_p2 = por %p4210_p1, %p4209_p0 }
0x1412   : > { %p4207_p13 = pneg %p4206_p9 }
0x1413   : > { %p4213_p4 = por %p4212_p3, %p4211_p2 }
0x1415   : > { %p4214_p7 = pnand %p4213_p4, %p4207_p13 }
0x1417   : > { %4217 = shalt.err (!%p4214_p7)
}
0x1418   : > { %s4361_s18 = smov 128   ;;  %s7826_s21 = sld [smem:[#allocation31_spill]] }
0x1419   : > { %s4362_s27 = smov 8   ;;  %s3560_s28 = sshll.u32 %s7779_s17, 4  ;;  %s7182_s28 = int_to_ptr.vmem [resolvable:$true] %s3560_s28 }
0x141a   : > { %3998 = dma.vmem_to_hbm [thread:$0]  (%p4436_p5), %s7140_s10, 512, %s7137_s23, %s7148_s22, %s4361_s18, %s4361_s18, %s4362_s27  }
0x141b   : > { %s7827_s8 = sld [smem:[#allocation207_spill]]  ;;  %s3592_s12 = sshll.u32 %s4778_s19, 4  ;;  %s7214_s12 = int_to_ptr.vmem [resolvable:$true] %s3592_s12 }
0x141c   : > { %s4218_s25 = scalar_lea.vmem %s7182_s28, 512  ;;  %s4363_s29 = smov [#allocation7]  }
0x141d   : > { %p4219_p8 = scmp.ne.s32.totalorder %s7182_s28, %s4218_s25  ;;  %s4222_s23 = sshll.u32 %s4363_s29, 4  ;;  %s4223_s23 = int_to_ptr.vmem [resolvable:$false] %s4222_s23 }
0x141e   : > { %s3532_s15 = scalar_lea.sflag [#allocation5], %s7826_s21  ;;  %s4224_s17 = scalar_lea.vmem %s4223_s23, 1024 }
0x141f   : > { %p4220_p10 = pnand %p4219_p8, %p4436_p5  ;;  %p4225_p12 = scmp.lt.s32.totalorder %s7182_s28, %s4223_s23 }
0x1420   : > { %p4226_p9 = scmp.lt.s32.totalorder %s4224_s17, %s4218_s25 }
0x1421   : > { %s7180_s11 = scalar_lea.hbm %s7827_s8, %s7131_s30  ;;  %p4221_p11 = pneg %p4220_p10 }
0x1422   : > { %p4227_p13 = por %p4226_p9, %p4225_p12 }
0x1424   : > { %p4228_p0 = pnand %p4227_p13, %p4221_p11 }
0x1426   : > { %4231 = shalt.err (!%p4228_p0)
}
0x1427   : > { %s4232_s10 = scalar_lea.hbm %s7146_s20, 512  ;;  %s4236_s16 = scalar_lea.hbm %s7825_s13, 1536 }
0x1428   : > { %p4233_p1 = scmp.ne.s32.totalorder %s7146_s20, %s4232_s10  ;;  %p4237_p4 = scmp.lt.u32.totalorder %s7146_s20, %s7825_s13 }
0x1429   : > { %p4238_p7 = scmp.lt.u32.totalorder %s4236_s16, %s4232_s10  ;;  %p4240_p10 = scmp.lt.u32.totalorder %s4232_s10, %s7146_s20 }
0x142a   : > { %p4234_p2 = pnand %p4233_p1, %p4436_p5 }
0x142b   : > { %p4239_p8 = por %p4238_p7, %p4237_p4 }
0x142c   : > { %p4235_p3 = pneg %p4234_p2 }
0x142d   : > { %p4241_p11 = por %p4240_p10, %p4239_p8 }
0x142f   : > { %p4242_p12 = pnand %p4241_p11, %p4235_p3 }
0x1431   : > { %4245 = shalt.err (!%p4242_p12)
}
0x1432   : > { %3997 = dma.vmem_to_hbm [thread:$0]  (%p4436_p5), %s7182_s28, 512, %s7146_s20, %s3532_s15, %s4361_s18, %s4361_s18, %s4362_s27  }
0x1433   : > { %s4246_s5 = scalar_lea.vmem %s7214_s12, 512  ;;  %s4364_s6 = smov [#allocation10]  }
0x1434   : > { %p4247_p9 = scmp.ne.s32.totalorder %s7214_s12, %s4246_s5  ;;  %s4250_s3 = sshll.u32 %s4364_s6, 4  ;;  %s4251_s3 = int_to_ptr.vmem [resolvable:$false] %s4250_s3 }
0x1435   : > { %s4252_s7 = scalar_lea.vmem %s4251_s3, 1024  ;;  %p4253_p1 = scmp.lt.s32.totalorder %s7214_s12, %s4251_s3 }
0x1436   : > { %p4248_p13 = pnand %p4247_p9, %p4436_p5  ;;  %p4254_p2 = scmp.lt.s32.totalorder %s4252_s7, %s4246_s5 }
0x1438   : > { %p4249_p0 = pneg %p4248_p13  ;;  %p4255_p3 = por %p4254_p2, %p4253_p1 }
0x143a   : > { %p4256_p4 = pnand %p4255_p3, %p4249_p0 }
0x143c   : > { %4259 = shalt.err (!%p4256_p4)
}
0x143d   : > { %s4260_s19 = scalar_lea.hbm %s7180_s11, 512  ;;  %s4264_s15 = scalar_lea.hbm %s7827_s8, 1536 }
0x143e   : > { %p4261_p7 = scmp.ne.s32.totalorder %s7180_s11, %s4260_s19  ;;  %p4265_p11 = scmp.lt.u32.totalorder %s7180_s11, %s7827_s8 }
0x143f   : > { %p4266_p12 = scmp.lt.u32.totalorder %s4264_s15, %s4260_s19  ;;  %p4268_p13 = scmp.lt.u32.totalorder %s4260_s19, %s7180_s11 }
0x1440   : > { %p4262_p8 = pnand %p4261_p7, %p4436_p5 }
0x1441   : > { %p4267_p9 = por %p4266_p12, %p4265_p11 }
0x1442   : > { %p4263_p10 = pneg %p4262_p8 }
0x1443   : > { %p4269_p0 = por %p4268_p13, %p4267_p9 }
0x1445   : > { %p4270_p1 = pnand %p4269_p0, %p4263_p10 }
0x1447   : > { %4273 = shalt.err (!%p4270_p1)
}
0x1448   : > { %s7828_s23 = sld [smem:[#allocation150_spill]]  ;;  %s7829_s17 = sld [smem:[#allocation153_spill]] }
0x1449   : > { %s7830_s10 = sld [smem:[#allocation149_spill]]  ;;  %s7831_s26 = sld [smem:[#allocation152_spill]] }
0x144a   : > { %s7832_s24 = sld [smem:[#allocation156_spill]]  ;;  %s7833_s16 = sld [smem:[#allocation155_spill]] }
0x144b   : > { %s7834_s2 = sld [smem:[#allocation151_spill]]  ;;  %s7835_s4 = sld [smem:[#allocation154_spill]] }
0x144c   : > { %s7836_s5 = sld [smem:[#allocation157_spill]]  ;;  %s7842_s3 = sld [smem:[#allocation208_spill]] }
0x144d   : > { %3999 = dma.vmem_to_hbm [thread:$0]  (%p4436_p5), %s7214_s12, 512, %s7180_s11, %s7148_s22, %s4361_s18, %s4361_s18, %s4362_s27  }
0x144e   : > { %v3386_v6 = vstv %s7828_s23  ;;  %v3421_v49 = vstv %s7829_s17  ;;  %s7837_s22 = sld [smem:[#allocation158_spill]]  ;;  %s3608_s11 = sshll.u32 %s4781_s0, 4  ;;  %s7331_s11 = int_to_ptr.vmem [resolvable:$true] %s3608_s11 }
0x144f   : > { %v3381_v15 = vstv %s7830_s10  ;;  %v3416_v44 = vstv %s7831_s26  ;;  %v3388_v23 = vmul.f32 %v3386_v6, %v7105_v0  ;;  %v3423_v21 = vmul.f32 %v3421_v49, %v7105_v0  ;;  %s3547_s19 = scalar_lea.sflag [#allocation12], %s7826_s21  ;;  %s4274_s20 = scalar_lea.vmem %s7331_s11, 512 }
0x1450   : > { %v3448_v45 = vstv %s7832_s24  ;;  %v3443_v53 = vstv %s7833_s16  ;;  %v3387_v54 = vmul.f32 %v3386_v6, %v7102_v37  ;;  %v3422_v48 = vmul.f32 %v3421_v49, %v7102_v37  ;;  %p4275_p2 = scmp.ne.s32.totalorder %s7331_s11, %s4274_s20  ;;  %s4365_s28 = smov [#allocation11]  }
0x1451   : > { %v7250_v2 = vstv %s7834_s2  ;;  %v7255_v12 = vstv %s7835_s4  ;;  %v3450_v40 = vmul.f32 %v3448_v45, %v7105_v0  ;;  %v3449_v56 = vmul.f32 %v3448_v45, %v7102_v37  ;;  %s4278_s15 = sshll.u32 %s4365_s28, 4  ;;  %s4279_s15 = int_to_ptr.vmem [resolvable:$false] %s4278_s15 }
0x1452   : > { %v7258_v39 = vstv %s7836_s5  ;;  %v3390_v10 = vmul.f32 %v3386_v6, %v7115_v34  ;;  %v7266_v7 = vmul.f32 %v3421_v49, %v7115_v34  ;;  %v3452_v27 = vmul.f32 %v3448_v45, %v7115_v34  ;;  %s7329_s7 = scalar_lea.hbm %s7842_s3, %s7131_s30  ;;  %p4276_p3 = pnand %p4275_p2, %p4436_p5 }
0x1453   : > { %v3389_v25 = vmul.f32 %v3386_v6, %v7112_v29  ;;  %v3424_v59 = vmul.f32 %v3421_v49, %v7112_v29  ;;  %v3451_v47 = vmul.f32 %v3448_v45, %v7112_v29  ;;  %s4280_s30 = scalar_lea.vmem %s4279_s15, 1024  ;;  %p4281_p7 = scmp.lt.s32.totalorder %s7331_s11, %s4279_s15 }
0x1454   : > { %v7275_v61 = vstv %s7837_s22  ;;  %p4277_p4 = pneg %p4276_p3  ;;  %p4282_p8 = scmp.lt.s32.totalorder %s4280_s30, %s4274_s20 }
0x1456   : > { %p4283_p10 = por %p4282_p8, %p4281_p7 }
0x1458   : > { %p4284_p11 = pnand %p4283_p10, %p4277_p4 }
0x1471   : > { %v3372_v33 = vpop.permute.xlu1 %3371  ;;  %v3370_v57 = vpop.permute.xlu0 %3369 }
0x1472   : > { %v3378_v18 = vmul.f32 %v7757_v50, %v3372_v33  ;;  %v3377_v36 = vmul.f32 %v7757_v50, %v3370_v57 }
0x1474   : > { %v3383_v46 = vmul.f32 %v3381_v15, %v3378_v18  ;;  %v3418_v35 = vmul.f32 %v3416_v44, %v3378_v18  ;;  %v3445_v17 = vmul.f32 %v3443_v53, %v3378_v18  ;;  %v3382_v24 = vmul.f32 %v3381_v15, %v3377_v36 }
0x1475   : > { %v3376_v13 = vpop.permute.xlu1 %3375  ;;  %v3374_v60 = vpop.permute.xlu0 %3373  ;;  %v3417_v1 = vmul.f32 %v3416_v44, %v3377_v36  ;;  %v3444_v11 = vmul.f32 %v3443_v53, %v3377_v36 }
0x1476   : > { %v3380_v26 = vmul.f32 %v7757_v50, %v3376_v13  ;;  %v3379_v52 = vmul.f32 %v7757_v50, %v3374_v60  ;;  %v3392_v28 = vadd.f32 %v3388_v23, %v3383_v46  ;;  %v3427_v42 = vadd.f32 %v3423_v21, %v3418_v35 }
0x1477   : > { %v3454_v41 = vadd.f32 %v3450_v40, %v3445_v17  ;;  %v3391_v22 = vadd.f32 %v3387_v54, %v3382_v24  ;;  %v3426_v62 = vadd.f32 %v3422_v48, %v3417_v1  ;;  %v3453_v50 = vadd.f32 %v3449_v56, %v3444_v11 }
0x1478   : > { %v3385_v19 = vmul.f32 %v3381_v15, %v3380_v26  ;;  %v3447_v55 = vmul.f32 %v3443_v53, %v3380_v26  ;;  %v3420_v38 = vmul.f32 %v3416_v44, %v3380_v26  ;;  %v3384_v5 = vmul.f32 %v3381_v15, %v3379_v52 }
0x1479   : > { %v3360_v31 = vpop.permute.xlu1 %3359  ;;  %v3358_v51 = vpop.permute.xlu0 %3357  ;;  %v3419_v9 = vmul.f32 %v3416_v44, %v3379_v52  ;;  %v3446_v43 = vmul.f32 %v3443_v53, %v3379_v52 }
0x147a   : > { %v3366_v20 = vmul.f32 %v7758_v58, %v3360_v31  ;;  %v3365_v30 = vmul.f32 %v7758_v58, %v3358_v51  ;;  %v3394_v14 = vadd.f32 %v3390_v10, %v3385_v19  ;;  %v3456_v32 = vadd.f32 %v3452_v27, %v3447_v55 }
0x147b   : > { %v3393_v33 = vadd.f32 %v3389_v25, %v3384_v5  ;;  %v3455_v36 = vadd.f32 %v3451_v47, %v3446_v43  ;;  %v3428_v55 = vadd.f32 %v3424_v59, %v3419_v9 }
0x147c   : > { %v3397_v8 = vmul.f32 %v7250_v2, %v3366_v20  ;;  %v3432_v16 = vmul.f32 %v7255_v12, %v3366_v20  ;;  %v3459_v37 = vmul.f32 %v7258_v39, %v3366_v20  ;;  %v3396_v0 = vmul.f32 %v7250_v2, %v3365_v30 }
0x147d   : > { %v3458_v29 = vmul.f32 %v7258_v39, %v3365_v30  ;;  %v3364_v34 = vpop.permute.xlu1 %3363  ;;  %v3362_v6 = vpop.permute.xlu0 %3361  ;;  %v3431_v45 = vmul.f32 %v7255_v12, %v3365_v30 }
0x147e   : > { %v3401_v49 = vadd.f32 %v3397_v8, %v3392_v28  ;;  %v3368_v15 = vmul.f32 %v7758_v58, %v3364_v34  ;;  %v3367_v44 = vmul.f32 %v7758_v58, %v3362_v6  ;;  %v3463_v57 = vadd.f32 %v3459_v37, %v3454_v41 }
0x147f   : > { %v3400_v53 = vadd.f32 %v3396_v0, %v3391_v22  ;;  %v3462_v18 = vadd.f32 %v3458_v29, %v3453_v50  ;;  %v3436_v17 = vadd.f32 %v3432_v16, %v3427_v42  ;;  %v3435_v56 = vadd.f32 %v3431_v45, %v3426_v62 }
0x1480   : > { %v3406_v23 = vrot.slane %v3401_v49, 7  ;;  %v3399_v21 = vmul.f32 %v7250_v2, %v3368_v15  ;;  %v3461_v46 = vmul.f32 %v7258_v39, %v3368_v15  ;;  %v3468_v40 = vrot.slane %v3463_v57, 1  ;;  %v7838_v57 = vld [vmem:[#allocation194_spill] sm:$0xff] }
0x1481   : > { %v3404_v54 = vrot.slane %v3400_v53, 7  ;;  %v3466_v48 = vrot.slane %v3462_v18, 1  ;;  %v3398_v35 = vmul.f32 %v7250_v2, %v3367_v44  ;;  %v3434_v26 = vmul.f32 %v7255_v12, %v3368_v15  ;;  %v7839_v53 = vld [vmem:[#allocation195_spill] sm:$0xff] }
0x1482   : > { %v3403_v10 = vadd.f32 %v3399_v21, %v3394_v14  ;;  %v3465_v13 = vadd.f32 %v3461_v46, %v3456_v32  ;;  %v3433_v28 = vmul.f32 %v7255_v12, %v3367_v44  ;;  %v3460_v47 = vmul.f32 %v7258_v39, %v3367_v44 }
0x1483   : > { %v3408_v58 = vsel %vm543_vm8, %v3404_v54, %v3406_v23  ;;  %v3410_v60 = vsel %vm543_vm8, %v3406_v23, %v3404_v54  ;;  %v3470_v24 = vsel %vm606_vm9, %v3466_v48, %v3468_v40  ;;  %v3472_v1 = vsel %vm606_vm9, %v3468_v40, %v3466_v48  ;;  %v4152_v40 = vld [vmem:[#allocation3] sm:$0xff] }
0x1484   : > { %v3412_v27 = vmul.f32 %v7719_v3, %v3410_v60  ;;  %v3440_v11 = vadd.f32 %v3436_v17, %v3408_v58  ;;  %v3475_v2 = vmul.f32 %v7721_v4, %v3472_v1  ;;  %v3407_v25 = vrot.slane %v3403_v10, 7  ;;  %v7841_v60 = vld [vmem:[#allocation177_spill] sm:$0xff]  ;;  %v4153_v1 = vld [vmem:[#allocation3 + $0x10] sm:$0xff] }
0x1485   : > { %v3402_v52 = vadd.f32 %v3398_v35, %v3393_v33  ;;  %v3429_v42 = vadd.f32 %v7266_v7, %v3420_v38  ;;  %v3469_v31 = vrot.slane %v3465_v13, 1  ;;  %v3464_v22 = vadd.f32 %v3460_v47, %v3455_v36  ;;  %v4151_v36 = vld [vmem:[#allocation3 + $0x8] sm:$0xff]  ;;  %v7840_v13 = vld [vmem:[#allocation178_spill] sm:$0xff] }
0x1486   : > { %v3439_v41 = vadd.f32 %v3435_v56, %v3412_v27  ;;  %v3479_v19 = vadd.f32 %v3475_v2, %v3440_v11  ;;  %v3437_v5 = vadd.f32 %v3433_v28, %v3428_v55  ;;  %v4154_v2 = vld [vmem:[#allocation3 + $0x18] sm:$0xff] }
0x1487   : > { %v3405_v51 = vrot.slane %v3402_v52, 7  ;;  %v3438_v30 = vadd.f32 %v3434_v26, %v3429_v42  ;;  %v3467_v39 = vrot.slane %v3464_v22, 1 }
0x1488   : > { %v3478_v62 = vadd.f32 %v3470_v24, %v3439_v41  ;;  %v3484_v20 = vadd.f32 %v7275_v61, %v3479_v19 }
0x1489   : > { %v3409_v50 = vsel %vm543_vm8, %v3405_v51, %v3407_v25  ;;  %v3411_v12 = vsel %vm543_vm8, %v3407_v25, %v3405_v51  ;;  %v3471_v14 = vsel %vm606_vm9, %v3467_v39, %v3469_v31  ;;  %v3473_v32 = vsel %vm606_vm9, %v3469_v31, %v3467_v39 }
0x148a   : > { %v3483_v7 = vadd.f32 %v7275_v61, %v3478_v62  ;;  %v3488_v38 = vmul.f32 0.5, %v3484_v20  ;;  %v3414_v59 = vmul.f32 %v7719_v3, %v3411_v12  ;;  %v3442_v9 = vadd.f32 %v3438_v30, %v3409_v50 }
0x148b   : > { %v3477_v16 = vmul.f32 %v7721_v4, %v3473_v32 }
0x148c   : > { %v3487_v43 = vmul.f32 0.5, %v3483_v7  ;;  %4135 = vtanh.f32 %v3488_v38  ;;  %v3441_v8 = vadd.f32 %v3437_v5, %v3414_v59 }
0x148d   : > { %v3481_v0 = vadd.f32 %v3477_v16, %v3442_v9 }
0x148e   : > { %4137 = vtanh.f32 %v3487_v43  ;;  %v3480_v37 = vadd.f32 %v3471_v14, %v3441_v8 }
0x148f   : > { %v3486_v34 = vadd.f32 %v7275_v61, %v3481_v0 }
0x1490   : > { %v3485_v29 = vadd.f32 %v7275_v61, %v3480_v37 }
0x1491   : > { %v3490_v6 = vmul.f32 0.5, %v3486_v34 }
0x1492   : > { %v3489_v3 = vmul.f32 0.5, %v3485_v29 }
0x1494   : > { %4139 = vtanh.f32 %v3489_v3 }
0x1495   : > { %4141 = vtanh.f32 %v3490_v6 }
0x1496   : > { %v4136_v49 = vpop.eup %4135 }
0x1497   : > { %v3496_v45 = vadd.f32 1.0, %v4136_v49 }
0x1498   : > { %v4138_v63 = vpop.eup %4137 }
0x1499   : > { %v3495_v15 = vadd.f32 1.0, %v4138_v63  ;;  %v3500_v44 = vmul.f32 0.5, %v3496_v45 }
0x149b   : > { %v3499_v33 = vmul.f32 0.5, %v3495_v15  ;;  %v3504_v4 = vsub.f32 %v7838_v57, %v3500_v44 }
0x149d   : > { %v3503_v18 = vsub.f32 %v7839_v53, %v3499_v33  ;;  %v3508_v23 = vadd.f32 %v4151_v36, %v3504_v4  ;;  %v3524_v61 = vand.u32 2147483647, %v3504_v4 }
0x149e   : > { %v4140_v21 = vpop.eup %4139 }
0x149f   : > { %v4142_v46 = vpop.eup %4141  ;;  %v3507_v54 = vadd.f32 %v4152_v40, %v3503_v18  ;;  %v3497_v48 = vadd.f32 1.0, %v4140_v21  ;;  %3512 = vst [vmem:[#allocation2 + $0x8] sm:$0xff] %v3508_v23  ;;  %v3523_v35 = vand.u32 2147483647, %v3503_v18  ;;  %3528 = vst [vmem:[%s4781_s0 + $0x8] sm:$0xff] %v3524_v61 }
0x14a0   : > { %v3498_v17 = vadd.f32 1.0, %v4142_v46 }
0x14a1   : > { %3511 = vst [vmem:[#allocation2] sm:$0xff] %v3507_v54  ;;  %v3501_v56 = vmul.f32 0.5, %v3497_v48  ;;  %3527 = vst [vmem:[%s4781_s0] sm:$0xff] %v3523_v35 }
0x14a2   : > { %v3502_v10 = vmul.f32 0.5, %v3498_v17 }
0x14a3   : > { %v3505_v58 = vsub.f32 %v7840_v13, %v3501_v56 }
0x14a4   : > { %v3506_v24 = vsub.f32 %v7841_v60, %v3502_v10 }
0x14a5   : > { %v3509_v27 = vadd.f32 %v4153_v1, %v3505_v58  ;;  %v3525_v11 = vand.u32 2147483647, %v3505_v58 }
0x14a6   : > { %v3510_v26 = vadd.f32 %v4154_v2, %v3506_v24  ;;  %v3526_v25 = vand.u32 2147483647, %v3506_v24 }
0x14a7   : > { %3513 = vst [vmem:[#allocation2 + $0x10] sm:$0xff] %v3509_v27  ;;  %3529 = vst [vmem:[%s4781_s0 + $0x10] sm:$0xff] %v3525_v11 }
0x14a8   : > { %3514 = vst [vmem:[#allocation2 + $0x18] sm:$0xff] %v3510_v26  ;;  %3530 = vst [vmem:[%s4781_s0 + $0x18] sm:$0xff] %v3526_v25 }
0x14a9   : > { %4287 = shalt.err (!%p4284_p11)
}
0x14aa   : > { %s4288_s0 = scalar_lea.hbm %s7329_s7, 512  ;;  %s4292_s23 = scalar_lea.hbm %s7842_s3, 1536 }
0x14ab   : > { %p4289_p12 = scmp.ne.s32.totalorder %s7329_s7, %s4288_s0  ;;  %p4293_p0 = scmp.lt.u32.totalorder %s7329_s7, %s7842_s3 }
0x14ac   : > { %p4294_p1 = scmp.lt.u32.totalorder %s4292_s23, %s4288_s0  ;;  %p4296_p3 = scmp.lt.u32.totalorder %s4288_s0, %s7329_s7 }
0x14ad   : > { %p4290_p9 = pnand %p4289_p12, %p4436_p5 }
0x14ae   : > { %p4295_p2 = por %p4294_p1, %p4293_p0 }
0x14af   : > { %p4291_p13 = pneg %p4290_p9 }
0x14b0   : > { %p4297_p4 = por %p4296_p3, %p4295_p2 }
0x14b2   : > { %p4298_p7 = pnand %p4297_p4, %p4291_p13 }
0x14b4   : > { %4301 = shalt.err (!%p4298_p7)
}
0x14b5   : > { %4000 = dma.vmem_to_hbm [thread:$0]  (%p4436_p5), %s7331_s11, 512, %s7329_s7, %s3547_s19, %s4361_s18, %s4361_s18, %s4362_s27  }
0x14b6 PF: > { %s7843_s26 = sld [smem:[#allocation26_spill]]  ;;  %s7844_s24 = sld [smem:[#allocation23_spill]] }
0x14bc   : > { %p4024_p8 = scmp.ge.s32.totalorder %s7843_s26, 2  ;;  %s3623_s2 = sand.u32 1, %s7844_s24  }
0x14bd   : > { %s3624_s4 = scalar_lea.sflag [#allocation5], %s3623_s2 }
0x14be   : > { %p4010_p10 = pnand %p4024_p8, %p4440_p6 }
0x14c0   : > { %4325 = dma.done.wait (!%p4010_p10), %s3624_s4, 512  }
0x14c1   : > { %4327 = vsyncadd (!%p4010_p10), %s3624_s4, 4294966784  ;;  %s7846_s14 = sadd.s32 4294967294, %s7843_s26  }
0x14c2   : > { %s3632_s5 = sand.u32 1, %s7846_s14  }
0x14c3   : > { %s3633_s22 = scalar_lea.sflag [#allocation9], %s3632_s5 }
0x14c4   : > { %4329 = dma.done.wait (!%p4010_p10), %s3633_s22, 1024  }
0x14c5   : > { %4331 = vsyncadd (!%p4010_p10), %s3633_s22, 4294966272  ;;  %s3651_s21 = scalar_lea.sflag [#allocation12], %s3623_s2 }
0x14c6   : > { %4333 = dma.done.wait (!%p4010_p10), %s3651_s21, 512  }
0x14c7   : > { %4335 = vsyncadd (!%p4010_p10), %s3651_s21, 4294966784  ;;  %s7847_s21 = sld [smem:[#allocation27_spill]]  ;;  %s7848_s18 = sld [smem:[#allocation24_spill]] }
0x14c8   : > { %s7849_s19 = sld [smem:[#allocation25_spill]]  ;;  %s7850_s20 = sld [smem:[#allocation28_spill]] }
0x14cd   : > { %p23_p5 = scmp.ge.s32.totalorder %s7847_s21, 5  }
0x14cf   :  { %25 = sbr.rel (!%p23_p5) target bundleno = 14 (0xe), region = 119 }
0x14d6   :  { %3656 = vsyncpa [#allocation5], 1 }
0x14d7   :  { %3658 = vsyncpa [#allocation5 + $0x1], 1 }
0x14d8   :  { %3659 = vsyncpa [#allocation9], 1 }
0x14d9   :  { %3661 = vsyncpa [#allocation9 + $0x1], 1 }
0x14da   :  { %3662 = vsyncpa [#allocation12], 1 }
0x14db   :  { %3664 = vsyncpa [#allocation12 + $0x1], 1 }
0x14dc   :  { %3665 = vsyncpa [#allocation6], 1 }
0x14dd   :  { %3667 = vsyncpa [#allocation6 + $0x1], 1 }

</bundles_post_ra>
